<compile_context>
chip_gen: v6e
topology: v6e:2x2x1
jax: 0.10.0
libtpu: 0.0.40
codegen_flags: <defaults>
</compile_context>

<pallas_src>
import functools

import jax
import jax.numpy as jnp
from jax import lax
from jax.experimental import pallas as pl
from jax.experimental.pallas import tpu as pltpu


def _round_up(a, b):
    return (a + b - 1) // b * b


def _small_matmul(x, w):
    """(TB, K) @ (K, N) with tiny static K as unrolled VPU broadcast-FMAs.

    Exact f32; keeps sub-8 contraction dims off the MXU.  Neutral under the
    mem-bound regime, and avoids any f32-on-MXU pass-count wiggle vs the
    HIGHEST-precision reference.
    """
    k = w.shape[0]
    acc = x[:, 0:1] * w[0:1, :]
    for j in range(1, k):
        acc = acc + x[:, j:j + 1] * w[j:j + 1, :]
    return acc


def dagmm_forward_kernel(
    x_ref,
    we1_ref, be1_ref, we2_ref, be2_ref,            # encoder
    wd1_ref, bd1_ref, wd2_ref, bd2_ref,            # decoder
    wt1_ref, bt1_ref,                              # estimation layer 1
    wt2_ref, bt2_ref,                              # estimation layer 2
    out_ref,                                       # packed (TB, E+2+D+G) slab
    *, E, D, G,
):
    x = x_ref[...]                                                 # (TB, D)

    # ---------------- autoencoder ----------------
    # Big matmuls (K = D, H) on the MXU with f32 accumulation.
    h = jnp.maximum(
        jnp.dot(x, we1_ref[...], preferred_element_type=jnp.float32)
        + be1_ref[...], 0.0)
    enc = (jnp.dot(h, we2_ref[...], preferred_element_type=jnp.float32)
           + be2_ref[...])                                         # (TB, E)

    # Decoder first layer has K = E (tiny): VPU broadcast-FMA, skip the MXU.
    h2 = jnp.maximum(_small_matmul(enc, wd1_ref[...]) + bd1_ref[...], 0.0)
    dec = (jnp.dot(h2, wd2_ref[...], preferred_element_type=jnp.float32)
           + bd2_ref[...])                                         # (TB, D)

    # ---------------- distances (per row) ----------------
    sum_a2 = jnp.sum(x * x, axis=1, keepdims=True)                 # ||a||^2
    sum_b2 = jnp.sum(dec * dec, axis=1, keepdims=True)             # ||b||^2
    ab = jnp.sum(x * dec, axis=1, keepdims=True)
    diff = x - dec                                  # explicit diff: no cancellation
    diff_norm = jnp.sqrt(jnp.sum(diff * diff, axis=1, keepdims=True))

    # F.cosine_similarity (eps=1e-8): ab / (max(||a||,1e-8)*max(||b||,1e-8))
    # fused as rsqrt products (EUP slot, no VPU divide).
    cos = (ab
           * lax.rsqrt(jnp.maximum(sum_a2, 1e-16))
           * lax.rsqrt(jnp.maximum(sum_b2, 1e-16)))
    # relative_euclidean_distance: ||a-b|| / clamp(||a||, min=1e-10)
    euc = diff_norm * lax.rsqrt(jnp.maximum(sum_a2, 1e-20))

    # ---------------- estimation network ----------------
    z = jnp.concatenate([enc, euc, cos], axis=1)                   # (TB, E+2)
    t = jnp.tanh(_small_matmul(z, wt1_ref[...]) + bt1_ref[...])    # (TB, 10)
    logits = _small_matmul(t, wt2_ref[...]) + bt2_ref[...]         # (TB, G)

    # softmax(dim=1), numerically stable; exact reciprocal (mem-bound neutral).
    m = jnp.max(logits, axis=1, keepdims=True)
    e = jnp.exp(logits - m)
    gamma = e * pl.reciprocal(jnp.sum(e, axis=1, keepdims=True), approx=False)

    # -------- single full-width store of the exact-width packed row ---------
    out_ref[...] = jnp.concatenate([z, dec, gamma], axis=1)        # (TB, E+2+D+G)


def dagmm_forward(x, params, *, block_b=1024):
    """x: (B, D) float32.  Returns (enc, dec, z, gamma) like DAGMMModule.forward."""
    B, D = x.shape
    E = params["we2"].shape[1]          # autoencoder latent dim
    G = params["wt2"].shape[1]          # n_gmm
    latent_dim = E + 2

    # Batch tile: as large as possible (HBM-bound -> amortize the ~0.35us
    # per-step overhead), multiple of 8 sublanes, but core-aware: cap at
    # ceil(B/2) so the grid keeps >= 2 steps and both v7x TCs stay busy.
    tb = min(block_b, _round_up(max((B + 1) // 2, 8), 8))
    b_pad = _round_up(B, tb)
    if b_pad != B:
        x = jnp.pad(x, ((0, b_pad - B), (0, 0)))   # zero rows are harmless

    w_out = latent_dim + D + G                     # exact payload width (no 128 pad)
    grid = (b_pad // tb,)

    weights = (
        params["we1"], params["be1"], params["we2"], params["be2"],
        params["wd1"], params["bd1"], params["wd2"], params["bd2"],
        params["wt1"], params["bt1"], params["wt2"], params["bt2"],
    )

    def const_spec(a):
        # Full-array block, constant index_map -> DMA'd once, VMEM-resident
        # across all grid steps.
        return pl.BlockSpec(a.shape, lambda i: (0, 0))

    kernel = functools.partial(dagmm_forward_kernel, E=E, D=D, G=G)

    out = pl.pallas_call(
        kernel,
        grid=grid,
        in_specs=[pl.BlockSpec((tb, D), lambda i: (i, 0))]
                 + [const_spec(w) for w in weights],
        out_specs=pl.BlockSpec((tb, w_out), lambda i: (i, 0)),
        out_shape=jax.ShapeDtypeStruct((b_pad, w_out), jnp.float32),
        compiler_params=pltpu.CompilerParams(
            # Batch axis is embarrassingly parallel -> v7x megacore split.
            dimension_semantics=("parallel",),
            # Generous vs. actual need (a few hundred KiB of double-buffered
            # tiles + tiny resident weights); safe on v7x's 64 MiB VMEM.
            vmem_limit_bytes=32 << 20,
        ),
    )(x, *weights)

    enc = out[:B, :E]
    z = out[:B, :latent_dim]                       # [enc, euc, cos]
    dec = out[:B, latent_dim:latent_dim + D]
    gamma = out[:B, latent_dim + D:latent_dim + D + G]
    return enc, dec, z, gamma


def _reference_forward(x, p):
    """Pure-JAX reference mirroring the PyTorch semantics.

    precision=HIGHEST pins the f32 matmuls so the check is not at the mercy of
    XLA's default (bf16-class) TPU matmul precision.
    """
    high = jax.lax.Precision.HIGHEST
    h = jnp.maximum(jnp.dot(x, p["we1"], precision=high) + p["be1"], 0.0)
    enc = jnp.dot(h, p["we2"], precision=high) + p["be2"]
    h2 = jnp.maximum(jnp.dot(enc, p["wd1"], precision=high) + p["bd1"], 0.0)
    dec = jnp.dot(h2, p["wd2"], precision=high) + p["bd2"]

    a, b = x, dec
    a_n = jnp.linalg.norm(a, axis=1, keepdims=True)
    b_n = jnp.linalg.norm(b, axis=1, keepdims=True)
    cos = jnp.sum(a * b, axis=1, keepdims=True) / (
        jnp.maximum(a_n, 1e-8) * jnp.maximum(b_n, 1e-8))
    euc = jnp.linalg.norm(a - b, axis=1, keepdims=True) / jnp.maximum(a_n, 1e-10)
    z = jnp.concatenate([enc, euc, cos], axis=1)

    t = jnp.tanh(jnp.dot(z, p["wt1"], precision=high) + p["bt1"])
    gamma = jax.nn.softmax(jnp.dot(t, p["wt2"], precision=high) + p["bt2"], axis=1)
    return enc, dec, z, gamma


def make_params(key, D, H, E, latent_dim, est_hidden, n_gmm):
    ks = jax.random.split(key, 12)

    def lin(k, fan_in, fan_out):
        bound = 1.0 / jnp.sqrt(fan_in)
        return jax.random.uniform(k, (fan_in, fan_out), jnp.float32, -bound, bound)

    return {
        # encoder: D -> H -> E
        "we1": lin(ks[0], D, H), "be1": jnp.zeros((1, H), jnp.float32),
        "we2": lin(ks[1], H, E), "be2": jnp.zeros((1, E), jnp.float32),
        # decoder: E -> H -> D
        "wd1": lin(ks[2], E, H), "bd1": jnp.zeros((1, H), jnp.float32),
        "wd2": lin(ks[3], H, D), "bd2": jnp.zeros((1, D), jnp.float32),
        # estimation: latent_dim -> 10 -> n_gmm
        "wt1": lin(ks[4], latent_dim, est_hidden),
        "bt1": 0.01 * jax.random.normal(ks[5], (1, est_hidden), jnp.float32),
        "wt2": lin(ks[6], est_hidden, n_gmm),
        "bt2": 0.01 * jax.random.normal(ks[7], (1, n_gmm), jnp.float32),
    }


if __name__ == "__main__":
    # Small model dims (Merlion DAGMM AE on a flattened window); batch large
    # enough to exercise the batch grid / pipelining (grid = 2 steps of 256).
    B, D = 512, 32
    H, E = 16, 4
    latent_dim = E + 2
    n_gmm = 4
    est_hidden = 10

    key = jax.random.PRNGKey(0)
    kx, kp = jax.random.split(key)
    x = jax.random.normal(kx, (B, D), jnp.float32)
    params = make_params(kp, D, H, E, latent_dim, est_hidden, n_gmm)

    enc, dec, z, gamma = jax.block_until_ready(dagmm_forward(x, params))

    enc_r, dec_r, z_r, gamma_r = _reference_forward(x, params)
    assert enc.shape == (B, E) and dec.shape == (B, D)
    assert z.shape == (B, latent_dim) and gamma.shape == (B, n_gmm)
    # Tolerance covers f32-on-MXU pass-count differences between the Mosaic
    # kernel and the HIGHEST-precision XLA reference.
    tol = dict(atol=2e-4, rtol=2e-4)
    assert jnp.allclose(enc, enc_r, **tol)
    assert jnp.allclose(dec, dec_r, **tol)
    assert jnp.allclose(z, z_r, **tol)
    assert jnp.allclose(gamma, gamma_r, **tol)

    print("KERNEL_OK")
</pallas_src>

<mosaic_0001>
module attributes {stable_mosaic.version = 11 : i64} {
  func.func @dagmm_forward_kernel(%arg0: i32, %arg1: memref<256x32xf32, #tpu.memory_space<vmem>>, %arg2: memref<32x16xf32, #tpu.memory_space<vmem>>, %arg3: memref<1x16xf32, #tpu.memory_space<vmem>>, %arg4: memref<16x4xf32, #tpu.memory_space<vmem>>, %arg5: memref<1x4xf32, #tpu.memory_space<vmem>>, %arg6: memref<4x16xf32, #tpu.memory_space<vmem>>, %arg7: memref<1x16xf32, #tpu.memory_space<vmem>>, %arg8: memref<16x32xf32, #tpu.memory_space<vmem>>, %arg9: memref<1x32xf32, #tpu.memory_space<vmem>>, %arg10: memref<6x10xf32, #tpu.memory_space<vmem>>, %arg11: memref<1x10xf32, #tpu.memory_space<vmem>>, %arg12: memref<10x4xf32, #tpu.memory_space<vmem>>, %arg13: memref<1x4xf32, #tpu.memory_space<vmem>>, %arg14: memref<256x42xf32, #tpu.memory_space<vmem>>) attributes {dimension_semantics = [#tpu.dimension_semantics<parallel>], iteration_bounds = array<i64: 2>, scalar_prefetch = 0 : i64, scratch_operands = 0 : i64, tpu.core_type = #tpu.core_type<tc>, window_params = [{transform_indices = @transform_0, window_bounds = array<i64: 256, 32>}, {pipeline_mode = #tpu.pipeline_mode<synchronous>, transform_indices = @transform_1, window_bounds = array<i64: 32, 16>}, {pipeline_mode = #tpu.pipeline_mode<synchronous>, transform_indices = @transform_2, window_bounds = array<i64: 1, 16>}, {pipeline_mode = #tpu.pipeline_mode<synchronous>, transform_indices = @transform_3, window_bounds = array<i64: 16, 4>}, {pipeline_mode = #tpu.pipeline_mode<synchronous>, transform_indices = @transform_4, window_bounds = array<i64: 1, 4>}, {pipeline_mode = #tpu.pipeline_mode<synchronous>, transform_indices = @transform_5, window_bounds = array<i64: 4, 16>}, {pipeline_mode = #tpu.pipeline_mode<synchronous>, transform_indices = @transform_6, window_bounds = array<i64: 1, 16>}, {pipeline_mode = #tpu.pipeline_mode<synchronous>, transform_indices = @transform_7, window_bounds = array<i64: 16, 32>}, {pipeline_mode = #tpu.pipeline_mode<synchronous>, transform_indices = @transform_8, window_bounds = array<i64: 1, 32>}, {pipeline_mode = #tpu.pipeline_mode<synchronous>, transform_indices = @transform_9, window_bounds = array<i64: 6, 10>}, {pipeline_mode = #tpu.pipeline_mode<synchronous>, transform_indices = @transform_10, window_bounds = array<i64: 1, 10>}, {pipeline_mode = #tpu.pipeline_mode<synchronous>, transform_indices = @transform_11, window_bounds = array<i64: 10, 4>}, {pipeline_mode = #tpu.pipeline_mode<synchronous>, transform_indices = @transform_12, window_bounds = array<i64: 1, 4>}, {transform_indices = @transform_13, window_bounds = array<i64: 256, 42>}]} {
    %c0 = arith.constant 0 : index
    %c0_0 = arith.constant 0 : index
    %0 = vector.load %arg1[%c0, %c0_0] : memref<256x32xf32, #tpu.memory_space<vmem>>, vector<256x32xf32>
    %c0_1 = arith.constant 0 : index
    %c0_2 = arith.constant 0 : index
    %1 = vector.load %arg2[%c0_1, %c0_2] : memref<32x16xf32, #tpu.memory_space<vmem>>, vector<32x16xf32>
    %cst = arith.constant dense<0.000000e+00> : vector<256x16xf32>
    %2 = tpu.matmul %0, %1, %cst {dimension_numbers = #tpu.dot_dimension_numbers<[1], [0], [0], [1], [0, 0, 1, 1], [], []>} : vector<256x32xf32>, vector<32x16xf32>, vector<256x16xf32> -> vector<256x16xf32>
    %c0_3 = arith.constant 0 : index
    %c0_4 = arith.constant 0 : index
    %3 = vector.load %arg3[%c0_3, %c0_4] : memref<1x16xf32, #tpu.memory_space<vmem>>, vector<1x16xf32>
    %4 = vector.broadcast %3 : vector<1x16xf32> to vector<256x16xf32>
    %5 = arith.addf %2, %4 : vector<256x16xf32>
    %cst_5 = arith.constant 0.000000e+00 : f32
    %6 = vector.broadcast %cst_5 : f32 to vector<256x16xf32>
    %7 = arith.maximumf %5, %6 : vector<256x16xf32>
    %c0_6 = arith.constant 0 : index
    %c0_7 = arith.constant 0 : index
    %8 = vector.load %arg4[%c0_6, %c0_7] : memref<16x4xf32, #tpu.memory_space<vmem>>, vector<16x4xf32>
    %cst_8 = arith.constant dense<0.000000e+00> : vector<256x4xf32>
    %9 = tpu.matmul %7, %8, %cst_8 {dimension_numbers = #tpu.dot_dimension_numbers<[1], [0], [0], [1], [0, 0, 1, 1], [], []>} : vector<256x16xf32>, vector<16x4xf32>, vector<256x4xf32> -> vector<256x4xf32>
    %c0_9 = arith.constant 0 : index
    %c0_10 = arith.constant 0 : index
    %10 = vector.load %arg5[%c0_9, %c0_10] : memref<1x4xf32, #tpu.memory_space<vmem>>, vector<1x4xf32>
    %11 = vector.broadcast %10 : vector<1x4xf32> to vector<256x4xf32>
    %12 = arith.addf %9, %11 : vector<256x4xf32>
    %c0_11 = arith.constant 0 : index
    %c0_12 = arith.constant 0 : index
    %13 = vector.load %arg6[%c0_11, %c0_12] : memref<4x16xf32, #tpu.memory_space<vmem>>, vector<4x16xf32>
    %14 = vector.extract_strided_slice %12 {offsets = [0, 0], sizes = [256, 1], strides = [1, 1]} : vector<256x4xf32> to vector<256x1xf32>
    %15 = vector.extract_strided_slice %13 {offsets = [0, 0], sizes = [1, 16], strides = [1, 1]} : vector<4x16xf32> to vector<1x16xf32>
    %16 = vector.broadcast %14 : vector<256x1xf32> to vector<256x16xf32>
    %17 = vector.broadcast %15 : vector<1x16xf32> to vector<256x16xf32>
    %18 = arith.mulf %16, %17 : vector<256x16xf32>
    %19 = vector.extract_strided_slice %12 {offsets = [0, 1], sizes = [256, 1], strides = [1, 1]} : vector<256x4xf32> to vector<256x1xf32>
    %20 = vector.extract_strided_slice %13 {offsets = [1, 0], sizes = [1, 16], strides = [1, 1]} : vector<4x16xf32> to vector<1x16xf32>
    %21 = vector.broadcast %19 : vector<256x1xf32> to vector<256x16xf32>
    %22 = vector.broadcast %20 : vector<1x16xf32> to vector<256x16xf32>
    %23 = arith.mulf %21, %22 : vector<256x16xf32>
    %24 = arith.addf %18, %23 : vector<256x16xf32>
    %25 = vector.extract_strided_slice %12 {offsets = [0, 2], sizes = [256, 1], strides = [1, 1]} : vector<256x4xf32> to vector<256x1xf32>
    %26 = vector.extract_strided_slice %13 {offsets = [2, 0], sizes = [1, 16], strides = [1, 1]} : vector<4x16xf32> to vector<1x16xf32>
    %27 = vector.broadcast %25 : vector<256x1xf32> to vector<256x16xf32>
    %28 = vector.broadcast %26 : vector<1x16xf32> to vector<256x16xf32>
    %29 = arith.mulf %27, %28 : vector<256x16xf32>
    %30 = arith.addf %24, %29 : vector<256x16xf32>
    %31 = vector.extract_strided_slice %12 {offsets = [0, 3], sizes = [256, 1], strides = [1, 1]} : vector<256x4xf32> to vector<256x1xf32>
    %32 = vector.extract_strided_slice %13 {offsets = [3, 0], sizes = [1, 16], strides = [1, 1]} : vector<4x16xf32> to vector<1x16xf32>
    %33 = vector.broadcast %31 : vector<256x1xf32> to vector<256x16xf32>
    %34 = vector.broadcast %32 : vector<1x16xf32> to vector<256x16xf32>
    %35 = arith.mulf %33, %34 : vector<256x16xf32>
    %36 = arith.addf %30, %35 : vector<256x16xf32>
    %c0_13 = arith.constant 0 : index
    %c0_14 = arith.constant 0 : index
    %37 = vector.load %arg7[%c0_13, %c0_14] : memref<1x16xf32, #tpu.memory_space<vmem>>, vector<1x16xf32>
    %38 = vector.broadcast %37 : vector<1x16xf32> to vector<256x16xf32>
    %39 = arith.addf %36, %38 : vector<256x16xf32>
    %cst_15 = arith.constant 0.000000e+00 : f32
    %40 = vector.broadcast %cst_15 : f32 to vector<256x16xf32>
    %41 = arith.maximumf %39, %40 : vector<256x16xf32>
    %c0_16 = arith.constant 0 : index
    %c0_17 = arith.constant 0 : index
    %42 = vector.load %arg8[%c0_16, %c0_17] : memref<16x32xf32, #tpu.memory_space<vmem>>, vector<16x32xf32>
    %cst_18 = arith.constant dense<0.000000e+00> : vector<256x32xf32>
    %43 = tpu.matmul %41, %42, %cst_18 {dimension_numbers = #tpu.dot_dimension_numbers<[1], [0], [0], [1], [0, 0, 1, 1], [], []>} : vector<256x16xf32>, vector<16x32xf32>, vector<256x32xf32> -> vector<256x32xf32>
    %c0_19 = arith.constant 0 : index
    %c0_20 = arith.constant 0 : index
    %44 = vector.load %arg9[%c0_19, %c0_20] : memref<1x32xf32, #tpu.memory_space<vmem>>, vector<1x32xf32>
    %45 = vector.broadcast %44 : vector<1x32xf32> to vector<256x32xf32>
    %46 = arith.addf %43, %45 : vector<256x32xf32>
    %47 = arith.mulf %0, %0 : vector<256x32xf32>
    %cst_21 = arith.constant dense<0.000000e+00> : vector<256xf32>
    %48 = vector.multi_reduction <add>, %47, %cst_21 [1] : vector<256x32xf32> to vector<256xf32>
    %49 = vector.shape_cast %48 : vector<256xf32> to vector<256x1xf32>
    %50 = arith.mulf %46, %46 : vector<256x32xf32>
    %cst_22 = arith.constant dense<0.000000e+00> : vector<256xf32>
    %51 = vector.multi_reduction <add>, %50, %cst_22 [1] : vector<256x32xf32> to vector<256xf32>
    %52 = vector.shape_cast %51 : vector<256xf32> to vector<256x1xf32>
    %53 = arith.mulf %0, %46 : vector<256x32xf32>
    %cst_23 = arith.constant dense<0.000000e+00> : vector<256xf32>
    %54 = vector.multi_reduction <add>, %53, %cst_23 [1] : vector<256x32xf32> to vector<256xf32>
    %55 = vector.shape_cast %54 : vector<256xf32> to vector<256x1xf32>
    %56 = arith.subf %0, %46 : vector<256x32xf32>
    %57 = arith.mulf %56, %56 : vector<256x32xf32>
    %cst_24 = arith.constant dense<0.000000e+00> : vector<256xf32>
    %58 = vector.multi_reduction <add>, %57, %cst_24 [1] : vector<256x32xf32> to vector<256xf32>
    %59 = vector.shape_cast %58 : vector<256xf32> to vector<256x1xf32>
    %60 = math.sqrt %59 : vector<256x1xf32>
    %cst_25 = arith.constant 1.000000e-16 : f32
    %61 = vector.broadcast %cst_25 : f32 to vector<256x1xf32>
    %62 = arith.maximumf %49, %61 : vector<256x1xf32>
    %63 = math.rsqrt %62 : vector<256x1xf32>
    %64 = arith.mulf %55, %63 : vector<256x1xf32>
    %cst_26 = arith.constant 1.000000e-16 : f32
    %65 = vector.broadcast %cst_26 : f32 to vector<256x1xf32>
    %66 = arith.maximumf %52, %65 : vector<256x1xf32>
    %67 = math.rsqrt %66 : vector<256x1xf32>
    %68 = arith.mulf %64, %67 : vector<256x1xf32>
    %cst_27 = arith.constant 9.99999968E-21 : f32
    %69 = vector.broadcast %cst_27 : f32 to vector<256x1xf32>
    %70 = arith.maximumf %49, %69 : vector<256x1xf32>
    %71 = math.rsqrt %70 : vector<256x1xf32>
    %72 = arith.mulf %60, %71 : vector<256x1xf32>
    %73 = tpu.concatenate %12, %72, %68 in 1 : vector<256x4xf32>, vector<256x1xf32>, vector<256x1xf32> -> vector<256x6xf32>
    %c0_28 = arith.constant 0 : index
    %c0_29 = arith.constant 0 : index
    %74 = vector.load %arg10[%c0_28, %c0_29] : memref<6x10xf32, #tpu.memory_space<vmem>>, vector<6x10xf32>
    %75 = vector.extract_strided_slice %73 {offsets = [0, 0], sizes = [256, 1], strides = [1, 1]} : vector<256x6xf32> to vector<256x1xf32>
    %76 = vector.extract_strided_slice %74 {offsets = [0, 0], sizes = [1, 10], strides = [1, 1]} : vector<6x10xf32> to vector<1x10xf32>
    %77 = vector.broadcast %75 : vector<256x1xf32> to vector<256x10xf32>
    %78 = vector.broadcast %76 : vector<1x10xf32> to vector<256x10xf32>
    %79 = arith.mulf %77, %78 : vector<256x10xf32>
    %80 = vector.extract_strided_slice %73 {offsets = [0, 1], sizes = [256, 1], strides = [1, 1]} : vector<256x6xf32> to vector<256x1xf32>
    %81 = vector.extract_strided_slice %74 {offsets = [1, 0], sizes = [1, 10], strides = [1, 1]} : vector<6x10xf32> to vector<1x10xf32>
    %82 = vector.broadcast %80 : vector<256x1xf32> to vector<256x10xf32>
    %83 = vector.broadcast %81 : vector<1x10xf32> to vector<256x10xf32>
    %84 = arith.mulf %82, %83 : vector<256x10xf32>
    %85 = arith.addf %79, %84 : vector<256x10xf32>
    %86 = vector.extract_strided_slice %73 {offsets = [0, 2], sizes = [256, 1], strides = [1, 1]} : vector<256x6xf32> to vector<256x1xf32>
    %87 = vector.extract_strided_slice %74 {offsets = [2, 0], sizes = [1, 10], strides = [1, 1]} : vector<6x10xf32> to vector<1x10xf32>
    %88 = vector.broadcast %86 : vector<256x1xf32> to vector<256x10xf32>
    %89 = vector.broadcast %87 : vector<1x10xf32> to vector<256x10xf32>
    %90 = arith.mulf %88, %89 : vector<256x10xf32>
    %91 = arith.addf %85, %90 : vector<256x10xf32>
    %92 = vector.extract_strided_slice %73 {offsets = [0, 3], sizes = [256, 1], strides = [1, 1]} : vector<256x6xf32> to vector<256x1xf32>
    %93 = vector.extract_strided_slice %74 {offsets = [3, 0], sizes = [1, 10], strides = [1, 1]} : vector<6x10xf32> to vector<1x10xf32>
    %94 = vector.broadcast %92 : vector<256x1xf32> to vector<256x10xf32>
    %95 = vector.broadcast %93 : vector<1x10xf32> to vector<256x10xf32>
    %96 = arith.mulf %94, %95 : vector<256x10xf32>
    %97 = arith.addf %91, %96 : vector<256x10xf32>
    %98 = vector.extract_strided_slice %73 {offsets = [0, 4], sizes = [256, 1], strides = [1, 1]} : vector<256x6xf32> to vector<256x1xf32>
    %99 = vector.extract_strided_slice %74 {offsets = [4, 0], sizes = [1, 10], strides = [1, 1]} : vector<6x10xf32> to vector<1x10xf32>
    %100 = vector.broadcast %98 : vector<256x1xf32> to vector<256x10xf32>
    %101 = vector.broadcast %99 : vector<1x10xf32> to vector<256x10xf32>
    %102 = arith.mulf %100, %101 : vector<256x10xf32>
    %103 = arith.addf %97, %102 : vector<256x10xf32>
    %104 = vector.extract_strided_slice %73 {offsets = [0, 5], sizes = [256, 1], strides = [1, 1]} : vector<256x6xf32> to vector<256x1xf32>
    %105 = vector.extract_strided_slice %74 {offsets = [5, 0], sizes = [1, 10], strides = [1, 1]} : vector<6x10xf32> to vector<1x10xf32>
    %106 = vector.broadcast %104 : vector<256x1xf32> to vector<256x10xf32>
    %107 = vector.broadcast %105 : vector<1x10xf32> to vector<256x10xf32>
    %108 = arith.mulf %106, %107 : vector<256x10xf32>
    %109 = arith.addf %103, %108 : vector<256x10xf32>
    %c0_30 = arith.constant 0 : index
    %c0_31 = arith.constant 0 : index
    %110 = vector.load %arg11[%c0_30, %c0_31] : memref<1x10xf32, #tpu.memory_space<vmem>>, vector<1x10xf32>
    %111 = vector.broadcast %110 : vector<1x10xf32> to vector<256x10xf32>
    %112 = arith.addf %109, %111 : vector<256x10xf32>
    %113 = math.tanh %112 : vector<256x10xf32>
    %c0_32 = arith.constant 0 : index
    %c0_33 = arith.constant 0 : index
    %114 = vector.load %arg12[%c0_32, %c0_33] : memref<10x4xf32, #tpu.memory_space<vmem>>, vector<10x4xf32>
    %115 = vector.extract_strided_slice %113 {offsets = [0, 0], sizes = [256, 1], strides = [1, 1]} : vector<256x10xf32> to vector<256x1xf32>
    %116 = vector.extract_strided_slice %114 {offsets = [0, 0], sizes = [1, 4], strides = [1, 1]} : vector<10x4xf32> to vector<1x4xf32>
    %117 = vector.broadcast %115 : vector<256x1xf32> to vector<256x4xf32>
    %118 = vector.broadcast %116 : vector<1x4xf32> to vector<256x4xf32>
    %119 = arith.mulf %117, %118 : vector<256x4xf32>
    %120 = vector.extract_strided_slice %113 {offsets = [0, 1], sizes = [256, 1], strides = [1, 1]} : vector<256x10xf32> to vector<256x1xf32>
    %121 = vector.extract_strided_slice %114 {offsets = [1, 0], sizes = [1, 4], strides = [1, 1]} : vector<10x4xf32> to vector<1x4xf32>
    %122 = vector.broadcast %120 : vector<256x1xf32> to vector<256x4xf32>
    %123 = vector.broadcast %121 : vector<1x4xf32> to vector<256x4xf32>
    %124 = arith.mulf %122, %123 : vector<256x4xf32>
    %125 = arith.addf %119, %124 : vector<256x4xf32>
    %126 = vector.extract_strided_slice %113 {offsets = [0, 2], sizes = [256, 1], strides = [1, 1]} : vector<256x10xf32> to vector<256x1xf32>
    %127 = vector.extract_strided_slice %114 {offsets = [2, 0], sizes = [1, 4], strides = [1, 1]} : vector<10x4xf32> to vector<1x4xf32>
    %128 = vector.broadcast %126 : vector<256x1xf32> to vector<256x4xf32>
    %129 = vector.broadcast %127 : vector<1x4xf32> to vector<256x4xf32>
    %130 = arith.mulf %128, %129 : vector<256x4xf32>
    %131 = arith.addf %125, %130 : vector<256x4xf32>
    %132 = vector.extract_strided_slice %113 {offsets = [0, 3], sizes = [256, 1], strides = [1, 1]} : vector<256x10xf32> to vector<256x1xf32>
    %133 = vector.extract_strided_slice %114 {offsets = [3, 0], sizes = [1, 4], strides = [1, 1]} : vector<10x4xf32> to vector<1x4xf32>
    %134 = vector.broadcast %132 : vector<256x1xf32> to vector<256x4xf32>
    %135 = vector.broadcast %133 : vector<1x4xf32> to vector<256x4xf32>
    %136 = arith.mulf %134, %135 : vector<256x4xf32>
    %137 = arith.addf %131, %136 : vector<256x4xf32>
    %138 = vector.extract_strided_slice %113 {offsets = [0, 4], sizes = [256, 1], strides = [1, 1]} : vector<256x10xf32> to vector<256x1xf32>
    %139 = vector.extract_strided_slice %114 {offsets = [4, 0], sizes = [1, 4], strides = [1, 1]} : vector<10x4xf32> to vector<1x4xf32>
    %140 = vector.broadcast %138 : vector<256x1xf32> to vector<256x4xf32>
    %141 = vector.broadcast %139 : vector<1x4xf32> to vector<256x4xf32>
    %142 = arith.mulf %140, %141 : vector<256x4xf32>
    %143 = arith.addf %137, %142 : vector<256x4xf32>
    %144 = vector.extract_strided_slice %113 {offsets = [0, 5], sizes = [256, 1], strides = [1, 1]} : vector<256x10xf32> to vector<256x1xf32>
    %145 = vector.extract_strided_slice %114 {offsets = [5, 0], sizes = [1, 4], strides = [1, 1]} : vector<10x4xf32> to vector<1x4xf32>
    %146 = vector.broadcast %144 : vector<256x1xf32> to vector<256x4xf32>
    %147 = vector.broadcast %145 : vector<1x4xf32> to vector<256x4xf32>
    %148 = arith.mulf %146, %147 : vector<256x4xf32>
    %149 = arith.addf %143, %148 : vector<256x4xf32>
    %150 = vector.extract_strided_slice %113 {offsets = [0, 6], sizes = [256, 1], strides = [1, 1]} : vector<256x10xf32> to vector<256x1xf32>
    %151 = vector.extract_strided_slice %114 {offsets = [6, 0], sizes = [1, 4], strides = [1, 1]} : vector<10x4xf32> to vector<1x4xf32>
    %152 = vector.broadcast %150 : vector<256x1xf32> to vector<256x4xf32>
    %153 = vector.broadcast %151 : vector<1x4xf32> to vector<256x4xf32>
    %154 = arith.mulf %152, %153 : vector<256x4xf32>
    %155 = arith.addf %149, %154 : vector<256x4xf32>
    %156 = vector.extract_strided_slice %113 {offsets = [0, 7], sizes = [256, 1], strides = [1, 1]} : vector<256x10xf32> to vector<256x1xf32>
    %157 = vector.extract_strided_slice %114 {offsets = [7, 0], sizes = [1, 4], strides = [1, 1]} : vector<10x4xf32> to vector<1x4xf32>
    %158 = vector.broadcast %156 : vector<256x1xf32> to vector<256x4xf32>
    %159 = vector.broadcast %157 : vector<1x4xf32> to vector<256x4xf32>
    %160 = arith.mulf %158, %159 : vector<256x4xf32>
    %161 = arith.addf %155, %160 : vector<256x4xf32>
    %162 = vector.extract_strided_slice %113 {offsets = [0, 8], sizes = [256, 1], strides = [1, 1]} : vector<256x10xf32> to vector<256x1xf32>
    %163 = vector.extract_strided_slice %114 {offsets = [8, 0], sizes = [1, 4], strides = [1, 1]} : vector<10x4xf32> to vector<1x4xf32>
    %164 = vector.broadcast %162 : vector<256x1xf32> to vector<256x4xf32>
    %165 = vector.broadcast %163 : vector<1x4xf32> to vector<256x4xf32>
    %166 = arith.mulf %164, %165 : vector<256x4xf32>
    %167 = arith.addf %161, %166 : vector<256x4xf32>
    %168 = vector.extract_strided_slice %113 {offsets = [0, 9], sizes = [256, 1], strides = [1, 1]} : vector<256x10xf32> to vector<256x1xf32>
    %169 = vector.extract_strided_slice %114 {offsets = [9, 0], sizes = [1, 4], strides = [1, 1]} : vector<10x4xf32> to vector<1x4xf32>
    %170 = vector.broadcast %168 : vector<256x1xf32> to vector<256x4xf32>
    %171 = vector.broadcast %169 : vector<1x4xf32> to vector<256x4xf32>
    %172 = arith.mulf %170, %171 : vector<256x4xf32>
    %173 = arith.addf %167, %172 : vector<256x4xf32>
    %c0_34 = arith.constant 0 : index
    %c0_35 = arith.constant 0 : index
    %174 = vector.load %arg13[%c0_34, %c0_35] : memref<1x4xf32, #tpu.memory_space<vmem>>, vector<1x4xf32>
    %175 = vector.broadcast %174 : vector<1x4xf32> to vector<256x4xf32>
    %176 = arith.addf %173, %175 : vector<256x4xf32>
    %cst_36 = arith.constant dense<0xFF800000> : vector<256xf32>
    %177 = vector.multi_reduction <maximumf>, %176, %cst_36 [1] : vector<256x4xf32> to vector<256xf32>
    %178 = vector.shape_cast %177 : vector<256xf32> to vector<256x1xf32>
    %179 = vector.broadcast %178 : vector<256x1xf32> to vector<256x4xf32>
    %180 = arith.subf %176, %179 : vector<256x4xf32>
    %181 = math.exp %180 : vector<256x4xf32>
    %cst_37 = arith.constant dense<0.000000e+00> : vector<256xf32>
    %182 = vector.multi_reduction <add>, %181, %cst_37 [1] : vector<256x4xf32> to vector<256xf32>
    %183 = vector.shape_cast %182 : vector<256xf32> to vector<256x1xf32>
    %184 = tpu.reciprocal %183 : vector<256x1xf32> -> vector<256x1xf32>
    %185 = vector.broadcast %184 : vector<256x1xf32> to vector<256x4xf32>
    %186 = arith.mulf %181, %185 : vector<256x4xf32>
    %187 = tpu.concatenate %73, %46, %186 in 1 : vector<256x6xf32>, vector<256x32xf32>, vector<256x4xf32> -> vector<256x42xf32>
    %c0_38 = arith.constant 0 : index
    %c0_39 = arith.constant 0 : index
    %188 = vector.load %arg14[%c0_38, %c0_39] : memref<256x42xf32, #tpu.memory_space<vmem>>, vector<256x42xf32>
    tpu.vector_store %arg14[%c0_38, %c0_39], %187 {strides = array<i32>} : memref<256x42xf32, #tpu.memory_space<vmem>>, vector<256x42xf32>,
    return
  }
  func.func @transform_0(%arg0: i32) -> (i32, i32) {
    %c0_i32 = arith.constant 0 : i32
    %c0_i32_0 = arith.constant 0 : i32
    return %arg0, %c0_i32 : i32, i32
  }
  func.func @transform_1(%arg0: i32) -> (i32, i32) {
    %c0_i32 = arith.constant 0 : i32
    %c0_i32_0 = arith.constant 0 : i32
    %c0_i32_1 = arith.constant 0 : i32
    return %c0_i32, %c0_i32_0 : i32, i32
  }
  func.func @transform_2(%arg0: i32) -> (i32, i32) {
    %c0_i32 = arith.constant 0 : i32
    %c0_i32_0 = arith.constant 0 : i32
    %c0_i32_1 = arith.constant 0 : i32
    return %c0_i32, %c0_i32_0 : i32, i32
  }
  func.func @transform_3(%arg0: i32) -> (i32, i32) {
    %c0_i32 = arith.constant 0 : i32
    %c0_i32_0 = arith.constant 0 : i32
    %c0_i32_1 = arith.constant 0 : i32
    return %c0_i32, %c0_i32_0 : i32, i32
  }
  func.func @transform_4(%arg0: i32) -> (i32, i32) {
    %c0_i32 = arith.constant 0 : i32
    %c0_i32_0 = arith.constant 0 : i32
    %c0_i32_1 = arith.constant 0 : i32
    return %c0_i32, %c0_i32_0 : i32, i32
  }
  func.func @transform_5(%arg0: i32) -> (i32, i32) {
    %c0_i32 = arith.constant 0 : i32
    %c0_i32_0 = arith.constant 0 : i32
    %c0_i32_1 = arith.constant 0 : i32
    return %c0_i32, %c0_i32_0 : i32, i32
  }
  func.func @transform_6(%arg0: i32) -> (i32, i32) {
    %c0_i32 = arith.constant 0 : i32
    %c0_i32_0 = arith.constant 0 : i32
    %c0_i32_1 = arith.constant 0 : i32
    return %c0_i32, %c0_i32_0 : i32, i32
  }
  func.func @transform_7(%arg0: i32) -> (i32, i32) {
    %c0_i32 = arith.constant 0 : i32
    %c0_i32_0 = arith.constant 0 : i32
    %c0_i32_1 = arith.constant 0 : i32
    return %c0_i32, %c0_i32_0 : i32, i32
  }
  func.func @transform_8(%arg0: i32) -> (i32, i32) {
    %c0_i32 = arith.constant 0 : i32
    %c0_i32_0 = arith.constant 0 : i32
    %c0_i32_1 = arith.constant 0 : i32
    return %c0_i32, %c0_i32_0 : i32, i32
  }
  func.func @transform_9(%arg0: i32) -> (i32, i32) {
    %c0_i32 = arith.constant 0 : i32
    %c0_i32_0 = arith.constant 0 : i32
    %c0_i32_1 = arith.constant 0 : i32
    return %c0_i32, %c0_i32_0 : i32, i32
  }
  func.func @transform_10(%arg0: i32) -> (i32, i32) {
    %c0_i32 = arith.constant 0 : i32
    %c0_i32_0 = arith.constant 0 : i32
    %c0_i32_1 = arith.constant 0 : i32
    return %c0_i32, %c0_i32_0 : i32, i32
  }
  func.func @transform_11(%arg0: i32) -> (i32, i32) {
    %c0_i32 = arith.constant 0 : i32
    %c0_i32_0 = arith.constant 0 : i32
    %c0_i32_1 = arith.constant 0 : i32
    return %c0_i32, %c0_i32_0 : i32, i32
  }
  func.func @transform_12(%arg0: i32) -> (i32, i32) {
    %c0_i32 = arith.constant 0 : i32
    %c0_i32_0 = arith.constant 0 : i32
    %c0_i32_1 = arith.constant 0 : i32
    return %c0_i32, %c0_i32_0 : i32, i32
  }
  func.func @transform_13(%arg0: i32) -> (i32, i32) {
    %c0_i32 = arith.constant 0 : i32
    %c0_i32_0 = arith.constant 0 : i32
    return %arg0, %c0_i32 : i32, i32
  }
}

</mosaic_0001>

<bundles_post_ra>
// kernel: tpu_custom_call.1
= control target key start
LH: loop header
LB: loop body
LE: loop exit
PB: predicated region body
PF: predicated region fallthrough
CT: control target
= control target key end

     0   :  { %s8875_s25 = smov 0   ;;  %s14764_s0 = inlined_call_operand.vmem [shape: f32[512,32], index: 0, kind: input, shape index: {}]   ;;  %s14765_s1 = inlined_call_operand.vmem [shape: f32[32,16], index: 1, kind: input, shape index: {}]   ;;  %s14766_s2 = inlined_call_operand.vmem [shape: f32[1,16], index: 2, kind: input, shape index: {}]   ;;  %s14767_s3 = inlined_call_operand.vmem [shape: f32[16,4], index: 3, kind: input, shape index: {}]   ;;  %s14768_s4 = inlined_call_operand.vmem [shape: f32[1,4], index: 4, kind: input, shape index: {}]   ;;  %s14769_s5 = inlined_call_operand.vmem [shape: f32[4,16], index: 5, kind: input, shape index: {}]   ;;  %s14770_s6 = inlined_call_operand.vmem [shape: f32[1,16], index: 6, kind: input, shape index: {}]   ;;  %s14771_s7 = inlined_call_operand.vmem [shape: f32[16,32], index: 7, kind: input, shape index: {}]   ;;  %s14772_s8 = inlined_call_operand.vmem [shape: f32[1,32], index: 8, kind: input, shape index: {}]   ;;  %s14773_s9 = inlined_call_operand.vmem [shape: f32[6,10], index: 9, kind: input, shape index: {}]   ;;  %s14774_s10 = inlined_call_operand.vmem [shape: f32[1,10], index: 10, kind: input, shape index: {}]   ;;  %s14775_s11 = inlined_call_operand.vmem [shape: f32[10,4], index: 11, kind: input, shape index: {}]   ;;  %s14776_s12 = inlined_call_operand.vmem [shape: f32[1,4], index: 12, kind: input, shape index: {}]   ;;  %s14777_s13 = inlined_call_operand.vmem [shape: f32[512,42], index: 13, kind: output, shape index: {}]  }
   0x1 LB: > { %s7492_s26 = sadd.s32 4294967295, %s8791_s25   ;;  %p7496_p0 = scmp.ge.s32.totalorder %s8791_s25, 1  ;;  %s8791_s25 = sphi %s8875_s25, %s23_s25  }
   0x2   : > { %p388_p1 = scmp.lt.s32.totalorder %s8791_s25, 3 }
   0x4   : > { %p389_p2 = pnand %p7496_p0, %p388_p1 }
   0x6   : > { %392 = sbr.rel (%p389_p2) target bundleno = 2861 (0xb2d), region = 72 }
   0xb   : > { %v479_v0 = vld [vmem:[%s14765_s1 + $0x18] sm:$0xff]  ;;  %v478_v1 = vld [vmem:[%s14765_s1 + $0x10] sm:$0xff]  ;;  %s7497_s14 = sshll.u32 %s7492_s26, 5  ;;  %v842_v2 = vld [vmem:[%s14767_s3 + $0x8] sm:$0xff]  ;;  %vm487_vm0 = vcmask 261120   ;;  %vm850_vm1 = vcmask 130048  }
   0xc   : > { %7709 = vmatprep.subr.mxu0 %v479_v0  ;;  %p433_p3 = scmp.lt.s32.totalorder %s7497_s14, 63  ;;  %v477_v3 = vld [vmem:[%s14765_s1 + $0x8] sm:$0xff]  ;;  %7869 = vmatprep.subr.mxu1 %v842_v2  ;;  %v841_v4 = vld [vmem:[%s14767_s3] sm:$0xff]  ;;  %vm3414_vm4 = vcmask 31744   ;;  %vm3447_vm5 = vcmask 39936   ;;  %s8803_s17 = smov 6  }
   0xd   : > { %7710 = vmatpush3.msra.mxu0 %v479_v0  ;;  %7871 = vmatpush3.msra.mxu1 %v842_v2  ;;  %v476_v5 = vld [vmem:[%s14765_s1] sm:$0xff]  ;;  %s8804_s18 = smov 38  }
   0xe   : > { %7711 = vmatprep.subr.mxu0 %v478_v1  ;;  %s15984_s14 = smov (!%p433_p3, %s7497_s14), 63  ;;  %7870 = vmatprep.subr.mxu1 %v841_v4 }
   0xf   : > { %7712 = vmatpush3.msra.mxu0 %v478_v1  ;;  %s7498_s23 = sshll.u32 %s15984_s14, 3  ;;  %7872 = vmatpush3.msra.mxu1 %v841_v4 }
  0x10   : > { %7713 = vmatprep.subr.mxu0 %v477_v3  ;;  %s8909_s27 = scalar_lea.vmem %s14764_s0, %s7498_s23  ;;  %s14576_s20 = scalar_lea.vmem %s14777_s13, %s7498_s23 }
  0x11   : > { %7714 = vmatpush3.msra.mxu0 %v477_v3  ;;  %v8912_v6 = vld [vmem:[%s8909_s27] sm:$0xff]  ;;  %v8915_v7 = vld [vmem:[%s8909_s27 + $0x8] sm:$0xff]  ;;  %v8918_v8 = vld [vmem:[%s8909_s27 + $0x10] sm:$0xff] }
  0x12   : > { %7715 = vmatprep.subr.mxu0 %v476_v5  ;;  %7717 = vmatprep.mubr.msk.f32.mxu0 %vm487_vm0, %v8912_v6  ;;  %v8927_v9 = vld [vmem:[%s8909_s27 + $0x18] sm:$0xff]  ;;  %v8930_v10 = vld [vmem:[%s8909_s27 + $0x20] sm:$0xff]  ;;  %v8937_v11 = vld [vmem:[%s8909_s27 + $0x28] sm:$0xff]  ;;  %v2359_v38 = vmul.f32 %v8915_v7, %v8915_v7  ;;  %v2360_v40 = vmul.f32 %v8918_v8, %v8918_v8  ;;  %v2358_v41 = vmul.f32 %v8912_v6, %v8912_v6 }
  0x13   : > { %7716 = vmatpush3.msra.mxu0 %v476_v5  ;;  %v8940_v12 = vld [vmem:[%s8909_s27 + $0x30] sm:$0xff]  ;;  %v8947_v13 = vld [vmem:[%s8909_s27 + $0x38] sm:$0xff]  ;;  %v8950_v14 = vld [vmem:[%s8909_s27 + $0x40] sm:$0xff]  ;;  %v2361_v42 = vmul.f32 %v8927_v9, %v8927_v9  ;;  %v2362_v43 = vmul.f32 %v8930_v10, %v8930_v10  ;;  %v2363_v47 = vmul.f32 %v8937_v11, %v8937_v11 }
  0x14   : > { %7718 = vmatmul.mubr.msk.f32.vlgmr.msra.gmra.mxu0 %vm487_vm0, %v8915_v7  ;;  %7765 = vmatprep.subr.mxu0 %v842_v2  ;;  %v8957_v15 = vld [vmem:[%s8909_s27 + $0x48] sm:$0xff]  ;;  %v8960_v16 = vld [vmem:[%s8909_s27 + $0x50] sm:$0xff]  ;;  %v8967_v17 = vld [vmem:[%s8909_s27 + $0x58] sm:$0xff]  ;;  %v2393_v39 = vsel %vm487_vm0, %v2359_v38, 0.0  ;;  %v2396_v44 = vsel %vm487_vm0, %v2360_v40, 0.0  ;;  %v2390_v45 = vsel %vm487_vm0, %v2358_v41, 0.0  ;;  %v2364_v49 = vmul.f32 %v8940_v12, %v8940_v12 }
  0x15   : > { %7720 = vmatprep.mubr.msk.f32.mxu0 %vm487_vm0, %v8918_v8  ;;  %7766 = vmatpush3.msra.mxu0 %v842_v2  ;;  %v8970_v18 = vld [vmem:[%s8909_s27 + $0x60] sm:$0xff]  ;;  %v8977_v19 = vld [vmem:[%s8909_s27 + $0x68] sm:$0xff]  ;;  %v8980_v20 = vld [vmem:[%s8909_s27 + $0x70] sm:$0xff]  ;;  %v2399_v46 = vsel %vm487_vm0, %v2361_v42, 0.0  ;;  %v2402_v48 = vsel %vm487_vm0, %v2362_v43, 0.0  ;;  %v2405_v50 = vsel %vm487_vm0, %v2363_v47, 0.0  ;;  %v2365_v51 = vmul.f32 %v8947_v13, %v8947_v13 }
  0x16   : > { %7767 = vmatprep.subr.mxu0 %v841_v4  ;;  %v8987_v21 = vld [vmem:[%s8909_s27 + $0x78] sm:$0xff]  ;;  %v8990_v22 = vld [vmem:[%s8909_s27 + $0x80] sm:$0xff]  ;;  %v8997_v23 = vld [vmem:[%s8909_s27 + $0x88] sm:$0xff]  ;;  %2394 = vadd.xlane.f32.xlu0 %v2393_v39  ;;  %v2408_v52 = vsel %vm487_vm0, %v2364_v49, 0.0  ;;  %v2366_v53 = vmul.f32 %v8950_v14, %v8950_v14  ;;  %v2367_v55 = vmul.f32 %v8957_v15, %v8957_v15  ;;  %v2368_v57 = vmul.f32 %v8960_v16, %v8960_v16 }
  0x17   : > { %7768 = vmatpush3.msra.mxu0 %v841_v4  ;;  %v9000_v24 = vld [vmem:[%s8909_s27 + $0x90] sm:$0xff]  ;;  %v9007_v25 = vld [vmem:[%s8909_s27 + $0x98] sm:$0xff]  ;;  %v9010_v26 = vld [vmem:[%s8909_s27 + $0xa0] sm:$0xff]  ;;  %2391 = vadd.xlane.f32.xlu1 %v2390_v45  ;;  %v2411_v54 = vsel %vm487_vm0, %v2365_v51, 0.0  ;;  %v2369_v59 = vmul.f32 %v8967_v17, %v8967_v17  ;;  %v2370_v61 = vmul.f32 %v8970_v18, %v8970_v18  ;;  %v2371_v63 = vmul.f32 %v8977_v19, %v8977_v19 }
  0x18   : > { %7721 = vmatmul.mubr.msk.f32.gmra.mxu0 %vm487_vm0, %v8927_v9  ;;  %v9017_v27 = vld [vmem:[%s8909_s27 + $0xa8] sm:$0xff]  ;;  %v9020_v28 = vld [vmem:[%s8909_s27 + $0xb0] sm:$0xff]  ;;  %v9027_v29 = vld [vmem:[%s8909_s27 + $0xb8] sm:$0xff]  ;;  %v2414_v56 = vsel %vm487_vm0, %v2366_v53, 0.0  ;;  %v2417_v58 = vsel %vm487_vm0, %v2367_v55, 0.0  ;;  %v2420_v60 = vsel %vm487_vm0, %v2368_v57, 0.0  ;;  %v2372_v1 = vmul.f32 %v8980_v20, %v8980_v20 }
  0x19   : > { %7723 = vmatprep.mubr.msk.f32.mxu0 %vm487_vm0, %v8930_v10  ;;  %v9030_v30 = vld [vmem:[%s8909_s27 + $0xc0] sm:$0xff]  ;;  %v9037_v31 = vld [vmem:[%s8909_s27 + $0xc8] sm:$0xff]  ;;  %v9040_v32 = vld [vmem:[%s8909_s27 + $0xd0] sm:$0xff]  ;;  %v2423_v62 = vsel %vm487_vm0, %v2369_v59, 0.0  ;;  %v2426_v0 = vsel %vm487_vm0, %v2370_v61, 0.0  ;;  %v2429_v2 = vsel %vm487_vm0, %v2371_v63, 0.0  ;;  %v2373_v3 = vmul.f32 %v8987_v21, %v8987_v21 }
  0x1a   : > { %v9047_v33 = vld [vmem:[%s8909_s27 + $0xd8] sm:$0xff]  ;;  %v9050_v34 = vld [vmem:[%s8909_s27 + $0xe0] sm:$0xff]  ;;  %v9057_v35 = vld [vmem:[%s8909_s27 + $0xe8] sm:$0xff]  ;;  %2397 = vadd.xlane.f32.xlu0 %v2396_v44  ;;  %v2432_v4 = vsel %vm487_vm0, %v2372_v1, 0.0  ;;  %v2374_v5 = vmul.f32 %v8990_v22, %v8990_v22  ;;  %v2375_v7 = vmul.f32 %v8997_v23, %v8997_v23  ;;  %v2376_v9 = vmul.f32 %v9000_v24, %v9000_v24 }
  0x1b   : > { %v9060_v36 = vld [vmem:[%s8909_s27 + $0xf0] sm:$0xff]  ;;  %v9067_v37 = vld [vmem:[%s8909_s27 + $0xf8] sm:$0xff]  ;;  %2400 = vadd.xlane.f32.xlu1 %v2399_v46  ;;  %v2435_v6 = vsel %vm487_vm0, %v2373_v3, 0.0 }
  0x1c   : > { %7724 = vmatmul.mubr.msk.f32.gmra.mxu0 %vm487_vm0, %v8937_v11  ;;  %v2438_v8 = vsel %vm487_vm0, %v2374_v5, 0.0  ;;  %v2441_v10 = vsel %vm487_vm0, %v2375_v7, 0.0  ;;  %v2377_v11 = vmul.f32 %v9007_v25, %v9007_v25  ;;  %v2388_v38 = vmul.f32 %v9060_v36, %v9060_v36 }
  0x1d   : > { %7726 = vmatprep.mubr.msk.f32.mxu0 %vm487_vm0, %v8940_v12  ;;  %v2444_v12 = vsel %vm487_vm0, %v2376_v9, 0.0  ;;  %v2389_v39 = vmul.f32 %v9067_v37, %v9067_v37 }
  0x1e   : > { %2403 = vadd.xlane.f32.xlu0 %v2402_v48 }
  0x1f   : > { %2406 = vadd.xlane.f32.xlu1 %v2405_v50  ;;  %v2483_v40 = vsel %vm487_vm0, %v2389_v39, 0.0 }
  0x20   : > { %7727 = vmatmul.mubr.msk.f32.gmra.mxu0 %vm487_vm0, %v8947_v13  ;;  %v2378_v13 = vmul.f32 %v9010_v26, %v9010_v26 }
  0x21   : > { %7729 = vmatprep.mubr.msk.f32.mxu0 %vm487_vm0, %v8950_v14  ;;  %v2447_v14 = vsel %vm487_vm0, %v2377_v11, 0.0 }
  0x22   : > { %2409 = vadd.xlane.f32.xlu0 %v2408_v52 }
  0x23   : > { %2412 = vadd.xlane.f32.xlu1 %v2411_v54 }
  0x24   : > { %7730 = vmatmul.mubr.msk.f32.gmra.mxu0 %vm487_vm0, %v8957_v15  ;;  %v2379_v15 = vmul.f32 %v9017_v27, %v9017_v27 }
  0x25   : > { %7732 = vmatprep.mubr.msk.f32.mxu0 %vm487_vm0, %v8960_v16  ;;  %v2450_v16 = vsel %vm487_vm0, %v2378_v13, 0.0 }
  0x26   : > { %2415 = vadd.xlane.f32.xlu0 %v2414_v56 }
  0x27   : > { %2418 = vadd.xlane.f32.xlu1 %v2417_v58 }
  0x28   : > { %7733 = vmatmul.mubr.msk.f32.gmra.mxu0 %vm487_vm0, %v8967_v17  ;;  %v2380_v17 = vmul.f32 %v9020_v28, %v9020_v28 }
  0x29   : > { %7735 = vmatprep.mubr.msk.f32.mxu0 %vm487_vm0, %v8970_v18  ;;  %v2453_v18 = vsel %vm487_vm0, %v2379_v15, 0.0 }
  0x2a   : > { %2421 = vadd.xlane.f32.xlu0 %v2420_v60 }
  0x2b   : > { %2424 = vadd.xlane.f32.xlu1 %v2423_v62 }
  0x2c   : > { %7736 = vmatmul.mubr.msk.f32.gmra.mxu0 %vm487_vm0, %v8977_v19  ;;  %v2381_v19 = vmul.f32 %v9027_v29, %v9027_v29 }
  0x2d   : > { %7738 = vmatprep.mubr.msk.f32.mxu0 %vm487_vm0, %v8980_v20  ;;  %v2456_v20 = vsel %vm487_vm0, %v2380_v17, 0.0 }
  0x2e   : > { %2427 = vadd.xlane.f32.xlu0 %v2426_v0 }
  0x2f   : > { %2430 = vadd.xlane.f32.xlu1 %v2429_v2 }
  0x30   : > { %7739 = vmatmul.mubr.msk.f32.gmra.mxu0 %vm487_vm0, %v8987_v21  ;;  %v2382_v21 = vmul.f32 %v9030_v30, %v9030_v30 }
  0x31   : > { %7741 = vmatprep.mubr.msk.f32.mxu0 %vm487_vm0, %v8990_v22  ;;  %v2459_v22 = vsel %vm487_vm0, %v2381_v19, 0.0 }
  0x32   : > { %2433 = vadd.xlane.f32.xlu0 %v2432_v4 }
  0x33   : > { %2436 = vadd.xlane.f32.xlu1 %v2435_v6 }
  0x34   : > { %7742 = vmatmul.mubr.msk.f32.gmra.mxu0 %vm487_vm0, %v8997_v23  ;;  %v2383_v23 = vmul.f32 %v9037_v31, %v9037_v31 }
  0x35   : > { %7744 = vmatprep.mubr.msk.f32.mxu0 %vm487_vm0, %v9000_v24  ;;  %v2462_v24 = vsel %vm487_vm0, %v2382_v21, 0.0 }
  0x36   : > { %2439 = vadd.xlane.f32.xlu0 %v2438_v8 }
  0x37   : > { %2442 = vadd.xlane.f32.xlu1 %v2441_v10 }
  0x38   : > { %7745 = vmatmul.mubr.msk.f32.gmra.mxu0 %vm487_vm0, %v9007_v25  ;;  %v2384_v25 = vmul.f32 %v9040_v32, %v9040_v32 }
  0x39   : > { %7747 = vmatprep.mubr.msk.f32.mxu0 %vm487_vm0, %v9010_v26  ;;  %v2465_v26 = vsel %vm487_vm0, %v2383_v23, 0.0 }
  0x3a   : > { %2445 = vadd.xlane.f32.xlu0 %v2444_v12 }
  0x3b   : > { %2448 = vadd.xlane.f32.xlu1 %v2447_v14 }
  0x3c   : > { %7748 = vmatmul.mubr.msk.f32.gmra.mxu0 %vm487_vm0, %v9017_v27  ;;  %v2385_v27 = vmul.f32 %v9047_v33, %v9047_v33 }
  0x3d   : > { %7750 = vmatprep.mubr.msk.f32.mxu0 %vm487_vm0, %v9020_v28  ;;  %v2468_v28 = vsel %vm487_vm0, %v2384_v25, 0.0 }
  0x3e   : > { %2451 = vadd.xlane.f32.xlu0 %v2450_v16 }
  0x3f   : > { %2454 = vadd.xlane.f32.xlu1 %v2453_v18 }
  0x40   : > { %7751 = vmatmul.mubr.msk.f32.gmra.mxu0 %vm487_vm0, %v9027_v29  ;;  %v2386_v29 = vmul.f32 %v9050_v34, %v9050_v34 }
  0x41   : > { %7753 = vmatprep.mubr.msk.f32.mxu0 %vm487_vm0, %v9030_v30  ;;  %v2471_v30 = vsel %vm487_vm0, %v2385_v27, 0.0 }
  0x42   : > { %2457 = vadd.xlane.f32.xlu0 %v2456_v20 }
  0x43   : > { %2460 = vadd.xlane.f32.xlu1 %v2459_v22 }
  0x44   : > { %7754 = vmatmul.mubr.msk.f32.gmra.mxu0 %vm487_vm0, %v9037_v31  ;;  %v2387_v31 = vmul.f32 %v9057_v35, %v9057_v35 }
  0x45   : > { %7756 = vmatprep.mubr.msk.f32.mxu0 %vm487_vm0, %v9040_v32  ;;  %v2474_v32 = vsel %vm487_vm0, %v2386_v29, 0.0 }
  0x46   : > { %2463 = vadd.xlane.f32.xlu0 %v2462_v24 }
  0x47   : > { %2466 = vadd.xlane.f32.xlu1 %v2465_v26 }
  0x48   : > { %7757 = vmatmul.mubr.msk.f32.gmra.mxu0 %vm487_vm0, %v9047_v33  ;;  %v2477_v33 = vsel %vm487_vm0, %v2387_v31, 0.0 }
  0x49   : > { %7759 = vmatprep.mubr.msk.f32.mxu0 %vm487_vm0, %v9050_v34  ;;  %v2480_v34 = vsel %vm487_vm0, %v2388_v38, 0.0 }
  0x4a   : > { %2469 = vadd.xlane.f32.xlu0 %v2468_v28 }
  0x4b   : > { %2472 = vadd.xlane.f32.xlu1 %v2471_v30 }
  0x4c   : > { %7760 = vmatmul.mubr.msk.f32.gmra.mxu0 %vm487_vm0, %v9057_v35  ;;  %v9170_v35 = vld [vmem:[%s14766_s2] ss:$0 sm:$0xff] }
  0x4d   : > { %7762 = vmatprep.mubr.msk.f32.mxu0 %vm487_vm0, %v9060_v36 }
  0x4e   : > { %2475 = vadd.xlane.f32.xlu0 %v2474_v32 }
  0x4f   : > { %2478 = vadd.xlane.f32.xlu1 %v2477_v33 }
  0x50   : > { %7763 = vmatmul.mubr.msk.f32.gmra.mxu0 %vm487_vm0, %v9067_v37 }
  0x52   : > { %2481 = vadd.xlane.f32.xlu0 %v2480_v34 }
  0x53   : > { %2484 = vadd.xlane.f32.xlu1 %v2483_v40 }
  0xd4   : > { %v7719_v36 = vpop.f32.mrf.mxu0 }
  0xd5   : > { %v656_v41 = vadd.f32 %v7719_v36, %v9170_v35 }
  0xd6   : > { %v650_v42 = vpop.f32.mrf.mxu0 }
  0xd7   : > { %v651_v43 = vadd.f32 %v9170_v35, %v650_v42  ;;  %v810_v46 = vmax.f32 %v656_v41, 0.0 }
  0xd8   : > { %v7722_v37 = vpop.f32.mrf.mxu0 }
  0xd9   : > { %v809_v44 = vmax.f32 %v651_v43, 0.0  ;;  %v666_v45 = vadd.f32 %v7722_v37, %v9170_v35 }
  0xda   : > { %v660_v47 = vpop.f32.mrf.mxu0 }
  0xdb   : > { %7769 = vmatprep.mubr.msk.f32.mxu0 %vm850_vm1, %v809_v44  ;;  %v661_v48 = vadd.f32 %v9170_v35, %v660_v47  ;;  %v812_v49 = vmax.f32 %v666_v45, 0.0 }
  0xdc   : > { %7770 = vmatmul.mubr.msk.f32.vlgmr.msra.gmra.mxu0 %vm850_vm1, %v810_v46  ;;  %v7725_v50 = vpop.f32.mrf.mxu0 }
  0xdd   : > { %v811_v51 = vmax.f32 %v661_v48, 0.0  ;;  %v676_v52 = vadd.f32 %v7725_v50, %v9170_v35 }
  0xde   : > { %v670_v53 = vpop.f32.mrf.mxu0 }
  0xdf   : > { %7772 = vmatprep.mubr.msk.f32.mxu0 %vm850_vm1, %v811_v51  ;;  %v671_v54 = vadd.f32 %v9170_v35, %v670_v53  ;;  %v814_v55 = vmax.f32 %v676_v52, 0.0 }
  0xe0   : > { %7773 = vmatmul.mubr.msk.f32.gmra.mxu0 %vm850_vm1, %v812_v49  ;;  %v7728_v56 = vpop.f32.mrf.mxu0 }
  0xe1   : > { %v813_v57 = vmax.f32 %v671_v54, 0.0  ;;  %v686_v58 = vadd.f32 %v7728_v56, %v9170_v35 }
  0xe2   : > { %v680_v59 = vpop.f32.mrf.mxu0 }
  0xe3   : > { %7775 = vmatprep.mubr.msk.f32.mxu0 %vm850_vm1, %v813_v57  ;;  %v681_v60 = vadd.f32 %v9170_v35, %v680_v59  ;;  %v816_v61 = vmax.f32 %v686_v58, 0.0 }
  0xe4   : > { %7776 = vmatmul.mubr.msk.f32.gmra.mxu0 %vm850_vm1, %v814_v55  ;;  %v7731_v62 = vpop.f32.mrf.mxu0 }
  0xe5   : > { %v815_v63 = vmax.f32 %v681_v60, 0.0  ;;  %v696_v0 = vadd.f32 %v7731_v62, %v9170_v35 }
  0xe6   : > { %v690_v1 = vpop.f32.mrf.mxu0 }
  0xe7   : > { %7778 = vmatprep.mubr.msk.f32.mxu0 %vm850_vm1, %v815_v63  ;;  %v691_v2 = vadd.f32 %v9170_v35, %v690_v1  ;;  %v818_v3 = vmax.f32 %v696_v0, 0.0 }
  0xe8   : > { %7779 = vmatmul.mubr.msk.f32.gmra.mxu0 %vm850_vm1, %v816_v61  ;;  %v7734_v4 = vpop.f32.mrf.mxu0 }
  0xe9   : > { %v817_v5 = vmax.f32 %v691_v2, 0.0  ;;  %v706_v6 = vadd.f32 %v7734_v4, %v9170_v35 }
  0xea   : > { %v700_v7 = vpop.f32.mrf.mxu0 }
  0xeb   : > { %7781 = vmatprep.mubr.msk.f32.mxu0 %vm850_vm1, %v817_v5  ;;  %v701_v8 = vadd.f32 %v9170_v35, %v700_v7  ;;  %v820_v9 = vmax.f32 %v706_v6, 0.0 }
  0xec   : > { %7782 = vmatmul.mubr.msk.f32.gmra.mxu0 %vm850_vm1, %v818_v3  ;;  %v7737_v10 = vpop.f32.mrf.mxu0 }
  0xed   : > { %v819_v11 = vmax.f32 %v701_v8, 0.0  ;;  %v716_v12 = vadd.f32 %v7737_v10, %v9170_v35  ;;  %v14782_v8 = vmov 1  }
  0xee   : > { %v710_v13 = vpop.f32.mrf.mxu0  ;;  %7894 = vset.pattern.permute.xlu1 %v14782_v8 }
  0xef   : > { %7784 = vmatprep.mubr.msk.f32.mxu0 %vm850_vm1, %v819_v11  ;;  %v711_v14 = vadd.f32 %v9170_v35, %v710_v13  ;;  %v822_v15 = vmax.f32 %v716_v12, 0.0  ;;  %v14780_v12 = vmov 3   ;;  %v14789_v13 = vmov 2  }
  0xf0   : > { %7785 = vmatmul.mubr.msk.f32.gmra.mxu0 %vm850_vm1, %v820_v9  ;;  %v7740_v16 = vpop.f32.mrf.mxu0  ;;  %v14778_v9 = vmov 0  }
  0xf1   : > { %v821_v17 = vmax.f32 %v711_v14, 0.0  ;;  %v726_v18 = vadd.f32 %v7740_v16, %v9170_v35  ;;  %7893 = vset.pattern.permute.xlu0 %v14778_v9 }
  0xf2   : > { %v720_v19 = vpop.f32.mrf.mxu0 }
  0xf3   : > { %7787 = vmatprep.mubr.msk.f32.mxu0 %vm850_vm1, %v821_v17  ;;  %v721_v20 = vadd.f32 %v9170_v35, %v720_v19  ;;  %v824_v21 = vmax.f32 %v726_v18, 0.0  ;;  %v2029_v19 = vld [vmem:[%s14771_s7 + $0x8] sm:$0xff] }
  0xf4   : > { %7788 = vmatmul.mubr.msk.f32.gmra.mxu0 %vm850_vm1, %v822_v15  ;;  %v7743_v22 = vpop.f32.mrf.mxu0  ;;  %7817 = vmatprep.subr.mxu1 %v2029_v19 }
  0xf5   : > { %v823_v23 = vmax.f32 %v721_v20, 0.0  ;;  %v736_v24 = vadd.f32 %v7743_v22, %v9170_v35  ;;  %v2028_v20 = vld [vmem:[%s14771_s7] sm:$0xff]  ;;  %v9283_v22 = vpop.xlane.xlu0 %2394 }
  0xf6   : > { %v730_v25 = vpop.f32.mrf.mxu0 }
  0xf7   : > { %7790 = vmatprep.mubr.msk.f32.mxu1 %vm850_vm1, %v823_v23  ;;  %v731_v26 = vadd.f32 %v9170_v35, %v730_v25  ;;  %v826_v27 = vmax.f32 %v736_v24, 0.0  ;;  %v9285_v23 = vpop.xlane.xlu1 %2391 }
  0xf8   : > { %7791 = vmatmul.mubr.msk.f32.vlgmr.msra.gmra.mxu1 %vm850_vm1, %v824_v21  ;;  %v7746_v28 = vpop.f32.mrf.mxu0 }
  0xf9   : > { %v825_v29 = vmax.f32 %v731_v26, 0.0  ;;  %v746_v30 = vadd.f32 %v7746_v28, %v9170_v35  ;;  %7818 = vmatpush3.msra.mxu1 %v2029_v19  ;;  %v9294_v26 = vpop.xlane.xlu0 %2397 }
  0xfa   : > { %v740_v31 = vpop.f32.mrf.mxu0  ;;  %7819 = vmatprep.subr.mxu1 %v2028_v20 }
  0xfb   : > { %7793 = vmatprep.mubr.msk.f32.mxu1 %vm850_vm1, %v825_v29  ;;  %v741_v32 = vadd.f32 %v9170_v35, %v740_v31  ;;  %v828_v38 = vmax.f32 %v746_v30, 0.0  ;;  %7820 = vmatpush3.msra.mxu1 %v2028_v20 }
  0xfc   : > { %7794 = vmatmul.mubr.msk.f32.gmra.mxu1 %vm850_vm1, %v826_v27  ;;  %v7749_v33 = vpop.f32.mrf.mxu0  ;;  %v9296_v27 = vpop.xlane.xlu1 %2400 }
  0xfd   : > { %v827_v39 = vmax.f32 %v741_v32, 0.0  ;;  %v756_v34 = vadd.f32 %v7749_v33, %v9170_v35  ;;  %v9304_v28 = vpop.xlane.xlu0 %2403 }
  0xfe   : > { %v750_v40 = vpop.f32.mrf.mxu0 }
  0xff   : > { %v751_v36 = vadd.f32 %v9170_v35, %v750_v40  ;;  %7796 = vmatprep.mubr.msk.f32.mxu1 %vm850_vm1, %v827_v39  ;;  %v830_v41 = vmax.f32 %v756_v34, 0.0 }
 0x100   : > { %v7752_v42 = vpop.f32.mrf.mxu0  ;;  %7797 = vmatmul.mubr.msk.f32.gmra.mxu1 %vm850_vm1, %v828_v38  ;;  %v9306_v29 = vpop.xlane.xlu1 %2406 }
 0x101   : > { %v829_v43 = vmax.f32 %v751_v36, 0.0  ;;  %v766_v37 = vadd.f32 %v7752_v42, %v9170_v35  ;;  %v9317_v32 = vpop.xlane.xlu0 %2409 }
 0x102   : > { %v760_v44 = vpop.f32.mrf.mxu0 }
 0x103   : > { %v761_v45 = vadd.f32 %v9170_v35, %v760_v44  ;;  %7799 = vmatprep.mubr.msk.f32.mxu1 %vm850_vm1, %v829_v43  ;;  %v832_v46 = vmax.f32 %v766_v37, 0.0 }
 0x104   : > { %v7755_v47 = vpop.f32.mrf.mxu0  ;;  %7800 = vmatmul.mubr.msk.f32.gmra.mxu1 %vm850_vm1, %v830_v41  ;;  %v9319_v38 = vpop.xlane.xlu1 %2412 }
 0x105   : > { %v831_v48 = vmax.f32 %v761_v45, 0.0  ;;  %v776_v49 = vadd.f32 %v7755_v47, %v9170_v35  ;;  %v9328_v34 = vpop.xlane.xlu0 %2415 }
 0x106   : > { %v770_v50 = vpop.f32.mrf.mxu0  ;;  %14935 = vst [vmem:[#allocation2_spill] sm:$0xff] %v9328_v34 }
 0x107   : > { %v771_v51 = vadd.f32 %v9170_v35, %v770_v50  ;;  %7802 = vmatprep.mubr.msk.f32.mxu1 %vm850_vm1, %v831_v48  ;;  %v834_v52 = vmax.f32 %v776_v49, 0.0 }
 0x108   : > { %v7758_v53 = vpop.f32.mrf.mxu0  ;;  %7803 = vmatmul.mubr.msk.f32.gmra.mxu1 %vm850_vm1, %v832_v46  ;;  %v9330_v40 = vpop.xlane.xlu1 %2418 }
 0x109   : > { %v833_v54 = vmax.f32 %v771_v51, 0.0  ;;  %v786_v55 = vadd.f32 %v7758_v53, %v9170_v35  ;;  %v9336_v36 = vpop.xlane.xlu0 %2421 }
 0x10a   : > { %v780_v56 = vpop.f32.mrf.mxu0  ;;  %14936 = vst [vmem:[#allocation3_spill] sm:$0xff] %v9336_v36 }
 0x10b   : > { %v781_v57 = vadd.f32 %v9170_v35, %v780_v56  ;;  %7805 = vmatprep.mubr.msk.f32.mxu1 %vm850_vm1, %v833_v54  ;;  %v836_v58 = vmax.f32 %v786_v55, 0.0 }
 0x10c   : > { %v7761_v59 = vpop.f32.mrf.mxu0  ;;  %7806 = vmatmul.mubr.msk.f32.gmra.mxu1 %vm850_vm1, %v834_v52  ;;  %v9338_v41 = vpop.xlane.xlu1 %2424 }
 0x10d   : > { %v835_v60 = vmax.f32 %v781_v57, 0.0  ;;  %v796_v61 = vadd.f32 %v7761_v59, %v9170_v35  ;;  %14937 = vst [vmem:[#allocation4_spill] sm:$0xff] %v9338_v41  ;;  %v9347_v37 = vpop.xlane.xlu0 %2427 }
 0x10e   : > { %v790_v62 = vpop.f32.mrf.mxu0  ;;  %14939 = vst [vmem:[#allocation6_spill] sm:$0xff] %v9347_v37 }
 0x10f   : > { %v791_v63 = vadd.f32 %v9170_v35, %v790_v62  ;;  %7808 = vmatprep.mubr.msk.f32.mxu1 %vm850_vm1, %v835_v60  ;;  %v838_v0 = vmax.f32 %v796_v61, 0.0 }
 0x110   : > { %v7764_v1 = vpop.f32.mrf.mxu0  ;;  %7809 = vmatmul.mubr.msk.f32.gmra.mxu1 %vm850_vm1, %v836_v58  ;;  %v9349_v44 = vpop.xlane.xlu1 %2430 }
 0x111   : > { %v837_v2 = vmax.f32 %v791_v63, 0.0  ;;  %v806_v3 = vadd.f32 %v7764_v1, %v9170_v35  ;;  %14940 = vst [vmem:[#allocation7_spill] sm:$0xff] %v9349_v44  ;;  %v9357_v46 = vpop.xlane.xlu0 %2433 }
 0x112   : > { %v800_v4 = vpop.f32.mrf.mxu0  ;;  %14941 = vst [vmem:[#allocation8_spill] sm:$0xff] %v9357_v46 }
 0x113   : > { %v801_v5 = vadd.f32 %v9170_v35, %v800_v4  ;;  %7811 = vmatprep.mubr.msk.f32.mxu1 %vm850_vm1, %v837_v2  ;;  %v840_v6 = vmax.f32 %v806_v3, 0.0  ;;  %v9241_v35 = vld [vmem:[%s14768_s4] ss:$0 sm:$0xff] }
 0x114   : > { %7812 = vmatmul.mubr.msk.f32.gmra.mxu1 %vm850_vm1, %v838_v0  ;;  %v9359_v47 = vpop.xlane.xlu1 %2436 }
 0x115   : > { %v839_v7 = vmax.f32 %v801_v5, 0.0  ;;  %14942 = vst [vmem:[#allocation9_spill] sm:$0xff] %v9359_v47  ;;  %v9370_v49 = vpop.xlane.xlu0 %2439 }
 0x116   : > { %14944 = vst [vmem:[#allocation11_spill] sm:$0xff] %v9370_v49 }
 0x117   : > { %7814 = vmatprep.mubr.msk.f32.mxu1 %vm850_vm1, %v839_v7 }
 0x118   : > { %7815 = vmatmul.mubr.msk.f32.gmra.mxu1 %vm850_vm1, %v840_v6  ;;  %v9372_v50 = vpop.xlane.xlu1 %2442 }
 0x119   : > { %14945 = vst [vmem:[#allocation12_spill] sm:$0xff] %v9372_v50  ;;  %v9378_v52 = vpop.xlane.xlu0 %2445 }
 0x11a   : > { %14946 = vst [vmem:[#allocation13_spill] sm:$0xff] %v9378_v52 }
 0x11c   : > { %v9380_v53 = vpop.xlane.xlu1 %2448 }
 0x11d   : > { %14947 = vst [vmem:[#allocation14_spill] sm:$0xff] %v9380_v53  ;;  %v9389_v55 = vpop.xlane.xlu0 %2451 }
 0x11e   : > { %14949 = vst [vmem:[#allocation16_spill] sm:$0xff] %v9389_v55 }
 0x120   : > { %v9391_v56 = vpop.xlane.xlu1 %2454 }
 0x121   : > { %14950 = vst [vmem:[#allocation17_spill] sm:$0xff] %v9391_v56  ;;  %v9400_v59 = vpop.xlane.xlu0 %2457 }
 0x122   : > { %14952 = vst [vmem:[#allocation19_spill] sm:$0xff] %v9400_v59 }
 0x124   : > { %v9402_v60 = vpop.xlane.xlu1 %2460 }
 0x125   : > { %14953 = vst [vmem:[#allocation20_spill] sm:$0xff] %v9402_v60  ;;  %v9410_v61 = vpop.xlane.xlu0 %2463 }
 0x126   : > { %14954 = vst [vmem:[#allocation21_spill] sm:$0xff] %v9410_v61 }
 0x128   : > { %v9412_v62 = vpop.xlane.xlu1 %2466 }
 0x129   : > { %14955 = vst [vmem:[#allocation22_spill] sm:$0xff] %v9412_v62  ;;  %v9423_v1 = vpop.xlane.xlu0 %2469  ;;  %v14974_v62 = vmov 0  }
 0x12a   : > { %14957 = vst [vmem:[#allocation24_spill] sm:$0xff] %v9423_v1  ;;  %v14972_v1 = vmov 3  }
 0x12c   : > { %v9425_v2 = vpop.xlane.xlu1 %2472 }
 0x12d   : > { %14958 = vst [vmem:[#allocation25_spill] sm:$0xff] %v9425_v2  ;;  %v9434_v5 = vpop.xlane.xlu0 %2475  ;;  %v9514_v2 = vld [vmem:[%s14770_s6] ss:$0 sm:$0xff] }
 0x12e   : > { %14960 = vst [vmem:[#allocation27_spill] sm:$0xff] %v9434_v5 }
 0x130   : > { %v9436_v6 = vpop.xlane.xlu1 %2478 }
 0x131   : > { %14961 = vst [vmem:[#allocation28_spill] sm:$0xff] %v9436_v6  ;;  %v9442_v7 = vpop.xlane.xlu0 %2481 }
 0x132   : > { %14962 = vst [vmem:[#allocation29_spill] sm:$0xff] %v9442_v7 }
 0x19c   : > { %v7771_v10 = vpop.f32.mrf.mxu0 }
 0x19d   : > { %v9244_v11 = vadd.f32 %v7771_v10, %v9241_v35  ;;  %v9444_v10 = vpop.xlane.xlu1 %2484 }
 0x19e   : > { %v1013_v14 = vpop.f32.mrf.mxu0  ;;  %14963 = vst [vmem:[#allocation30_spill] sm:$0xff] %v9444_v10 }
 0x19f   : > { %1374 = vperm.xlu1 %7894, %v9244_v11   ;;  %1180 = vperm.xlu0 %7893, %v9244_v11   ;;  %v9253_v15 = vadd.f32 %v9241_v35, %v1013_v14  ;;  %v1333_v14 = vlaneseq }
 0x1a0   : > { %v7774_v16 = vpop.f32.mrf.mxu0 }
 0x1a1   : > { %v9260_v17 = vadd.f32 %v7774_v16, %v9241_v35 }
 0x1a2   : > { %v1023_v18 = vpop.f32.mrf.mxu0 }
 0x1a3   : > { %7896 = vset.pattern.permute.xlu1 %v14780_v12  ;;  %7895 = vset.pattern.permute.xlu0 %v14789_v13  ;;  %v9277_v21 = vadd.f32 %v9241_v35, %v1023_v18  ;;  %v9450_v18 = vshrl.u32 %v1333_v14, 7 }
 0x1a4   : > { %1766 = vperm.xlu1 %7896, %v9244_v11   ;;  %1570 = vperm.xlu0 %7895, %v9244_v11   ;;  %v7777_v24 = vpop.f32.mrf.mxu0 }
 0x1a5   : > { %v9292_v25 = vadd.f32 %v7777_v24, %v9241_v35  ;;  %14964 = vst [vmem:[#allocation31_spill] sm:$0xff] %v9450_v18  ;;  %v9490_v7 = vsub.s32 3, %v9450_v18 }
 0x1a6   : > { %v1033_v30 = vpop.f32.mrf.mxu0 }
 0x1a7   : > { %v9311_v31 = vadd.f32 %v9241_v35, %v1033_v30  ;;  %v9458_v30 = vsub.s32 1, %v9450_v18  ;;  %14970 = vst [vmem:[#allocation37_spill] sm:$0xff] %v9490_v7 }
 0x1a8   : > { %7899 = vset.pattern.permute.xlu1 %v14789_v13  ;;  %7897 = vset.pattern.permute.xlu0 %v14778_v9  ;;  %v7780_v33 = vpop.f32.mrf.mxu0 }
 0x1a9   : > { %1566 = vperm.xlu1 %7899, %v9253_v15   ;;  %1175 = vperm.xlu0 %7897, %v9253_v15   ;;  %v9326_v39 = vadd.f32 %v7780_v33, %v9241_v35  ;;  %14966 = vst [vmem:[#allocation33_spill] sm:$0xff] %v9458_v30  ;;  %v9461_v33 = vsub.s32 0, %v9450_v18 }
 0x1aa   : > { %v1043_v42 = vpop.f32.mrf.mxu0 }
 0x1ab   : > { %v9345_v43 = vadd.f32 %v9241_v35, %v1043_v42  ;;  %14967 = vst [vmem:[#allocation34_spill] sm:$0xff] %v9461_v33  ;;  %v1172_v42 = vld [vmem:[%s14769_s5] sm:$0xf] }
 0x1ac   : > { %v7783_v45 = vpop.f32.mrf.mxu0  ;;  %v9475_v14 = vrot.slane %v1172_v42, %v9461_v33 }
 0x1ad   : > { %7901 = vset.pattern.permute.xlu1 %v14778_v9  ;;  %7898 = vset.pattern.permute.xlu0 %v14782_v8  ;;  %14938 = vst [vmem:[#allocation5_spill] sm:$0xff] %v9345_v43  ;;  %v9364_v48 = vadd.f32 %v7783_v45, %v9241_v35  ;;  %v9469_v45 = vsub.s32 2, %v9450_v18 }
 0x1ae   : > { %1190 = vperm.xlu1 %7901, %v9260_v17   ;;  %1370 = vperm.xlu0 %7898, %v9253_v15   ;;  %v1053_v51 = vpop.f32.mrf.mxu0 }
 0x1af   : > { %14943 = vst [vmem:[#allocation10_spill] sm:$0xff] %v9364_v48  ;;  %v9383_v54 = vadd.f32 %v9241_v35, %v1053_v51  ;;  %14968 = vst [vmem:[#allocation35_spill] sm:$0xff] %v9469_v45 }
 0x1b0   : > { %v7786_v57 = vpop.f32.mrf.mxu0 }
 0x1b1   : > { %14948 = vst [vmem:[#allocation15_spill] sm:$0xff] %v9383_v54  ;;  %v9398_v58 = vadd.f32 %v7786_v57, %v9241_v35 }
 0x1b2   : > { %7903 = vset.pattern.permute.xlu1 %v14789_v13  ;;  %7900 = vset.pattern.permute.xlu0 %v14780_v12  ;;  %v1063_v63 = vpop.f32.mrf.mxu0 }
 0x1b3   : > { %1578 = vperm.xlu1 %7903, %v9260_v17   ;;  %1762 = vperm.xlu0 %7900, %v9253_v15   ;;  %14951 = vst [vmem:[#allocation18_spill] sm:$0xff] %v9398_v58  ;;  %v9417_v0 = vadd.f32 %v9241_v35, %v1063_v63 }
 0x1b4   : > { %v7789_v3 = vpop.f32.mrf.mxu0 }
 0x1b5   : > { %14956 = vst [vmem:[#allocation23_spill] sm:$0xff] %v9417_v0  ;;  %v9432_v4 = vadd.f32 %v7789_v3, %v9241_v35  ;;  %v9472_v3 = vrot.slane %v1172_v42, %v9458_v30 }
 0x1b6   : > { %v1073_v16 = vpop.f32.mrf.mxu0 }
 0x1b7   : > { %7905 = vset.pattern.permute.xlu1 %v14778_v9  ;;  %7902 = vset.pattern.permute.xlu0 %v14782_v8  ;;  %14959 = vst [vmem:[#allocation26_spill] sm:$0xff] %v9432_v4  ;;  %v9453_v19 = vadd.f32 %v9241_v35, %v1073_v16  ;;  %v9482_v16 = vrot.slane %v1172_v42, %v9469_v45 }
 0x1b8   : > { %1185 = vperm.xlu1 %7905, %v9277_v21   ;;  %1382 = vperm.xlu0 %7902, %v9260_v17   ;;  %v7792_v51 = vpop.f32.mrf.mxu1 }
 0x1b9   : > { %14965 = vst [vmem:[#allocation32_spill] sm:$0xff] %v9453_v19 }
 0x1bc   : > { %7906 = vset.pattern.permute.xlu1 %v14782_v8  ;;  %7904 = vset.pattern.permute.xlu0 %v14780_v12 }
 0x1bd   : > { %1378 = vperm.xlu1 %7906, %v9277_v21   ;;  %1774 = vperm.xlu0 %7904, %v9260_v17  }
 0x1c1   : > { %7907 = vset.pattern.permute.xlu1 %v14789_v13  ;;  %7910 = vset.pattern.permute.xlu0 %v14782_v8 }
 0x1c2   : > { %1574 = vperm.xlu1 %7907, %v9277_v21   ;;  %1390 = vperm.xlu0 %7910, %v9292_v25  }
 0x1c6   : > { %7908 = vset.pattern.permute.xlu1 %v14780_v12  ;;  %7912 = vset.pattern.permute.xlu0 %v14780_v12 }
 0x1c7   : > { %1770 = vperm.xlu1 %7908, %v9277_v21   ;;  %1782 = vperm.xlu0 %7912, %v9292_v25  }
 0x1cb   : > { %7909 = vset.pattern.permute.xlu1 %v14778_v9  ;;  %7913 = vset.pattern.permute.xlu0 %v14778_v9 }
 0x1cc   : > { %1200 = vperm.xlu1 %7909, %v9292_v25   ;;  %1195 = vperm.xlu0 %7913, %v9311_v31  }
 0x1d0   : > { %7911 = vset.pattern.permute.xlu1 %v14789_v13  ;;  %7915 = vset.pattern.permute.xlu0 %v14789_v13 }
 0x1d1   : > { %1586 = vperm.xlu1 %7911, %v9292_v25   ;;  %1582 = vperm.xlu0 %7915, %v9311_v31  }
 0x1d5   : > { %7914 = vset.pattern.permute.xlu1 %v14782_v8  ;;  %7918 = vset.pattern.permute.xlu0 %v14782_v8 }
 0x1d6   : > { %1386 = vperm.xlu1 %7914, %v9311_v31   ;;  %1398 = vperm.xlu0 %7918, %v9326_v39  }
 0x1da   : > { %7916 = vset.pattern.permute.xlu1 %v14780_v12  ;;  %7920 = vset.pattern.permute.xlu0 %v14780_v12 }
 0x1db   : > { %1778 = vperm.xlu1 %7916, %v9311_v31   ;;  %1790 = vperm.xlu0 %7920, %v9326_v39  }
 0x1df   : > { %7917 = vset.pattern.permute.xlu1 %v14778_v9  ;;  %7921 = vset.pattern.permute.xlu0 %v14778_v9 }
 0x1e0   : > { %1210 = vperm.xlu1 %7917, %v9326_v39   ;;  %1205 = vperm.xlu0 %7921, %v9345_v43  }
 0x1e4   : > { %7919 = vset.pattern.permute.xlu1 %v14789_v13  ;;  %7923 = vset.pattern.permute.xlu0 %v14789_v13 }
 0x1e5   : > { %1594 = vperm.xlu1 %7919, %v9326_v39   ;;  %1590 = vperm.xlu0 %7923, %v9345_v43  }
 0x1e9   : > { %7922 = vset.pattern.permute.xlu1 %v14782_v8  ;;  %7926 = vset.pattern.permute.xlu0 %v14782_v8 }
 0x1ea   : > { %1394 = vperm.xlu1 %7922, %v9345_v43   ;;  %1406 = vperm.xlu0 %7926, %v9364_v48  }
 0x1ee   : > { %7924 = vset.pattern.permute.xlu1 %v14780_v12  ;;  %7928 = vset.pattern.permute.xlu0 %v14780_v12 }
 0x1ef   : > { %1786 = vperm.xlu1 %7924, %v9345_v43   ;;  %1798 = vperm.xlu0 %7928, %v9364_v48  }
 0x1f3   : > { %7925 = vset.pattern.permute.xlu1 %v14778_v9  ;;  %7929 = vset.pattern.permute.xlu0 %v14778_v9 }
 0x1f4   : > { %1220 = vperm.xlu1 %7925, %v9364_v48   ;;  %1215 = vperm.xlu0 %7929, %v9383_v54  }
 0x1f8   : > { %7927 = vset.pattern.permute.xlu1 %v14789_v13  ;;  %7931 = vset.pattern.permute.xlu0 %v14789_v13 }
 0x1f9   : > { %1602 = vperm.xlu1 %7927, %v9364_v48   ;;  %1598 = vperm.xlu0 %7931, %v9383_v54  }
 0x1fd   : > { %7930 = vset.pattern.permute.xlu1 %v14782_v8  ;;  %7934 = vset.pattern.permute.xlu0 %v14782_v8 }
 0x1fe   : > { %1402 = vperm.xlu1 %7930, %v9383_v54   ;;  %1414 = vperm.xlu0 %7934, %v9398_v58  }
 0x202   : > { %7932 = vset.pattern.permute.xlu1 %v14780_v12  ;;  %7936 = vset.pattern.permute.xlu0 %v14780_v12 }
 0x203   : > { %1794 = vperm.xlu1 %7932, %v9383_v54   ;;  %1806 = vperm.xlu0 %7936, %v9398_v58  }
 0x207   : > { %7933 = vset.pattern.permute.xlu1 %v14778_v9  ;;  %7937 = vset.pattern.permute.xlu0 %v14778_v9 }
 0x208   : > { %1230 = vperm.xlu1 %7933, %v9398_v58   ;;  %1225 = vperm.xlu0 %7937, %v9417_v0  }
 0x20c   : > { %7935 = vset.pattern.permute.xlu1 %v14789_v13  ;;  %7939 = vset.pattern.permute.xlu0 %v14789_v13 }
 0x20d   : > { %1610 = vperm.xlu1 %7935, %v9398_v58   ;;  %1606 = vperm.xlu0 %7939, %v9417_v0  }
 0x211   : > { %7938 = vset.pattern.permute.xlu1 %v14782_v8  ;;  %7942 = vset.pattern.permute.xlu0 %v14782_v8 }
 0x212   : > { %1410 = vperm.xlu1 %7938, %v9417_v0   ;;  %1422 = vperm.xlu0 %7942, %v9432_v4  }
 0x216   : > { %7940 = vset.pattern.permute.xlu1 %v14780_v12  ;;  %7944 = vset.pattern.permute.xlu0 %v14780_v12 }
 0x217   : > { %1802 = vperm.xlu1 %7940, %v9417_v0   ;;  %1814 = vperm.xlu0 %7944, %v9432_v4  }
 0x21a   : > { %v1375_v20 = vpop.permute.xlu1 %1374  ;;  %v1181_v24 = vpop.permute.xlu0 %1180 }
 0x21b   : > { %7941 = vset.pattern.permute.xlu1 %v14778_v9  ;;  %7945 = vset.pattern.permute.xlu0 %v14778_v9  ;;  %v9485_v9 = vadd.f32 %v7792_v51, %v9241_v35  ;;  %v1502_v12 = vmul.f32 %v9472_v3, %v1375_v20  ;;  %v1338_v8 = vmul.f32 %v9475_v14, %v1181_v24 }
 0x21c   : > { %1240 = vperm.xlu1 %7941, %v9432_v4   ;;  %1235 = vperm.xlu0 %7945, %v9453_v19   ;;  %v9498_v20 = vrot.slane %v1172_v42, %v9490_v7 }
 0x21d   : > { %14969 = vst [vmem:[#allocation36_spill] sm:$0xff] %v9485_v9  ;;  %v1534_v51 = vadd.f32 %v1502_v12, %v1338_v8 }
 0x21f   : > { %v1767_v57 = vpop.permute.xlu1 %1766  ;;  %v1571_v63 = vpop.permute.xlu0 %1570 }
 0x220   : > { %7943 = vset.pattern.permute.xlu1 %v14789_v13  ;;  %7947 = vset.pattern.permute.xlu0 %v14789_v13  ;;  %v14971_v13 = vmov 1   ;;  %v1698_v10 = vmul.f32 %v9482_v16, %v1571_v63  ;;  %v1083_v63 = vpop.f32.mrf.mxu1  ;;  %v1894_v8 = vmul.f32 %v9498_v20, %v1767_v57 }
 0x221   : > { %1618 = vperm.xlu1 %7943, %v9432_v4   ;;  %1614 = vperm.xlu0 %7947, %v9453_v19  }
 0x222   : > { %v1730_v18 = vadd.f32 %v1698_v10, %v1534_v51  ;;  %v9509_v10 = vadd.f32 %v9241_v35, %v1083_v63 }
 0x224   : > { %v1567_v33 = vpop.permute.xlu1 %1566  ;;  %v1176_v30 = vpop.permute.xlu0 %1175  ;;  %v1926_v7 = vadd.f32 %v1894_v8, %v1730_v18  ;;  %14973 = vst [vmem:[#allocation38_spill] sm:$0xff] %v9509_v10  ;;  %v14975_v8 = vmov 2  }
 0x225   : > { %7946 = vset.pattern.permute.xlu1 %v14971_v13  ;;  %7950 = vset.pattern.permute.xlu0 %v14971_v13  ;;  %v1337_v5 = vmul.f32 %v9475_v14, %v1176_v30  ;;  %v1697_v12 = vmul.f32 %v9482_v16, %v1567_v33  ;;  %v7795_v18 = vpop.f32.mrf.mxu1 }
 0x226   : > { %1418 = vperm.xlu1 %7946, %v9453_v19   ;;  %1430 = vperm.xlu0 %7950, %v9485_v9  }
 0x229   : > { %v1191_v24 = vpop.permute.xlu1 %1190  ;;  %v1371_v45 = vpop.permute.xlu0 %1370 }
 0x22a   : > { %v1501_v6 = vmul.f32 %v9472_v3, %v1371_v45  ;;  %7948 = vset.pattern.permute.xlu1 %v14972_v1  ;;  %7952 = vset.pattern.permute.xlu0 %v14972_v1 }
 0x22b   : > { %1810 = vperm.xlu1 %7948, %v9453_v19   ;;  %1822 = vperm.xlu0 %7952, %v9485_v9  }
 0x22c   : > { %v1533_v42 = vadd.f32 %v1501_v6, %v1337_v5  ;;  %v1965_v6 = vadd.f32 %v9514_v2, %v1926_v7  ;;  %v1340_v7 = vmul.f32 %v9475_v14, %v1191_v24 }
 0x22e   : > { %v1579_v30 = vpop.permute.xlu1 %1578  ;;  %v1729_v45 = vadd.f32 %v1697_v12, %v1533_v42  ;;  %v1763_v51 = vpop.permute.xlu0 %1762  ;;  %v1997_v42 = vmax.f32 %v1965_v6, 0.0 }
 0x22f   : > { %v1893_v61 = vmul.f32 %v9498_v20, %v1763_v51  ;;  %7949 = vset.pattern.permute.xlu1 %v14974_v62  ;;  %7953 = vset.pattern.permute.xlu0 %v14974_v62  ;;  %v1700_v6 = vmul.f32 %v9482_v16, %v1579_v30 }
 0x230   : > { %1250 = vperm.xlu1 %7949, %v9485_v9   ;;  %1245 = vperm.xlu0 %7953, %v9509_v10  }
 0x231   : > { %v1925_v5 = vadd.f32 %v1893_v61, %v1729_v45  ;;  %v9529_v61 = vadd.f32 %v7795_v18, %v9241_v35 }
 0x233   : > { %v1964_v33 = vadd.f32 %v9514_v2, %v1925_v5  ;;  %v1186_v57 = vpop.permute.xlu1 %1185  ;;  %v1383_v63 = vpop.permute.xlu0 %1382  ;;  %14976 = vst [vmem:[#allocation39_spill] sm:$0xff] %v9529_v61 }
 0x234   : > { %7951 = vset.pattern.permute.xlu1 %v14975_v8  ;;  %7955 = vset.pattern.permute.xlu0 %v14975_v8  ;;  %v1504_v51 = vmul.f32 %v9472_v3, %v1383_v63 }
 0x235   : > { %v1996_v12 = vmax.f32 %v1964_v33, 0.0  ;;  %1626 = vperm.xlu1 %7951, %v9485_v9   ;;  %1622 = vperm.xlu0 %7955, %v9509_v10  }
 0x236   : > { %v1536_v33 = vadd.f32 %v1504_v51, %v1340_v7  ;;  %v1093_v51 = vpop.f32.mrf.mxu1 }
 0x237   : > { %7821 = vmatprep.mubr.msk.f32.mxu1 %vm850_vm1, %v1996_v12  ;;  %v9548_v60 = vadd.f32 %v9241_v35, %v1093_v51 }
 0x238   : > { %v1379_v45 = vpop.permute.xlu1 %1378  ;;  %7822 = vmatmul.mubr.msk.f32.vlgmr.msra.gmra.mxu1 %vm850_vm1, %v1997_v42  ;;  %v1775_v5 = vpop.permute.xlu0 %1774  ;;  %v1732_v24 = vadd.f32 %v1700_v6, %v1536_v33  ;;  %v1339_v42 = vmul.f32 %v9475_v14, %v1186_v57 }
 0x239   : > { %7954 = vset.pattern.permute.xlu1 %v14971_v13  ;;  %7958 = vset.pattern.permute.xlu0 %v14971_v13  ;;  %v1503_v18 = vmul.f32 %v9472_v3, %v1379_v45  ;;  %v1896_v59 = vmul.f32 %v9498_v20, %v1775_v5  ;;  %14977 = vst [vmem:[#allocation40_spill] sm:$0xff] %v9548_v60 }
 0x23a   : > { %1426 = vperm.xlu1 %7954, %v9509_v10   ;;  %1438 = vperm.xlu0 %7958, %v9529_v61  }
 0x23b   : > { %v1535_v30 = vadd.f32 %v1503_v18, %v1339_v42  ;;  %v1928_v45 = vadd.f32 %v1896_v59, %v1732_v24 }
 0x23d   : > { %v1575_v63 = vpop.permute.xlu1 %1574  ;;  %v1391_v12 = vpop.permute.xlu0 %1390  ;;  %v1967_v18 = vadd.f32 %v9514_v2, %v1928_v45 }
 0x23e   : > { %7956 = vset.pattern.permute.xlu1 %v14972_v1  ;;  %7960 = vset.pattern.permute.xlu0 %v14972_v1  ;;  %v1699_v7 = vmul.f32 %v9482_v16, %v1575_v63 }
 0x23f   : > { %1818 = vperm.xlu1 %7956, %v9509_v10   ;;  %1830 = vperm.xlu0 %7960, %v9529_v61   ;;  %v1999_v51 = vmax.f32 %v1967_v18, 0.0 }
 0x240   : > { %v1731_v6 = vadd.f32 %v1699_v7, %v1535_v30  ;;  %v7798_v7 = vpop.f32.mrf.mxu1 }
 0x242   : > { %v1771_v33 = vpop.permute.xlu1 %1770  ;;  %v1783_v5 = vpop.permute.xlu0 %1782 }
 0x243   : > { %v1895_v55 = vmul.f32 %v9498_v20, %v1771_v33  ;;  %7957 = vset.pattern.permute.xlu1 %v14974_v62  ;;  %7961 = vset.pattern.permute.xlu0 %v14974_v62  ;;  %v1103_v56 = vpop.f32.mrf.mxu1 }
 0x244   : > { %1260 = vperm.xlu1 %7957, %v9529_v61   ;;  %1255 = vperm.xlu0 %7961, %v9548_v60  }
 0x245   : > { %v1927_v57 = vadd.f32 %v1895_v55, %v1731_v6  ;;  %v9563_v55 = vadd.f32 %v7798_v7, %v9241_v35  ;;  %v1506_v6 = vmul.f32 %v9472_v3, %v1391_v12  ;;  %v1898_v12 = vmul.f32 %v9498_v20, %v1783_v5 }
 0x247   : > { %v1966_v59 = vadd.f32 %v9514_v2, %v1927_v57  ;;  %v1201_v63 = vpop.permute.xlu1 %1200  ;;  %v1196_v24 = vpop.permute.xlu0 %1195  ;;  %14978 = vst [vmem:[#allocation41_spill] sm:$0xff] %v9563_v55 }
 0x248   : > { %7959 = vset.pattern.permute.xlu1 %v14975_v8  ;;  %7963 = vset.pattern.permute.xlu0 %v14975_v8  ;;  %v1342_v30 = vmul.f32 %v9475_v14, %v1201_v63  ;;  %v1341_v63 = vmul.f32 %v9475_v14, %v1196_v24 }
 0x249   : > { %v1998_v42 = vmax.f32 %v1966_v59, 0.0  ;;  %1634 = vperm.xlu1 %7959, %v9529_v61   ;;  %1630 = vperm.xlu0 %7963, %v9548_v60  }
 0x24a   : > { %v1538_v18 = vadd.f32 %v1506_v6, %v1342_v30  ;;  %v9582_v6 = vadd.f32 %v9241_v35, %v1103_v56 }
 0x24b   : > { %7824 = vmatprep.mubr.msk.f32.mxu1 %vm850_vm1, %v1998_v42 }
 0x24c   : > { %v1587_v45 = vpop.permute.xlu1 %1586  ;;  %7825 = vmatmul.mubr.msk.f32.gmra.mxu1 %vm850_vm1, %v1999_v51  ;;  %v1583_v33 = vpop.permute.xlu0 %1582  ;;  %14979 = vst [vmem:[#allocation42_spill] sm:$0xff] %v9582_v6 }
 0x24d   : > { %7962 = vset.pattern.permute.xlu1 %v14971_v13  ;;  %7966 = vset.pattern.permute.xlu0 %v14971_v13  ;;  %v1702_v57 = vmul.f32 %v9482_v16, %v1587_v45  ;;  %v1701_v30 = vmul.f32 %v9482_v16, %v1583_v33 }
 0x24e   : > { %1434 = vperm.xlu1 %7962, %v9548_v60   ;;  %1446 = vperm.xlu0 %7966, %v9563_v55  }
 0x24f   : > { %v1734_v7 = vadd.f32 %v1702_v57, %v1538_v18 }
 0x251   : > { %v1387_v59 = vpop.permute.xlu1 %1386  ;;  %v1399_v42 = vpop.permute.xlu0 %1398  ;;  %v1930_v24 = vadd.f32 %v1898_v12, %v1734_v7 }
 0x252   : > { %v1505_v51 = vmul.f32 %v9472_v3, %v1387_v59  ;;  %7964 = vset.pattern.permute.xlu1 %v14972_v1  ;;  %7968 = vset.pattern.permute.xlu0 %v14972_v1 }
 0x253   : > { %1826 = vperm.xlu1 %7964, %v9548_v60   ;;  %1838 = vperm.xlu0 %7968, %v9563_v55   ;;  %v1969_v33 = vadd.f32 %v9514_v2, %v1930_v24 }
 0x254   : > { %v1537_v45 = vadd.f32 %v1505_v51, %v1341_v63 }
 0x255   : > { %v2001_v12 = vmax.f32 %v1969_v33, 0.0 }
 0x256   : > { %v1779_v57 = vpop.permute.xlu1 %1778  ;;  %v1733_v18 = vadd.f32 %v1701_v30, %v1537_v45  ;;  %v1791_v59 = vpop.permute.xlu0 %1790 }
 0x257   : > { %v1897_v52 = vmul.f32 %v9498_v20, %v1779_v57  ;;  %7965 = vset.pattern.permute.xlu1 %v14974_v62  ;;  %7969 = vset.pattern.permute.xlu0 %v14974_v62  ;;  %v7801_v30 = vpop.f32.mrf.mxu1 }
 0x258   : > { %1270 = vperm.xlu1 %7965, %v9563_v55   ;;  %1265 = vperm.xlu0 %7969, %v9582_v6  }
 0x259   : > { %v1929_v5 = vadd.f32 %v1897_v52, %v1733_v18  ;;  %v9597_v52 = vadd.f32 %v7801_v30, %v9241_v35  ;;  %v1508_v18 = vmul.f32 %v9472_v3, %v1399_v42  ;;  %v1900_v42 = vmul.f32 %v9498_v20, %v1791_v59 }
 0x25b   : > { %v1968_v56 = vadd.f32 %v9514_v2, %v1929_v5  ;;  %v1211_v63 = vpop.permute.xlu1 %1210  ;;  %v1206_v7 = vpop.permute.xlu0 %1205  ;;  %14980 = vst [vmem:[#allocation43_spill] sm:$0xff] %v9597_v52 }
 0x25c   : > { %7967 = vset.pattern.permute.xlu1 %v14975_v8  ;;  %7971 = vset.pattern.permute.xlu0 %v14975_v8  ;;  %v1344_v45 = vmul.f32 %v9475_v14, %v1211_v63  ;;  %v1343_v63 = vmul.f32 %v9475_v14, %v1206_v7 }
 0x25d   : > { %v2000_v51 = vmax.f32 %v1968_v56, 0.0  ;;  %1642 = vperm.xlu1 %7967, %v9563_v55   ;;  %1638 = vperm.xlu0 %7971, %v9582_v6   ;;  %v1113_v55 = vpop.f32.mrf.mxu1 }
 0x25e   : > { %v1540_v33 = vadd.f32 %v1508_v18, %v1344_v45  ;;  %v9616_v18 = vadd.f32 %v9241_v35, %v1113_v55 }
 0x25f   : > { %7827 = vmatprep.mubr.msk.f32.mxu1 %vm850_vm1, %v2000_v51 }
 0x260   : > { %v1595_v24 = vpop.permute.xlu1 %1594  ;;  %7828 = vmatmul.mubr.msk.f32.gmra.mxu1 %vm850_vm1, %v2001_v12  ;;  %v1591_v57 = vpop.permute.xlu0 %1590  ;;  %14981 = vst [vmem:[#allocation44_spill] sm:$0xff] %v9616_v18 }
 0x261   : > { %7970 = vset.pattern.permute.xlu1 %v14971_v13  ;;  %7974 = vset.pattern.permute.xlu0 %v14971_v13  ;;  %v1704_v5 = vmul.f32 %v9482_v16, %v1595_v24  ;;  %v1703_v45 = vmul.f32 %v9482_v16, %v1591_v57 }
 0x262   : > { %1442 = vperm.xlu1 %7970, %v9582_v6   ;;  %1454 = vperm.xlu0 %7974, %v9597_v52  }
 0x263   : > { %v1736_v30 = vadd.f32 %v1704_v5, %v1540_v33 }
 0x265   : > { %v1395_v56 = vpop.permute.xlu1 %1394  ;;  %v1407_v51 = vpop.permute.xlu0 %1406  ;;  %v1932_v7 = vadd.f32 %v1900_v42, %v1736_v30 }
 0x266   : > { %v1507_v12 = vmul.f32 %v9472_v3, %v1395_v56  ;;  %7972 = vset.pattern.permute.xlu1 %v14972_v1  ;;  %7976 = vset.pattern.permute.xlu0 %v14972_v1 }
 0x267   : > { %1834 = vperm.xlu1 %7972, %v9582_v6   ;;  %1846 = vperm.xlu0 %7976, %v9597_v52   ;;  %v1971_v57 = vadd.f32 %v9514_v2, %v1932_v7 }
 0x268   : > { %v1539_v24 = vadd.f32 %v1507_v12, %v1343_v63 }
 0x269   : > { %v2003_v42 = vmax.f32 %v1971_v57, 0.0 }
 0x26a   : > { %v1787_v5 = vpop.permute.xlu1 %1786  ;;  %v1735_v33 = vadd.f32 %v1703_v45, %v1539_v24  ;;  %v1799_v56 = vpop.permute.xlu0 %1798 }
 0x26b   : > { %v1899_v60 = vmul.f32 %v9498_v20, %v1787_v5  ;;  %7973 = vset.pattern.permute.xlu1 %v14974_v62  ;;  %7977 = vset.pattern.permute.xlu0 %v14974_v62  ;;  %v7804_v45 = vpop.f32.mrf.mxu1 }
 0x26c   : > { %1280 = vperm.xlu1 %7973, %v9597_v52   ;;  %1275 = vperm.xlu0 %7977, %v9616_v18  }
 0x26d   : > { %v1931_v59 = vadd.f32 %v1899_v60, %v1735_v33  ;;  %v9631_v60 = vadd.f32 %v7804_v45, %v9241_v35  ;;  %v1510_v33 = vmul.f32 %v9472_v3, %v1407_v51  ;;  %v1902_v51 = vmul.f32 %v9498_v20, %v1799_v56 }
 0x26f   : > { %v1970_v55 = vadd.f32 %v9514_v2, %v1931_v59  ;;  %v1221_v63 = vpop.permute.xlu1 %1220  ;;  %v1216_v30 = vpop.permute.xlu0 %1215  ;;  %14982 = vst [vmem:[#allocation45_spill] sm:$0xff] %v9631_v60 }
 0x270   : > { %7975 = vset.pattern.permute.xlu1 %v14975_v8  ;;  %7979 = vset.pattern.permute.xlu0 %v14975_v8  ;;  %v1346_v24 = vmul.f32 %v9475_v14, %v1221_v63  ;;  %v1345_v63 = vmul.f32 %v9475_v14, %v1216_v30 }
 0x271   : > { %v2002_v12 = vmax.f32 %v1970_v55, 0.0  ;;  %1650 = vperm.xlu1 %7975, %v9597_v52   ;;  %1646 = vperm.xlu0 %7979, %v9616_v18   ;;  %v1123_v52 = vpop.f32.mrf.mxu1 }
 0x272   : > { %v1542_v57 = vadd.f32 %v1510_v33, %v1346_v24  ;;  %v9650_v33 = vadd.f32 %v9241_v35, %v1123_v52 }
 0x273   : > { %7830 = vmatprep.mubr.msk.f32.mxu1 %vm850_vm1, %v2002_v12 }
 0x274   : > { %v1603_v7 = vpop.permute.xlu1 %1602  ;;  %7831 = vmatmul.mubr.msk.f32.gmra.mxu1 %vm850_vm1, %v2003_v42  ;;  %v1599_v5 = vpop.permute.xlu0 %1598  ;;  %14983 = vst [vmem:[#allocation46_spill] sm:$0xff] %v9650_v33 }
 0x275   : > { %7978 = vset.pattern.permute.xlu1 %v14971_v13  ;;  %7982 = vset.pattern.permute.xlu0 %v14971_v13  ;;  %v1706_v59 = vmul.f32 %v9482_v16, %v1603_v7  ;;  %v1705_v24 = vmul.f32 %v9482_v16, %v1599_v5 }
 0x276   : > { %1450 = vperm.xlu1 %7978, %v9616_v18   ;;  %1462 = vperm.xlu0 %7982, %v9631_v60  }
 0x277   : > { %v1738_v45 = vadd.f32 %v1706_v59, %v1542_v57 }
 0x279   : > { %v1403_v55 = vpop.permute.xlu1 %1402  ;;  %v1415_v12 = vpop.permute.xlu0 %1414  ;;  %v1934_v30 = vadd.f32 %v1902_v51, %v1738_v45 }
 0x27a   : > { %v1509_v42 = vmul.f32 %v9472_v3, %v1403_v55  ;;  %7980 = vset.pattern.permute.xlu1 %v14972_v1  ;;  %7984 = vset.pattern.permute.xlu0 %v14972_v1 }
 0x27b   : > { %1842 = vperm.xlu1 %7980, %v9616_v18   ;;  %1854 = vperm.xlu0 %7984, %v9631_v60   ;;  %v1973_v5 = vadd.f32 %v9514_v2, %v1934_v30 }
 0x27c   : > { %v1541_v7 = vadd.f32 %v1509_v42, %v1345_v63 }
 0x27d   : > { %v2005_v51 = vmax.f32 %v1973_v5, 0.0 }
 0x27e   : > { %v1795_v59 = vpop.permute.xlu1 %1794  ;;  %v1737_v57 = vadd.f32 %v1705_v24, %v1541_v7  ;;  %v1807_v55 = vpop.permute.xlu0 %1806 }
 0x27f   : > { %v1901_v6 = vmul.f32 %v9498_v20, %v1795_v59  ;;  %7981 = vset.pattern.permute.xlu1 %v14974_v62  ;;  %7985 = vset.pattern.permute.xlu0 %v14974_v62  ;;  %v7807_v24 = vpop.f32.mrf.mxu1 }
 0x280   : > { %1290 = vperm.xlu1 %7981, %v9631_v60   ;;  %1285 = vperm.xlu0 %7985, %v9650_v33  }
 0x281   : > { %v1933_v56 = vadd.f32 %v1901_v6, %v1737_v57  ;;  %v9665_v6 = vadd.f32 %v7807_v24, %v9241_v35  ;;  %v1512_v57 = vmul.f32 %v9472_v3, %v1415_v12  ;;  %v1904_v12 = vmul.f32 %v9498_v20, %v1807_v55 }
 0x283   : > { %v1972_v52 = vadd.f32 %v9514_v2, %v1933_v56  ;;  %v1231_v63 = vpop.permute.xlu1 %1230  ;;  %v1226_v45 = vpop.permute.xlu0 %1225  ;;  %14984 = vst [vmem:[#allocation47_spill] sm:$0xff] %v9665_v6 }
 0x284   : > { %7983 = vset.pattern.permute.xlu1 %v14975_v8  ;;  %7987 = vset.pattern.permute.xlu0 %v14975_v8  ;;  %v1348_v7 = vmul.f32 %v9475_v14, %v1231_v63  ;;  %v1347_v63 = vmul.f32 %v9475_v14, %v1226_v45 }
 0x285   : > { %v2004_v42 = vmax.f32 %v1972_v52, 0.0  ;;  %1658 = vperm.xlu1 %7983, %v9631_v60   ;;  %1654 = vperm.xlu0 %7987, %v9650_v33   ;;  %v1133_v60 = vpop.f32.mrf.mxu1 }
 0x286   : > { %v1544_v5 = vadd.f32 %v1512_v57, %v1348_v7  ;;  %v9684_v57 = vadd.f32 %v9241_v35, %v1133_v60 }
 0x287   : > { %7833 = vmatprep.mubr.msk.f32.mxu1 %vm850_vm1, %v2004_v42 }
 0x288   : > { %v1611_v30 = vpop.permute.xlu1 %1610  ;;  %7834 = vmatmul.mubr.msk.f32.gmra.mxu1 %vm850_vm1, %v2005_v51  ;;  %v1607_v59 = vpop.permute.xlu0 %1606  ;;  %14985 = vst [vmem:[#allocation48_spill] sm:$0xff] %v9684_v57 }
 0x289   : > { %7986 = vset.pattern.permute.xlu1 %v14971_v13  ;;  %7990 = vset.pattern.permute.xlu0 %v14971_v13  ;;  %v1708_v56 = vmul.f32 %v9482_v16, %v1611_v30  ;;  %v1707_v7 = vmul.f32 %v9482_v16, %v1607_v59 }
 0x28a   : > { %1458 = vperm.xlu1 %7986, %v9650_v33   ;;  %1470 = vperm.xlu0 %7990, %v9665_v6  }
 0x28b   : > { %v1740_v24 = vadd.f32 %v1708_v56, %v1544_v5 }
 0x28d   : > { %v1411_v52 = vpop.permute.xlu1 %1410  ;;  %v1423_v42 = vpop.permute.xlu0 %1422  ;;  %v1936_v45 = vadd.f32 %v1904_v12, %v1740_v24 }
 0x28e   : > { %v1511_v51 = vmul.f32 %v9472_v3, %v1411_v52  ;;  %7988 = vset.pattern.permute.xlu1 %v14972_v1  ;;  %7992 = vset.pattern.permute.xlu0 %v14972_v1 }
 0x28f   : > { %1850 = vperm.xlu1 %7988, %v9650_v33   ;;  %1862 = vperm.xlu0 %7992, %v9665_v6   ;;  %v1975_v59 = vadd.f32 %v9514_v2, %v1936_v45 }
 0x290   : > { %v1543_v30 = vadd.f32 %v1511_v51, %v1347_v63 }
 0x291   : > { %v2007_v12 = vmax.f32 %v1975_v59, 0.0 }
 0x292   : > { %v1803_v56 = vpop.permute.xlu1 %1802  ;;  %v1739_v5 = vadd.f32 %v1707_v7, %v1543_v30  ;;  %v1815_v52 = vpop.permute.xlu0 %1814 }
 0x293   : > { %v1903_v18 = vmul.f32 %v9498_v20, %v1803_v56  ;;  %7989 = vset.pattern.permute.xlu1 %v14974_v62  ;;  %7993 = vset.pattern.permute.xlu0 %v14974_v62  ;;  %v7810_v7 = vpop.f32.mrf.mxu1 }
 0x294   : > { %1300 = vperm.xlu1 %7989, %v9665_v6   ;;  %1295 = vperm.xlu0 %7993, %v9684_v57  }
 0x295   : > { %v1935_v55 = vadd.f32 %v1903_v18, %v1739_v5  ;;  %v9699_v18 = vadd.f32 %v7810_v7, %v9241_v35  ;;  %v1514_v5 = vmul.f32 %v9472_v3, %v1423_v42  ;;  %v1906_v42 = vmul.f32 %v9498_v20, %v1815_v52 }
 0x297   : > { %v1974_v60 = vadd.f32 %v9514_v2, %v1935_v55  ;;  %v1241_v63 = vpop.permute.xlu1 %1240  ;;  %v1236_v24 = vpop.permute.xlu0 %1235  ;;  %14986 = vst [vmem:[#allocation49_spill] sm:$0xff] %v9699_v18 }
 0x298   : > { %7991 = vset.pattern.permute.xlu1 %v14975_v8  ;;  %7995 = vset.pattern.permute.xlu0 %v14975_v8  ;;  %v1350_v30 = vmul.f32 %v9475_v14, %v1241_v63  ;;  %v1349_v63 = vmul.f32 %v9475_v14, %v1236_v24 }
 0x299   : > { %v2006_v51 = vmax.f32 %v1974_v60, 0.0  ;;  %1666 = vperm.xlu1 %7991, %v9665_v6   ;;  %1662 = vperm.xlu0 %7995, %v9684_v57   ;;  %v1143_v6 = vpop.f32.mrf.mxu1 }
 0x29a   : > { %v1546_v59 = vadd.f32 %v1514_v5, %v1350_v30  ;;  %v9718_v5 = vadd.f32 %v9241_v35, %v1143_v6 }
 0x29b   : > { %7836 = vmatprep.mubr.msk.f32.mxu1 %vm850_vm1, %v2006_v51 }
 0x29c   : > { %v1619_v45 = vpop.permute.xlu1 %1618  ;;  %7837 = vmatmul.mubr.msk.f32.gmra.mxu1 %vm850_vm1, %v2007_v12  ;;  %v1615_v56 = vpop.permute.xlu0 %1614  ;;  %14987 = vst [vmem:[#allocation50_spill] sm:$0xff] %v9718_v5 }
 0x29d   : > { %7994 = vset.pattern.permute.xlu1 %v14971_v13  ;;  %7998 = vset.pattern.permute.xlu0 %v14971_v13  ;;  %v1710_v55 = vmul.f32 %v9482_v16, %v1619_v45  ;;  %v1709_v30 = vmul.f32 %v9482_v16, %v1615_v56 }
 0x29e   : > { %1466 = vperm.xlu1 %7994, %v9684_v57   ;;  %1478 = vperm.xlu0 %7998, %v9699_v18  }
 0x29f   : > { %v1742_v7 = vadd.f32 %v1710_v55, %v1546_v59 }
 0x2a1   : > { %v1419_v60 = vpop.permute.xlu1 %1418  ;;  %v1431_v51 = vpop.permute.xlu0 %1430  ;;  %v1938_v24 = vadd.f32 %v1906_v42, %v1742_v7 }
 0x2a2   : > { %v1513_v12 = vmul.f32 %v9472_v3, %v1419_v60  ;;  %7996 = vset.pattern.permute.xlu1 %v14972_v1  ;;  %8000 = vset.pattern.permute.xlu0 %v14972_v1  ;;  %v7813_v42 = vpop.f32.mrf.mxu1 }
 0x2a3   : > { %1858 = vperm.xlu1 %7996, %v9684_v57   ;;  %1870 = vperm.xlu0 %8000, %v9699_v18   ;;  %v1977_v56 = vadd.f32 %v9514_v2, %v1938_v24 }
 0x2a4   : > { %v1545_v45 = vadd.f32 %v1513_v12, %v1349_v63 }
 0x2a5   : > { %v2009_v12 = vmax.f32 %v1977_v56, 0.0 }
 0x2a6   : > { %v1811_v55 = vpop.permute.xlu1 %1810  ;;  %v1741_v59 = vadd.f32 %v1709_v30, %v1545_v45  ;;  %v1823_v60 = vpop.permute.xlu0 %1822 }
 0x2a7   : > { %v1905_v33 = vmul.f32 %v9498_v20, %v1811_v55  ;;  %7997 = vset.pattern.permute.xlu1 %v14974_v62  ;;  %8001 = vset.pattern.permute.xlu0 %v14974_v62 }
 0x2a8   : > { %1310 = vperm.xlu1 %7997, %v9699_v18   ;;  %1305 = vperm.xlu0 %8001, %v9718_v5  }
 0x2a9   : > { %v1937_v52 = vadd.f32 %v1905_v33, %v1741_v59  ;;  %v9735_v33 = vld [vmem:[%s14768_s4] ss:$0 sm:$0xff]  ;;  %v1516_v59 = vmul.f32 %v9472_v3, %v1431_v51  ;;  %v1908_v51 = vmul.f32 %v9498_v20, %v1823_v60 }
 0x2aa   : > { %v9738_v30 = vadd.f32 %v9735_v33, %v7813_v42 }
 0x2ab   : > { %v1976_v35 = vadd.f32 %v9514_v2, %v1937_v52  ;;  %v1251_v6 = vpop.permute.xlu1 %1250  ;;  %v1246_v63 = vpop.permute.xlu0 %1245 }
 0x2ac   : > { %7999 = vset.pattern.permute.xlu1 %v14975_v8  ;;  %8003 = vset.pattern.permute.xlu0 %v14975_v8  ;;  %14988 = vst [vmem:[#allocation51_spill] sm:$0xff] %v9738_v30  ;;  %v1352_v45 = vmul.f32 %v9475_v14, %v1251_v6  ;;  %v1351_v6 = vmul.f32 %v9475_v14, %v1246_v63 }
 0x2ad   : > { %v2008_v7 = vmax.f32 %v1976_v35, 0.0  ;;  %1674 = vperm.xlu1 %7999, %v9699_v18   ;;  %1670 = vperm.xlu0 %8003, %v9718_v5   ;;  %v1153_v18 = vpop.f32.mrf.mxu1 }
 0x2ae   : > { %v1548_v56 = vadd.f32 %v1516_v59, %v1352_v45  ;;  %v9757_v59 = vadd.f32 %v9735_v33, %v1153_v18 }
 0x2af   : > { %7839 = vmatprep.mubr.msk.f32.mxu1 %vm850_vm1, %v2008_v7 }
 0x2b0   : > { %v1627_v24 = vpop.permute.xlu1 %1626  ;;  %7840 = vmatmul.mubr.msk.f32.gmra.mxu1 %vm850_vm1, %v2009_v12  ;;  %v1623_v55 = vpop.permute.xlu0 %1622  ;;  %14989 = vst [vmem:[#allocation52_spill] sm:$0xff] %v9757_v59 }
 0x2b1   : > { %8002 = vset.pattern.permute.xlu1 %v14971_v13  ;;  %8006 = vset.pattern.permute.xlu0 %v14971_v13  ;;  %v1712_v52 = vmul.f32 %v9482_v16, %v1627_v24  ;;  %v1711_v45 = vmul.f32 %v9482_v16, %v1623_v55 }
 0x2b2   : > { %1474 = vperm.xlu1 %8002, %v9718_v5   ;;  %1486 = vperm.xlu0 %8006, %v9738_v30  }
 0x2b3   : > { %v1744_v42 = vadd.f32 %v1712_v52, %v1548_v56 }
 0x2b5   : > { %v1427_v35 = vpop.permute.xlu1 %1426  ;;  %v1439_v7 = vpop.permute.xlu0 %1438  ;;  %v1940_v63 = vadd.f32 %v1908_v51, %v1744_v42 }
 0x2b6   : > { %v1515_v12 = vmul.f32 %v9472_v3, %v1427_v35  ;;  %8004 = vset.pattern.permute.xlu1 %v14972_v1  ;;  %8008 = vset.pattern.permute.xlu0 %v14972_v1 }
 0x2b7   : > { %1866 = vperm.xlu1 %8004, %v9718_v5   ;;  %1878 = vperm.xlu0 %8008, %v9738_v30   ;;  %v1979_v55 = vadd.f32 %v9514_v2, %v1940_v63 }
 0x2b8   : > { %v1547_v24 = vadd.f32 %v1515_v12, %v1351_v6 }
 0x2b9   : > { %v2011_v51 = vmax.f32 %v1979_v55, 0.0 }
 0x2ba   : > { %v1819_v52 = vpop.permute.xlu1 %1818  ;;  %v1743_v56 = vadd.f32 %v1711_v45, %v1547_v24  ;;  %v1831_v35 = vpop.permute.xlu0 %1830 }
 0x2bb   : > { %v1907_v57 = vmul.f32 %v9498_v20, %v1819_v52  ;;  %8005 = vset.pattern.permute.xlu1 %v14974_v62  ;;  %8009 = vset.pattern.permute.xlu0 %v14974_v62  ;;  %v7816_v45 = vpop.f32.mrf.mxu1 }
 0x2bc   : > { %1320 = vperm.xlu1 %8005, %v9738_v30   ;;  %1315 = vperm.xlu0 %8009, %v9757_v59  }
 0x2bd   : > { %v1939_v60 = vadd.f32 %v1907_v57, %v1743_v56  ;;  %v9772_v57 = vadd.f32 %v9735_v33, %v7816_v45  ;;  %v1518_v56 = vmul.f32 %v9472_v3, %v1439_v7  ;;  %v1910_v7 = vmul.f32 %v9498_v20, %v1831_v35 }
 0x2bf   : > { %v1978_v18 = vadd.f32 %v9514_v2, %v1939_v60  ;;  %v1261_v6 = vpop.permute.xlu1 %1260  ;;  %v1256_v42 = vpop.permute.xlu0 %1255  ;;  %14990 = vst [vmem:[#allocation53_spill] sm:$0xff] %v9772_v57 }
 0x2c0   : > { %8007 = vset.pattern.permute.xlu1 %v14975_v8  ;;  %8011 = vset.pattern.permute.xlu0 %v14975_v8  ;;  %v1354_v24 = vmul.f32 %v9475_v14, %v1261_v6  ;;  %v1353_v6 = vmul.f32 %v9475_v14, %v1256_v42 }
 0x2c1   : > { %v2010_v12 = vmax.f32 %v1978_v18, 0.0  ;;  %1682 = vperm.xlu1 %8007, %v9738_v30   ;;  %1678 = vperm.xlu0 %8011, %v9757_v59   ;;  %v1163_v30 = vpop.f32.mrf.mxu1 }
 0x2c2   : > { %v1550_v55 = vadd.f32 %v1518_v56, %v1354_v24  ;;  %v9791_v56 = vadd.f32 %v9735_v33, %v1163_v30 }
 0x2c3   : > { %7842 = vmatprep.mubr.msk.f32.mxu1 %vm850_vm1, %v2010_v12 }
 0x2c4   : > { %v1635_v63 = vpop.permute.xlu1 %1634  ;;  %7843 = vmatmul.mubr.msk.f32.gmra.mxu1 %vm850_vm1, %v2011_v51  ;;  %v1631_v52 = vpop.permute.xlu0 %1630  ;;  %14991 = vst [vmem:[#allocation54_spill] sm:$0xff] %v9791_v56 }
 0x2c5   : > { %8010 = vset.pattern.permute.xlu1 %v14971_v13  ;;  %8014 = vset.pattern.permute.xlu0 %v14971_v13  ;;  %v1714_v60 = vmul.f32 %v9482_v16, %v1635_v63  ;;  %v1713_v24 = vmul.f32 %v9482_v16, %v1631_v52 }
 0x2c6   : > { %1482 = vperm.xlu1 %8010, %v9757_v59   ;;  %1494 = vperm.xlu0 %8014, %v9772_v57  }
 0x2c7   : > { %v1746_v45 = vadd.f32 %v1714_v60, %v1550_v55 }
 0x2c9   : > { %v1435_v18 = vpop.permute.xlu1 %1434  ;;  %v1447_v12 = vpop.permute.xlu0 %1446  ;;  %v1942_v42 = vadd.f32 %v1910_v7, %v1746_v45 }
 0x2ca   : > { %v1517_v51 = vmul.f32 %v9472_v3, %v1435_v18  ;;  %8012 = vset.pattern.permute.xlu1 %v14972_v1  ;;  %8016 = vset.pattern.permute.xlu0 %v14972_v1 }
 0x2cb   : > { %1874 = vperm.xlu1 %8012, %v9757_v59   ;;  %1886 = vperm.xlu0 %8016, %v9772_v57   ;;  %v1981_v52 = vadd.f32 %v9514_v2, %v1942_v42 }
 0x2cc   : > { %v1549_v63 = vadd.f32 %v1517_v51, %v1353_v6 }
 0x2cd   : > { %v2013_v51 = vmax.f32 %v1981_v52, 0.0 }
 0x2ce   : > { %v1827_v60 = vpop.permute.xlu1 %1826  ;;  %v1745_v55 = vadd.f32 %v1713_v24, %v1549_v63  ;;  %v1839_v18 = vpop.permute.xlu0 %1838  ;;  %v1520_v63 = vmul.f32 %v9472_v3, %v1447_v12 }
 0x2cf   : > { %v1909_v5 = vmul.f32 %v9498_v20, %v1827_v60  ;;  %8013 = vset.pattern.permute.xlu1 %v14974_v62  ;;  %8017 = vset.pattern.permute.xlu0 %v14974_v62 }
 0x2d0   : > { %1330 = vperm.xlu1 %8013, %v9772_v57   ;;  %1325 = vperm.xlu0 %8017, %v9791_v56  }
 0x2d1   : > { %v1941_v35 = vadd.f32 %v1909_v5, %v1745_v55 }
 0x2d3   : > { %v1980_v33 = vadd.f32 %v9514_v2, %v1941_v35  ;;  %v1271_v30 = vpop.permute.xlu1 %1270  ;;  %v1266_v6 = vpop.permute.xlu0 %1265 }
 0x2d4   : > { %8015 = vset.pattern.permute.xlu1 %v14975_v8  ;;  %8019 = vset.pattern.permute.xlu0 %v14975_v8  ;;  %v1356_v5 = vmul.f32 %v9475_v14, %v1271_v30  ;;  %v1355_v52 = vmul.f32 %v9475_v14, %v1266_v6 }
 0x2d5   : > { %v2012_v45 = vmax.f32 %v1980_v33, 0.0  ;;  %1690 = vperm.xlu1 %8015, %v9772_v57   ;;  %1686 = vperm.xlu0 %8019, %v9791_v56  }
 0x2d6   : > { %v1552_v60 = vadd.f32 %v1520_v63, %v1356_v5 }
 0x2d7   : > { %7845 = vmatprep.mubr.msk.f32.mxu1 %vm850_vm1, %v2012_v45  ;;  %v1912_v45 = vmul.f32 %v9498_v20, %v1839_v18 }
 0x2d8   : > { %v1643_v7 = vpop.permute.xlu1 %1642  ;;  %7846 = vmatmul.mubr.msk.f32.gmra.mxu1 %vm850_vm1, %v2013_v51  ;;  %v1639_v24 = vpop.permute.xlu0 %1638 }
 0x2d9   : > { %8018 = vset.pattern.permute.xlu1 %v14971_v13  ;;  %8022 = vset.pattern.permute.xlu0 %v14971_v13  ;;  %v1716_v42 = vmul.f32 %v9482_v16, %v1643_v7  ;;  %v1715_v12 = vmul.f32 %v9482_v16, %v1639_v24 }
 0x2da   : > { %1490 = vperm.xlu1 %8018, %v9791_v56  }
 0x2db   : > { %v1748_v33 = vadd.f32 %v1716_v42, %v1552_v60 }
 0x2dd   : > { %v1443_v55 = vpop.permute.xlu1 %1442  ;;  %v1455_v35 = vpop.permute.xlu0 %1454  ;;  %v1944_v7 = vadd.f32 %v1912_v45, %v1748_v33 }
 0x2de   : > { %v1519_v30 = vmul.f32 %v9472_v3, %v1443_v55  ;;  %8020 = vset.pattern.permute.xlu1 %v14972_v1 }
 0x2df   : > { %1882 = vperm.xlu1 %8020, %v9791_v56   ;;  %v1983_v42 = vadd.f32 %v9514_v2, %v1944_v7 }
 0x2e0   : > { %v1551_v51 = vadd.f32 %v1519_v30, %v1355_v52 }
 0x2e1   : > { %v2015_v18 = vmax.f32 %v1983_v42, 0.0 }
 0x2e2   : > { %v1835_v57 = vpop.permute.xlu1 %1834  ;;  %v1747_v59 = vadd.f32 %v1715_v12, %v1551_v51  ;;  %v1847_v5 = vpop.permute.xlu0 %1846 }
 0x2e3   : > { %v1911_v63 = vmul.f32 %v9498_v20, %v1835_v57  ;;  %8021 = vset.pattern.permute.xlu1 %v14974_v62  ;;  %v1522_v57 = vmul.f32 %v9472_v3, %v1455_v35 }
 0x2e5   : > { %v1943_v6 = vadd.f32 %v1911_v63, %v1747_v59 }
 0x2e7   : > { %v1982_v60 = vadd.f32 %v9514_v2, %v1943_v6  ;;  %v1281_v55 = vpop.permute.xlu1 %1280  ;;  %v1276_v56 = vpop.permute.xlu0 %1275 }
 0x2e8   : > { %v1358_v24 = vmul.f32 %v9475_v14, %v1281_v55  ;;  %v1357_v51 = vmul.f32 %v9475_v14, %v1276_v56 }
 0x2e9   : > { %v2014_v53 = vmax.f32 %v1982_v60, 0.0 }
 0x2ea   : > { %v1554_v30 = vadd.f32 %v1522_v57, %v1358_v24  ;;  %v9835_v24 = vld [vmem:[%s14772_s8] ss:$0 sm:$0xff] }
 0x2eb   : > { %7848 = vmatprep.mubr.msk.f32.mxu1 %vm850_vm1, %v2014_v53  ;;  %v1914_v53 = vmul.f32 %v9498_v20, %v1847_v5 }
 0x2ec   : > { %v1651_v52 = vpop.permute.xlu1 %1650  ;;  %7849 = vmatmul.mubr.msk.f32.gmra.mxu1 %vm850_vm1, %v2015_v18  ;;  %v1647_v33 = vpop.permute.xlu0 %1646 }
 0x2ed   : > { %v1718_v59 = vmul.f32 %v9482_v16, %v1651_v52  ;;  %v1717_v6 = vmul.f32 %v9482_v16, %v1647_v33 }
 0x2ef   : > { %v1750_v7 = vadd.f32 %v1718_v59, %v1554_v30 }
 0x2f1   : > { %v1451_v45 = vpop.permute.xlu1 %1450  ;;  %v1463_v12 = vpop.permute.xlu0 %1462  ;;  %v1946_v60 = vadd.f32 %v1914_v53, %v1750_v7 }
 0x2f2   : > { %v1521_v63 = vmul.f32 %v9472_v3, %v1451_v45 }
 0x2f3   : > { %v1985_v57 = vadd.f32 %v9514_v2, %v1946_v60  ;;  %v8750_v60 = vld [vmem:[%s8909_s27] sm:$0xff] }
 0x2f4   : > { %v1553_v42 = vadd.f32 %v1521_v63, %v1357_v51 }
 0x2f5   : > { %v2017_v53 = vmax.f32 %v1985_v57, 0.0 }
 0x2f6   : > { %v1843_v55 = vpop.permute.xlu1 %1842  ;;  %v1749_v18 = vadd.f32 %v1717_v6, %v1553_v42  ;;  %v1855_v61 = vpop.permute.xlu0 %1854 }
 0x2f7   : > { %v1913_v35 = vmul.f32 %v9498_v20, %v1843_v55 }
 0x2f8   : > { %v7823_v56 = vpop.f32.mrf.mxu1 }
 0x2f9   : > { %v1945_v52 = vadd.f32 %v1913_v35, %v1749_v18  ;;  %v9839_v5 = vadd.f32 %v7823_v56, %v9835_v24 }
 0x2fa   : > { %v2199_v33 = vpop.f32.mrf.mxu1 }
 0x2fb   : > { %14992 = vst [vmem:[#allocation55_spill] sm:$0xff] %v9839_v5  ;;  %v1984_v59 = vadd.f32 %v9514_v2, %v1945_v52  ;;  %v9843_v30 = vadd.f32 %v9835_v24, %v2199_v33  ;;  %v1291_v45 = vpop.permute.xlu1 %1290  ;;  %v1286_v51 = vpop.permute.xlu0 %1285  ;;  %v2487_v6 = vmul.f32 %v9839_v5, %v9839_v5  ;;  %v1524_v52 = vmul.f32 %v9472_v3, %v1463_v12 }
 0x2fc   : > { %v1360_v18 = vmul.f32 %v9475_v14, %v1291_v45 }
 0x2fd   : > { %14993 = vst [vmem:[#allocation56_spill] sm:$0xff] %v9843_v30  ;;  %v2016_v7 = vmax.f32 %v1984_v59, 0.0  ;;  %v2486_v63 = vmul.f32 %v9843_v30, %v9843_v30  ;;  %v2614_v2 = vmul.f32 %v8750_v60, %v9843_v30  ;;  %v2742_v55 = vsub.f32 %v8750_v60, %v9843_v30  ;;  %v8751_v59 = vld [vmem:[%s8909_s27 + $0x8] sm:$0xff] }
 0x2fe   : > { %v2521_v33 = vsel %vm487_vm0, %v2487_v6, 0.0  ;;  %v1556_v30 = vadd.f32 %v1524_v52, %v1360_v18 }
 0x2ff   : > { %7851 = vmatprep.mubr.msk.f32.mxu1 %vm850_vm1, %v2016_v7  ;;  %v2518_v42 = vsel %vm487_vm0, %v2486_v63, 0.0  ;;  %v2615_v7 = vmul.f32 %v8751_v59, %v9839_v5  ;;  %v2743_v63 = vsub.f32 %v8751_v59, %v9839_v5  ;;  %v2646_v60 = vsel %vm487_vm0, %v2614_v2, 0.0 }
 0x300   : > { %v1659_v35 = vpop.permute.xlu1 %1658  ;;  %2519 = vadd.xlane.f32.xlu0 %v2518_v42  ;;  %7852 = vmatmul.mubr.msk.f32.gmra.mxu1 %vm850_vm1, %v2017_v53  ;;  %v1655_v56 = vpop.permute.xlu0 %1654  ;;  %v2774_v45 = vmul.f32 %v2742_v55, %v2742_v55  ;;  %v1359_v53 = vmul.f32 %v9475_v14, %v1286_v51 }
 0x301   : > { %v1720_v57 = vmul.f32 %v9482_v16, %v1659_v35  ;;  %v2649_v6 = vsel %vm487_vm0, %v2615_v7, 0.0  ;;  %v2775_v10 = vmul.f32 %v2743_v63, %v2743_v63  ;;  %v1719_v2 = vmul.f32 %v9482_v16, %v1655_v56 }
 0x302   : > { %v2806_v50 = vsel %vm487_vm0, %v2774_v45, 0.0 }
 0x303   : > { %2522 = vadd.xlane.f32.xlu1 %v2521_v33  ;;  %v1752_v12 = vadd.f32 %v1720_v57, %v1556_v30  ;;  %v1916_v33 = vmul.f32 %v9498_v20, %v1855_v61  ;;  %v2809_v30 = vsel %vm487_vm0, %v2775_v10, 0.0  ;;  %v9877_v61 = vld [vmem:[%s14770_s6] ss:$0 sm:$0xff] }
 0x304   : > { %2647 = vadd.xlane.f32.xlu0 %v2646_v60 }
 0x305   : > { %v1459_v42 = vpop.permute.xlu1 %1458  ;;  %v1471_v49 = vpop.permute.xlu0 %1470  ;;  %v1948_v18 = vadd.f32 %v1916_v33, %v1752_v12 }
 0x306   : > { %v1523_v35 = vmul.f32 %v9472_v3, %v1459_v42 }
 0x307   : > { %2650 = vadd.xlane.f32.xlu1 %v2649_v6 }
 0x308   : > { %v1555_v55 = vadd.f32 %v1523_v35, %v1359_v53  ;;  %2807 = vadd.xlane.f32.xlu0 %v2806_v50  ;;  %v1987_v50 = vadd.f32 %v9877_v61, %v1948_v18  ;;  %v8753_v35 = vld [vmem:[%s8909_s27 + $0x18] sm:$0xff] }
 0x30a   : > { %v1851_v52 = vpop.permute.xlu1 %1850  ;;  %v1751_v51 = vadd.f32 %v1719_v2, %v1555_v55  ;;  %v1863_v59 = vpop.permute.xlu0 %1862 }
 0x30b   : > { %v1915_v57 = vmul.f32 %v9498_v20, %v1851_v52  ;;  %2810 = vadd.xlane.f32.xlu1 %v2809_v30  ;;  %v2019_v52 = vmax.f32 %v1987_v50, 0.0  ;;  %v8754_v30 = vld [vmem:[%s8909_s27 + $0x10] sm:$0xff]  ;;  %v1526_v50 = vmul.f32 %v9472_v3, %v1471_v49 }
 0x30c   : > { %v7826_v7 = vpop.f32.mrf.mxu1 }
 0x30d   : > { %v1947_v63 = vadd.f32 %v1915_v57, %v1751_v51  ;;  %v9872_v60 = vadd.f32 %v7826_v7, %v9835_v24 }
 0x30e   : > { %v2209_v56 = vpop.f32.mrf.mxu1 }
 0x30f   : > { %14994 = vst [vmem:[#allocation57_spill] sm:$0xff] %v9872_v60  ;;  %v1986_v45 = vadd.f32 %v9877_v61, %v1947_v63  ;;  %v9882_v10 = vadd.f32 %v9835_v24, %v2209_v56  ;;  %v1301_v53 = vpop.permute.xlu1 %1300  ;;  %v1296_v42 = vpop.permute.xlu0 %1295  ;;  %v2489_v12 = vmul.f32 %v9872_v60, %v9872_v60  ;;  %v2617_v6 = vmul.f32 %v8753_v35, %v9872_v60 }
 0x310   : > { %v2745_v18 = vsub.f32 %v8753_v35, %v9872_v60  ;;  %v1362_v63 = vmul.f32 %v9475_v14, %v1301_v53 }
 0x311   : > { %14995 = vst [vmem:[#allocation58_spill] sm:$0xff] %v9882_v10  ;;  %v2018_v33 = vmax.f32 %v1986_v45, 0.0  ;;  %v2527_v2 = vsel %vm487_vm0, %v2489_v12, 0.0  ;;  %v2488_v55 = vmul.f32 %v9882_v10, %v9882_v10  ;;  %v2616_v57 = vmul.f32 %v8754_v30, %v9882_v10 }
 0x312   : > { %2528 = vadd.xlane.f32.xlu1 %v2527_v2  ;;  %v2744_v7 = vsub.f32 %v8754_v30, %v9882_v10  ;;  %v2655_v12 = vsel %vm487_vm0, %v2617_v6, 0.0  ;;  %v2777_v35 = vmul.f32 %v2745_v18, %v2745_v18  ;;  %v1558_v5 = vadd.f32 %v1526_v50, %v1362_v63 }
 0x313   : > { %7854 = vmatprep.mubr.msk.f32.mxu1 %vm850_vm1, %v2018_v33  ;;  %v2524_v51 = vsel %vm487_vm0, %v2488_v55, 0.0  ;;  %v2652_v2 = vsel %vm487_vm0, %v2616_v57, 0.0  ;;  %v1918_v18 = vmul.f32 %v9498_v20, %v1863_v59 }
 0x314   : > { %v1667_v56 = vpop.permute.xlu1 %1666  ;;  %2525 = vadd.xlane.f32.xlu0 %v2524_v51  ;;  %7855 = vmatmul.mubr.msk.f32.gmra.mxu1 %vm850_vm1, %v2019_v52  ;;  %v1663_v45 = vpop.permute.xlu0 %1662  ;;  %v2776_v55 = vmul.f32 %v2744_v7, %v2744_v7  ;;  %v2815_v51 = vsel %vm487_vm0, %v2777_v35, 0.0  ;;  %v1361_v52 = vmul.f32 %v9475_v14, %v1296_v42 }
 0x315   : > { %v1722_v33 = vmul.f32 %v9482_v16, %v1667_v56  ;;  %v1721_v56 = vmul.f32 %v9482_v16, %v1663_v45 }
 0x316   : > { %2656 = vadd.xlane.f32.xlu1 %v2655_v12  ;;  %v2812_v49 = vsel %vm487_vm0, %v2776_v55, 0.0 }
 0x317   : > { %v1754_v60 = vadd.f32 %v1722_v33, %v1558_v5 }
 0x318   : > { %2653 = vadd.xlane.f32.xlu0 %v2652_v2 }
 0x319   : > { %v1467_v30 = vpop.permute.xlu1 %1466  ;;  %v1479_v53 = vpop.permute.xlu0 %1478  ;;  %v1950_v7 = vadd.f32 %v1918_v18, %v1754_v60 }
 0x31a   : > { %v1525_v6 = vmul.f32 %v9472_v3, %v1467_v30  ;;  %2816 = vadd.xlane.f32.xlu1 %v2815_v51 }
 0x31b   : > { %v1989_v2 = vadd.f32 %v9877_v61, %v1950_v7 }
 0x31c   : > { %v1557_v57 = vadd.f32 %v1525_v6, %v1361_v52  ;;  %2813 = vadd.xlane.f32.xlu0 %v2812_v49  ;;  %v8755_v52 = vld [vmem:[%s8909_s27 + $0x28] sm:$0xff] }
 0x31d   : > { %v2021_v7 = vmax.f32 %v1989_v2, 0.0  ;;  %v1528_v2 = vmul.f32 %v9472_v3, %v1479_v53 }
 0x31e   : > { %v1859_v63 = vpop.permute.xlu1 %1858  ;;  %v1753_v12 = vadd.f32 %v1721_v56, %v1557_v57  ;;  %v1871_v50 = vpop.permute.xlu0 %1870 }
 0x31f   : > { %v1917_v35 = vmul.f32 %v9498_v20, %v1859_v63 }
 0x320   : > { %v7829_v42 = vpop.f32.mrf.mxu1 }
 0x321   : > { %v1949_v5 = vadd.f32 %v1917_v35, %v1753_v12  ;;  %v9911_v33 = vadd.f32 %v7829_v42, %v9835_v24  ;;  %v8756_v12 = vld [vmem:[%s8909_s27 + $0x20] sm:$0xff] }
 0x322   : > { %v2219_v55 = vpop.f32.mrf.mxu1 }
 0x323   : > { %14996 = vst [vmem:[#allocation59_spill] sm:$0xff] %v9911_v33  ;;  %v1988_v59 = vadd.f32 %v9877_v61, %v1949_v5  ;;  %v9916_v45 = vadd.f32 %v9835_v24, %v2219_v55  ;;  %v1311_v60 = vpop.permute.xlu1 %1310  ;;  %v1306_v30 = vpop.permute.xlu0 %1305  ;;  %v2491_v51 = vmul.f32 %v9911_v33, %v9911_v33  ;;  %v2619_v6 = vmul.f32 %v8755_v52, %v9911_v33 }
 0x324   : > { %v2747_v57 = vsub.f32 %v8755_v52, %v9911_v33  ;;  %v1364_v5 = vmul.f32 %v9475_v14, %v1311_v60 }
 0x325   : > { %14997 = vst [vmem:[#allocation60_spill] sm:$0xff] %v9916_v45  ;;  %v2020_v49 = vmax.f32 %v1988_v59, 0.0  ;;  %v2533_v18 = vsel %vm487_vm0, %v2491_v51, 0.0  ;;  %v2490_v56 = vmul.f32 %v9916_v45, %v9916_v45  ;;  %v2618_v35 = vmul.f32 %v8756_v12, %v9916_v45 }
 0x326   : > { %2534 = vadd.xlane.f32.xlu1 %v2533_v18  ;;  %v2746_v42 = vsub.f32 %v8756_v12, %v9916_v45  ;;  %v2661_v51 = vsel %vm487_vm0, %v2619_v6, 0.0  ;;  %v2779_v52 = vmul.f32 %v2747_v57, %v2747_v57  ;;  %v1560_v33 = vadd.f32 %v1528_v2, %v1364_v5 }
 0x327   : > { %7857 = vmatprep.mubr.msk.f32.mxu1 %vm850_vm1, %v2020_v49  ;;  %v2530_v63 = vsel %vm487_vm0, %v2490_v56, 0.0  ;;  %v2658_v18 = vsel %vm487_vm0, %v2618_v35, 0.0  ;;  %v1920_v57 = vmul.f32 %v9498_v20, %v1871_v50 }
 0x328   : > { %v1675_v55 = vpop.permute.xlu1 %1674  ;;  %2531 = vadd.xlane.f32.xlu0 %v2530_v63  ;;  %7858 = vmatmul.mubr.msk.f32.gmra.mxu1 %vm850_vm1, %v2021_v7  ;;  %v1671_v59 = vpop.permute.xlu0 %1670  ;;  %v2778_v56 = vmul.f32 %v2746_v42, %v2746_v42  ;;  %v2821_v63 = vsel %vm487_vm0, %v2779_v52, 0.0  ;;  %v1363_v7 = vmul.f32 %v9475_v14, %v1306_v30 }
 0x329   : > { %v1724_v49 = vmul.f32 %v9482_v16, %v1675_v55  ;;  %v1723_v55 = vmul.f32 %v9482_v16, %v1671_v59 }
 0x32a   : > { %2662 = vadd.xlane.f32.xlu1 %v2661_v51  ;;  %v2818_v53 = vsel %vm487_vm0, %v2778_v56, 0.0 }
 0x32b   : > { %v1756_v45 = vadd.f32 %v1724_v49, %v1560_v33 }
 0x32c   : > { %2659 = vadd.xlane.f32.xlu0 %v2658_v18 }
 0x32d   : > { %v1475_v12 = vpop.permute.xlu1 %1474  ;;  %v1487_v60 = vpop.permute.xlu0 %1486  ;;  %v1952_v42 = vadd.f32 %v1920_v57, %v1756_v45 }
 0x32e   : > { %v1527_v6 = vmul.f32 %v9472_v3, %v1475_v12  ;;  %2822 = vadd.xlane.f32.xlu1 %v2821_v63 }
 0x32f   : > { %v1991_v18 = vadd.f32 %v9877_v61, %v1952_v42 }
 0x330   : > { %v1559_v35 = vadd.f32 %v1527_v6, %v1363_v7  ;;  %2819 = vadd.xlane.f32.xlu0 %v2818_v53  ;;  %v8757_v7 = vld [vmem:[%s8909_s27 + $0x38] sm:$0xff] }
 0x331   : > { %v2023_v42 = vmax.f32 %v1991_v18, 0.0  ;;  %v1530_v18 = vmul.f32 %v9472_v3, %v1487_v60 }
 0x332   : > { %v1867_v5 = vpop.permute.xlu1 %1866  ;;  %v1755_v51 = vadd.f32 %v1723_v55, %v1559_v35  ;;  %v1879_v2 = vpop.permute.xlu0 %1878 }
 0x333   : > { %v1919_v52 = vmul.f32 %v9498_v20, %v1867_v5 }
 0x334   : > { %v7832_v30 = vpop.f32.mrf.mxu1 }
 0x335   : > { %v1951_v33 = vadd.f32 %v1919_v52, %v1755_v51  ;;  %v9945_v49 = vadd.f32 %v7832_v30, %v9835_v24  ;;  %v8758_v51 = vld [vmem:[%s8909_s27 + $0x30] sm:$0xff] }
 0x336   : > { %v2229_v56 = vpop.f32.mrf.mxu1 }
 0x337   : > { %14998 = vst [vmem:[#allocation61_spill] sm:$0xff] %v9945_v49  ;;  %v1990_v50 = vadd.f32 %v9877_v61, %v1951_v33  ;;  %v9950_v59 = vadd.f32 %v9835_v24, %v2229_v56  ;;  %v1321_v45 = vpop.permute.xlu1 %1320  ;;  %v1316_v12 = vpop.permute.xlu0 %1315  ;;  %v2493_v63 = vmul.f32 %v9945_v49, %v9945_v49  ;;  %v2621_v6 = vmul.f32 %v8757_v7, %v9945_v49 }
 0x338   : > { %v2749_v35 = vsub.f32 %v8757_v7, %v9945_v49  ;;  %v1366_v33 = vmul.f32 %v9475_v14, %v1321_v45 }
 0x339   : > { %14999 = vst [vmem:[#allocation62_spill] sm:$0xff] %v9950_v59  ;;  %v2022_v53 = vmax.f32 %v1990_v50, 0.0  ;;  %v2539_v57 = vsel %vm487_vm0, %v2493_v63, 0.0  ;;  %v2492_v55 = vmul.f32 %v9950_v59, %v9950_v59  ;;  %v2620_v52 = vmul.f32 %v8758_v51, %v9950_v59 }
 0x33a   : > { %2540 = vadd.xlane.f32.xlu1 %v2539_v57  ;;  %v2748_v30 = vsub.f32 %v8758_v51, %v9950_v59  ;;  %v2667_v63 = vsel %vm487_vm0, %v2621_v6, 0.0  ;;  %v2781_v7 = vmul.f32 %v2749_v35, %v2749_v35  ;;  %v1562_v49 = vadd.f32 %v1530_v18, %v1366_v33 }
 0x33b   : > { %7860 = vmatprep.mubr.msk.f32.mxu1 %vm850_vm1, %v2022_v53  ;;  %v2536_v5 = vsel %vm487_vm0, %v2492_v55, 0.0  ;;  %v2664_v57 = vsel %vm487_vm0, %v2620_v52, 0.0  ;;  %v1922_v35 = vmul.f32 %v9498_v20, %v1879_v2 }
 0x33c   : > { %v1683_v56 = vpop.permute.xlu1 %1682  ;;  %2537 = vadd.xlane.f32.xlu0 %v2536_v5  ;;  %7861 = vmatmul.mubr.msk.f32.gmra.mxu1 %vm850_vm1, %v2023_v42  ;;  %v1679_v50 = vpop.permute.xlu0 %1678  ;;  %v2780_v55 = vmul.f32 %v2748_v30, %v2748_v30  ;;  %v2827_v45 = vsel %vm487_vm0, %v2781_v7, 0.0  ;;  %v1365_v5 = vmul.f32 %v9475_v14, %v1316_v12 }
 0x33d   : > { %v1726_v53 = vmul.f32 %v9482_v16, %v1683_v56  ;;  %v1725_v56 = vmul.f32 %v9482_v16, %v1679_v50 }
 0x33e   : > { %2668 = vadd.xlane.f32.xlu1 %v2667_v63  ;;  %v2824_v60 = vsel %vm487_vm0, %v2780_v55, 0.0 }
 0x33f   : > { %v1758_v42 = vadd.f32 %v1726_v53, %v1562_v49 }
 0x340   : > { %2665 = vadd.xlane.f32.xlu0 %v2664_v57 }
 0x341   : > { %v1483_v51 = vpop.permute.xlu1 %1482  ;;  %v1495_v6 = vpop.permute.xlu0 %1494  ;;  %v1954_v30 = vadd.f32 %v1922_v35, %v1758_v42 }
 0x342   : > { %v1529_v59 = vmul.f32 %v9472_v3, %v1483_v51  ;;  %2828 = vadd.xlane.f32.xlu1 %v2827_v45  ;;  %v8759_v45 = vld [vmem:[%s8909_s27 + $0x48] sm:$0xff] }
 0x343   : > { %v1993_v57 = vadd.f32 %v9877_v61, %v1954_v30 }
 0x344   : > { %v1561_v52 = vadd.f32 %v1529_v59, %v1365_v5  ;;  %2825 = vadd.xlane.f32.xlu0 %v2824_v60 }
 0x346   : > { %v1875_v33 = vpop.permute.xlu1 %1874  ;;  %v1757_v63 = vadd.f32 %v1725_v56, %v1561_v52  ;;  %v1887_v18 = vpop.permute.xlu0 %1886  ;;  %v2025_v52 = vmax.f32 %v1993_v57, 0.0  ;;  %v1532_v57 = vmul.f32 %v9472_v3, %v1495_v6 }
 0x347   : > { %v1921_v7 = vmul.f32 %v9498_v20, %v1875_v33 }
 0x348   : > { %v7835_v12 = vpop.f32.mrf.mxu1 }
 0x349   : > { %v1953_v49 = vadd.f32 %v1921_v7, %v1757_v63  ;;  %v9979_v53 = vadd.f32 %v7835_v12, %v9835_v24  ;;  %v8760_v63 = vld [vmem:[%s8909_s27 + $0x40] sm:$0xff] }
 0x34a   : > { %v2239_v55 = vpop.f32.mrf.mxu1 }
 0x34b   : > { %15000 = vst [vmem:[#allocation63_spill] sm:$0xff] %v9979_v53  ;;  %v1992_v2 = vadd.f32 %v9877_v61, %v1953_v49  ;;  %v9984_v59 = vadd.f32 %v9835_v24, %v2239_v55  ;;  %v1331_v50 = vpop.permute.xlu1 %1330  ;;  %v2495_v51 = vmul.f32 %v9979_v53, %v9979_v53  ;;  %v2623_v5 = vmul.f32 %v8759_v45, %v9979_v53  ;;  %v1326_v30 = vpop.permute.xlu0 %1325 }
 0x34c   : > { %v2751_v56 = vsub.f32 %v8759_v45, %v9979_v53  ;;  %v1368_v49 = vmul.f32 %v9475_v14, %v1331_v50 }
 0x34d   : > { %15001 = vst [vmem:[#allocation64_spill] sm:$0xff] %v9984_v59  ;;  %v2024_v42 = vmax.f32 %v1992_v2, 0.0  ;;  %v2545_v60 = vsel %vm487_vm0, %v2495_v51, 0.0  ;;  %v2494_v35 = vmul.f32 %v9984_v59, %v9984_v59  ;;  %v2622_v7 = vmul.f32 %v8760_v63, %v9984_v59 }
 0x34e   : > { %2546 = vadd.xlane.f32.xlu1 %v2545_v60  ;;  %v2750_v12 = vsub.f32 %v8760_v63, %v9984_v59  ;;  %v2673_v2 = vsel %vm487_vm0, %v2623_v5, 0.0  ;;  %v2783_v51 = vmul.f32 %v2751_v56, %v2751_v56  ;;  %v1924_v56 = vmul.f32 %v9498_v20, %v1887_v18 }
 0x34f   : > { %7863 = vmatprep.mubr.msk.f32.mxu1 %vm850_vm1, %v2024_v42  ;;  %v2542_v33 = vsel %vm487_vm0, %v2494_v35, 0.0  ;;  %v2670_v42 = vsel %vm487_vm0, %v2622_v7, 0.0  ;;  %v1564_v35 = vadd.f32 %v1532_v57, %v1368_v49 }
 0x350   : > { %v1691_v55 = vpop.permute.xlu1 %1690  ;;  %2543 = vadd.xlane.f32.xlu0 %v2542_v33  ;;  %7864 = vmatmul.mubr.msk.f32.gmra.mxu1 %vm850_vm1, %v2025_v52  ;;  %v2782_v60 = vmul.f32 %v2750_v12, %v2750_v12  ;;  %v1687_v63 = vpop.permute.xlu0 %1686  ;;  %v2833_v50 = vsel %vm487_vm0, %v2783_v51, 0.0  ;;  %v1367_v33 = vmul.f32 %v9475_v14, %v1326_v30 }
 0x351   : > { %v1728_v45 = vmul.f32 %v9482_v16, %v1691_v55  ;;  %v1727_v7 = vmul.f32 %v9482_v16, %v1687_v63 }
 0x352   : > { %2674 = vadd.xlane.f32.xlu1 %v2673_v2  ;;  %v2830_v6 = vsel %vm487_vm0, %v2782_v60, 0.0 }
 0x353   : > { %v1760_v52 = vadd.f32 %v1728_v45, %v1564_v35 }
 0x354   : > { %2671 = vadd.xlane.f32.xlu0 %v2670_v42  ;;  %v8761_v42 = vld [vmem:[%s8909_s27 + $0x58] sm:$0xff] }
 0x355   : > { %v1491_v59 = vpop.permute.xlu1 %1490  ;;  %v1956_v49 = vadd.f32 %v1924_v56, %v1760_v52  ;;  %v8762_v52 = vld [vmem:[%s8909_s27 + $0x50] sm:$0xff] }
 0x356   : > { %v1531_v5 = vmul.f32 %v9472_v3, %v1491_v59  ;;  %2834 = vadd.xlane.f32.xlu1 %v2833_v50 }
 0x357   : > { %v1995_v3 = vadd.f32 %v9877_v61, %v1956_v49 }
 0x358   : > { %v1563_v12 = vadd.f32 %v1531_v5, %v1367_v33  ;;  %2831 = vadd.xlane.f32.xlu0 %v2830_v6 }
 0x359   : > { %v2027_v33 = vmax.f32 %v1995_v3, 0.0 }
 0x35a   : > { %v1883_v55 = vpop.permute.xlu1 %1882  ;;  %v1759_v2 = vadd.f32 %v1727_v7, %v1563_v12 }
 0x35b   : > { %v1923_v51 = vmul.f32 %v9498_v20, %v1883_v55 }
 0x35c   : > { %v7838_v57 = vpop.f32.mrf.mxu1 }
 0x35d   : > { %v1955_v14 = vadd.f32 %v1923_v51, %v1759_v2  ;;  %v10013_v30 = vadd.f32 %v7838_v57, %v9835_v24 }
 0x35e   : > { %v2249_v59 = vpop.f32.mrf.mxu1 }
 0x35f   : > { %15002 = vst [vmem:[#allocation65_spill] sm:$0xff] %v10013_v30  ;;  %v1994_v18 = vadd.f32 %v9877_v61, %v1955_v14  ;;  %v10018_v16 = vadd.f32 %v9835_v24, %v2249_v59  ;;  %v2497_v45 = vmul.f32 %v10013_v30, %v10013_v30  ;;  %v2625_v20 = vmul.f32 %v8761_v42, %v10013_v30 }
 0x360   : > { %v2753_v50 = vsub.f32 %v8761_v42, %v10013_v30  ;;  %v8763_v42 = vld [vmem:[%s8909_s27 + $0x68] sm:$0xff] }
 0x361   : > { %15003 = vst [vmem:[#allocation66_spill] sm:$0xff] %v10018_v16  ;;  %v2026_v60 = vmax.f32 %v1994_v18, 0.0  ;;  %v2551_v35 = vsel %vm487_vm0, %v2497_v45, 0.0  ;;  %v2496_v63 = vmul.f32 %v10018_v16, %v10018_v16  ;;  %v2624_v5 = vmul.f32 %v8762_v52, %v10018_v16 }
 0x362   : > { %2552 = vadd.xlane.f32.xlu1 %v2551_v35  ;;  %v2752_v6 = vsub.f32 %v8762_v52, %v10018_v16  ;;  %v2679_v56 = vsel %vm487_vm0, %v2625_v20, 0.0  ;;  %v2785_v7 = vmul.f32 %v2753_v50, %v2753_v50 }
 0x363   : > { %7866 = vmatprep.mubr.msk.f32.mxu1 %vm850_vm1, %v2026_v60  ;;  %v2548_v61 = vsel %vm487_vm0, %v2496_v63, 0.0  ;;  %v2676_v12 = vsel %vm487_vm0, %v2624_v5, 0.0  ;;  %v8764_v63 = vld [vmem:[%s8909_s27 + $0x60] sm:$0xff] }
 0x364   : > { %2549 = vadd.xlane.f32.xlu0 %v2548_v61  ;;  %7867 = vmatmul.mubr.msk.f32.gmra.mxu1 %vm850_vm1, %v2027_v33  ;;  %v2784_v49 = vmul.f32 %v2752_v6, %v2752_v6  ;;  %v2839_v55 = vsel %vm487_vm0, %v2785_v7, 0.0 }
 0x366   : > { %2680 = vadd.xlane.f32.xlu1 %v2679_v56  ;;  %v2836_v2 = vsel %vm487_vm0, %v2784_v49, 0.0 }
 0x368   : > { %2677 = vadd.xlane.f32.xlu0 %v2676_v12 }
 0x36a   : > { %2840 = vadd.xlane.f32.xlu1 %v2839_v55 }
 0x36c   : > { %2837 = vadd.xlane.f32.xlu0 %v2836_v2 }
 0x370   : > { %v7841_v51 = vpop.f32.mrf.mxu1 }
 0x371   : > { %v10039_v57 = vadd.f32 %v7841_v51, %v9835_v24 }
 0x372   : > { %v2259_v14 = vpop.f32.mrf.mxu1 }
 0x373   : > { %15004 = vst [vmem:[#allocation67_spill] sm:$0xff] %v10039_v57  ;;  %v10042_v3 = vadd.f32 %v9835_v24, %v2259_v14  ;;  %v2499_v59 = vmul.f32 %v10039_v57, %v10039_v57  ;;  %v2627_v20 = vmul.f32 %v8763_v42, %v10039_v57  ;;  %v2755_v60 = vsub.f32 %v8763_v42, %v10039_v57 }
 0x375   : > { %15005 = vst [vmem:[#allocation68_spill] sm:$0xff] %v10042_v3  ;;  %v2557_v18 = vsel %vm487_vm0, %v2499_v59, 0.0  ;;  %v2498_v45 = vmul.f32 %v10042_v3, %v10042_v3  ;;  %v2626_v50 = vmul.f32 %v8764_v63, %v10042_v3  ;;  %v2754_v33 = vsub.f32 %v8764_v63, %v10042_v3 }
 0x376   : > { %2558 = vadd.xlane.f32.xlu1 %v2557_v18  ;;  %v2685_v61 = vsel %vm487_vm0, %v2627_v20, 0.0  ;;  %v2787_v52 = vmul.f32 %v2755_v60, %v2755_v60  ;;  %v8765_v18 = vld [vmem:[%s8909_s27 + $0x78] sm:$0xff]  ;;  %v8766_v60 = vld [vmem:[%s8909_s27 + $0x70] sm:$0xff] }
 0x377   : > { %v2554_v35 = vsel %vm487_vm0, %v2498_v45, 0.0  ;;  %v2682_v5 = vsel %vm487_vm0, %v2626_v50, 0.0  ;;  %v2786_v6 = vmul.f32 %v2754_v33, %v2754_v33 }
 0x378   : > { %2555 = vadd.xlane.f32.xlu0 %v2554_v35  ;;  %v2845_v56 = vsel %vm487_vm0, %v2787_v52, 0.0 }
 0x379   : > { %v2842_v7 = vsel %vm487_vm0, %v2786_v6, 0.0 }
 0x37a   : > { %2686 = vadd.xlane.f32.xlu1 %v2685_v61 }
 0x37c   : > { %2683 = vadd.xlane.f32.xlu0 %v2682_v5 }
 0x37e   : > { %2846 = vadd.xlane.f32.xlu1 %v2845_v56 }
 0x380   : > { %2843 = vadd.xlane.f32.xlu0 %v2842_v7 }
 0x384   : > { %v7844_v12 = vpop.f32.mrf.mxu1 }
 0x385   : > { %v10061_v49 = vadd.f32 %v7844_v12, %v9835_v24 }
 0x386   : > { %v2269_v55 = vpop.f32.mrf.mxu1 }
 0x387   : > { %15006 = vst [vmem:[#allocation69_spill] sm:$0xff] %v10061_v49  ;;  %v10064_v2 = vadd.f32 %v9835_v24, %v2269_v55  ;;  %v2501_v51 = vmul.f32 %v10061_v49, %v10061_v49  ;;  %v2629_v45 = vmul.f32 %v8765_v18, %v10061_v49  ;;  %v2757_v42 = vsub.f32 %v8765_v18, %v10061_v49  ;;  %v8767_v18 = vld [vmem:[%s8909_s27 + $0x88] sm:$0xff] }
 0x389   : > { %15007 = vst [vmem:[#allocation70_spill] sm:$0xff] %v10064_v2  ;;  %v2563_v14 = vsel %vm487_vm0, %v2501_v51, 0.0  ;;  %v2500_v59 = vmul.f32 %v10064_v2, %v10064_v2  ;;  %v2628_v35 = vmul.f32 %v8766_v60, %v10064_v2  ;;  %v2756_v63 = vsub.f32 %v8766_v60, %v10064_v2  ;;  %v8768_v60 = vld [vmem:[%s8909_s27 + $0x80] sm:$0xff] }
 0x38a   : > { %2564 = vadd.xlane.f32.xlu1 %v2563_v14  ;;  %v2691_v50 = vsel %vm487_vm0, %v2629_v45, 0.0  ;;  %v2789_v33 = vmul.f32 %v2757_v42, %v2757_v42 }
 0x38b   : > { %v2560_v20 = vsel %vm487_vm0, %v2500_v59, 0.0  ;;  %v2688_v61 = vsel %vm487_vm0, %v2628_v35, 0.0  ;;  %v2788_v52 = vmul.f32 %v2756_v63, %v2756_v63 }
 0x38c   : > { %2561 = vadd.xlane.f32.xlu0 %v2560_v20  ;;  %v2851_v5 = vsel %vm487_vm0, %v2789_v33, 0.0 }
 0x38d   : > { %v2848_v6 = vsel %vm487_vm0, %v2788_v52, 0.0 }
 0x38e   : > { %2692 = vadd.xlane.f32.xlu1 %v2691_v50 }
 0x390   : > { %2689 = vadd.xlane.f32.xlu0 %v2688_v61 }
 0x392   : > { %2852 = vadd.xlane.f32.xlu1 %v2851_v5 }
 0x394   : > { %2849 = vadd.xlane.f32.xlu0 %v2848_v6 }
 0x398   : > { %v7847_v56 = vpop.f32.mrf.mxu1 }
 0x399   : > { %v10083_v7 = vadd.f32 %v7847_v56, %v9835_v24 }
 0x39a   : > { %v2279_v12 = vpop.f32.mrf.mxu1 }
 0x39b   : > { %15008 = vst [vmem:[#allocation71_spill] sm:$0xff] %v10083_v7  ;;  %v10086_v55 = vadd.f32 %v9835_v24, %v2279_v12  ;;  %v2503_v51 = vmul.f32 %v10083_v7, %v10083_v7  ;;  %v2631_v45 = vmul.f32 %v8767_v18, %v10083_v7  ;;  %v2759_v42 = vsub.f32 %v8767_v18, %v10083_v7  ;;  %v8774_v7 = vld [vmem:[%s8909_s27 + $0xb0] sm:$0xff] }
 0x39d   : > { %15009 = vst [vmem:[#allocation72_spill] sm:$0xff] %v10086_v55  ;;  %v2569_v14 = vsel %vm487_vm0, %v2503_v51, 0.0  ;;  %v2502_v59 = vmul.f32 %v10086_v55, %v10086_v55  ;;  %v2630_v35 = vmul.f32 %v8768_v60, %v10086_v55  ;;  %v2758_v63 = vsub.f32 %v8768_v60, %v10086_v55 }
 0x39e   : > { %2570 = vadd.xlane.f32.xlu1 %v2569_v14  ;;  %v2697_v50 = vsel %vm487_vm0, %v2631_v45, 0.0  ;;  %v2791_v33 = vmul.f32 %v2759_v42, %v2759_v42  ;;  %v8769_v42 = vld [vmem:[%s8909_s27 + $0x98] sm:$0xff] }
 0x39f   : > { %v2566_v20 = vsel %vm487_vm0, %v2502_v59, 0.0  ;;  %v2694_v61 = vsel %vm487_vm0, %v2630_v35, 0.0  ;;  %v2790_v52 = vmul.f32 %v2758_v63, %v2758_v63  ;;  %v8770_v63 = vld [vmem:[%s8909_s27 + $0x90] sm:$0xff] }
 0x3a0   : > { %2567 = vadd.xlane.f32.xlu0 %v2566_v20  ;;  %v2857_v5 = vsel %vm487_vm0, %v2791_v33, 0.0 }
 0x3a1   : > { %v2854_v6 = vsel %vm487_vm0, %v2790_v52, 0.0 }
 0x3a2   : > { %2698 = vadd.xlane.f32.xlu1 %v2697_v50 }
 0x3a4   : > { %2695 = vadd.xlane.f32.xlu0 %v2694_v61 }
 0x3a6   : > { %2858 = vadd.xlane.f32.xlu1 %v2857_v5 }
 0x3a8   : > { %2855 = vadd.xlane.f32.xlu0 %v2854_v6 }
 0x3ac   : > { %v7850_v56 = vpop.f32.mrf.mxu1 }
 0x3ad   : > { %v10105_v12 = vadd.f32 %v7850_v56, %v9835_v24 }
 0x3ae   : > { %v2289_v51 = vpop.f32.mrf.mxu1 }
 0x3af   : > { %15010 = vst [vmem:[#allocation73_spill] sm:$0xff] %v10105_v12  ;;  %v10108_v14 = vadd.f32 %v9835_v24, %v2289_v51  ;;  %v2505_v59 = vmul.f32 %v10105_v12, %v10105_v12  ;;  %v2633_v20 = vmul.f32 %v8769_v42, %v10105_v12  ;;  %v2761_v60 = vsub.f32 %v8769_v42, %v10105_v12  ;;  %v10129_v42 = vpop.xlane.xlu1 %2522 }
 0x3b1   : > { %15011 = vst [vmem:[#allocation74_spill] sm:$0xff] %v10108_v14  ;;  %v2575_v18 = vsel %vm487_vm0, %v2505_v59, 0.0  ;;  %v2504_v45 = vmul.f32 %v10108_v14, %v10108_v14  ;;  %v2632_v50 = vmul.f32 %v8770_v63, %v10108_v14  ;;  %v2760_v33 = vsub.f32 %v8770_v63, %v10108_v14 }
 0x3b2   : > { %2576 = vadd.xlane.f32.xlu1 %v2575_v18  ;;  %v2703_v61 = vsel %vm487_vm0, %v2633_v20, 0.0  ;;  %v2793_v52 = vmul.f32 %v2761_v60, %v2761_v60 }
 0x3b3   : > { %v2572_v35 = vsel %vm487_vm0, %v2504_v45, 0.0  ;;  %v2700_v5 = vsel %vm487_vm0, %v2632_v50, 0.0  ;;  %v2792_v6 = vmul.f32 %v2760_v33, %v2760_v33  ;;  %v8771_v33 = vld [vmem:[%s8909_s27 + $0xa8] sm:$0xff] }
 0x3b4   : > { %2573 = vadd.xlane.f32.xlu0 %v2572_v35  ;;  %v2863_v56 = vsel %vm487_vm0, %v2793_v52, 0.0  ;;  %v10136_v35 = vpop.xlane.xlu0 %2519 }
 0x3b5   : > { %v2860_v51 = vsel %vm487_vm0, %v2792_v6, 0.0  ;;  %v8772_v6 = vld [vmem:[%s8909_s27 + $0xa0] sm:$0xff] }
 0x3b6   : > { %2704 = vadd.xlane.f32.xlu1 %v2703_v61 }
 0x3b8   : > { %2701 = vadd.xlane.f32.xlu0 %v2700_v5  ;;  %v10151_v14 = vpop.xlane.xlu0 %2647 }
 0x3ba   : > { %2864 = vadd.xlane.f32.xlu1 %v2863_v56 }
 0x3bc   : > { %2861 = vadd.xlane.f32.xlu0 %v2860_v51 }
 0x3c0   : > { %v7853_v59 = vpop.f32.mrf.mxu1 }
 0x3c1   : > { %v10127_v18 = vadd.f32 %v7853_v59, %v9835_v24  ;;  %v10148_v59 = vpop.xlane.xlu1 %2650 }
 0x3c2   : > { %v2299_v45 = vpop.f32.mrf.mxu1 }
 0x3c3   : > { %15012 = vst [vmem:[#allocation75_spill] sm:$0xff] %v10127_v18  ;;  %v10132_v20 = vadd.f32 %v9835_v24, %v2299_v45  ;;  %v2507_v60 = vmul.f32 %v10127_v18, %v10127_v18  ;;  %v2635_v61 = vmul.f32 %v8771_v33, %v10127_v18  ;;  %v2763_v52 = vsub.f32 %v8771_v33, %v10127_v18 }
 0x3c5   : > { %15013 = vst [vmem:[#allocation76_spill] sm:$0xff] %v10132_v20  ;;  %v2581_v63 = vsel %vm487_vm0, %v2507_v60, 0.0  ;;  %v2506_v50 = vmul.f32 %v10132_v20, %v10132_v20  ;;  %v2634_v56 = vmul.f32 %v8772_v6, %v10132_v20  ;;  %v2762_v51 = vsub.f32 %v8772_v6, %v10132_v20  ;;  %v10158_v6 = vpop.xlane.xlu0 %2807  ;;  %v8773_v20 = vld [vmem:[%s8909_s27 + $0xb8] sm:$0xff] }
 0x3c6   : > { %2582 = vadd.xlane.f32.xlu1 %v2581_v63  ;;  %v2709_v45 = vsel %vm487_vm0, %v2635_v61, 0.0  ;;  %v2795_v60 = vmul.f32 %v2763_v52, %v2763_v52  ;;  %vm2904_vm6 = vcmp.eq.f32.partialorder %v10158_v6, inf  ;;  %vm2906_vm7 = vcmp.eq.f32.partialorder %v10158_v6, 0.0 }
 0x3c7   : > { %v2578_v5 = vsel %vm487_vm0, %v2506_v50, 0.0  ;;  %v2706_v12 = vsel %vm487_vm0, %v2634_v56, 0.0  ;;  %v2794_v33 = vmul.f32 %v2762_v51, %v2762_v51  ;;  %v10155_v50 = vpop.xlane.xlu1 %2810 }
 0x3c8   : > { %2579 = vadd.xlane.f32.xlu0 %v2578_v5  ;;  %v2869_v63 = vsel %vm487_vm0, %v2795_v60, 0.0  ;;  %8301 = vrsqrt.f32 %v10155_v50  ;;  %vm2911_vm2 = vcmp.eq.f32.partialorder %v10155_v50, inf  ;;  %vm2913_vm3 = vcmp.eq.f32.partialorder %v10155_v50, 0.0 }
 0x3c9   : > { %v2866_v5 = vsel %vm487_vm0, %v2794_v33, 0.0 }
 0x3ca   : > { %2710 = vadd.xlane.f32.xlu1 %v2709_v45  ;;  %v10162_v45 = vpop.xlane.xlu0 %2525 }
 0x3cb   : > { %v10160_v61 = vpop.xlane.xlu1 %2528 }
 0x3cc   : > { %2707 = vadd.xlane.f32.xlu0 %v2706_v12 }
 0x3ce   : > { %2870 = vadd.xlane.f32.xlu1 %v2869_v63  ;;  %v10180_v55 = vpop.xlane.xlu0 %2653 }
 0x3cf   : > { %v10172_v33 = vpop.xlane.xlu1 %2656 }
 0x3d0   : > { %2867 = vadd.xlane.f32.xlu0 %v2866_v5 }
 0x3d3   : > { %v10187_v57 = vpop.xlane.xlu1 %2816 }
 0x3d4   : > { %v7856_v52 = vpop.f32.mrf.mxu1  ;;  %vm2925_vm8 = vcmp.eq.f32.partialorder %v10187_v57, inf  ;;  %vm2927_vm9 = vcmp.eq.f32.partialorder %v10187_v57, 0.0 }
 0x3d5   : > { %v10165_v56 = vadd.f32 %v7856_v52, %v9835_v24 }
 0x3d6   : > { %v2309_v12 = vpop.f32.mrf.mxu1 }
 0x3d7   : > { %15014 = vst [vmem:[#allocation77_spill] sm:$0xff] %v10165_v56  ;;  %v10168_v51 = vadd.f32 %v9835_v24, %v2309_v12  ;;  %v2509_v60 = vmul.f32 %v10165_v56, %v10165_v56  ;;  %v2637_v18 = vmul.f32 %v8773_v20, %v10165_v56  ;;  %v2765_v52 = vsub.f32 %v8773_v20, %v10165_v56  ;;  %v10193_v56 = vpop.xlane.xlu1 %2534 }
 0x3d9   : > { %15015 = vst [vmem:[#allocation78_spill] sm:$0xff] %v10168_v51  ;;  %v2587_v63 = vsel %vm487_vm0, %v2509_v60, 0.0  ;;  %v2508_v5 = vmul.f32 %v10168_v51, %v10168_v51  ;;  %v2636_v2 = vmul.f32 %v8774_v7, %v10168_v51  ;;  %v2764_v49 = vsub.f32 %v8774_v7, %v10168_v51 }
 0x3da   : > { %2588 = vadd.xlane.f32.xlu1 %v2587_v63  ;;  %v2715_v60 = vsel %vm487_vm0, %v2637_v18, 0.0  ;;  %v2797_v3 = vmul.f32 %v2765_v52, %v2765_v52  ;;  %v10190_v63 = vpop.xlane.xlu0 %2813 }
 0x3db   : > { %v2584_v12 = vsel %vm487_vm0, %v2508_v5, 0.0  ;;  %v2712_v16 = vsel %vm487_vm0, %v2636_v2, 0.0  ;;  %v2796_v20 = vmul.f32 %v2764_v49, %v2764_v49  ;;  %vm2918_vm11 = vcmp.eq.f32.partialorder %v10190_v63, inf }
 0x3dc   : > { %2585 = vadd.xlane.f32.xlu0 %v2584_v12  ;;  %v2875_v5 = vsel %vm487_vm0, %v2797_v3, 0.0  ;;  %v10198_v12 = vpop.xlane.xlu1 %2662  ;;  %vm2920_vm13 = vcmp.eq.f32.partialorder %v10190_v63, 0.0 }
 0x3dd   : > { %v2872_v7 = vsel %vm487_vm0, %v2796_v20, 0.0 }
 0x3de   : > { %2716 = vadd.xlane.f32.xlu1 %v2715_v60  ;;  %v10196_v18 = vpop.xlane.xlu0 %2531 }
 0x3e0   : > { %2713 = vadd.xlane.f32.xlu0 %v2712_v16  ;;  %v10216_v30 = vpop.xlane.xlu1 %2822 }
 0x3e1   : > { %vm2939_vm10 = vcmp.eq.f32.partialorder %v10216_v30, inf  ;;  %vm2941_vm12 = vcmp.eq.f32.partialorder %v10216_v30, 0.0 }
 0x3e2   : > { %2876 = vadd.xlane.f32.xlu1 %v2875_v5  ;;  %v10203_v2 = vpop.xlane.xlu0 %2659 }
 0x3e4   : > { %2873 = vadd.xlane.f32.xlu0 %v2872_v7  ;;  %v8775_v7 = vld [vmem:[%s8909_s27 + $0xc8] sm:$0xff]  ;;  %v10225_v47 = vpop.xlane.xlu1 %2540 }
 0x3e8   : > { %v7859_v52 = vpop.f32.mrf.mxu1 }
 0x3e9   : > { %v10201_v49 = vadd.f32 %v7859_v52, %v9835_v24 }
 0x3ea   : > { %v2319_v16 = vpop.f32.mrf.mxu1 }
 0x3eb   : > { %15016 = vst [vmem:[#allocation79_spill] sm:$0xff] %v10201_v49  ;;  %v10206_v3 = vadd.f32 %v9835_v24, %v2319_v16  ;;  %v2511_v60 = vmul.f32 %v10201_v49, %v10201_v49  ;;  %v2639_v51 = vmul.f32 %v8775_v7, %v10201_v49  ;;  %v2767_v52 = vsub.f32 %v8775_v7, %v10201_v49  ;;  %v8776_v16 = vld [vmem:[%s8909_s27 + $0xc0] sm:$0xff] }
 0x3ed   : > { %15017 = vst [vmem:[#allocation80_spill] sm:$0xff] %v10206_v3  ;;  %v2593_v20 = vsel %vm487_vm0, %v2511_v60, 0.0  ;;  %v2510_v5 = vmul.f32 %v10206_v3, %v10206_v3  ;;  %v2638_v10 = vmul.f32 %v8776_v16, %v10206_v3  ;;  %v2766_v9 = vsub.f32 %v8776_v16, %v10206_v3  ;;  %v10222_v60 = vpop.xlane.xlu0 %2819  ;;  %v10232_v16 = vpop.xlane.xlu1 %2668  ;;  %v8777_v3 = vld [vmem:[%s8909_s27 + $0xd8] sm:$0xff] }
 0x3ee   : > { %2594 = vadd.xlane.f32.xlu1 %v2593_v20  ;;  %v2721_v46 = vsel %vm487_vm0, %v2639_v51, 0.0  ;;  %v2799_v19 = vmul.f32 %v2767_v52, %v2767_v52  ;;  %vm2932_vm14 = vcmp.eq.f32.partialorder %v10222_v60, inf  ;;  %vm2934_vm15 = vcmp.eq.f32.partialorder %v10222_v60, 0.0 }
 0x3ef   : > { %v2590_v53 = vsel %vm487_vm0, %v2510_v5, 0.0  ;;  %v2718_v20 = vsel %vm487_vm0, %v2638_v10, 0.0  ;;  %v2798_v7 = vmul.f32 %v2766_v9, %v2766_v9 }
 0x3f0   : > { %2591 = vadd.xlane.f32.xlu0 %v2590_v53  ;;  %v2881_v5 = vsel %vm487_vm0, %v2799_v19, 0.0 }
 0x3f1   : > { %v10228_v49 = vpop.xlane.xlu0 %2537  ;;  %v2878_v53 = vsel %vm487_vm0, %v2798_v7, 0.0  ;;  %v10239_v10 = vpop.xlane.xlu1 %2828 }
 0x3f2   : > { %2722 = vadd.xlane.f32.xlu1 %v2721_v46  ;;  %vm2955_vm1 = vcmp.eq.f32.partialorder %v10239_v10, 0.0 }
 0x3f4   : > { %2719 = vadd.xlane.f32.xlu0 %v2718_v20 }
 0x3f5   : > { %v10234_v51 = vpop.xlane.xlu0 %2665  ;;  %v10254_v37 = vpop.xlane.xlu1 %2546 }
 0x3f6   : > { %2882 = vadd.xlane.f32.xlu1 %v2881_v5 }
 0x3f8   : > { %2879 = vadd.xlane.f32.xlu0 %v2878_v53 }
 0x3f9   : > { %v10246_v7 = vpop.xlane.xlu0 %2825 }
 0x3fc   : > { %v7862_v46 = vpop.f32.mrf.mxu1 }
 0x3fd   : > { %v10237_v52 = vadd.f32 %v7862_v46, %v9835_v24 }
 0x3fe   : > { %v2329_v9 = vpop.f32.mrf.mxu1 }
 0x3ff   : > { %15018 = vst [vmem:[#allocation81_spill] sm:$0xff] %v10237_v52  ;;  %v10242_v20 = vadd.f32 %v9835_v24, %v2329_v9  ;;  %v2513_v19 = vmul.f32 %v10237_v52, %v10237_v52  ;;  %v2641_v46 = vmul.f32 %v8777_v3, %v10237_v52  ;;  %v2769_v4 = vsub.f32 %v8777_v3, %v10237_v52  ;;  %v8778_v9 = vld [vmem:[%s8909_s27 + $0xd0] sm:$0xff] }
 0x401   : > { %15019 = vst [vmem:[#allocation82_spill] sm:$0xff] %v10242_v20  ;;  %v2599_v5 = vsel %vm487_vm0, %v2513_v19, 0.0  ;;  %v2512_v53 = vmul.f32 %v10242_v20, %v10242_v20  ;;  %v2640_v0 = vmul.f32 %v8778_v9, %v10242_v20  ;;  %v2768_v44 = vsub.f32 %v8778_v9, %v10242_v20  ;;  %v10260_v19 = vpop.xlane.xlu0 %2543 }
 0x402   : > { %2600 = vadd.xlane.f32.xlu1 %v2599_v5  ;;  %15020 = vst [vmem:[#allocation83_spill] sm:$0xff] %v10260_v19  ;;  %v2727_v58 = vsel %vm487_vm0, %v2641_v46, 0.0  ;;  %v2801_v36 = vmul.f32 %v2769_v4, %v2769_v4  ;;  %v10264_v5 = vpop.xlane.xlu1 %2674 }
 0x403   : > { %v2596_v24 = vsel %vm487_vm0, %v2512_v53, 0.0  ;;  %v2724_v54 = vsel %vm487_vm0, %v2640_v0, 0.0  ;;  %v2800_v3 = vmul.f32 %v2768_v44, %v2768_v44  ;;  %15021 = vst [vmem:[#allocation84_spill] sm:$0xff] %v10264_v5  ;;  %v8779_v44 = vld [vmem:[%s14772_s8] ss:$0 sm:$0xff] }
 0x404   : > { %2597 = vadd.xlane.f32.xlu0 %v2596_v24  ;;  %v2887_v53 = vsel %vm487_vm0, %v2801_v36, 0.0 }
 0x405   : > { %v10267_v52 = vpop.xlane.xlu0 %2671  ;;  %v2884_v24 = vsel %vm487_vm0, %v2800_v3, 0.0 }
 0x406   : > { %2728 = vadd.xlane.f32.xlu1 %v2727_v58  ;;  %15022 = vst [vmem:[#allocation85_spill] sm:$0xff] %v10267_v52  ;;  %v10270_v9 = vpop.xlane.xlu1 %2834  ;;  %v8780_v52 = vld [vmem:[%s8909_s27 + $0xe8] sm:$0xff] }
 0x408   : > { %2725 = vadd.xlane.f32.xlu0 %v2724_v54 }
 0x409   : > { %v10272_v58 = vpop.xlane.xlu0 %2831 }
 0x40a   : > { %2888 = vadd.xlane.f32.xlu1 %v2887_v53  ;;  %v10279_v0 = vpop.xlane.xlu1 %2552 }
 0x40b   : > { %15024 = vst [vmem:[#allocation87_spill] sm:$0xff] %v10279_v0 }
 0x40c   : > { %2885 = vadd.xlane.f32.xlu0 %v2884_v24 }
 0x40d   : > { %v10285_v53 = vpop.xlane.xlu0 %2549 }
 0x40e   : > { %15026 = vst [vmem:[#allocation89_spill] sm:$0xff] %v10285_v53  ;;  %v10297_v53 = vpop.xlane.xlu1 %2680 }
 0x40f   : > { %15027 = vst [vmem:[#allocation90_spill] sm:$0xff] %v10297_v53 }
 0x410   : > { %v7865_v46 = vpop.f32.mrf.mxu1 }
 0x411   : > { %v10277_v54 = vadd.f32 %v8779_v44, %v7865_v46  ;;  %v10300_v34 = vpop.xlane.xlu0 %2677 }
 0x412   : > { %v2339_v36 = vpop.f32.mrf.mxu1  ;;  %15028 = vst [vmem:[#allocation91_spill] sm:$0xff] %v10300_v34 }
 0x413   : > { %15023 = vst [vmem:[#allocation86_spill] sm:$0xff] %v10277_v54  ;;  %v10281_v4 = vadd.f32 %v8779_v44, %v2339_v36  ;;  %v2515_v3 = vmul.f32 %v10277_v54, %v10277_v54  ;;  %v2643_v41 = vmul.f32 %v8780_v52, %v10277_v54  ;;  %v2771_v46 = vsub.f32 %v8780_v52, %v10277_v54  ;;  %v8781_v36 = vld [vmem:[%s8909_s27 + $0xe0] sm:$0xff]  ;;  %v8782_v54 = vld [vmem:[%s8909_s27 + $0xf8] sm:$0xff] }
 0x415   : > { %15025 = vst [vmem:[#allocation88_spill] sm:$0xff] %v10281_v4  ;;  %v2605_v24 = vsel %vm487_vm0, %v2515_v3, 0.0  ;;  %v2514_v20 = vmul.f32 %v10281_v4, %v10281_v4  ;;  %v2642_v48 = vmul.f32 %v8781_v36, %v10281_v4  ;;  %v2770_v5 = vsub.f32 %v8781_v36, %v10281_v4 }
 0x416   : > { %2606 = vadd.xlane.f32.xlu1 %v2605_v24  ;;  %v2733_v3 = vsel %vm487_vm0, %v2643_v41, 0.0  ;;  %v2803_v19 = vmul.f32 %v2771_v46, %v2771_v46  ;;  %v10304_v24 = vpop.xlane.xlu1 %2840  ;;  %v10308_v41 = vpop.xlane.xlu0 %2837 }
 0x417   : > { %v2602_v0 = vsel %vm487_vm0, %v2514_v20, 0.0  ;;  %v2730_v43 = vsel %vm487_vm0, %v2642_v48, 0.0  ;;  %v2802_v52 = vmul.f32 %v2770_v5, %v2770_v5  ;;  %15029 = vst [vmem:[#allocation92_spill] sm:$0xff] %v10304_v24  ;;  %15030 = vst [vmem:[#allocation93_spill] sm:$0xff] %v10308_v41 }
 0x418   : > { %2603 = vadd.xlane.f32.xlu0 %v2602_v0  ;;  %v2893_v20 = vsel %vm487_vm0, %v2803_v19, 0.0 }
 0x419   : > { %v2890_v0 = vsel %vm487_vm0, %v2802_v52, 0.0  ;;  %v3319_v52 = vmax.f32 %v9283_v22, 1e-20 }
 0x41a   : > { %2734 = vadd.xlane.f32.xlu1 %v2733_v3  ;;  %v10310_v46 = vpop.xlane.xlu1 %2558  ;;  %v10312_v3 = vpop.xlane.xlu0 %2555 }
 0x41b   : > { %15031 = vst [vmem:[#allocation94_spill] sm:$0xff] %v10310_v46  ;;  %15032 = vst [vmem:[#allocation95_spill] sm:$0xff] %v10312_v3  ;;  %8303 = vrsqrt.f32 %v3319_v52 }
 0x41c   : > { %2731 = vadd.xlane.f32.xlu0 %v2730_v43 }
 0x41e   : > { %2894 = vadd.xlane.f32.xlu1 %v2893_v20  ;;  %v10321_v20 = vpop.xlane.xlu1 %2686  ;;  %v10331_v34 = vpop.xlane.xlu0 %2683 }
 0x41f   : > { %15035 = vst [vmem:[#allocation98_spill] sm:$0xff] %v10321_v20  ;;  %v8783_v20 = vld [vmem:[%s8909_s27 + $0xf0] sm:$0xff] }
 0x420   : > { %2891 = vadd.xlane.f32.xlu0 %v2890_v0 }
 0x424   : > { %v7868_v36 = vpop.f32.mrf.mxu1 }
 0x425   : > { %v10314_v48 = vadd.f32 %v8779_v44, %v7868_v36 }
 0x426   : > { %v2349_v43 = vpop.f32.mrf.mxu1 }
 0x427   : > { %15033 = vst [vmem:[#allocation96_spill] sm:$0xff] %v10314_v48  ;;  %v10316_v19 = vadd.f32 %v8779_v44, %v2349_v43  ;;  %v2517_v5 = vmul.f32 %v10314_v48, %v10314_v48  ;;  %v2645_v36 = vmul.f32 %v8782_v54, %v10314_v48  ;;  %v2773_v3 = vsub.f32 %v8782_v54, %v10314_v48  ;;  %v8302_v54 = vpop.eup %8301 }
 0x428   : > { %v3127_v44 = vmax.f32 %v9283_v22, 1e-16  ;;  %v3223_v43 = vmax.f32 %v10129_v42, 1e-16  ;;  %v10338_v22 = vpop.xlane.xlu1 %2846 }
 0x429   : > { %15034 = vst [vmem:[#allocation97_spill] sm:$0xff] %v10316_v19  ;;  %v2611_v0 = vsel %vm487_vm0, %v2517_v5, 0.0  ;;  %v2516_v4 = vmul.f32 %v10316_v19, %v10316_v19  ;;  %v2644_v5 = vmul.f32 %v8783_v20, %v10316_v19  ;;  %v2772_v53 = vsub.f32 %v8783_v20, %v10316_v19  ;;  %v10343_v20 = vpop.xlane.xlu0 %2843 }
 0x42a   : > { %2612 = vadd.xlane.f32.xlu1 %v2611_v0  ;;  %v2739_v41 = vsel %vm487_vm0, %v2645_v36, 0.0  ;;  %v2805_v24 = vmul.f32 %v2773_v3, %v2773_v3  ;;  %8305 = vrsqrt.f32 %v3127_v44  ;;  %v2914_v36 = vand.u32 2147483648, %v10155_v50 }
 0x42b   : > { %v2608_v46 = vsel %vm487_vm0, %v2516_v4, 0.0  ;;  %8307 = vrsqrt.f32 %v3223_v43  ;;  %v2736_v42 = vsel %vm487_vm0, %v2644_v5, 0.0  ;;  %v2804_v0 = vmul.f32 %v2772_v53, %v2772_v53 }
 0x42c   : > { %2609 = vadd.xlane.f32.xlu0 %v2608_v46  ;;  %8309 = vrsqrt.f32 %v10158_v6  ;;  %v2910_v4 = vmul.f32 %v8302_v54, %v10155_v50  ;;  %v2899_v46 = vsel %vm487_vm0, %v2805_v24, 0.0  ;;  %v10346_v3 = vpop.xlane.xlu1 %2564  ;;  %v3318_v44 = vmax.f32 %v9285_v23, 1e-20  ;;  %v8304_v54 = vpop.eup %8303 }
 0x42d   : > { %v10351_v53 = vpop.xlane.xlu0 %2561  ;;  %v3126_v24 = vmax.f32 %v9285_v23, 1e-16 }
 0x42e   : > { %2740 = vadd.xlane.f32.xlu1 %v2739_v41  ;;  %v2896_v41 = vsel %vm487_vm0, %v2804_v0, 0.0  ;;  %v2912_v52 = vsel %vm2911_vm2, %v10155_v50, %v2910_v4  ;;  %8311 = vrsqrt.f32 %v3318_v44  ;;  %vm2953_vm0 = vcmp.eq.f32.partialorder %v10239_v10, inf }
 0x42f   : > { %v2915_v43 = vsel %vm2913_vm3, %v2914_v36, %v2912_v52  ;;  %8313 = vrsqrt.f32 %v3126_v24  ;;  %v2907_v24 = vand.u32 2147483648, %v10158_v6  ;;  %vm2946_vm2 = vcmp.eq.f32.partialorder %v10246_v7, inf }
 0x430   : > { %2737 = vadd.xlane.f32.xlu0 %v2736_v42  ;;  %v10357_v5 = vpop.xlane.xlu1 %2692  ;;  %v3222_v42 = vmax.f32 %v10136_v35, 1e-16  ;;  %v3383_v4 = vmul.f32 %v8304_v54, %v2915_v43  ;;  %vm2948_vm3 = vcmp.eq.f32.partialorder %v10246_v7, 0.0 }
 0x432   : > { %2900 = vadd.xlane.f32.xlu1 %v2899_v46  ;;  %v10360_v46 = vpop.xlane.xlu0 %2689  ;;  %8315 = vrsqrt.f32 %v3222_v42  ;;  %v3416_v52 = vsel %vm3414_vm4, %v9244_v11, %v3383_v4 }
 0x433   : > { %8317 = vrsqrt.f32 %v10187_v57 }
 0x434   : > { %2897 = vadd.xlane.f32.xlu0 %v2896_v41  ;;  %v10364_v23 = vpop.xlane.xlu1 %2852 }
 0x436   : > { %v10369_v48 = vpop.xlane.xlu0 %2849 }
 0x437   : > { %v8306_v0 = vpop.eup %8305 }
 0x438   : > { %v8308_v41 = vpop.eup %8307  ;;  %v3191_v50 = vmul.f32 %v8306_v0, %v10148_v59  ;;  %v10375_v59 = vpop.xlane.xlu1 %2570  ;;  %v3129_v0 = vmax.f32 %v9296_v27, 1e-16 }
 0x439   : > { %v8310_v19 = vpop.eup %8309 }
 0x43a   : > { %v3287_v35 = vmul.f32 %v8308_v41, %v3191_v50  ;;  %v2903_v36 = vmul.f32 %v8310_v19, %v10158_v6  ;;  %v10380_v11 = vpop.xlane.xlu0 %2567  ;;  %v3321_v19 = vmax.f32 %v9296_v27, 1e-20  ;;  %v3225_v50 = vmax.f32 %v10160_v61, 1e-16 }
 0x43b   : > { %v8312_v42 = vpop.eup %8311 }
 0x43c   : > { %v10372_v44 = vsel %vm3447_vm5, %v3416_v52, %v3287_v35  ;;  %v2905_v43 = vsel %vm2904_vm6, %v10158_v6, %v2903_v36  ;;  %v10387_v4 = vpop.xlane.xlu1 %2698  ;;  %v8314_v41 = vpop.eup %8313  ;;  %8319 = vrsqrt.f32 %v3321_v19  ;;  %vm2967_vm6 = vcmp.eq.f32.partialorder %v10270_v9, inf }
 0x43d   : > { %15036 = vst [vmem:[#allocation99_spill] sm:$0xff] %v10372_v44  ;;  %v2908_v54 = vsel %vm2906_vm7, %v2907_v24, %v2905_v43  ;;  %v14878_v43 = vmov 4   ;;  %8321 = vrsqrt.f32 %v3129_v0  ;;  %v3190_v24 = vmul.f32 %v8314_v41, %v10151_v14 }
 0x43e   : > { %v3382_v52 = vmul.f32 %v8312_v42, %v2908_v54  ;;  %v10391_v6 = vpop.xlane.xlu0 %2695  ;;  %8323 = vrsqrt.f32 %v3225_v50  ;;  %v14880_v41 = vmov 5   ;;  %v2928_v50 = vand.u32 2147483648, %v10187_v57 }
 0x43f   : > { %v8316_v35 = vpop.eup %8315  ;;  %8325 = vrsqrt.f32 %v10216_v30  ;;  %vm2969_vm7 = vcmp.eq.f32.partialorder %v10270_v9, 0.0 }
 0x440   : > { %v8318_v36 = vpop.eup %8317  ;;  %v3415_v27 = vsel %vm3414_vm4, %v9253_v15, %v3382_v52  ;;  %v3286_v61 = vmul.f32 %v8316_v35, %v3190_v24  ;;  %v10400_v54 = vpop.xlane.xlu1 %2858  ;;  %8327 = vrsqrt.f32 %v10190_v63  ;;  %v3323_v24 = vmax.f32 %v9306_v29, 1e-20 }
 0x441   : > { %v2924_v19 = vmul.f32 %v8318_v36, %v10187_v57  ;;  %8329 = vrsqrt.f32 %v10222_v60 }
 0x442   : > { %v10404_v42 = vpop.xlane.xlu0 %2855  ;;  %v10408_v14 = vsel %vm3447_vm5, %v3415_v27, %v3286_v61  ;;  %v3320_v27 = vmax.f32 %v9294_v26, 1e-20  ;;  %8331 = vrsqrt.f32 %v3323_v24 }
 0x443   : > { %3488 = vperm.xlu1 %8021, %v10372_v44   ;;  %15037 = vst [vmem:[#allocation100_spill] sm:$0xff] %v10408_v14  ;;  %v2926_v15 = vsel %vm2925_vm8, %v10187_v57, %v2924_v19  ;;  %vm2960_vm8 = vcmp.eq.f32.partialorder %v10272_v58, inf }
 0x444   : > { %v10414_v0 = vpop.xlane.xlu1 %2576  ;;  %v2929_v35 = vsel %vm2927_vm9, %v2928_v50, %v2926_v15  ;;  %v3227_v50 = vmax.f32 %v10193_v56, 1e-16  ;;  %8333 = vrsqrt.f32 %v3320_v27  ;;  %v3224_v56 = vmax.f32 %v10162_v45, 1e-16 }
 0x445   : > { %v15042_v45 = vmov 4   ;;  %vm2962_vm9 = vcmp.eq.f32.partialorder %v10272_v58, 0.0 }
 0x446   : > { %v10420_v52 = vpop.xlane.xlu0 %2573 }
 0x447   : > { %8023 = vset.pattern.permute.xlu1 %v14975_v8  ;;  %15038 = vst [vmem:[#allocation101_spill] sm:$0xff] %v10420_v52 }
 0x448   : > { %3878 = vperm.xlu1 %8023, %v10372_v44   ;;  %v10427_v61 = vpop.xlane.xlu1 %2704 }
 0x449   : > { %v8320_v36 = vpop.eup %8319  ;;  %15039 = vst [vmem:[#allocation102_spill] sm:$0xff] %v10427_v61 }
 0x44a   : > { %3682 = vperm.xlu0 %8022, %v10372_v44   ;;  %v3385_v19 = vmul.f32 %v8320_v36, %v2929_v35  ;;  %v8322_v57 = vpop.eup %8321  ;;  %v3128_v35 = vmax.f32 %v9294_v26, 1e-16 }
 0x44b   : > { %v8324_v15 = vpop.eup %8323  ;;  %v3193_v52 = vmul.f32 %v8322_v57, %v10172_v33 }
 0x44c   : > { %8025 = vset.pattern.permute.xlu1 %v14878_v43  ;;  %v3131_v43 = vmax.f32 %v9306_v29, 1e-16  ;;  %v8326_v61 = vpop.eup %8325  ;;  %v3418_v29 = vsel %vm3414_vm4, %v9260_v17, %v3385_v19  ;;  %v10444_v24 = vpop.xlane.xlu1 %2864  ;;  %v3322_v17 = vmax.f32 %v9304_v28, 1e-20  ;;  %v3226_v19 = vmax.f32 %v10196_v18, 1e-16 }
 0x44d   : > { %4270 = vperm.xlu1 %8025, %v10372_v44   ;;  %v3289_v36 = vmul.f32 %v8324_v15, %v3193_v52  ;;  %v8328_v33 = vpop.eup %8327  ;;  %v2938_v57 = vmul.f32 %v8326_v61, %v10216_v30 }
 0x44e   : > { %8024 = vset.pattern.permute.xlu0 %v14972_v1  ;;  %8335 = vrsqrt.f32 %v3131_v43  ;;  %v3130_v43 = vmax.f32 %v9304_v28, 1e-16  ;;  %v2917_v52 = vmul.f32 %v8328_v33, %v10190_v63  ;;  %v8330_v28 = vpop.eup %8329 }
 0x44f   : > { %4074 = vperm.xlu0 %8024, %v10372_v44   ;;  %8337 = vrsqrt.f32 %v3227_v50  ;;  %v10449_v26 = vsel %vm3447_vm5, %v3418_v29, %v3289_v36  ;;  %v2940_v15 = vsel %vm2939_vm10, %v10216_v30, %v2938_v57  ;;  %v2942_v50 = vand.u32 2147483648, %v10216_v30  ;;  %v8332_v36 = vpop.eup %8331 }
 0x450   : > { %15041 = vst [vmem:[#allocation103_spill] sm:$0xff] %v10449_v26  ;;  %8339 = vrsqrt.f32 %v3128_v35  ;;  %v10459_v61 = vpop.xlane.xlu1 %2582  ;;  %v2919_v29 = vsel %vm2918_vm11, %v10190_v63, %v2917_v52 }
 0x451   : > { %8028 = vset.pattern.permute.xlu1 %v14971_v13  ;;  %8341 = vrsqrt.f32 %v3224_v56  ;;  %v2943_v18 = vsel %vm2941_vm12, %v2942_v50, %v2940_v15  ;;  %v2921_v56 = vand.u32 2147483648, %v10190_v63  ;;  %v8334_v33 = vpop.eup %8333 }
 0x452   : > { %3678 = vperm.xlu1 %8028, %v10408_v14   ;;  %8343 = vrsqrt.f32 %v3322_v17  ;;  %v2931_v17 = vmul.f32 %v8330_v28, %v10222_v60 }
 0x453   : > { %8026 = vset.pattern.permute.xlu0 %v14880_v41  ;;  %v10433_v41 = vpop.xlane.xlu0 %2701  ;;  %8345 = vrsqrt.f32 %v3130_v43  ;;  %v2922_v57 = vsel %vm2920_vm13, %v2921_v56, %v2919_v29  ;;  %v3387_v43 = vmul.f32 %v8332_v36, %v2943_v18 }
 0x454   : > { %4466 = vperm.xlu0 %8026, %v10372_v44   ;;  %v15040_v44 = vmov 5   ;;  %8347 = vrsqrt.f32 %v3226_v19  ;;  %v10477_v30 = vpop.xlane.xlu1 %2710  ;;  %v3384_v50 = vmul.f32 %v8334_v33, %v2922_v57  ;;  %v2933_v28 = vsel %vm2932_vm14, %v10222_v60, %v2931_v17 }
 0x455   : > { %8349 = vrsqrt.f32 %v10239_v10  ;;  %v3420_v18 = vsel %vm3414_vm4, %v9292_v25, %v3387_v43  ;;  %v3325_v33 = vmax.f32 %v9319_v38, 1e-20  ;;  %vm2995_vm14 = vcmp.eq.f32.partialorder %v10338_v22, inf }
 0x456   : > { %8030 = vset.pattern.permute.xlu1 %v14972_v1  ;;  %v3417_v43 = vsel %vm3414_vm4, %v9277_v21, %v3384_v50  ;;  %8351 = vrsqrt.f32 %v10246_v7 }
 0x457   : > { %4070 = vperm.xlu1 %8030, %v10408_v14   ;;  %v10451_v27 = vpop.xlane.xlu0 %2861  ;;  %8353 = vrsqrt.f32 %v3325_v33  ;;  %v3324_v33 = vmax.f32 %v9317_v32, 1e-20 }
 0x458   : > { %8027 = vset.pattern.permute.xlu0 %v14974_v62 }
 0x459   : > { %3483 = vperm.xlu0 %8027, %v10408_v14  }
 0x45b   : > { %8032 = vset.pattern.permute.xlu1 %v15040_v44  ;;  %v10465_v35 = vpop.xlane.xlu0 %2579  ;;  %v8336_v52 = vpop.eup %8335 }
 0x45c   : > { %4462 = vperm.xlu1 %8032, %v10408_v14   ;;  %v8338_v19 = vpop.eup %8337  ;;  %v3195_v63 = vmul.f32 %v8336_v52, %v10198_v12 }
 0x45d   : > { %8029 = vset.pattern.permute.xlu0 %v14975_v8  ;;  %v8340_v29 = vpop.eup %8339 }
 0x45e   : > { %3874 = vperm.xlu0 %8029, %v10408_v14   ;;  %v8342_v56 = vpop.eup %8341  ;;  %v3291_v36 = vmul.f32 %v8338_v19, %v3195_v63  ;;  %v3192_v12 = vmul.f32 %v8340_v29, %v10180_v55  ;;  %v3229_v63 = vmax.f32 %v10225_v47, 1e-16 }
 0x45f   : > { %v10481_v15 = vpop.xlane.xlu0 %2707  ;;  %v8344_v55 = vpop.eup %8343 }
 0x460   : > { %8033 = vset.pattern.permute.xlu1 %v14974_v62  ;;  %15043 = vst [vmem:[#allocation104_spill] sm:$0xff] %v10481_v15  ;;  %v10492_v15 = vpop.xlane.xlu1 %2870  ;;  %v10503_v25 = vsel %vm3447_vm5, %v3420_v18, %v3291_v36  ;;  %v3288_v52 = vmul.f32 %v8342_v56, %v3192_v12 }
 0x461   : > { %3498 = vperm.xlu1 %8033, %v10449_v26   ;;  %15044 = vst [vmem:[#allocation105_spill] sm:$0xff] %v10503_v25 }
 0x462   : > { %8031 = vset.pattern.permute.xlu0 %v15042_v45  ;;  %v10515_v29 = vsel %vm3447_vm5, %v3417_v43, %v3288_v52  ;;  %v3228_v43 = vmax.f32 %v10228_v49, 1e-16 }
 0x463   : > { %4266 = vperm.xlu0 %8031, %v10408_v14   ;;  %v2935_v14 = vand.u32 2147483648, %v10222_v60  ;;  %v10499_v17 = vpop.xlane.xlu0 %2867  ;;  %v3133_v60 = vmax.f32 %v9319_v38, 1e-16  ;;  %15045 = vst [vmem:[#allocation106_spill] sm:$0xff] %v10515_v29 }
 0x464   : > { %v10510_v19 = vpop.xlane.xlu1 %2588 }
 0x465   : > { %8034 = vset.pattern.permute.xlu1 %v14971_v13  ;;  %v2936_v57 = vsel %vm2934_vm15, %v2935_v14, %v2933_v28  ;;  %v8346_v14 = vpop.eup %8345  ;;  %8355 = vrsqrt.f32 %v3133_v60  ;;  %vm2997_vm15 = vcmp.eq.f32.partialorder %v10338_v22, 0.0 }
 0x466   : > { %3690 = vperm.xlu1 %8034, %v10449_v26   ;;  %v3386_v28 = vmul.f32 %v8344_v55, %v2936_v57  ;;  %v8348_v21 = vpop.eup %8347  ;;  %v3194_v18 = vmul.f32 %v8346_v14, %v10203_v2  ;;  %8357 = vrsqrt.f32 %v3229_v63  ;;  %v2956_v55 = vand.u32 2147483648, %v10239_v10 }
 0x467   : > { %8035 = vset.pattern.permute.xlu0 %v14975_v8  ;;  %v10517_v50 = vpop.xlane.xlu0 %2585  ;;  %v8350_v38 = vpop.eup %8349  ;;  %8359 = vrsqrt.f32 %v3324_v33 }
 0x468   : > { %3886 = vperm.xlu0 %8035, %v10449_v26   ;;  %v3419_v47 = vsel %vm3414_vm4, %v9311_v31, %v3386_v28  ;;  %v3290_v56 = vmul.f32 %v8348_v21, %v3194_v18  ;;  %v2952_v36 = vmul.f32 %v8350_v38, %v10239_v10  ;;  %v10526_v12 = vpop.xlane.xlu1 %2716  ;;  %v3132_v31 = vmax.f32 %v9317_v32, 1e-16  ;;  %v8352_v32 = vpop.eup %8351 }
 0x469   : > { %v8354_v63 = vpop.eup %8353  ;;  %v2945_v28 = vmul.f32 %v8352_v32, %v10246_v7 }
 0x46a   : > { %8036 = vset.pattern.permute.xlu1 %v14972_v1  ;;  %v10535_v2 = vsel %vm3447_vm5, %v3419_v47, %v3290_v56  ;;  %v2954_v52 = vsel %vm2953_vm0, %v10239_v10, %v2952_v36  ;;  %8361 = vrsqrt.f32 %v3132_v31  ;;  %vm2988_vm0 = vcmp.eq.f32.partialorder %v10343_v20, inf }
 0x46b   : > { %4082 = vperm.xlu1 %8036, %v10449_v26   ;;  %v10531_v57 = vpop.xlane.xlu0 %2713  ;;  %15046 = vst [vmem:[#allocation107_spill] sm:$0xff] %v10535_v2  ;;  %v2957_v14 = vsel %vm2955_vm1, %v2956_v55, %v2954_v52  ;;  %8363 = vrsqrt.f32 %v3228_v43  ;;  %v2947_v36 = vsel %vm2946_vm2, %v10246_v7, %v2945_v28  ;;  %v2949_v43 = vand.u32 2147483648, %v10246_v7 }
 0x46c   : > { %8037 = vset.pattern.permute.xlu0 %v15042_v45  ;;  %v10545_v60 = vpop.xlane.xlu1 %2876  ;;  %8365 = vrsqrt.f32 %v10270_v9  ;;  %v3389_v21 = vmul.f32 %v8354_v63, %v2957_v14  ;;  %v3231_v7 = vmax.f32 %v10254_v37, 1e-16  ;;  %vm2990_vm1 = vcmp.eq.f32.partialorder %v10343_v20, 0.0 }
 0x46d   : > { %4278 = vperm.xlu0 %8037, %v10449_v26   ;;  %v2950_v55 = vsel %vm2948_vm3, %v2949_v43, %v2947_v36  ;;  %v15048_v36 = vld [vmem:[#allocation5_spill] sm:$0xff]  ;;  %vm3009_vm2 = vcmp.eq.f32.partialorder %v10364_v23, inf  ;;  %vm3011_vm3 = vcmp.eq.f32.partialorder %v10364_v23, 0.0 }
 0x46e   : > { %v3422_v33 = vsel %vm3414_vm4, %v9326_v39, %v3389_v21  ;;  %v3135_v39 = vmax.f32 %v9330_v40, 1e-16 }
 0x46f   : > { %8038 = vset.pattern.permute.xlu1 %v15040_v44  ;;  %v10549_v49 = vpop.xlane.xlu0 %2873 }
 0x470   : > { %4474 = vperm.xlu1 %8038, %v10449_v26  }
 0x471   : > { %8047 = vset.pattern.permute.xlu0 %v14975_v8 }
 0x472   : > { %3894 = vperm.xlu0 %8047, %v10503_v25   ;;  %v8356_v38 = vpop.eup %8355 }
 0x473   : > { %v8358_v18 = vpop.eup %8357  ;;  %v3197_v56 = vmul.f32 %v8356_v38, %v10232_v16  ;;  %v3327_v16 = vmax.f32 %v9330_v40, 1e-20 }
 0x474   : > { %8039 = vset.pattern.permute.xlu1 %v14974_v62  ;;  %v8360_v63 = vpop.eup %8359 }
 0x475   : > { %3493 = vperm.xlu1 %8039, %v10515_v29   ;;  %v3293_v31 = vmul.f32 %v8358_v18, %v3197_v56  ;;  %v3388_v21 = vmul.f32 %v8360_v63, %v2950_v55  ;;  %8367 = vrsqrt.f32 %v3327_v16  ;;  %v2970_v63 = vand.u32 2147483648, %v10270_v9 }
 0x476   : > { %8049 = vset.pattern.permute.xlu0 %v15042_v45  ;;  %8369 = vrsqrt.f32 %v3135_v39 }
 0x477   : > { %4286 = vperm.xlu0 %8049, %v10503_v25   ;;  %v10554_v10 = vpop.xlane.xlu1 %2594  ;;  %v10576_v32 = vsel %vm3447_vm5, %v3422_v33, %v3293_v31  ;;  %v8362_v28 = vpop.eup %8361  ;;  %8371 = vrsqrt.f32 %v3231_v7  ;;  %v3421_v33 = vsel %vm3414_vm4, %v15048_v36, %v3388_v21  ;;  %v15051_v7 = vld [vmem:[#allocation2_spill] sm:$0xff]  ;;  %v15053_v36 = vld [vmem:[#allocation83_spill] sm:$0xff] }
 0x478   : > { %15047 = vst [vmem:[#allocation108_spill] sm:$0xff] %v10576_v32  ;;  %v8364_v38 = vpop.eup %8363  ;;  %v3196_v40 = vmul.f32 %v8362_v28, %v10234_v51  ;;  %8373 = vrsqrt.f32 %v10272_v58  ;;  %v3326_v28 = vmax.f32 %v15051_v7, 1e-20 }
 0x479   : > { %8040 = vset.pattern.permute.xlu1 %v14971_v13  ;;  %v10558_v47 = vpop.xlane.xlu0 %2591  ;;  %v8366_v18 = vpop.eup %8365 }
 0x47a   : > { %3686 = vperm.xlu1 %8040, %v10515_v29   ;;  %v3292_v31 = vmul.f32 %v8364_v38, %v3196_v40  ;;  %v2966_v43 = vmul.f32 %v8366_v18, %v10270_v9  ;;  %v3134_v18 = vmax.f32 %v15051_v7, 1e-16  ;;  %8375 = vrsqrt.f32 %v3326_v28 }
 0x47b   : > { %8052 = vset.pattern.permute.xlu0 %v14971_v13  ;;  %v10570_v52 = vpop.xlane.xlu1 %2722 }
 0x47c   : > { %3694 = vperm.xlu0 %8052, %v10535_v2   ;;  %v10602_v51 = vsel %vm3447_vm5, %v3421_v33, %v3292_v31  ;;  %v2968_v39 = vsel %vm2967_vm6, %v10270_v9, %v2966_v43  ;;  %v3230_v33 = vmax.f32 %v15053_v36, 1e-16  ;;  %8377 = vrsqrt.f32 %v3134_v18  ;;  %v15056_v36 = vld [vmem:[#allocation92_spill] sm:$0xff] }
 0x47d   : > { %v10579_v14 = vpop.xlane.xlu0 %2719  ;;  %15049 = vst [vmem:[#allocation5_spill] sm:$0xff] %v10602_v51  ;;  %v2971_v21 = vsel %vm2969_vm7, %v2970_v63, %v2968_v39  ;;  %v15055_v63 = vld [vmem:[#allocation84_spill] sm:$0xff]  ;;  %vm2981_vm10 = vcmp.eq.f32.partialorder %v15056_v36, inf  ;;  %vm2983_vm11 = vcmp.eq.f32.partialorder %v15056_v36, 0.0  ;;  %vm3002_vm6 = vcmp.eq.f32.partialorder %v10369_v48, inf }
 0x47e   : > { %8041 = vset.pattern.permute.xlu1 %v14975_v8  ;;  %8379 = vrsqrt.f32 %v3230_v33  ;;  %vm3004_vm7 = vcmp.eq.f32.partialorder %v10369_v48, 0.0 }
 0x47f   : > { %3882 = vperm.xlu1 %8041, %v10515_v29   ;;  %v10585_v56 = vpop.xlane.xlu1 %2882  ;;  %8381 = vrsqrt.f32 %v15056_v36 }
 0x480   : > { %8054 = vset.pattern.permute.xlu0 %v14972_v1 }
 0x481   : > { %4086 = vperm.xlu0 %8054, %v10535_v2   ;;  %v10591_v37 = vpop.xlane.xlu0 %2879 }
 0x482   : > { %v8368_v40 = vpop.eup %8367 }
 0x483   : > { %8042 = vset.pattern.permute.xlu1 %v14972_v1  ;;  %v8370_v43 = vpop.eup %8369  ;;  %v3391_v9 = vmul.f32 %v8368_v40, %v2971_v21 }
 0x484   : > { %4078 = vperm.xlu1 %8042, %v10515_v29   ;;  %v8372_v26 = vpop.eup %8371  ;;  %v3199_v7 = vmul.f32 %v8370_v43, %v15055_v63  ;;  %v2963_v43 = vand.u32 2147483648, %v10272_v58 }
 0x485   : > { %8056 = vset.pattern.permute.xlu0 %v15040_v44  ;;  %v8374_v39 = vpop.eup %8373 }
 0x486   : > { %4478 = vperm.xlu0 %8056, %v10535_v2   ;;  %v3295_v40 = vmul.f32 %v8372_v26, %v3199_v7  ;;  %v2959_v28 = vmul.f32 %v8374_v39, %v10272_v58 }
 0x488   : > { %8043 = vset.pattern.permute.xlu1 %v15042_v45  ;;  %v2961_v26 = vsel %vm2960_vm8, %v10272_v58, %v2959_v28  ;;  %v15063_v28 = vld [vmem:[#allocation87_spill] sm:$0xff]  ;;  %vm3023_vm8 = vcmp.eq.f32.partialorder %v10400_v54, inf }
 0x489   : > { %4274 = vperm.xlu1 %8043, %v10515_v29   ;;  %v2964_v63 = vsel %vm2962_vm9, %v2963_v43, %v2961_v26  ;;  %v15065_v43 = vld [vmem:[#allocation85_spill] sm:$0xff]  ;;  %vm3025_vm9 = vcmp.eq.f32.partialorder %v10400_v54, 0.0 }
 0x48a   : > { %8059 = vset.pattern.permute.xlu0 %v14975_v8 }
 0x48b   : > { %3902 = vperm.xlu0 %8059, %v10576_v32   ;;  %v10597_v16 = vpop.xlane.xlu1 %2600 }
 0x48d   : > { %8044 = vset.pattern.permute.xlu1 %v15040_v44  ;;  %v10605_v55 = vpop.xlane.xlu0 %2597 }
 0x48e   : > { %4470 = vperm.xlu1 %8044, %v10515_v29   ;;  %15050 = vst [vmem:[#allocation109_spill] sm:$0xff] %v10605_v55 }
 0x48f   : > { %8061 = vset.pattern.permute.xlu0 %v15042_v45  ;;  %v10614_v38 = vpop.xlane.xlu1 %2728 }
 0x490   : > { %4294 = vperm.xlu0 %8061, %v10576_v32   ;;  %15052 = vst [vmem:[#allocation2_spill] sm:$0xff] %v10614_v38 }
 0x491   : > { %v10620_v31 = vpop.xlane.xlu0 %2725 }
 0x492   : > { %8045 = vset.pattern.permute.xlu1 %v14974_v62  ;;  %15054 = vst [vmem:[#allocation83_spill] sm:$0xff] %v10620_v31  ;;  %v15057_v31 = vld [vmem:[#allocation10_spill] sm:$0xff] }
 0x493   : > { %3508 = vperm.xlu1 %8045, %v10503_v25   ;;  %v10626_v29 = vpop.xlane.xlu1 %2888  ;;  %v3424_v21 = vsel %vm3414_vm4, %v15057_v31, %v3391_v9  ;;  %v15061_v9 = vld [vmem:[#allocation4_spill] sm:$0xff] }
 0x494   : > { %8064 = vset.pattern.permute.xlu0 %v14971_v13  ;;  %v10641_v33 = vsel %vm3447_vm5, %v3424_v21, %v3295_v40  ;;  %v3329_v39 = vmax.f32 %v15061_v9, 1e-20  ;;  %v3137_v7 = vmax.f32 %v15061_v9, 1e-16  ;;  %v8376_v40 = vpop.eup %8375 }
 0x495   : > { %3702 = vperm.xlu0 %8064, %v10602_v51   ;;  %v10633_v38 = vpop.xlane.xlu0 %2885  ;;  %15059 = vst [vmem:[#allocation92_spill] sm:$0xff] %v10641_v33  ;;  %v3390_v58 = vmul.f32 %v8376_v40, %v2964_v63 }
 0x496   : > { %8383 = vrsqrt.f32 %v3329_v39 }
 0x497   : > { %8046 = vset.pattern.permute.xlu1 %v14971_v13  ;;  %8385 = vrsqrt.f32 %v3137_v7 }
 0x498   : > { %3698 = vperm.xlu1 %8046, %v10503_v25  }
 0x499   : > { %8066 = vset.pattern.permute.xlu0 %v14972_v1 }
 0x49a   : > { %4094 = vperm.xlu0 %8066, %v10602_v51  }
 0x49c   : > { %8048 = vset.pattern.permute.xlu1 %v14972_v1 }
 0x49d   : > { %4090 = vperm.xlu1 %8048, %v10503_v25  }
 0x49e   : > { %8068 = vset.pattern.permute.xlu0 %v15040_v44 }
 0x49f   : > { %4486 = vperm.xlu0 %8068, %v10602_v51   ;;  %v10637_v18 = vpop.xlane.xlu1 %2606 }
 0x4a0   : > { %15058 = vst [vmem:[#allocation84_spill] sm:$0xff] %v10637_v18 }
 0x4a1   : > { %8050 = vset.pattern.permute.xlu1 %v15040_v44  ;;  %v10646_v31 = vpop.xlane.xlu0 %2603 }
 0x4a2   : > { %4482 = vperm.xlu1 %8050, %v10503_v25   ;;  %15060 = vst [vmem:[#allocation10_spill] sm:$0xff] %v10646_v31  ;;  %v3233_v25 = vmax.f32 %v15063_v28, 1e-16  ;;  %v8378_v31 = vpop.eup %8377  ;;  %v15066_v28 = vld [vmem:[#allocation93_spill] sm:$0xff] }
 0x4a3   : > { %8069 = vset.pattern.permute.xlu0 %v14974_v62  ;;  %v10655_v21 = vpop.xlane.xlu1 %2734  ;;  %v8380_v55 = vpop.eup %8379  ;;  %v3198_v9 = vmul.f32 %v8378_v31, %v15065_v43  ;;  %vm2974_vm12 = vcmp.eq.f32.partialorder %v15066_v28, inf  ;;  %vm2976_vm13 = vcmp.eq.f32.partialorder %v15066_v28, 0.0 }
 0x4a4   : > { %3528 = vperm.xlu0 %8069, %v10641_v33   ;;  %15062 = vst [vmem:[#allocation4_spill] sm:$0xff] %v10655_v21  ;;  %v8382_v26 = vpop.eup %8381  ;;  %8387 = vrsqrt.f32 %v3233_v25 }
 0x4a5   : > { %v10659_v18 = vpop.xlane.xlu0 %2731  ;;  %8389 = vrsqrt.f32 %v15066_v28  ;;  %v3294_v40 = vmul.f32 %v8380_v55, %v3198_v9  ;;  %v2980_v39 = vmul.f32 %v8382_v26, %v15056_v36  ;;  %v15073_v26 = vld [vmem:[#allocation3_spill] sm:$0xff] }
 0x4a6   : > { %8051 = vset.pattern.permute.xlu1 %v14974_v62  ;;  %15064 = vst [vmem:[#allocation87_spill] sm:$0xff] %v10659_v18  ;;  %v15068_v18 = vld [vmem:[#allocation15_spill] sm:$0xff]  ;;  %v3328_v43 = vmax.f32 %v15073_v26, 1e-20 }
 0x4a7   : > { %3503 = vperm.xlu1 %8051, %v10535_v2   ;;  %v10667_v21 = vpop.xlane.xlu1 %2894  ;;  %v3423_v63 = vsel %vm3414_vm4, %v15068_v18, %v3390_v58  ;;  %v2982_v55 = vsel %vm2981_vm10, %v15056_v36, %v2980_v39  ;;  %v2984_v18 = vand.u32 2147483648, %v15056_v36  ;;  %v8384_v39 = vpop.eup %8383  ;;  %vm3016_vm10 = vcmp.eq.f32.partialorder %v10404_v42, inf }
 0x4a8   : > { %8071 = vset.pattern.permute.xlu0 %v14975_v8  ;;  %15067 = vst [vmem:[#allocation85_spill] sm:$0xff] %v10667_v21  ;;  %v10678_v25 = vsel %vm3447_vm5, %v3423_v63, %v3294_v40  ;;  %v3136_v40 = vmax.f32 %v15073_v26, 1e-16  ;;  %8391 = vrsqrt.f32 %v3328_v43  ;;  %v15077_v26 = vld [vmem:[#allocation90_spill] sm:$0xff] }
 0x4a9   : > { %3910 = vperm.xlu0 %8071, %v10641_v33   ;;  %v10673_v7 = vpop.xlane.xlu0 %2891  ;;  %15070 = vst [vmem:[#allocation15_spill] sm:$0xff] %v10678_v25  ;;  %v2985_v9 = vsel %vm2983_vm11, %v2984_v18, %v2982_v55  ;;  %vm3018_vm11 = vcmp.eq.f32.partialorder %v10404_v42, 0.0 }
 0x4aa   : > { %15069 = vst [vmem:[#allocation93_spill] sm:$0xff] %v10673_v7  ;;  %v8386_v7 = vpop.eup %8385  ;;  %v3393_v36 = vmul.f32 %v8384_v39, %v2985_v9  ;;  %8393 = vrsqrt.f32 %v3136_v40 }
 0x4ab   : > { %8053 = vset.pattern.permute.xlu1 %v14975_v8 }
 0x4ac   : > { %3890 = vperm.xlu1 %8053, %v10535_v2  }
 0x4ad   : > { %8073 = vset.pattern.permute.xlu0 %v15042_v45 }
 0x4ae   : > { %4302 = vperm.xlu0 %8073, %v10641_v33  }
 0x4b0   : > { %8055 = vset.pattern.permute.xlu1 %v15042_v45 }
 0x4b1   : > { %4282 = vperm.xlu1 %8055, %v10535_v2   ;;  %v15075_v2 = vld [vmem:[#allocation89_spill] sm:$0xff] }
 0x4b2   : > { %8076 = vset.pattern.permute.xlu0 %v14971_v13 }
 0x4b3   : > { %v10681_v31 = vpop.xlane.xlu1 %2612  ;;  %3710 = vperm.xlu0 %8076, %v10678_v25  }
 0x4b4   : > { %15071 = vst [vmem:[#allocation110_spill] sm:$0xff] %v10681_v31  ;;  %v3232_v31 = vmax.f32 %v15075_v2, 1e-16  ;;  %v15078_v2 = vld [vmem:[#allocation18_spill] sm:$0xff] }
 0x4b5   : > { %8057 = vset.pattern.permute.xlu1 %v14974_v62  ;;  %v10687_v58 = vpop.xlane.xlu0 %2609  ;;  %v3426_v43 = vsel %vm3414_vm4, %v15078_v2, %v3393_v36 }
 0x4b6   : > { %15072 = vst [vmem:[#allocation111_spill] sm:$0xff] %v10687_v58  ;;  %3518 = vperm.xlu1 %8057, %v10576_v32   ;;  %v8388_v58 = vpop.eup %8387  ;;  %8395 = vrsqrt.f32 %v3232_v31 }
 0x4b7   : > { %v10692_v63 = vpop.xlane.xlu1 %2740  ;;  %8078 = vset.pattern.permute.xlu0 %v14972_v1  ;;  %v8390_v18 = vpop.eup %8389  ;;  %8397 = vrsqrt.f32 %v10338_v22 }
 0x4b8   : > { %15074 = vst [vmem:[#allocation3_spill] sm:$0xff] %v10692_v63  ;;  %4102 = vperm.xlu0 %8078, %v10678_v25   ;;  %v3201_v63 = vmul.f32 %v8386_v7, %v15077_v26  ;;  %v2973_v39 = vmul.f32 %v8390_v18, %v15066_v28  ;;  %v15084_v18 = vld [vmem:[#allocation7_spill] sm:$0xff] }
 0x4b9   : > { %v10699_v21 = vpop.xlane.xlu0 %2737  ;;  %v3331_v26 = vmax.f32 %v15084_v18, 1e-20 }
 0x4ba   : > { %8058 = vset.pattern.permute.xlu1 %v14971_v13  ;;  %15076 = vst [vmem:[#allocation89_spill] sm:$0xff] %v10699_v21  ;;  %v3297_v9 = vmul.f32 %v8388_v58, %v3201_v63  ;;  %v2975_v31 = vsel %vm2974_vm12, %v15066_v28, %v2973_v39  ;;  %v2977_v63 = vand.u32 2147483648, %v15066_v28  ;;  %v15085_v39 = vld [vmem:[#allocation94_spill] sm:$0xff]  ;;  %vm3037_vm12 = vcmp.eq.f32.partialorder %v10444_v24, inf }
 0x4bb   : > { %v10701_v55 = vpop.xlane.xlu1 %2900  ;;  %3706 = vperm.xlu1 %8058, %v10576_v32   ;;  %8399 = vrsqrt.f32 %v3331_v26 }
 0x4bc   : > { %8080 = vset.pattern.permute.xlu0 %v15040_v44  ;;  %v10719_v7 = vsel %vm3447_vm5, %v3426_v43, %v3297_v9  ;;  %v2978_v2 = vsel %vm2976_vm13, %v2977_v63, %v2975_v31  ;;  %v3139_v43 = vmax.f32 %v15084_v18, 1e-16  ;;  %v8392_v9 = vpop.eup %8391  ;;  %v15088_v18 = vld [vmem:[#allocation91_spill] sm:$0xff]  ;;  %vm3039_vm13 = vcmp.eq.f32.partialorder %v10444_v24, 0.0 }
 0x4bd   : > { %4494 = vperm.xlu0 %8080, %v10678_v25   ;;  %v10715_v40 = vpop.xlane.xlu0 %2897  ;;  %15081 = vst [vmem:[#allocation112_spill] sm:$0xff] %v10719_v7  ;;  %v3392_v28 = vmul.f32 %v8392_v9, %v2978_v2  ;;  %v15090_v2 = vld [vmem:[#allocation23_spill] sm:$0xff] }
 0x4be   : > { %15080 = vst [vmem:[#allocation18_spill] sm:$0xff] %v10715_v40  ;;  %v8394_v40 = vpop.eup %8393  ;;  %8401 = vrsqrt.f32 %v3139_v43 }
 0x4bf   : > { %v10711_v21 = vpop.permute.xlu1 %3488  ;;  %8060 = vset.pattern.permute.xlu1 %v14972_v1  ;;  %v3425_v26 = vsel %vm3414_vm4, %v15090_v2, %v3392_v28 }
 0x4c0   : > { %15079 = vst [vmem:[#allocation90_spill] sm:$0xff] %v10711_v21  ;;  %4098 = vperm.xlu1 %8060, %v10576_v32  }
 0x4c1   : > { %8081 = vset.pattern.permute.xlu0 %v14974_v62 }
 0x4c2   : > { %3538 = vperm.xlu0 %8081, %v10719_v7  }
 0x4c3   : > { %v10724_v58 = vpop.permute.xlu1 %3878 }
 0x4c4   : > { %15082 = vst [vmem:[#allocation113_spill] sm:$0xff] %v10724_v58  ;;  %8062 = vset.pattern.permute.xlu1 %v15040_v44  ;;  %v3235_v58 = vmax.f32 %v15085_v39, 1e-16 }
 0x4c5   : > { %4490 = vperm.xlu1 %8062, %v10576_v32   ;;  %v10730_v36 = vpop.permute.xlu0 %3682  ;;  %v8396_v32 = vpop.eup %8395 }
 0x4c6   : > { %15083 = vst [vmem:[#allocation114_spill] sm:$0xff] %v10730_v36  ;;  %8083 = vset.pattern.permute.xlu0 %v14975_v8  ;;  %v8398_v63 = vpop.eup %8397  ;;  %v3200_v36 = vmul.f32 %v8394_v40, %v15088_v18  ;;  %8403 = vrsqrt.f32 %v3235_v58 }
 0x4c7   : > { %3918 = vperm.xlu0 %8083, %v10719_v7   ;;  %8405 = vrsqrt.f32 %v10343_v20 }
 0x4c8   : > { %v10737_v21 = vpop.permute.xlu1 %4270  ;;  %v3296_v9 = vmul.f32 %v8396_v32, %v3200_v36  ;;  %v2998_v36 = vand.u32 2147483648, %v10338_v22 }
 0x4c9   : > { %15086 = vst [vmem:[#allocation7_spill] sm:$0xff] %v10737_v21  ;;  %8063 = vset.pattern.permute.xlu1 %v14974_v62  ;;  %v2994_v21 = vmul.f32 %v8398_v63, %v10338_v22  ;;  %v15094_v63 = vld [vmem:[#allocation6_spill] sm:$0xff] }
 0x4ca   : > { %3513 = vperm.xlu1 %8063, %v10602_v51   ;;  %v10741_v31 = vpop.permute.xlu0 %4074  ;;  %v10758_v40 = vsel %vm3447_vm5, %v3425_v26, %v3296_v9  ;;  %v3330_v18 = vmax.f32 %v15094_v63, 1e-20  ;;  %v3138_v26 = vmax.f32 %v15094_v63, 1e-16  ;;  %v15095_v9 = vld [vmem:[#allocation95_spill] sm:$0xff]  ;;  %v15097_v63 = vld [vmem:[#allocation98_spill] sm:$0xff] }
 0x4cb   : > { %15087 = vst [vmem:[#allocation94_spill] sm:$0xff] %v10741_v31  ;;  %8085 = vset.pattern.permute.xlu0 %v15042_v45  ;;  %15092 = vst [vmem:[#allocation115_spill] sm:$0xff] %v10758_v40  ;;  %v2996_v58 = vsel %vm2995_vm14, %v10338_v22, %v2994_v21  ;;  %v8400_v21 = vpop.eup %8399  ;;  %vm3030_vm14 = vcmp.eq.f32.partialorder %v10451_v27, inf }
 0x4cc   : > { %4310 = vperm.xlu0 %8085, %v10719_v7   ;;  %v2999_v2 = vsel %vm2997_vm15, %v2998_v36, %v2996_v58  ;;  %8407 = vrsqrt.f32 %v3330_v18  ;;  %vm3032_vm15 = vcmp.eq.f32.partialorder %v10451_v27, 0.0 }
 0x4cd   : > { %v10747_v39 = vpop.permute.xlu1 %3678  ;;  %v3395_v22 = vmul.f32 %v8400_v21, %v2999_v2  ;;  %8409 = vrsqrt.f32 %v3138_v26  ;;  %v15099_v2 = vld [vmem:[#allocation26_spill] sm:$0xff] }
 0x4ce   : > { %15089 = vst [vmem:[#allocation91_spill] sm:$0xff] %v10747_v39  ;;  %8065 = vset.pattern.permute.xlu1 %v14975_v8  ;;  %v8402_v39 = vpop.eup %8401 }
 0x4cf   : > { %3898 = vperm.xlu1 %8065, %v10602_v51   ;;  %v10754_v43 = vpop.permute.xlu0 %4466  ;;  %v3203_v31 = vmul.f32 %v8402_v39, %v15097_v63  ;;  %v3428_v18 = vsel %vm3414_vm4, %v15099_v2, %v3395_v22 }
 0x4d0   : > { %15091 = vst [vmem:[#allocation23_spill] sm:$0xff] %v10754_v43  ;;  %8088 = vset.pattern.permute.xlu0 %v14971_v13  ;;  %v3234_v43 = vmax.f32 %v15095_v9, 1e-16 }
 0x4d1   : > { %3718 = vperm.xlu0 %8088, %v10758_v40  }
 0x4d2   : > { %v10763_v32 = vpop.permute.xlu1 %4070  ;;  %8411 = vrsqrt.f32 %v3234_v43 }
 0x4d3   : > { %15093 = vst [vmem:[#allocation116_spill] sm:$0xff] %v10763_v32  ;;  %8067 = vset.pattern.permute.xlu1 %v15042_v45  ;;  %8413 = vrsqrt.f32 %v10364_v23 }
 0x4d4   : > { %4290 = vperm.xlu1 %8067, %v10602_v51   ;;  %v10769_v28 = vpop.permute.xlu0 %3483  ;;  %v8404_v51 = vpop.eup %8403 }
 0x4d5   : > { %8090 = vset.pattern.permute.xlu0 %v14972_v1  ;;  %v8406_v36 = vpop.eup %8405  ;;  %v3299_v21 = vmul.f32 %v8404_v51, %v3203_v31  ;;  %v2991_v31 = vand.u32 2147483648, %v10343_v20 }
 0x4d6   : > { %4110 = vperm.xlu0 %8090, %v10758_v40  }
 0x4d7   : > { %v10776_v32 = vpop.permute.xlu1 %4462  ;;  %v10797_v39 = vsel %vm3447_vm5, %v3428_v18, %v3299_v21  ;;  %v3237_v21 = vmax.f32 %v10346_v3, 1e-16 }
 0x4d8   : > { %15096 = vst [vmem:[#allocation6_spill] sm:$0xff] %v10776_v32  ;;  %8070 = vset.pattern.permute.xlu1 %v14971_v13  ;;  %v2987_v32 = vmul.f32 %v8406_v36, %v10343_v20  ;;  %15101 = vst [vmem:[#allocation26_spill] sm:$0xff] %v10797_v39  ;;  %v15102_v36 = vld [vmem:[#allocation9_spill] sm:$0xff] }
 0x4d9   : > { %3714 = vperm.xlu1 %8070, %v10641_v33   ;;  %v10780_v58 = vpop.permute.xlu0 %3874  ;;  %v3333_v63 = vmax.f32 %v15102_v36, 1e-20  ;;  %v3141_v18 = vmax.f32 %v15102_v36, 1e-16 }
 0x4da   : > { %8092 = vset.pattern.permute.xlu0 %v15040_v44  ;;  %v2989_v43 = vsel %vm2988_vm0, %v10343_v20, %v2987_v32  ;;  %v8408_v32 = vpop.eup %8407  ;;  %vm3051_vm0 = vcmp.eq.f32.partialorder %v10492_v15, inf }
 0x4db   : > { %4502 = vperm.xlu0 %8092, %v10758_v40   ;;  %v2992_v2 = vsel %vm2990_vm1, %v2991_v31, %v2989_v43  ;;  %8415 = vrsqrt.f32 %v3333_v63  ;;  %vm3053_vm1 = vcmp.eq.f32.partialorder %v10492_v15, 0.0 }
 0x4dc   : > { %v10786_v9 = vpop.permute.xlu1 %3498  ;;  %v3394_v20 = vmul.f32 %v8408_v32, %v2992_v2  ;;  %8417 = vrsqrt.f32 %v3141_v18  ;;  %v15104_v2 = vld [vmem:[#allocation32_spill] sm:$0xff] }
 0x4dd   : > { %15098 = vst [vmem:[#allocation95_spill] sm:$0xff] %v10786_v9  ;;  %8072 = vset.pattern.permute.xlu1 %v14972_v1  ;;  %v8410_v9 = vpop.eup %8409  ;;  %8419 = vrsqrt.f32 %v3237_v21  ;;  %v3012_v21 = vand.u32 2147483648, %v10364_v23 }
 0x4de   : > { %4106 = vperm.xlu1 %8072, %v10641_v33   ;;  %v10793_v26 = vpop.permute.xlu0 %4266  ;;  %v3202_v36 = vmul.f32 %v8410_v9, %v10331_v34  ;;  %8421 = vrsqrt.f32 %v10369_v48  ;;  %v3427_v63 = vsel %vm3414_vm4, %v15104_v2, %v3394_v20 }
 0x4df   : > { %15100 = vst [vmem:[#allocation98_spill] sm:$0xff] %v10793_v26  ;;  %8093 = vset.pattern.permute.xlu0 %v14974_v62 }
 0x4e0   : > { %3548 = vperm.xlu0 %8093, %v10797_v39  }
 0x4e1   : > { %v10802_v51 = vpop.permute.xlu1 %3690 }
 0x4e2   : > { %8074 = vset.pattern.permute.xlu1 %v15040_v44 }
 0x4e3   : > { %4498 = vperm.xlu1 %8074, %v10641_v33   ;;  %v10808_v22 = vpop.permute.xlu0 %3886  ;;  %v8412_v33 = vpop.eup %8411 }
 0x4e4   : > { %8095 = vset.pattern.permute.xlu0 %v14975_v8  ;;  %v8414_v31 = vpop.eup %8413  ;;  %v3298_v32 = vmul.f32 %v8412_v33, %v3202_v36 }
 0x4e5   : > { %3926 = vperm.xlu0 %8095, %v10797_v39  }
 0x4e6   : > { %v10815_v26 = vpop.permute.xlu1 %4082  ;;  %v10836_v34 = vsel %vm3447_vm5, %v3427_v63, %v3298_v32  ;;  %v3236_v32 = vmax.f32 %v10351_v53, 1e-16 }
 0x4e7   : > { %15103 = vst [vmem:[#allocation9_spill] sm:$0xff] %v10815_v26  ;;  %8075 = vset.pattern.permute.xlu1 %v14974_v62  ;;  %v3008_v26 = vmul.f32 %v8414_v31, %v10364_v23  ;;  %15106 = vst [vmem:[#allocation117_spill] sm:$0xff] %v10836_v34  ;;  %v15108_v31 = vld [vmem:[#allocation8_spill] sm:$0xff] }
 0x4e8   : > { %3523 = vperm.xlu1 %8075, %v10678_v25   ;;  %v10819_v43 = vpop.permute.xlu0 %4278  ;;  %v3332_v36 = vmax.f32 %v15108_v31, 1e-20  ;;  %v3140_v63 = vmax.f32 %v15108_v31, 1e-16 }
 0x4e9   : > { %8097 = vset.pattern.permute.xlu0 %v15042_v45  ;;  %v3010_v9 = vsel %vm3009_vm2, %v10364_v23, %v3008_v26  ;;  %v8416_v26 = vpop.eup %8415  ;;  %vm3044_vm2 = vcmp.eq.f32.partialorder %v10499_v17, inf }
 0x4ea   : > { %4318 = vperm.xlu0 %8097, %v10797_v39   ;;  %v3013_v2 = vsel %vm3011_vm3, %v3012_v21, %v3010_v9  ;;  %8423 = vrsqrt.f32 %v3332_v36  ;;  %vm3046_vm3 = vcmp.eq.f32.partialorder %v10499_v17, 0.0 }
 0x4eb   : > { %v10825_v3 = vpop.permute.xlu1 %4474  ;;  %v3397_v23 = vmul.f32 %v8416_v26, %v3013_v2  ;;  %8425 = vrsqrt.f32 %v3140_v63  ;;  %v15111_v2 = vld [vmem:[#allocation36_spill] sm:$0xff] }
 0x4ec   : > { %8077 = vset.pattern.permute.xlu1 %v14975_v8  ;;  %8427 = vrsqrt.f32 %v3236_v32  ;;  %v3005_v32 = vand.u32 2147483648, %v10369_v48 }
 0x4ed   : > { %3906 = vperm.xlu1 %8077, %v10678_v25   ;;  %v10832_v18 = vpop.permute.xlu0 %3894  ;;  %8429 = vrsqrt.f32 %v10400_v54  ;;  %v3430_v36 = vsel %vm3414_vm4, %v15111_v2, %v3397_v23 }
 0x4ee   : > { %15105 = vst [vmem:[#allocation32_spill] sm:$0xff] %v10832_v18  ;;  %8100 = vset.pattern.permute.xlu0 %v14971_v13  ;;  %v8418_v18 = vpop.eup %8417 }
 0x4ef   : > { %3726 = vperm.xlu0 %8100, %v10836_v34   ;;  %v3205_v31 = vmul.f32 %v8418_v18, %v10357_v5 }
 0x4f0   : > { %v10841_v33 = vpop.permute.xlu1 %3493 }
 0x4f1   : > { %15107 = vst [vmem:[#allocation118_spill] sm:$0xff] %v10841_v33  ;;  %8079 = vset.pattern.permute.xlu1 %v15042_v45 }
 0x4f2   : > { %4298 = vperm.xlu1 %8079, %v10678_v25   ;;  %v10847_v20 = vpop.permute.xlu0 %4286  ;;  %v8420_v25 = vpop.eup %8419 }
 0x4f3   : > { %8102 = vset.pattern.permute.xlu0 %v14972_v1  ;;  %v8422_v21 = vpop.eup %8421  ;;  %v3301_v26 = vmul.f32 %v8420_v25, %v3205_v31 }
 0x4f4   : > { %4118 = vperm.xlu0 %8102, %v10836_v34  }
 0x4f5   : > { %v10854_v33 = vpop.permute.xlu1 %3686  ;;  %v10875_v5 = vsel %vm3447_vm5, %v3430_v36, %v3301_v26  ;;  %v3239_v26 = vmax.f32 %v10375_v59, 1e-16 }
 0x4f6   : > { %15109 = vst [vmem:[#allocation8_spill] sm:$0xff] %v10854_v33  ;;  %8082 = vset.pattern.permute.xlu1 %v14971_v13  ;;  %v3001_v33 = vmul.f32 %v8422_v21, %v10369_v48  ;;  %15112 = vst [vmem:[#allocation36_spill] sm:$0xff] %v10875_v5  ;;  %v15115_v21 = vld [vmem:[#allocation12_spill] sm:$0xff] }
 0x4f7   : > { %3722 = vperm.xlu1 %8082, %v10719_v7   ;;  %v10858_v9 = vpop.permute.xlu0 %3694  ;;  %v3335_v31 = vmax.f32 %v15115_v21, 1e-20  ;;  %v3143_v36 = vmax.f32 %v15115_v21, 1e-16 }
 0x4f8   : > { %8104 = vset.pattern.permute.xlu0 %v15040_v44  ;;  %v3003_v18 = vsel %vm3002_vm6, %v10369_v48, %v3001_v33  ;;  %v8424_v33 = vpop.eup %8423  ;;  %vm3065_vm6 = vcmp.eq.f32.partialorder %v10545_v60, inf }
 0x4f9   : > { %4510 = vperm.xlu0 %8104, %v10836_v34   ;;  %v3006_v2 = vsel %vm3004_vm7, %v3005_v32, %v3003_v18  ;;  %8431 = vrsqrt.f32 %v3335_v31  ;;  %vm3067_vm7 = vcmp.eq.f32.partialorder %v10545_v60, 0.0 }
 0x4fa   : > { %v10864_v53 = vpop.permute.xlu1 %3882  ;;  %v3396_v48 = vmul.f32 %v8424_v33, %v3006_v2  ;;  %8433 = vrsqrt.f32 %v3143_v36  ;;  %v15118_v2 = vld [vmem:[#allocation38_spill] sm:$0xff] }
 0x4fb   : > { %15110 = vst [vmem:[#allocation119_spill] sm:$0xff] %v10864_v53  ;;  %8084 = vset.pattern.permute.xlu1 %v14972_v1  ;;  %v8426_v53 = vpop.eup %8425  ;;  %8435 = vrsqrt.f32 %v3239_v26  ;;  %v3026_v26 = vand.u32 2147483648, %v10400_v54 }
 0x4fc   : > { %4114 = vperm.xlu1 %8084, %v10719_v7   ;;  %v10871_v63 = vpop.permute.xlu0 %4086  ;;  %v3204_v21 = vmul.f32 %v8426_v53, %v10360_v46  ;;  %8437 = vrsqrt.f32 %v10404_v42  ;;  %v3429_v31 = vsel %vm3414_vm4, %v15118_v2, %v3396_v48 }
 0x4fd   : > { %8105 = vset.pattern.permute.xlu0 %v14974_v62 }
 0x4fe   : > { %3558 = vperm.xlu0 %8105, %v10875_v5  }
 0x4ff   : > { %v10880_v25 = vpop.permute.xlu1 %4078 }
 0x500   : > { %15113 = vst [vmem:[#allocation120_spill] sm:$0xff] %v10880_v25  ;;  %8086 = vset.pattern.permute.xlu1 %v15040_v44 }
 0x501   : > { %4506 = vperm.xlu1 %8086, %v10719_v7   ;;  %v10886_v23 = vpop.permute.xlu0 %4478  ;;  %v8428_v7 = vpop.eup %8427 }
 0x502   : > { %15114 = vst [vmem:[#allocation121_spill] sm:$0xff] %v10886_v23  ;;  %8107 = vset.pattern.permute.xlu0 %v14975_v8  ;;  %v8430_v32 = vpop.eup %8429  ;;  %v3300_v33 = vmul.f32 %v8428_v7, %v3204_v21 }
 0x503   : > { %3934 = vperm.xlu0 %8107, %v10875_v5  }
 0x504   : > { %v10893_v25 = vpop.permute.xlu1 %4274  ;;  %v10914_v46 = vsel %vm3447_vm5, %v3429_v31, %v3300_v33  ;;  %v3238_v33 = vmax.f32 %v10380_v11, 1e-16 }
 0x505   : > { %15116 = vst [vmem:[#allocation12_spill] sm:$0xff] %v10893_v25  ;;  %8087 = vset.pattern.permute.xlu1 %v14974_v62  ;;  %v3022_v25 = vmul.f32 %v8430_v32, %v10400_v54  ;;  %15120 = vst [vmem:[#allocation123_spill] sm:$0xff] %v10914_v46  ;;  %v15122_v32 = vld [vmem:[#allocation11_spill] sm:$0xff] }
 0x506   : > { %3533 = vperm.xlu1 %8087, %v10758_v40   ;;  %v10897_v18 = vpop.permute.xlu0 %3902  ;;  %v3334_v21 = vmax.f32 %v15122_v32, 1e-20  ;;  %v3142_v31 = vmax.f32 %v15122_v32, 1e-16 }
 0x507   : > { %8109 = vset.pattern.permute.xlu0 %v15042_v45  ;;  %v3024_v53 = vsel %vm3023_vm8, %v10400_v54, %v3022_v25  ;;  %v8432_v25 = vpop.eup %8431  ;;  %vm3058_vm8 = vcmp.eq.f32.partialorder %v10549_v49, inf }
 0x508   : > { %4326 = vperm.xlu0 %8109, %v10875_v5   ;;  %v3027_v2 = vsel %vm3025_vm9, %v3026_v26, %v3024_v53  ;;  %8439 = vrsqrt.f32 %v3334_v21  ;;  %vm3060_vm9 = vcmp.eq.f32.partialorder %v10549_v49, 0.0 }
 0x509   : > { %v10903_v59 = vpop.permute.xlu1 %4470  ;;  %v3399_v54 = vmul.f32 %v8432_v25, %v3027_v2  ;;  %8441 = vrsqrt.f32 %v3142_v31  ;;  %v15124_v2 = vld [vmem:[#allocation39_spill] sm:$0xff] }
 0x50a   : > { %15117 = vst [vmem:[#allocation122_spill] sm:$0xff] %v10903_v59  ;;  %8089 = vset.pattern.permute.xlu1 %v14975_v8  ;;  %8443 = vrsqrt.f32 %v3238_v33  ;;  %v3019_v33 = vand.u32 2147483648, %v10404_v42 }
 0x50b   : > { %3914 = vperm.xlu1 %8089, %v10758_v40   ;;  %v10910_v36 = vpop.permute.xlu0 %4294  ;;  %8445 = vrsqrt.f32 %v10444_v24  ;;  %v3432_v21 = vsel %vm3414_vm4, %v15124_v2, %v3399_v54 }
 0x50c   : > { %15119 = vst [vmem:[#allocation38_spill] sm:$0xff] %v10910_v36  ;;  %8112 = vset.pattern.permute.xlu0 %v14971_v13  ;;  %v8434_v36 = vpop.eup %8433 }
 0x50d   : > { %3734 = vperm.xlu0 %8112, %v10914_v46   ;;  %v3207_v32 = vmul.f32 %v8434_v36, %v10387_v4 }
 0x50e   : > { %v10919_v7 = vpop.permute.xlu1 %3508 }
 0x50f   : > { %8091 = vset.pattern.permute.xlu1 %v15042_v45 }
 0x510   : > { %4306 = vperm.xlu1 %8091, %v10758_v40   ;;  %v10925_v48 = vpop.permute.xlu0 %3702  ;;  %v8436_v40 = vpop.eup %8435 }
 0x511   : > { %15121 = vst [vmem:[#allocation124_spill] sm:$0xff] %v10925_v48  ;;  %8114 = vset.pattern.permute.xlu0 %v14972_v1  ;;  %v8438_v26 = vpop.eup %8437  ;;  %v3303_v25 = vmul.f32 %v8436_v40, %v3207_v32 }
 0x512   : > { %4126 = vperm.xlu0 %8114, %v10914_v46   ;;  %v3015_v48 = vmul.f32 %v8438_v26, %v10404_v42  ;;  %v15128_v26 = vld [vmem:[#allocation14_spill] sm:$0xff] }
 0x513   : > { %v10932_v59 = vpop.permute.xlu1 %3698  ;;  %v10953_v4 = vsel %vm3447_vm5, %v3432_v21, %v3303_v25  ;;  %v3337_v32 = vmax.f32 %v15128_v26, 1e-20  ;;  %v3145_v21 = vmax.f32 %v15128_v26, 1e-16  ;;  %v3241_v25 = vmax.f32 %v10414_v0, 1e-16 }
 0x514   : > { %8094 = vset.pattern.permute.xlu1 %v14971_v13  ;;  %15126 = vst [vmem:[#allocation125_spill] sm:$0xff] %v10953_v4  ;;  %v3017_v36 = vsel %vm3016_vm10, %v10404_v42, %v3015_v48  ;;  %vm3079_vm10 = vcmp.eq.f32.partialorder %v10585_v56, inf }
 0x515   : > { %3730 = vperm.xlu1 %8094, %v10797_v39   ;;  %v10936_v53 = vpop.permute.xlu0 %4094  ;;  %v3020_v2 = vsel %vm3018_vm11, %v3019_v33, %v3017_v36  ;;  %v8440_v48 = vpop.eup %8439  ;;  %8447 = vrsqrt.f32 %v3337_v32  ;;  %vm3081_vm11 = vcmp.eq.f32.partialorder %v10585_v56, 0.0 }
 0x516   : > { %15123 = vst [vmem:[#allocation11_spill] sm:$0xff] %v10936_v53  ;;  %8116 = vset.pattern.permute.xlu0 %v15040_v44  ;;  %v8442_v53 = vpop.eup %8441  ;;  %v3398_v42 = vmul.f32 %v8440_v48, %v3020_v2  ;;  %8449 = vrsqrt.f32 %v3145_v21  ;;  %v15130_v2 = vld [vmem:[#allocation40_spill] sm:$0xff] }
 0x517   : > { %4518 = vperm.xlu0 %8116, %v10914_v46   ;;  %v3206_v26 = vmul.f32 %v8442_v53, %v10391_v6  ;;  %8451 = vrsqrt.f32 %v3241_v25  ;;  %v3040_v25 = vand.u32 2147483648, %v10444_v24 }
 0x518   : > { %v10942_v11 = vpop.permute.xlu1 %4090  ;;  %8453 = vrsqrt.f32 %v10451_v27  ;;  %v3431_v32 = vsel %vm3414_vm4, %v15130_v2, %v3398_v42 }
 0x519   : > { %8096 = vset.pattern.permute.xlu1 %v14972_v1 }
 0x51a   : > { %4122 = vperm.xlu1 %8096, %v10797_v39   ;;  %v10949_v31 = vpop.permute.xlu0 %4486 }
 0x51b   : > { %15125 = vst [vmem:[#allocation39_spill] sm:$0xff] %v10949_v31  ;;  %8117 = vset.pattern.permute.xlu0 %v14974_v62 }
 0x51c   : > { %3568 = vperm.xlu0 %8117, %v10953_v4  }
 0x51d   : > { %v10958_v40 = vpop.permute.xlu1 %4482 }
 0x51e   : > { %8098 = vset.pattern.permute.xlu1 %v15040_v44 }
 0x51f   : > { %4514 = vperm.xlu1 %8098, %v10797_v39   ;;  %v10964_v54 = vpop.permute.xlu0 %3528  ;;  %v8444_v39 = vpop.eup %8443 }
 0x520   : > { %15127 = vst [vmem:[#allocation126_spill] sm:$0xff] %v10964_v54  ;;  %8119 = vset.pattern.permute.xlu0 %v14975_v8  ;;  %v8446_v33 = vpop.eup %8445  ;;  %v3302_v48 = vmul.f32 %v8444_v39, %v3206_v26 }
 0x521   : > { %3942 = vperm.xlu0 %8119, %v10953_v4   ;;  %v3036_v54 = vmul.f32 %v8446_v33, %v10444_v24  ;;  %v15135_v33 = vld [vmem:[#allocation13_spill] sm:$0xff] }
 0x522   : > { %v10971_v31 = vpop.permute.xlu1 %3503  ;;  %v10992_v6 = vsel %vm3447_vm5, %v3431_v32, %v3302_v48  ;;  %v3336_v26 = vmax.f32 %v15135_v33, 1e-20  ;;  %v3144_v32 = vmax.f32 %v15135_v33, 1e-16  ;;  %v15136_v48 = vld [vmem:[#allocation101_spill] sm:$0xff]  ;;  %v15138_v33 = vld [vmem:[#allocation102_spill] sm:$0xff] }
 0x523   : > { %8099 = vset.pattern.permute.xlu1 %v14974_v62  ;;  %15132 = vst [vmem:[#allocation127_spill] sm:$0xff] %v10992_v6  ;;  %v3038_v53 = vsel %vm3037_vm12, %v10444_v24, %v3036_v54  ;;  %v8448_v54 = vpop.eup %8447  ;;  %vm3072_vm12 = vcmp.eq.f32.partialorder %v10591_v37, inf }
 0x524   : > { %3543 = vperm.xlu1 %8099, %v10836_v34   ;;  %v10975_v36 = vpop.permute.xlu0 %3910  ;;  %v3041_v2 = vsel %vm3039_vm13, %v3040_v25, %v3038_v53  ;;  %v8450_v23 = vpop.eup %8449  ;;  %8455 = vrsqrt.f32 %v3336_v26  ;;  %vm3074_vm13 = vcmp.eq.f32.partialorder %v10591_v37, 0.0 }
 0x525   : > { %15129 = vst [vmem:[#allocation14_spill] sm:$0xff] %v10975_v36  ;;  %8121 = vset.pattern.permute.xlu0 %v15042_v45  ;;  %v3401_v24 = vmul.f32 %v8448_v54, %v3041_v2  ;;  %8457 = vrsqrt.f32 %v3144_v32  ;;  %v15139_v2 = vld [vmem:[#allocation41_spill] sm:$0xff] }
 0x526   : > { %4334 = vperm.xlu0 %8121, %v10953_v4  }
 0x527   : > { %v10981_v0 = vpop.permute.xlu1 %3890  ;;  %v3434_v26 = vsel %vm3414_vm4, %v15139_v2, %v3401_v24 }
 0x528   : > { %8101 = vset.pattern.permute.xlu1 %v14975_v8 }
 0x529   : > { %3922 = vperm.xlu1 %8101, %v10836_v34   ;;  %v10988_v21 = vpop.permute.xlu0 %4302 }
 0x52a   : > { %15131 = vst [vmem:[#allocation40_spill] sm:$0xff] %v10988_v21  ;;  %8124 = vset.pattern.permute.xlu0 %v14971_v13  ;;  %v3240_v21 = vmax.f32 %v15136_v48, 1e-16 }
 0x52b   : > { %3742 = vperm.xlu0 %8124, %v10992_v6  }
 0x52c   : > { %v10997_v39 = vpop.permute.xlu1 %4282  ;;  %8459 = vrsqrt.f32 %v3240_v21 }
 0x52d   : > { %15133 = vst [vmem:[#allocation128_spill] sm:$0xff] %v10997_v39  ;;  %8103 = vset.pattern.permute.xlu1 %v15042_v45  ;;  %8461 = vrsqrt.f32 %v10492_v15 }
 0x52e   : > { %4314 = vperm.xlu1 %8103, %v10836_v34   ;;  %v11003_v42 = vpop.permute.xlu0 %3710  ;;  %v8452_v34 = vpop.eup %8451 }
 0x52f   : > { %15134 = vst [vmem:[#allocation129_spill] sm:$0xff] %v11003_v42  ;;  %8126 = vset.pattern.permute.xlu0 %v14972_v1  ;;  %v8454_v25 = vpop.eup %8453  ;;  %v3209_v42 = vmul.f32 %v8450_v23, %v15138_v33 }
 0x530   : > { %4134 = vperm.xlu0 %8126, %v10992_v6   ;;  %v3029_v39 = vmul.f32 %v8454_v25, %v10451_v27  ;;  %v15143_v25 = vld [vmem:[#allocation17_spill] sm:$0xff] }
 0x531   : > { %v11010_v36 = vpop.permute.xlu1 %3518  ;;  %v3305_v54 = vmul.f32 %v8452_v34, %v3209_v42  ;;  %v3033_v42 = vand.u32 2147483648, %v10451_v27  ;;  %v3339_v33 = vmax.f32 %v15143_v25, 1e-20 }
 0x532   : > { %8106 = vset.pattern.permute.xlu1 %v14971_v13  ;;  %v3031_v21 = vsel %vm3030_vm14, %v10451_v27, %v3029_v39  ;;  %v8456_v39 = vpop.eup %8455  ;;  %vm3093_vm14 = vcmp.eq.f32.partialorder %v10626_v29, inf }
 0x533   : > { %3738 = vperm.xlu1 %8106, %v10875_v5   ;;  %v11014_v53 = vpop.permute.xlu0 %4102  ;;  %v11031_v23 = vsel %vm3447_vm5, %v3434_v26, %v3305_v54  ;;  %v3034_v2 = vsel %vm3032_vm15, %v3033_v42, %v3031_v21  ;;  %v3147_v26 = vmax.f32 %v15143_v25, 1e-16  ;;  %v3243_v54 = vmax.f32 %v10459_v61, 1e-16 }
 0x534   : > { %15137 = vst [vmem:[#allocation13_spill] sm:$0xff] %v11014_v53  ;;  %8128 = vset.pattern.permute.xlu0 %v15040_v44  ;;  %15141 = vst [vmem:[#allocation102_spill] sm:$0xff] %v11031_v23  ;;  %v8458_v53 = vpop.eup %8457  ;;  %v3400_v27 = vmul.f32 %v8456_v39, %v3034_v2  ;;  %8463 = vrsqrt.f32 %v3339_v33  ;;  %v15145_v2 = vld [vmem:[#allocation42_spill] sm:$0xff]  ;;  %vm3095_vm15 = vcmp.eq.f32.partialorder %v10626_v29, 0.0 }
 0x535   : > { %4526 = vperm.xlu0 %8128, %v10992_v6   ;;  %8465 = vrsqrt.f32 %v3147_v26  ;;  %v3208_v25 = vmul.f32 %v8458_v53, %v10433_v41 }
 0x536   : > { %v11020_v48 = vpop.permute.xlu1 %3706  ;;  %8467 = vrsqrt.f32 %v3243_v54  ;;  %v3433_v33 = vsel %vm3414_vm4, %v15145_v2, %v3400_v27  ;;  %v3054_v54 = vand.u32 2147483648, %v10492_v15 }
 0x537   : > { %8108 = vset.pattern.permute.xlu1 %v14972_v1  ;;  %8469 = vrsqrt.f32 %v10499_v17 }
 0x538   : > { %4130 = vperm.xlu1 %8108, %v10875_v5   ;;  %v11027_v32 = vpop.permute.xlu0 %4494 }
 0x539   : > { %15140 = vst [vmem:[#allocation101_spill] sm:$0xff] %v11027_v32  ;;  %8129 = vset.pattern.permute.xlu0 %v14974_v62 }
 0x53a   : > { %3578 = vperm.xlu0 %8129, %v11031_v23  }
 0x53b   : > { %v11036_v34 = vpop.permute.xlu1 %4098 }
 0x53c   : > { %8110 = vset.pattern.permute.xlu1 %v15040_v44 }
 0x53d   : > { %4522 = vperm.xlu1 %8110, %v10875_v5   ;;  %v11042_v24 = vpop.permute.xlu0 %3538  ;;  %v8460_v5 = vpop.eup %8459 }
 0x53e   : > { %15142 = vst [vmem:[#allocation41_spill] sm:$0xff] %v11042_v24  ;;  %8131 = vset.pattern.permute.xlu0 %v14975_v8  ;;  %v8462_v42 = vpop.eup %8461  ;;  %v3304_v39 = vmul.f32 %v8460_v5, %v3208_v25 }
 0x53f   : > { %3950 = vperm.xlu0 %8131, %v11031_v23   ;;  %v3050_v24 = vmul.f32 %v8462_v42, %v10492_v15  ;;  %v15149_v42 = vld [vmem:[#allocation16_spill] sm:$0xff] }
 0x540   : > { %v11049_v32 = vpop.permute.xlu1 %4490  ;;  %v11070_v41 = vsel %vm3447_vm5, %v3433_v33, %v3304_v39  ;;  %v3338_v25 = vmax.f32 %v15149_v42, 1e-20  ;;  %v3146_v33 = vmax.f32 %v15149_v42, 1e-16  ;;  %v3242_v39 = vmax.f32 %v10465_v35, 1e-16 }
 0x541   : > { %8111 = vset.pattern.permute.xlu1 %v14974_v62  ;;  %15147 = vst [vmem:[#allocation130_spill] sm:$0xff] %v11070_v41  ;;  %v3052_v53 = vsel %vm3051_vm0, %v10492_v15, %v3050_v24  ;;  %v8464_v24 = vpop.eup %8463  ;;  %vm3086_vm0 = vcmp.eq.f32.partialorder %v10633_v38, inf }
 0x542   : > { %3553 = vperm.xlu1 %8111, %v10914_v46   ;;  %v11053_v21 = vpop.permute.xlu0 %3918  ;;  %v3055_v2 = vsel %vm3053_vm1, %v3054_v54, %v3052_v53  ;;  %8471 = vrsqrt.f32 %v3338_v25  ;;  %vm3088_vm1 = vcmp.eq.f32.partialorder %v10633_v38, 0.0 }
 0x543   : > { %15144 = vst [vmem:[#allocation17_spill] sm:$0xff] %v11053_v21  ;;  %8133 = vset.pattern.permute.xlu0 %v15042_v45  ;;  %v8466_v21 = vpop.eup %8465  ;;  %v3403_v15 = vmul.f32 %v8464_v24, %v3055_v2  ;;  %8473 = vrsqrt.f32 %v3146_v33  ;;  %v15151_v2 = vld [vmem:[#allocation43_spill] sm:$0xff] }
 0x544   : > { %4342 = vperm.xlu0 %8133, %v11031_v23   ;;  %8475 = vrsqrt.f32 %v3242_v39  ;;  %v3211_v42 = vmul.f32 %v8466_v21, %v10477_v30  ;;  %v3047_v39 = vand.u32 2147483648, %v10499_v17 }
 0x545   : > { %v11059_v61 = vpop.permute.xlu1 %3513  ;;  %8477 = vrsqrt.f32 %v10545_v60  ;;  %v3436_v25 = vsel %vm3414_vm4, %v15151_v2, %v3403_v15 }
 0x546   : > { %8113 = vset.pattern.permute.xlu1 %v14975_v8 }
 0x547   : > { %3930 = vperm.xlu1 %8113, %v10914_v46   ;;  %v11066_v26 = vpop.permute.xlu0 %4310 }
 0x548   : > { %15146 = vst [vmem:[#allocation42_spill] sm:$0xff] %v11066_v26  ;;  %8136 = vset.pattern.permute.xlu0 %v14971_v13 }
 0x549   : > { %3750 = vperm.xlu0 %8136, %v11070_v41  }
 0x54a   : > { %v11075_v5 = vpop.permute.xlu1 %3898 }
 0x54b   : > { %8115 = vset.pattern.permute.xlu1 %v15042_v45 }
 0x54c   : > { %4322 = vperm.xlu1 %8115, %v10914_v46   ;;  %v11081_v27 = vpop.permute.xlu0 %3718  ;;  %v8468_v46 = vpop.eup %8467 }
 0x54d   : > { %15148 = vst [vmem:[#allocation131_spill] sm:$0xff] %v11081_v27  ;;  %8138 = vset.pattern.permute.xlu0 %v14972_v1  ;;  %v8470_v54 = vpop.eup %8469  ;;  %v3307_v24 = vmul.f32 %v8468_v46, %v3211_v42 }
 0x54e   : > { %4142 = vperm.xlu0 %8138, %v11070_v41   ;;  %v3043_v27 = vmul.f32 %v8470_v54, %v10499_v17  ;;  %v15156_v54 = vld [vmem:[#allocation20_spill] sm:$0xff] }
 0x54f   : > { %v11088_v26 = vpop.permute.xlu1 %4290  ;;  %v11109_v30 = vsel %vm3447_vm5, %v3436_v25, %v3307_v24  ;;  %v3341_v42 = vmax.f32 %v15156_v54, 1e-20  ;;  %v3149_v25 = vmax.f32 %v15156_v54, 1e-16  ;;  %v3245_v24 = vmax.f32 %v10510_v19, 1e-16 }
 0x550   : > { %8118 = vset.pattern.permute.xlu1 %v14971_v13  ;;  %15153 = vst [vmem:[#allocation132_spill] sm:$0xff] %v11109_v30  ;;  %v3045_v21 = vsel %vm3044_vm2, %v10499_v17, %v3043_v27  ;;  %v8472_v27 = vpop.eup %8471  ;;  %v15159_v54 = vld [vmem:[#allocation104_spill] sm:$0xff] }
 0x551   : > { %3746 = vperm.xlu1 %8118, %v10953_v4   ;;  %v11092_v53 = vpop.permute.xlu0 %4110  ;;  %v3048_v2 = vsel %vm3046_vm3, %v3047_v39, %v3045_v21  ;;  %8479 = vrsqrt.f32 %v3341_v42 }
 0x552   : > { %15150 = vst [vmem:[#allocation16_spill] sm:$0xff] %v11092_v53  ;;  %8140 = vset.pattern.permute.xlu0 %v15040_v44  ;;  %v8474_v53 = vpop.eup %8473  ;;  %v3402_v17 = vmul.f32 %v8472_v27, %v3048_v2  ;;  %8481 = vrsqrt.f32 %v3149_v25  ;;  %v15160_v2 = vld [vmem:[#allocation44_spill] sm:$0xff] }
 0x553   : > { %4534 = vperm.xlu0 %8140, %v11070_v41   ;;  %8483 = vrsqrt.f32 %v3245_v24 }
 0x554   : > { %v11098_v35 = vpop.permute.xlu1 %3714  ;;  %8485 = vrsqrt.f32 %v10549_v49  ;;  %v3435_v42 = vsel %vm3414_vm4, %v15160_v2, %v3402_v17 }
 0x555   : > { %8120 = vset.pattern.permute.xlu1 %v14972_v1 }
 0x556   : > { %4138 = vperm.xlu1 %8120, %v10953_v4   ;;  %v11105_v33 = vpop.permute.xlu0 %4502 }
 0x557   : > { %15152 = vst [vmem:[#allocation43_spill] sm:$0xff] %v11105_v33  ;;  %8141 = vset.pattern.permute.xlu0 %v14974_v62 }
 0x558   : > { %3588 = vperm.xlu0 %8141, %v11109_v30  }
 0x559   : > { %v11114_v46 = vpop.permute.xlu1 %4106 }
 0x55a   : > { %15154 = vst [vmem:[#allocation133_spill] sm:$0xff] %v11114_v46  ;;  %8122 = vset.pattern.permute.xlu1 %v15040_v44  ;;  %v15260_v46 = vld [vmem:[#allocation91_spill] sm:$0xff] }
 0x55b   : > { %4530 = vperm.xlu1 %8122, %v10953_v4   ;;  %v11120_v15 = vpop.permute.xlu0 %3548  ;;  %v8476_v4 = vpop.eup %8475 }
 0x55c   : > { %15155 = vst [vmem:[#allocation134_spill] sm:$0xff] %v11120_v15  ;;  %8143 = vset.pattern.permute.xlu0 %v14975_v8  ;;  %v8478_v39 = vpop.eup %8477  ;;  %v3210_v15 = vmul.f32 %v8474_v53, %v15159_v54 }
 0x55d   : > { %3958 = vperm.xlu0 %8143, %v11109_v30  }
 0x55e   : > { %v11127_v33 = vpop.permute.xlu1 %4498  ;;  %v3306_v27 = vmul.f32 %v8476_v4, %v3210_v15  ;;  %v3068_v15 = vand.u32 2147483648, %v10545_v60 }
 0x55f   : > { %15157 = vst [vmem:[#allocation20_spill] sm:$0xff] %v11127_v33  ;;  %8123 = vset.pattern.permute.xlu1 %v14974_v62  ;;  %v3064_v33 = vmul.f32 %v8478_v39, %v10545_v60  ;;  %v15165_v39 = vld [vmem:[#allocation19_spill] sm:$0xff] }
 0x560   : > { %3563 = vperm.xlu1 %8123, %v10992_v6   ;;  %v11131_v21 = vpop.permute.xlu0 %3926  ;;  %v11148_v53 = vsel %vm3447_vm5, %v3435_v42, %v3306_v27  ;;  %v3340_v54 = vmax.f32 %v15165_v39, 1e-20  ;;  %v3148_v42 = vmax.f32 %v15165_v39, 1e-16  ;;  %v3244_v27 = vmax.f32 %v10517_v50, 1e-16 }
 0x561   : > { %15158 = vst [vmem:[#allocation135_spill] sm:$0xff] %v11131_v21  ;;  %8145 = vset.pattern.permute.xlu0 %v15042_v45  ;;  %15162 = vst [vmem:[#allocation44_spill] sm:$0xff] %v11148_v53  ;;  %v3066_v24 = vsel %vm3065_vm6, %v10545_v60, %v3064_v33  ;;  %v8480_v33 = vpop.eup %8479 }
 0x562   : > { %4350 = vperm.xlu0 %8145, %v11109_v30   ;;  %v3069_v2 = vsel %vm3067_vm7, %v3068_v15, %v3066_v24  ;;  %v8482_v21 = vpop.eup %8481  ;;  %8487 = vrsqrt.f32 %v3340_v54 }
 0x563   : > { %v11137_v19 = vpop.permute.xlu1 %3523  ;;  %v3405_v60 = vmul.f32 %v8480_v33, %v3069_v2  ;;  %8489 = vrsqrt.f32 %v3148_v42  ;;  %v3213_v39 = vmul.f32 %v8482_v21, %v10526_v12  ;;  %v15169_v2 = vld [vmem:[#allocation45_spill] sm:$0xff] }
 0x564   : > { %8125 = vset.pattern.permute.xlu1 %v14975_v8  ;;  %8491 = vrsqrt.f32 %v3244_v27  ;;  %v3061_v27 = vand.u32 2147483648, %v10549_v49 }
 0x565   : > { %3938 = vperm.xlu1 %8125, %v10992_v6   ;;  %v11144_v25 = vpop.permute.xlu0 %4318  ;;  %8493 = vrsqrt.f32 %v10585_v56  ;;  %v3438_v54 = vsel %vm3414_vm4, %v15169_v2, %v3405_v60 }
 0x566   : > { %15161 = vst [vmem:[#allocation104_spill] sm:$0xff] %v11144_v25  ;;  %8148 = vset.pattern.permute.xlu0 %v14971_v13 }
 0x567   : > { %3758 = vperm.xlu0 %8148, %v11148_v53  }
 0x568   : > { %v11153_v4 = vpop.permute.xlu1 %3906 }
 0x569   : > { %15163 = vst [vmem:[#allocation136_spill] sm:$0xff] %v11153_v4  ;;  %8127 = vset.pattern.permute.xlu1 %v15042_v45 }
 0x56a   : > { %4330 = vperm.xlu1 %8127, %v10992_v6   ;;  %v11159_v17 = vpop.permute.xlu0 %3726  ;;  %v8484_v6 = vpop.eup %8483 }
 0x56b   : > { %15164 = vst [vmem:[#allocation137_spill] sm:$0xff] %v11159_v17  ;;  %8150 = vset.pattern.permute.xlu0 %v14972_v1  ;;  %v8486_v15 = vpop.eup %8485  ;;  %v3309_v33 = vmul.f32 %v8484_v6, %v3213_v39 }
 0x56c   : > { %4150 = vperm.xlu0 %8150, %v11148_v53   ;;  %v3057_v17 = vmul.f32 %v8486_v15, %v10549_v49  ;;  %v15174_v15 = vld [vmem:[#allocation22_spill] sm:$0xff] }
 0x56d   : > { %v11166_v25 = vpop.permute.xlu1 %4298  ;;  %v11187_v12 = vsel %vm3447_vm5, %v3438_v54, %v3309_v33  ;;  %v3343_v39 = vmax.f32 %v15174_v15, 1e-20  ;;  %v3151_v54 = vmax.f32 %v15174_v15, 1e-16  ;;  %v3247_v33 = vmax.f32 %v10554_v10, 1e-16 }
 0x56e   : > { %15166 = vst [vmem:[#allocation19_spill] sm:$0xff] %v11166_v25  ;;  %8130 = vset.pattern.permute.xlu1 %v14971_v13  ;;  %15171 = vst [vmem:[#allocation140_spill] sm:$0xff] %v11187_v12  ;;  %v3059_v21 = vsel %vm3058_vm8, %v10549_v49, %v3057_v17  ;;  %vm3121_vm8 = vcmp.eq.f32.partialorder %v10701_v55, inf  ;;  %v15255_v25 = vld [vmem:[#allocation31_spill] sm:$0xff] }
 0x56f   : > { %3754 = vperm.xlu1 %8130, %v11031_v23   ;;  %v11170_v24 = vpop.permute.xlu0 %4118  ;;  %v3062_v2 = vsel %vm3060_vm9, %v3061_v27, %v3059_v21  ;;  %v8488_v17 = vpop.eup %8487  ;;  %8495 = vrsqrt.f32 %v3343_v39  ;;  %vm3123_vm9 = vcmp.eq.f32.partialorder %v10701_v55, 0.0 }
 0x570   : > { %15167 = vst [vmem:[#allocation138_spill] sm:$0xff] %v11170_v24  ;;  %8152 = vset.pattern.permute.xlu0 %v15040_v44  ;;  %v8490_v24 = vpop.eup %8489  ;;  %v3404_v49 = vmul.f32 %v8488_v17, %v3062_v2  ;;  %8497 = vrsqrt.f32 %v3151_v54  ;;  %v15178_v2 = vld [vmem:[#allocation46_spill] sm:$0xff] }
 0x571   : > { %4542 = vperm.xlu0 %8152, %v11148_v53   ;;  %v3212_v15 = vmul.f32 %v8490_v24, %v10531_v57  ;;  %8499 = vrsqrt.f32 %v3247_v33  ;;  %v3082_v33 = vand.u32 2147483648, %v10585_v56 }
 0x572   : > { %v11176_v50 = vpop.permute.xlu1 %3722  ;;  %8501 = vrsqrt.f32 %v10591_v37  ;;  %v3437_v39 = vsel %vm3414_vm4, %v15178_v2, %v3404_v49 }
 0x573   : > { %15168 = vst [vmem:[#allocation139_spill] sm:$0xff] %v11176_v50  ;;  %8132 = vset.pattern.permute.xlu1 %v14972_v1  ;;  %v15256_v50 = vld [vmem:[#allocation113_spill] sm:$0xff] }
 0x574   : > { %4146 = vperm.xlu1 %8132, %v11031_v23   ;;  %v11183_v42 = vpop.permute.xlu0 %4510 }
 0x575   : > { %15170 = vst [vmem:[#allocation45_spill] sm:$0xff] %v11183_v42  ;;  %8153 = vset.pattern.permute.xlu0 %v14974_v62 }
 0x576   : > { %3598 = vperm.xlu0 %8153, %v11187_v12  }
 0x577   : > { %v11192_v6 = vpop.permute.xlu1 %4114 }
 0x578   : > { %15172 = vst [vmem:[#allocation141_spill] sm:$0xff] %v11192_v6  ;;  %8134 = vset.pattern.permute.xlu1 %v15040_v44 }
 0x579   : > { %4538 = vperm.xlu1 %8134, %v11031_v23   ;;  %v11198_v60 = vpop.permute.xlu0 %3558  ;;  %v8492_v23 = vpop.eup %8491 }
 0x57a   : > { %15173 = vst [vmem:[#allocation142_spill] sm:$0xff] %v11198_v60  ;;  %8155 = vset.pattern.permute.xlu0 %v14975_v8  ;;  %v8494_v27 = vpop.eup %8493  ;;  %v3308_v17 = vmul.f32 %v8492_v23, %v3212_v15 }
 0x57b   : > { %3966 = vperm.xlu0 %8155, %v11187_v12   ;;  %v3078_v60 = vmul.f32 %v8494_v27, %v10585_v56  ;;  %v15183_v27 = vld [vmem:[#allocation21_spill] sm:$0xff] }
 0x57c   : > { %v11205_v42 = vpop.permute.xlu1 %4506  ;;  %v11226_v57 = vsel %vm3447_vm5, %v3437_v39, %v3308_v17  ;;  %v3342_v15 = vmax.f32 %v15183_v27, 1e-20  ;;  %v3150_v39 = vmax.f32 %v15183_v27, 1e-16  ;;  %v3246_v17 = vmax.f32 %v10558_v47, 1e-16 }
 0x57d   : > { %15175 = vst [vmem:[#allocation22_spill] sm:$0xff] %v11205_v42  ;;  %8135 = vset.pattern.permute.xlu1 %v14974_v62  ;;  %15180 = vst [vmem:[#allocation145_spill] sm:$0xff] %v11226_v57  ;;  %v3080_v24 = vsel %vm3079_vm10, %v10585_v56, %v3078_v60  ;;  %v8496_v60 = vpop.eup %8495 }
 0x57e   : > { %3573 = vperm.xlu1 %8135, %v11070_v41   ;;  %v11209_v21 = vpop.permute.xlu0 %3934  ;;  %v3083_v2 = vsel %vm3081_vm11, %v3082_v33, %v3080_v24  ;;  %8503 = vrsqrt.f32 %v3342_v15 }
 0x57f   : > { %15176 = vst [vmem:[#allocation143_spill] sm:$0xff] %v11209_v21  ;;  %8157 = vset.pattern.permute.xlu0 %v15042_v45  ;;  %v8498_v21 = vpop.eup %8497  ;;  %v3407_v56 = vmul.f32 %v8496_v60, %v3083_v2  ;;  %8505 = vrsqrt.f32 %v3150_v39  ;;  %v15187_v2 = vld [vmem:[#allocation47_spill] sm:$0xff] }
 0x580   : > { %4358 = vperm.xlu0 %8157, %v11187_v12   ;;  %8507 = vrsqrt.f32 %v3246_v17  ;;  %v3215_v27 = vmul.f32 %v8498_v21, %v10570_v52  ;;  %v3075_v17 = vand.u32 2147483648, %v10591_v37 }
 0x581   : > { %v11215_v10 = vpop.permute.xlu1 %3533  ;;  %8509 = vrsqrt.f32 %v10626_v29  ;;  %v3440_v15 = vsel %vm3414_vm4, %v15187_v2, %v3407_v56 }
 0x582   : > { %15177 = vst [vmem:[#allocation144_spill] sm:$0xff] %v11215_v10  ;;  %8137 = vset.pattern.permute.xlu1 %v14975_v8 }
 0x583   : > { %3946 = vperm.xlu1 %8137, %v11070_v41   ;;  %v11222_v54 = vpop.permute.xlu0 %4326 }
 0x584   : > { %15179 = vst [vmem:[#allocation46_spill] sm:$0xff] %v11222_v54  ;;  %8160 = vset.pattern.permute.xlu0 %v14971_v13 }
 0x585   : > { %3766 = vperm.xlu0 %8160, %v11226_v57  }
 0x586   : > { %v11231_v23 = vpop.permute.xlu1 %3914 }
 0x587   : > { %15181 = vst [vmem:[#allocation146_spill] sm:$0xff] %v11231_v23  ;;  %8139 = vset.pattern.permute.xlu1 %v15042_v45 }
 0x588   : > { %4338 = vperm.xlu1 %8139, %v11070_v41   ;;  %v11237_v49 = vpop.permute.xlu0 %3734  ;;  %v8500_v41 = vpop.eup %8499 }
 0x589   : > { %15182 = vst [vmem:[#allocation147_spill] sm:$0xff] %v11237_v49  ;;  %8162 = vset.pattern.permute.xlu0 %v14972_v1  ;;  %v8502_v33 = vpop.eup %8501  ;;  %v3311_v60 = vmul.f32 %v8500_v41, %v3215_v27 }
 0x58a   : > { %4158 = vperm.xlu0 %8162, %v11226_v57   ;;  %v3071_v49 = vmul.f32 %v8502_v33, %v10591_v37  ;;  %v15192_v33 = vld [vmem:[#allocation25_spill] sm:$0xff] }
 0x58b   : > { %v11244_v54 = vpop.permute.xlu1 %4306  ;;  %v11265_v52 = vsel %vm3447_vm5, %v3440_v15, %v3311_v60  ;;  %v3345_v27 = vmax.f32 %v15192_v33, 1e-20  ;;  %v3153_v15 = vmax.f32 %v15192_v33, 1e-16  ;;  %v3249_v60 = vmax.f32 %v10597_v16, 1e-16 }
 0x58c   : > { %15184 = vst [vmem:[#allocation21_spill] sm:$0xff] %v11244_v54  ;;  %8142 = vset.pattern.permute.xlu1 %v14971_v13  ;;  %15189 = vst [vmem:[#allocation150_spill] sm:$0xff] %v11265_v52  ;;  %v3073_v21 = vsel %vm3072_vm12, %v10591_v37, %v3071_v49  ;;  %v8504_v49 = vpop.eup %8503  ;;  %v15250_v54 = vld [vmem:[#allocation35_spill] sm:$0xff]  ;;  %vm7403_vm12 = vcmask 343040  }
 0x58d   : > { %3762 = vperm.xlu1 %8142, %v11109_v30   ;;  %v11248_v24 = vpop.permute.xlu0 %4126  ;;  %v3076_v2 = vsel %vm3074_vm13, %v3075_v17, %v3073_v21  ;;  %8511 = vrsqrt.f32 %v3345_v27 }
 0x58e   : > { %15185 = vst [vmem:[#allocation148_spill] sm:$0xff] %v11248_v24  ;;  %8164 = vset.pattern.permute.xlu0 %v15040_v44  ;;  %v8506_v24 = vpop.eup %8505  ;;  %v3406_v37 = vmul.f32 %v8504_v49, %v3076_v2  ;;  %8513 = vrsqrt.f32 %v3153_v15  ;;  %v15196_v2 = vld [vmem:[#allocation48_spill] sm:$0xff] }
 0x58f   : > { %4550 = vperm.xlu0 %8164, %v11226_v57   ;;  %v3214_v33 = vmul.f32 %v8506_v24, %v10579_v14  ;;  %8515 = vrsqrt.f32 %v3249_v60  ;;  %v3096_v60 = vand.u32 2147483648, %v10626_v29 }
 0x590   : > { %v11254_v47 = vpop.permute.xlu1 %3730  ;;  %8517 = vrsqrt.f32 %v10633_v38  ;;  %v3439_v27 = vsel %vm3414_vm4, %v15196_v2, %v3406_v37 }
 0x591   : > { %15186 = vst [vmem:[#allocation149_spill] sm:$0xff] %v11254_v47  ;;  %8144 = vset.pattern.permute.xlu1 %v14972_v1  ;;  %v15252_v47 = vld [vmem:[#allocation111_spill] sm:$0xff] }
 0x592   : > { %4154 = vperm.xlu1 %8144, %v11109_v30   ;;  %v11261_v39 = vpop.permute.xlu0 %4518  ;;  %v3252_v23 = vmax.f32 %v15252_v47, 1e-16 }
 0x593   : > { %15188 = vst [vmem:[#allocation47_spill] sm:$0xff] %v11261_v39  ;;  %8165 = vset.pattern.permute.xlu0 %v14974_v62 }
 0x594   : > { %3608 = vperm.xlu0 %8165, %v11265_v52  }
 0x595   : > { %v11270_v41 = vpop.permute.xlu1 %4122 }
 0x596   : > { %15190 = vst [vmem:[#allocation151_spill] sm:$0xff] %v11270_v41  ;;  %8146 = vset.pattern.permute.xlu1 %v15040_v44 }
 0x597   : > { %4546 = vperm.xlu1 %8146, %v11109_v30   ;;  %v11276_v56 = vpop.permute.xlu0 %3568  ;;  %v8508_v30 = vpop.eup %8507 }
 0x598   : > { %15191 = vst [vmem:[#allocation152_spill] sm:$0xff] %v11276_v56  ;;  %8167 = vset.pattern.permute.xlu0 %v14975_v8  ;;  %v8510_v17 = vpop.eup %8509  ;;  %v3310_v49 = vmul.f32 %v8508_v30, %v3214_v33 }
 0x599   : > { %3974 = vperm.xlu0 %8167, %v11265_v52   ;;  %v3092_v56 = vmul.f32 %v8510_v17, %v10626_v29  ;;  %v15201_v17 = vld [vmem:[#allocation24_spill] sm:$0xff] }
 0x59a   : > { %v11283_v39 = vpop.permute.xlu1 %4514  ;;  %v11304_v14 = vsel %vm3447_vm5, %v3439_v27, %v3310_v49  ;;  %v3344_v33 = vmax.f32 %v15201_v17, 1e-20  ;;  %v3152_v27 = vmax.f32 %v15201_v17, 1e-16  ;;  %v15202_v49 = vld [vmem:[#allocation109_spill] sm:$0xff]  ;;  %v15205_v17 = vld [vmem:[#allocation2_spill] sm:$0xff] }
 0x59b   : > { %15193 = vst [vmem:[#allocation25_spill] sm:$0xff] %v11283_v39  ;;  %8147 = vset.pattern.permute.xlu1 %v14974_v62  ;;  %15198 = vst [vmem:[#allocation155_spill] sm:$0xff] %v11304_v14  ;;  %v3094_v24 = vsel %vm3093_vm14, %v10626_v29, %v3092_v56  ;;  %v8512_v56 = vpop.eup %8511 }
 0x59c   : > { %3583 = vperm.xlu1 %8147, %v11148_v53   ;;  %v11287_v21 = vpop.permute.xlu0 %3942  ;;  %v3097_v2 = vsel %vm3095_vm15, %v3096_v60, %v3094_v24  ;;  %v8514_v39 = vpop.eup %8513  ;;  %8519 = vrsqrt.f32 %v3344_v33 }
 0x59d   : > { %15194 = vst [vmem:[#allocation153_spill] sm:$0xff] %v11287_v21  ;;  %8169 = vset.pattern.permute.xlu0 %v15042_v45  ;;  %v3409_v29 = vmul.f32 %v8512_v56, %v3097_v2  ;;  %8521 = vrsqrt.f32 %v3152_v27  ;;  %v15208_v2 = vld [vmem:[#allocation49_spill] sm:$0xff] }
 0x59e   : > { %4366 = vperm.xlu0 %8169, %v11265_v52  }
 0x59f   : > { %v11293_v16 = vpop.permute.xlu1 %3543  ;;  %v3442_v33 = vsel %vm3414_vm4, %v15208_v2, %v3409_v29 }
 0x5a0   : > { %15195 = vst [vmem:[#allocation154_spill] sm:$0xff] %v11293_v16  ;;  %8149 = vset.pattern.permute.xlu1 %v14975_v8 }
 0x5a1   : > { %3954 = vperm.xlu1 %8149, %v11148_v53   ;;  %v11300_v15 = vpop.permute.xlu0 %4334 }
 0x5a2   : > { %15197 = vst [vmem:[#allocation48_spill] sm:$0xff] %v11300_v15  ;;  %8172 = vset.pattern.permute.xlu0 %v14971_v13  ;;  %v3248_v15 = vmax.f32 %v15202_v49, 1e-16  ;;  %v15206_v49 = vld [vmem:[#allocation85_spill] sm:$0xff] }
 0x5a3   : > { %3774 = vperm.xlu0 %8172, %v11304_v14   ;;  %vm3107_vm2 = vcmp.eq.f32.partialorder %v15206_v49, inf  ;;  %vm3109_vm3 = vcmp.eq.f32.partialorder %v15206_v49, 0.0 }
 0x5a4   : > { %v11309_v30 = vpop.permute.xlu1 %3922  ;;  %8523 = vrsqrt.f32 %v3248_v15 }
 0x5a5   : > { %15199 = vst [vmem:[#allocation156_spill] sm:$0xff] %v11309_v30  ;;  %8151 = vset.pattern.permute.xlu1 %v15042_v45  ;;  %8525 = vrsqrt.f32 %v15206_v49 }
 0x5a6   : > { %4346 = vperm.xlu1 %8151, %v11148_v53   ;;  %v11315_v37 = vpop.permute.xlu0 %3742  ;;  %v8516_v53 = vpop.eup %8515 }
 0x5a7   : > { %15200 = vst [vmem:[#allocation157_spill] sm:$0xff] %v11315_v37  ;;  %8174 = vset.pattern.permute.xlu0 %v14972_v1  ;;  %v8518_v60 = vpop.eup %8517  ;;  %v3217_v37 = vmul.f32 %v8514_v39, %v15205_v17 }
 0x5a8   : > { %4166 = vperm.xlu0 %8174, %v11304_v14   ;;  %v3085_v30 = vmul.f32 %v8518_v60, %v10633_v38  ;;  %v15213_v60 = vld [vmem:[#allocation28_spill] sm:$0xff] }
 0x5a9   : > { %v11322_v21 = vpop.permute.xlu1 %4314  ;;  %v3313_v56 = vmul.f32 %v8516_v53, %v3217_v37  ;;  %v3089_v37 = vand.u32 2147483648, %v10633_v38  ;;  %v3347_v17 = vmax.f32 %v15213_v60, 1e-20 }
 0x5aa   : > { %15203 = vst [vmem:[#allocation24_spill] sm:$0xff] %v11322_v21  ;;  %8154 = vset.pattern.permute.xlu1 %v14971_v13  ;;  %v3087_v15 = vsel %vm3086_vm0, %v10633_v38, %v3085_v30  ;;  %v8520_v30 = vpop.eup %8519 }
 0x5ab   : > { %3770 = vperm.xlu1 %8154, %v11187_v12   ;;  %v11326_v24 = vpop.permute.xlu0 %4134  ;;  %v11343_v39 = vsel %vm3447_vm5, %v3442_v33, %v3313_v56  ;;  %v3090_v2 = vsel %vm3088_vm1, %v3089_v37, %v3087_v15  ;;  %v3155_v33 = vmax.f32 %v15213_v60, 1e-16  ;;  %v15214_v56 = vld [vmem:[#allocation84_spill] sm:$0xff]  ;;  %8527 = vrsqrt.f32 %v3347_v17  ;;  %v15217_v60 = vld [vmem:[#allocation83_spill] sm:$0xff] }
 0x5ac   : > { %15204 = vst [vmem:[#allocation109_spill] sm:$0xff] %v11326_v24  ;;  %8176 = vset.pattern.permute.xlu0 %v15040_v44  ;;  %15210 = vst [vmem:[#allocation49_spill] sm:$0xff] %v11343_v39  ;;  %v3408_v38 = vmul.f32 %v8520_v30, %v3090_v2  ;;  %v15220_v2 = vld [vmem:[#allocation50_spill] sm:$0xff] }
 0x5ad   : > { %4558 = vperm.xlu0 %8176, %v11304_v14   ;;  %8529 = vrsqrt.f32 %v3155_v33 }
 0x5ae   : > { %v11332_v21 = vpop.permute.xlu1 %3738  ;;  %v3441_v17 = vsel %vm3414_vm4, %v15220_v2, %v3408_v38 }
 0x5af   : > { %15207 = vst [vmem:[#allocation2_spill] sm:$0xff] %v11332_v21  ;;  %8156 = vset.pattern.permute.xlu1 %v14972_v1 }
 0x5b0   : > { %4162 = vperm.xlu1 %8156, %v11187_v12   ;;  %v11339_v27 = vpop.permute.xlu0 %4526 }
 0x5b1   : > { %15209 = vst [vmem:[#allocation85_spill] sm:$0xff] %v11339_v27  ;;  %8177 = vset.pattern.permute.xlu0 %v14974_v62  ;;  %v3251_v27 = vmax.f32 %v15214_v56, 1e-16  ;;  %v15218_v56 = vld [vmem:[#allocation93_spill] sm:$0xff] }
 0x5b2   : > { %3618 = vperm.xlu0 %8177, %v11343_v39   ;;  %vm3100_vm6 = vcmp.eq.f32.partialorder %v15218_v56, inf  ;;  %vm3102_vm7 = vcmp.eq.f32.partialorder %v15218_v56, 0.0 }
 0x5b3   : > { %v11348_v53 = vpop.permute.xlu1 %4130  ;;  %8531 = vrsqrt.f32 %v3251_v27 }
 0x5b4   : > { %15211 = vst [vmem:[#allocation158_spill] sm:$0xff] %v11348_v53  ;;  %8158 = vset.pattern.permute.xlu1 %v15040_v44  ;;  %v8522_v53 = vpop.eup %8521  ;;  %8533 = vrsqrt.f32 %v15218_v56 }
 0x5b5   : > { %4554 = vperm.xlu1 %8158, %v11187_v12   ;;  %v11354_v29 = vpop.permute.xlu0 %3578  ;;  %v8524_v12 = vpop.eup %8523 }
 0x5b6   : > { %15212 = vst [vmem:[#allocation159_spill] sm:$0xff] %v11354_v29  ;;  %8179 = vset.pattern.permute.xlu0 %v14975_v8  ;;  %v8526_v37 = vpop.eup %8525  ;;  %v3216_v29 = vmul.f32 %v8522_v53, %v15217_v60 }
 0x5b7   : > { %3982 = vperm.xlu0 %8179, %v11343_v39   ;;  %v3106_v21 = vmul.f32 %v8526_v37, %v15206_v49  ;;  %v15224_v37 = vld [vmem:[#allocation27_spill] sm:$0xff] }
 0x5b8   : > { %v11361_v24 = vpop.permute.xlu1 %4522  ;;  %v3312_v30 = vmul.f32 %v8524_v12, %v3216_v29  ;;  %v3110_v29 = vand.u32 2147483648, %v15206_v49  ;;  %v3346_v60 = vmax.f32 %v15224_v37, 1e-20 }
 0x5b9   : > { %15215 = vst [vmem:[#allocation28_spill] sm:$0xff] %v11361_v24  ;;  %8159 = vset.pattern.permute.xlu1 %v14974_v62  ;;  %v3108_v53 = vsel %vm3107_vm2, %v15206_v49, %v3106_v21  ;;  %v8528_v21 = vpop.eup %8527 }
 0x5ba   : > { %3593 = vperm.xlu1 %8159, %v11226_v57   ;;  %v11365_v15 = vpop.permute.xlu0 %3950  ;;  %v11382_v27 = vsel %vm3447_vm5, %v3441_v17, %v3312_v30  ;;  %v3111_v2 = vsel %vm3109_vm3, %v3110_v29, %v3108_v53  ;;  %v3154_v17 = vmax.f32 %v15224_v37, 1e-16  ;;  %v15225_v30 = vld [vmem:[#allocation10_spill] sm:$0xff]  ;;  %8535 = vrsqrt.f32 %v3346_v60  ;;  %v15227_v37 = vld [vmem:[#allocation4_spill] sm:$0xff] }
 0x5bb   : > { %15216 = vst [vmem:[#allocation84_spill] sm:$0xff] %v11365_v15  ;;  %8181 = vset.pattern.permute.xlu0 %v15042_v45  ;;  %15222 = vst [vmem:[#allocation50_spill] sm:$0xff] %v11382_v27  ;;  %v3411_v49 = vmul.f32 %v8528_v21, %v3111_v2  ;;  %v15229_v2 = vld [vmem:[#allocation51_spill] sm:$0xff] }
 0x5bc   : > { %4374 = vperm.xlu0 %8181, %v11343_v39   ;;  %8537 = vrsqrt.f32 %v3154_v17 }
 0x5bd   : > { %v11371_v24 = vpop.permute.xlu1 %3553  ;;  %v3444_v60 = vsel %vm3414_vm4, %v15229_v2, %v3411_v49 }
 0x5be   : > { %15219 = vst [vmem:[#allocation83_spill] sm:$0xff] %v11371_v24  ;;  %8161 = vset.pattern.permute.xlu1 %v14975_v8 }
 0x5bf   : > { %3962 = vperm.xlu1 %8161, %v11226_v57   ;;  %v11378_v33 = vpop.permute.xlu0 %4342 }
 0x5c0   : > { %15221 = vst [vmem:[#allocation93_spill] sm:$0xff] %v11378_v33  ;;  %8184 = vset.pattern.permute.xlu0 %v14971_v13  ;;  %v3250_v33 = vmax.f32 %v15225_v30, 1e-16 }
 0x5c1   : > { %3782 = vperm.xlu0 %8184, %v11382_v27  }
 0x5c2   : > { %v11387_v12 = vpop.permute.xlu1 %3930  ;;  %8539 = vrsqrt.f32 %v3250_v33 }
 0x5c3   : > { %15223 = vst [vmem:[#allocation160_spill] sm:$0xff] %v11387_v12  ;;  %8163 = vset.pattern.permute.xlu1 %v15042_v45  ;;  %v8530_v12 = vpop.eup %8529  ;;  %8541 = vrsqrt.f32 %v10701_v55 }
 0x5c4   : > { %4354 = vperm.xlu1 %8163, %v11226_v57   ;;  %v11393_v38 = vpop.permute.xlu0 %3750  ;;  %v8532_v57 = vpop.eup %8531  ;;  %v3219_v24 = vmul.f32 %v8530_v12, %v15227_v37 }
 0x5c5   : > { %8186 = vset.pattern.permute.xlu0 %v14972_v1  ;;  %v8534_v29 = vpop.eup %8533 }
 0x5c6   : > { %4174 = vperm.xlu0 %8186, %v11382_v27   ;;  %v3315_v21 = vmul.f32 %v8532_v57, %v3219_v24  ;;  %v3103_v24 = vand.u32 2147483648, %v15218_v56 }
 0x5c7   : > { %v11400_v15 = vpop.permute.xlu1 %4322 }
 0x5c8   : > { %15226 = vst [vmem:[#allocation27_spill] sm:$0xff] %v11400_v15  ;;  %8166 = vset.pattern.permute.xlu1 %v14971_v13  ;;  %v3099_v15 = vmul.f32 %v8534_v29, %v15218_v56  ;;  %v11421_v33 = vsel %vm3447_vm5, %v3444_v60, %v3315_v21  ;;  %v15233_v29 = vld [vmem:[#allocation30_spill] sm:$0xff] }
 0x5c9   : > { %3778 = vperm.xlu1 %8166, %v11265_v52   ;;  %v11404_v53 = vpop.permute.xlu0 %4142  ;;  %15230 = vst [vmem:[#allocation4_spill] sm:$0xff] %v11421_v33  ;;  %v3349_v37 = vmax.f32 %v15233_v29, 1e-20  ;;  %v3157_v60 = vmax.f32 %v15233_v29, 1e-16  ;;  %v15234_v21 = vld [vmem:[#allocation110_spill] sm:$0xff] }
 0x5ca   : > { %8188 = vset.pattern.permute.xlu0 %v15040_v44  ;;  %v3101_v12 = vsel %vm3100_vm6, %v15218_v56, %v3099_v15  ;;  %v8536_v15 = vpop.eup %8535  ;;  %v15237_v29 = vld [vmem:[#allocation87_spill] sm:$0xff] }
 0x5cb   : > { %4566 = vperm.xlu0 %8188, %v11382_v27   ;;  %v3104_v2 = vsel %vm3102_vm7, %v3103_v24, %v3101_v12  ;;  %v8538_v41 = vpop.eup %8537  ;;  %8543 = vrsqrt.f32 %v3349_v37 }
 0x5cc   : > { %v11410_v30 = vpop.permute.xlu1 %3746  ;;  %v3410_v56 = vmul.f32 %v8536_v15, %v3104_v2  ;;  %8545 = vrsqrt.f32 %v3157_v60  ;;  %v15240_v2 = vld [vmem:[#allocation52_spill] sm:$0xff]  ;;  %v11458_v60 = vld [vmem:[%s14773_s9] sm:$0x3f] }
 0x5cd   : > { %15228 = vst [vmem:[#allocation10_spill] sm:$0xff] %v11410_v30  ;;  %8168 = vset.pattern.permute.xlu1 %v14972_v1  ;;  %v11494_v42 = vrot.slane %v11458_v60, %v15250_v54 }
 0x5ce   : > { %4170 = vperm.xlu1 %8168, %v11265_v52   ;;  %v11417_v17 = vpop.permute.xlu0 %4534  ;;  %v3443_v37 = vsel %vm3414_vm4, %v15240_v2, %v3410_v56  ;;  %v15244_v56 = vld [vmem:[#allocation34_spill] sm:$0xff] }
 0x5cf   : > { %8189 = vset.pattern.permute.xlu0 %v14974_v62  ;;  %v4006_v47 = vmul.f32 %v11494_v42, %v15256_v50  ;;  %v15259_v50 = vld [vmem:[#allocation53_spill] sm:$0xff] }
 0x5d0   : > { %3628 = vperm.xlu0 %8189, %v11421_v33  }
 0x5d1   : > { %v11426_v57 = vpop.permute.xlu1 %4138 }
 0x5d2   : > { %15231 = vst [vmem:[#allocation51_spill] sm:$0xff] %v11426_v57  ;;  %8170 = vset.pattern.permute.xlu1 %v15040_v44  ;;  %v3253_v57 = vmax.f32 %v15234_v21, 1e-16  ;;  %v15238_v21 = vld [vmem:[#allocation18_spill] sm:$0xff] }
 0x5d3   : > { %4562 = vperm.xlu1 %8170, %v11265_v52   ;;  %v11432_v49 = vpop.permute.xlu0 %3588  ;;  %v8540_v52 = vpop.eup %8539  ;;  %vm3114_vm10 = vcmp.eq.f32.partialorder %v15238_v21, inf  ;;  %vm3116_vm11 = vcmp.eq.f32.partialorder %v15238_v21, 0.0 }
 0x5d4   : > { %15232 = vst [vmem:[#allocation161_spill] sm:$0xff] %v11432_v49  ;;  %8191 = vset.pattern.permute.xlu0 %v14975_v8  ;;  %v8542_v24 = vpop.eup %8541  ;;  %v3218_v49 = vmul.f32 %v8538_v41, %v15237_v29  ;;  %8547 = vrsqrt.f32 %v3253_v57  ;;  %v15242_v57 = vld [vmem:[#allocation33_spill] sm:$0xff] }
 0x5d5   : > { %3990 = vperm.xlu0 %8191, %v11421_v33   ;;  %8549 = vrsqrt.f32 %v15238_v21  ;;  %v3120_v16 = vmul.f32 %v8542_v24, %v10701_v55  ;;  %v11465_v29 = vrot.slane %v11458_v60, %v15242_v57  ;;  %v11476_v24 = vrot.slane %v11458_v60, %v15244_v56  ;;  %v15249_v56 = vld [vmem:[#allocation90_spill] sm:$0xff] }
 0x5d6   : > { %v11439_v30 = vpop.permute.xlu1 %4530  ;;  %v3314_v15 = vmul.f32 %v8540_v52, %v3218_v49  ;;  %v3124_v57 = vand.u32 2147483648, %v10701_v55 }
 0x5d7   : > { %15235 = vst [vmem:[#allocation30_spill] sm:$0xff] %v11439_v30  ;;  %8171 = vset.pattern.permute.xlu1 %v14974_v62  ;;  %v3122_v49 = vsel %vm3121_vm8, %v10701_v55, %v3120_v16  ;;  %v15248_v16 = vld [vmem:[#allocation29_spill] sm:$0xff] }
 0x5d8   : > { %3603 = vperm.xlu1 %8171, %v11304_v14   ;;  %v11443_v12 = vpop.permute.xlu0 %3958  ;;  %v11469_v52 = vsel %vm3447_vm5, %v3443_v37, %v3314_v15  ;;  %v15246_v37 = vld [vmem:[#allocation114_spill] sm:$0xff]  ;;  %v8544_v55 = vpop.eup %8543 }
 0x5d9   : > { %15236 = vst [vmem:[#allocation110_spill] sm:$0xff] %v11443_v12  ;;  %8193 = vset.pattern.permute.xlu0 %v15042_v45  ;;  %15243 = vst [vmem:[#allocation52_spill] sm:$0xff] %v11469_v52  ;;  %v3810_v15 = vmul.f32 %v11465_v29, %v15246_v37  ;;  %v3348_v12 = vmax.f32 %v15248_v16, 1e-20  ;;  %v3156_v37 = vmax.f32 %v15248_v16, 1e-16 }
 0x5da   : > { %4382 = vperm.xlu0 %8193, %v11421_v33  }
 0x5db   : > { %v11449_v30 = vpop.permute.xlu1 %3563  ;;  %8551 = vrsqrt.f32 %v3348_v12 }
 0x5dc   : > { %15239 = vst [vmem:[#allocation87_spill] sm:$0xff] %v11449_v30  ;;  %8173 = vset.pattern.permute.xlu1 %v14975_v8  ;;  %v3125_v30 = vsel %vm3123_vm9, %v3124_v57, %v3122_v49  ;;  %v15253_v49 = vld [vmem:[#allocation37_spill] sm:$0xff]  ;;  %8553 = vrsqrt.f32 %v3156_v37 }
 0x5dd   : > { %3970 = vperm.xlu1 %8173, %v11304_v14   ;;  %v11461_v41 = vpop.permute.xlu0 %4350  ;;  %v11503_v6 = vrot.slane %v11458_v60, %v15253_v49  ;;  %8555 = vrsqrt.f32 %v3252_v23  ;;  %v15261_v23 = vsub.s32 4, %v15255_v25 }
 0x5de   : > { %15241 = vst [vmem:[#allocation18_spill] sm:$0xff] %v11461_v41  ;;  %8196 = vset.pattern.permute.xlu0 %v14971_v13 }
 0x5df   : > { %3790 = vperm.xlu0 %8196, %v11469_v52  }
 0x5e0   : > { %v11478_v2 = vpop.permute.xlu1 %3938 }
 0x5e1   : > { %15245 = vst [vmem:[#allocation162_spill] sm:$0xff] %v11478_v2  ;;  %8175 = vset.pattern.permute.xlu1 %v15042_v45  ;;  %v3646_v2 = vmul.f32 %v11476_v24, %v15249_v56  ;;  %v3413_v56 = vmul.f32 %v8544_v55, %v3125_v30  ;;  %v3645_v30 = vmul.f32 %v11476_v24, %v10769_v28  ;;  %v15258_v55 = vld [vmem:[#allocation94_spill] sm:$0xff] }
 0x5e2   : > { %4362 = vperm.xlu1 %8175, %v11304_v14   ;;  %v11486_v41 = vpop.permute.xlu0 %3758  ;;  %v4005_v28 = vmul.f32 %v11494_v42, %v10780_v58 }
 0x5e3   : > { %15247 = vst [vmem:[#allocation114_spill] sm:$0xff] %v11486_v41  ;;  %8198 = vset.pattern.permute.xlu0 %v14972_v1  ;;  %v8546_v41 = vpop.eup %8545  ;;  %v3842_v57 = vadd.f32 %v3810_v15, %v3646_v2  ;;  %v15257_v15 = vld [vmem:[#allocation3_spill] sm:$0xff]  ;;  %v3446_v4 = vsel %vm3414_vm4, %v15259_v50, %v3413_v56 }
 0x5e4   : > { %4182 = vperm.xlu0 %8198, %v11469_v52   ;;  %v8548_v54 = vpop.eup %8547  ;;  %v3221_v49 = vmul.f32 %v8546_v41, %v15257_v15  ;;  %v3809_v41 = vmul.f32 %v11465_v29, %v15260_v46  ;;  %v15264_v46 = vsub.s32 5, %v15255_v25  ;;  %v15265_v50 = vld [vmem:[#allocation7_spill] sm:$0xff]  ;;  %v15273_v25 = vld [vmem:[#allocation9_spill] sm:$0xff] }
 0x5e5   : > { %v11498_v14 = vpop.permute.xlu1 %4330  ;;  %v8550_v16 = vpop.eup %8549  ;;  %v4038_v12 = vadd.f32 %v4006_v47, %v3842_v57  ;;  %v11533_v57 = vrot.slane %v11458_v60, %v15261_v23 }
 0x5e6   : > { %15251 = vst [vmem:[#allocation29_spill] sm:$0xff] %v11498_v14  ;;  %8178 = vset.pattern.permute.xlu1 %v14971_v13  ;;  %v4202_v14 = vmul.f32 %v11503_v6, %v15258_v55  ;;  %v3317_v37 = vmul.f32 %v8548_v54, %v3221_v49  ;;  %v3113_v2 = vmul.f32 %v8550_v16, %v15238_v21 }
 0x5e7   : > { %3786 = vperm.xlu1 %8178, %v11343_v39   ;;  %v11507_v10 = vpop.permute.xlu0 %4150  ;;  %v3841_v54 = vadd.f32 %v3809_v41, %v3645_v30  ;;  %v11546_v56 = vrot.slane %v11458_v60, %v15264_v46  ;;  %v3117_v30 = vand.u32 2147483648, %v15238_v21  ;;  %v15266_v60 = vld [vmem:[#allocation116_spill] sm:$0xff] }
 0x5e8   : > { %15254 = vst [vmem:[#allocation90_spill] sm:$0xff] %v11507_v10  ;;  %8200 = vset.pattern.permute.xlu0 %v15040_v44  ;;  %v11540_v49 = vsel %vm3447_vm5, %v3446_v4, %v3317_v37  ;;  %v4234_v58 = vadd.f32 %v4202_v14, %v4038_v12  ;;  %v3115_v16 = vsel %vm3114_vm10, %v15238_v21, %v3113_v2 }
 0x5e9   : > { %4574 = vperm.xlu0 %8200, %v11469_v52   ;;  %15263 = vst [vmem:[#allocation113_spill] sm:$0xff] %v11540_v49  ;;  %v4037_v15 = vadd.f32 %v4005_v28, %v3841_v54  ;;  %v4398_v4 = vmul.f32 %v11533_v57, %v15265_v50  ;;  %v3812_v14 = vmul.f32 %v11465_v29, %v10802_v51  ;;  %v15268_v28 = vld [vmem:[#allocation23_spill] sm:$0xff]  ;;  %v15270_v50 = vld [vmem:[#allocation98_spill] sm:$0xff] }
 0x5ea   : > { %v11520_v10 = vpop.permute.xlu1 %3754  ;;  %v4201_v12 = vmul.f32 %v11503_v6, %v15266_v60  ;;  %v3118_v37 = vsel %vm3116_vm11, %v3117_v30, %v3115_v16  ;;  %v4594_v23 = vmul.f32 %v11546_v56, %v15268_v28  ;;  %v15269_v54 = vld [vmem:[#allocation95_spill] sm:$0xff]  ;;  %v4397_v21 = vmul.f32 %v11533_v57, %v15270_v50  ;;  %v8552_v60 = vpop.eup %8551 }
 0x5eb   : > { %8180 = vset.pattern.permute.xlu1 %v14972_v1  ;;  %v4430_v41 = vadd.f32 %v4398_v4, %v4234_v58  ;;  %v3648_v46 = vmul.f32 %v11476_v24, %v15269_v54  ;;  %v4008_v16 = vmul.f32 %v11494_v42, %v10808_v22  ;;  %v3412_v30 = vmul.f32 %v8552_v60, %v3118_v37  ;;  %v8554_v4 = vpop.eup %8553  ;;  %v11583_v54 = vld [vmem:[%s14774_s10] ss:$0 sm:$0xff]  ;;  %v15272_v22 = vld [vmem:[#allocation89_spill] sm:$0xff] }
 0x5ec   : > { %4178 = vperm.xlu1 %8180, %v11343_v39   ;;  %v11536_v47 = vpop.permute.xlu0 %4542  ;;  %v4233_v51 = vadd.f32 %v4201_v12, %v4037_v15  ;;  %v8556_v12 = vpop.eup %8555  ;;  %v4204_v37 = vmul.f32 %v11503_v6, %v15273_v25 }
 0x5ed   : > { %15262 = vst [vmem:[#allocation111_spill] sm:$0xff] %v11536_v47  ;;  %8201 = vset.pattern.permute.xlu0 %v14974_v62  ;;  %v4626_v28 = vadd.f32 %v4594_v23, %v4430_v41  ;;  %v15274_v41 = vld [vmem:[#allocation6_spill] sm:$0xff] }
 0x5ee   : > { %3638 = vperm.xlu0 %8201, %v11540_v49   ;;  %v4593_v23 = vmul.f32 %v11546_v56, %v15274_v41  ;;  %v15275_v47 = vld [vmem:[#allocation54_spill] sm:$0xff] }
 0x5ef   : > { %v11550_v55 = vpop.permute.xlu1 %4146 }
 0x5f0   : > { %8182 = vset.pattern.permute.xlu1 %v15040_v44 }
 0x5f1   : > { %4570 = vperm.xlu1 %8182, %v11343_v39   ;;  %v11562_v2 = vpop.permute.xlu0 %3598  ;;  %v3844_v39 = vadd.f32 %v3812_v14, %v3648_v46  ;;  %v4429_v14 = vadd.f32 %v4397_v21, %v4233_v51  ;;  %v3220_v46 = vmul.f32 %v8554_v4, %v15272_v22  ;;  %v4665_v51 = vadd.f32 %v11583_v54, %v4626_v28 }
 0x5f2   : > { %15267 = vst [vmem:[#allocation3_spill] sm:$0xff] %v11562_v2  ;;  %8203 = vset.pattern.permute.xlu0 %v14975_v8  ;;  %v4400_v22 = vmul.f32 %v11533_v57, %v10819_v43 }
 0x5f3   : > { %3998 = vperm.xlu0 %8203, %v11540_v49   ;;  %v4040_v50 = vadd.f32 %v4008_v16, %v3844_v39  ;;  %v3316_v2 = vmul.f32 %v8556_v12, %v3220_v46  ;;  %v4625_v21 = vadd.f32 %v4593_v23, %v4429_v14  ;;  %v3814_v39 = vmul.f32 %v11465_v29, %v10932_v59 }
 0x5f4   : > { %v11574_v58 = vpop.permute.xlu1 %4538  ;;  %v3827_v59 = vmul.f32 %v11465_v29, %v11393_v38  ;;  %8557 = vtanh.f32 %v4665_v51  ;;  %v15277_v38 = vld [vmem:[#allocation32_spill] sm:$0xff] }
 0x5f5   : > { %8183 = vset.pattern.permute.xlu1 %v14974_v62  ;;  %v4236_v4 = vadd.f32 %v4204_v37, %v4040_v50  ;;  %v4664_v12 = vadd.f32 %v11583_v54, %v4625_v21  ;;  %v4010_v50 = vmul.f32 %v11494_v42, %v15277_v38  ;;  %v4219_v37 = vmul.f32 %v11503_v6, %v11404_v53 }
 0x5f6   : > { %3613 = vperm.xlu1 %8183, %v11382_v27   ;;  %v11578_v15 = vpop.permute.xlu0 %3966 }
 0x5f7   : > { %15271 = vst [vmem:[#allocation94_spill] sm:$0xff] %v11578_v15  ;;  %8205 = vset.pattern.permute.xlu0 %v15042_v45  ;;  %v3445_v15 = vsel %vm3414_vm4, %v15275_v47, %v3412_v30  ;;  %v3650_v30 = vmul.f32 %v11476_v24, %v10919_v7  ;;  %v4596_v7 = vmul.f32 %v11546_v56, %v10825_v3  ;;  %8559 = vtanh.f32 %v4664_v12 }
 0x5f8   : > { %4390 = vperm.xlu0 %8205, %v11540_v49   ;;  %v11606_v47 = vsel %vm3447_vm5, %v3445_v15, %v3316_v2  ;;  %v4432_v2 = vadd.f32 %v4400_v22, %v4236_v4  ;;  %v4402_v12 = vmul.f32 %v11533_v57, %v10847_v20  ;;  %v4598_v20 = vmul.f32 %v11546_v56, %v10958_v40 }
 0x5f9   : > { %v3574_v60 = vpop.permute.xlu1 %3573  ;;  %15276 = vst [vmem:[#allocation53_spill] sm:$0xff] %v11606_v47  ;;  %v3846_v14 = vadd.f32 %v3814_v39, %v3650_v30  ;;  %vm7370_vm5 = vcmask 310272  }
 0x5fa   : > { %8185 = vset.pattern.permute.xlu1 %v14975_v8  ;;  %v3663_v25 = vmul.f32 %v11476_v24, %v3574_v60  ;;  %v4206_v60 = vmul.f32 %v11503_v6, %v10942_v11  ;;  %v4628_v39 = vadd.f32 %v4596_v7, %v4432_v2  ;;  %v3649_v11 = vmul.f32 %v11476_v24, %v10971_v31 }
 0x5fb   : > { %3978 = vperm.xlu1 %8185, %v11382_v27   ;;  %v11600_v16 = vpop.permute.xlu0 %4358  ;;  %v4042_v23 = vadd.f32 %v4010_v50, %v3846_v14  ;;  %v4009_v14 = vmul.f32 %v11494_v42, %v10981_v0  ;;  %v3816_v31 = vmul.f32 %v11465_v29, %v11020_v48  ;;  %v4205_v50 = vmul.f32 %v11503_v6, %v10871_v63 }
 0x5fc   : > { %8208 = vset.pattern.permute.xlu0 %v14971_v13  ;;  %v3859_v46 = vadd.f32 %v3827_v59, %v3663_v25  ;;  %v4611_v25 = vmul.f32 %v11546_v56, %v11417_v17  ;;  %v3813_v17 = vmul.f32 %v11465_v29, %v10858_v9  ;;  %v3652_v9 = vmul.f32 %v11476_v24, %v11010_v36 }
 0x5fd   : > { %3798 = vperm.xlu0 %8208, %v11606_v47   ;;  %v4238_v22 = vadd.f32 %v4206_v60, %v4042_v23  ;;  %v4012_v36 = vmul.f32 %v11494_v42, %v10897_v18  ;;  %v15281_v60 = vld [vmem:[#allocation128_spill] sm:$0xff]  ;;  %v4208_v63 = vmul.f32 %v11503_v6, %v11036_v34  ;;  %v15282_v34 = vld [vmem:[#allocation121_spill] sm:$0xff] }
 0x5fe   : > { %v3947_v28 = vpop.permute.xlu1 %3946  ;;  %v3845_v7 = vadd.f32 %v3813_v17, %v3649_v11  ;;  %v3848_v38 = vadd.f32 %v3816_v31, %v3652_v9  ;;  %v4597_v11 = vmul.f32 %v11546_v56, %v15282_v34  ;;  %v3653_v34 = vmul.f32 %v11476_v24, %v11137_v19  ;;  %v15293_v19 = vld [vmem:[#allocation139_spill] sm:$0xff] }
 0x5ff   : > { %v4023_v43 = vmul.f32 %v11494_v42, %v3947_v28  ;;  %8187 = vset.pattern.permute.xlu1 %v15042_v45  ;;  %v4667_v28 = vadd.f32 %v11583_v54, %v4628_v39  ;;  %v4434_v2 = vadd.f32 %v4402_v12, %v4238_v22  ;;  %v3651_v22 = vmul.f32 %v11476_v24, %v11059_v61  ;;  %v15283_v12 = vld [vmem:[#allocation38_spill] sm:$0xff] }
 0x600   : > { %4370 = vperm.xlu1 %8187, %v11382_v27   ;;  %v11617_v15 = vpop.permute.xlu0 %3766  ;;  %v4041_v0 = vadd.f32 %v4009_v14, %v3845_v7  ;;  %v4404_v17 = vmul.f32 %v11533_v57, %v15283_v12  ;;  %v15284_v14 = vld [vmem:[#allocation124_spill] sm:$0xff]  ;;  %v15290_v12 = vld [vmem:[#allocation133_spill] sm:$0xff] }
 0x601   : > { %v4055_v41 = vadd.f32 %v4023_v43, %v3859_v46  ;;  %8210 = vset.pattern.permute.xlu0 %v14972_v1  ;;  %v11657_v43 = vpop.eup %8557  ;;  %8561 = vtanh.f32 %v4667_v28  ;;  %v3815_v31 = vmul.f32 %v11465_v29, %v15284_v14 }
 0x602   : > { %4190 = vperm.xlu0 %8210, %v11606_v47   ;;  %15279 = vst [vmem:[#allocation7_spill] sm:$0xff] %v11657_v43  ;;  %v4237_v23 = vadd.f32 %v4205_v50, %v4041_v0 }
 0x603   : > { %v4339_v51 = vpop.permute.xlu1 %4338  ;;  %v4251_v21 = vadd.f32 %v4219_v37, %v4055_v41  ;;  %v4630_v37 = vadd.f32 %v4598_v20, %v4434_v2  ;;  %v4011_v2 = vmul.f32 %v11494_v42, %v11075_v5  ;;  %v3818_v20 = vmul.f32 %v11465_v29, %v11098_v35  ;;  %v15287_v5 = vld [vmem:[#allocation126_spill] sm:$0xff] }
 0x604   : > { %v4415_v3 = vmul.f32 %v11533_v57, %v4339_v51  ;;  %8190 = vset.pattern.permute.xlu1 %v14971_v13  ;;  %v11673_v41 = vpop.eup %8559  ;;  %v4401_v51 = vmul.f32 %v11533_v57, %v15281_v60  ;;  %v3847_v50 = vadd.f32 %v3815_v31, %v3651_v22  ;;  %v4403_v22 = vmul.f32 %v11533_v57, %v11088_v26  ;;  %v15291_v31 = vld [vmem:[#allocation129_spill] sm:$0xff] }
 0x605   : > { %3794 = vperm.xlu1 %8190, %v11421_v33   ;;  %v11632_v53 = vpop.permute.xlu0 %4158  ;;  %15280 = vst [vmem:[#allocation116_spill] sm:$0xff] %v11673_v41  ;;  %v4669_v39 = vadd.f32 %v11583_v54, %v4630_v37  ;;  %v3654_v37 = vmul.f32 %v11476_v24, %v15287_v5 }
 0x606   : > { %v4447_v4 = vadd.f32 %v4415_v3, %v4251_v21  ;;  %8212 = vset.pattern.permute.xlu0 %v15040_v44  ;;  %v4044_v21 = vadd.f32 %v4012_v36, %v3848_v38  ;;  %v4600_v38 = vmul.f32 %v11546_v56, %v11049_v32  ;;  %v4043_v36 = vadd.f32 %v4011_v2, %v3847_v50 }
 0x607   : > { %4582 = vperm.xlu0 %8212, %v11606_v47   ;;  %8563 = vtanh.f32 %v4669_v39  ;;  %v3850_v60 = vadd.f32 %v3818_v20, %v3654_v37  ;;  %v15289_v39 = vld [vmem:[#allocation14_spill] sm:$0xff]  ;;  %v3817_v2 = vmul.f32 %v11465_v29, %v15291_v31  ;;  %v15292_v20 = vld [vmem:[#allocation136_spill] sm:$0xff] }
 0x608   : > { %v11640_v30 = vadd.f32 %v4611_v25, %v4447_v4  ;;  %v11642_v59 = vpop.permute.xlu1 %3762  ;;  %v4433_v25 = vadd.f32 %v4401_v51, %v4237_v23  ;;  %v4240_v4 = vadd.f32 %v4208_v63, %v4044_v21  ;;  %v15288_v51 = vld [vmem:[#allocation11_spill] sm:$0xff]  ;;  %v4013_v26 = vmul.f32 %v11494_v42, %v15292_v20  ;;  %v15301_v20 = vld [vmem:[#allocation20_spill] sm:$0xff] }
 0x609   : > { %8192 = vset.pattern.permute.xlu1 %v14972_v1  ;;  %v4207_v21 = vmul.f32 %v11503_v6, %v15288_v51  ;;  %v3849_v37 = vadd.f32 %v3817_v2, %v3653_v34  ;;  %v15296_v51 = vld [vmem:[#allocation39_spill] sm:$0xff] }
 0x60a   : > { %4186 = vperm.xlu1 %8192, %v11421_v33   ;;  %v11655_v46 = vpop.permute.xlu0 %4550  ;;  %v4629_v61 = vadd.f32 %v4597_v11, %v4433_v25  ;;  %v4436_v0 = vadd.f32 %v4404_v17, %v4240_v4  ;;  %v4014_v25 = vmul.f32 %v11494_v42, %v15289_v39  ;;  %v4210_v17 = vmul.f32 %v11503_v6, %v15290_v12 }
 0x60b   : > { %15278 = vst [vmem:[#allocation91_spill] sm:$0xff] %v11655_v46  ;;  %8214 = vset.pattern.permute.xlu0 %v14971_v13  ;;  %v4239_v4 = vadd.f32 %v4207_v21, %v4043_v36  ;;  %v15295_v36 = vld [vmem:[#allocation41_spill] sm:$0xff]  ;;  %v4599_v21 = vmul.f32 %v11546_v56, %v15296_v51 }
 0x60c   : > { %4931 = vperm.xlu0 %8214, %v11657_v43   ;;  %v4668_v23 = vadd.f32 %v11583_v54, %v4629_v61  ;;  %v4632_v32 = vadd.f32 %v4600_v38, %v4436_v0  ;;  %v4046_v11 = vadd.f32 %v4014_v25, %v3850_v60  ;;  %v3820_v0 = vmul.f32 %v11465_v29, %v15293_v19  ;;  %v15297_v25 = vld [vmem:[#allocation40_spill] sm:$0xff]  ;;  %v15304_v51 = vld [vmem:[#allocation141_spill] sm:$0xff] }
 0x60d   : > { %v11665_v48 = vpop.permute.xlu1 %4154  ;;  %v4435_v5 = vadd.f32 %v4403_v22, %v4239_v4  ;;  %v4406_v12 = vmul.f32 %v11533_v57, %v15297_v25  ;;  %v15298_v22 = vld [vmem:[#allocation13_spill] sm:$0xff] }
 0x60e   : > { %8194 = vset.pattern.permute.xlu1 %v15040_v44  ;;  %v11710_v9 = vpop.eup %8561  ;;  %8565 = vtanh.f32 %v4668_v23  ;;  %v4671_v61 = vadd.f32 %v11583_v54, %v4632_v32  ;;  %v3656_v23 = vmul.f32 %v11476_v24, %v15295_v36  ;;  %v4242_v60 = vadd.f32 %v4210_v17, %v4046_v11  ;;  %v15300_v17 = vld [vmem:[#allocation17_spill] sm:$0xff]  ;;  %v15303_v36 = vld [vmem:[#allocation144_spill] sm:$0xff] }
 0x60f   : > { %4578 = vperm.xlu1 %8194, %v11421_v33   ;;  %v11671_v40 = vpop.permute.xlu0 %3608  ;;  %15286 = vst [vmem:[#allocation95_spill] sm:$0xff] %v11710_v9  ;;  %v4045_v32 = vadd.f32 %v4013_v26, %v3849_v37  ;;  %v4209_v34 = vmul.f32 %v11503_v6, %v15298_v22  ;;  %v4631_v31 = vadd.f32 %v4599_v21, %v4435_v5 }
 0x610   : > { %8216 = vset.pattern.permute.xlu0 %v14974_v62  ;;  %8567 = vtanh.f32 %v4671_v61  ;;  %v3852_v4 = vadd.f32 %v3820_v0, %v3656_v23  ;;  %v4016_v2 = vmul.f32 %v11494_v42, %v15300_v17  ;;  %v4438_v61 = vadd.f32 %v4406_v12, %v4242_v60  ;;  %v15302_v0 = vld [vmem:[#allocation19_spill] sm:$0xff] }
 0x611   : > { %4732 = vperm.xlu0 %8216, %v11673_v41   ;;  %v4602_v26 = vmul.f32 %v11546_v56, %v15301_v20  ;;  %v4241_v19 = vadd.f32 %v4209_v34, %v4045_v32  ;;  %v4405_v37 = vmul.f32 %v11533_v57, %v15302_v0  ;;  %v3655_v5 = vmul.f32 %v11476_v24, %v15303_v36  ;;  %v15305_v60 = vld [vmem:[#allocation131_spill] sm:$0xff]  ;;  %v15306_v32 = vld [vmem:[#allocation146_spill] sm:$0xff]  ;;  %v15307_v20 = vld [vmem:[#allocation149_spill] sm:$0xff] }
 0x612   : > { %v11683_v3 = vpop.permute.xlu1 %4546  ;;  %v4048_v23 = vadd.f32 %v4016_v2, %v3852_v4  ;;  %v4212_v21 = vmul.f32 %v11503_v6, %v15304_v51  ;;  %v3819_v12 = vmul.f32 %v11465_v29, %v15305_v60  ;;  %v4670_v22 = vadd.f32 %v11583_v54, %v4631_v31  ;;  %v15308_v31 = vld [vmem:[#allocation134_spill] sm:$0xff] }
 0x613   : > { %8195 = vset.pattern.permute.xlu1 %v14974_v62  ;;  %v4015_v34 = vmul.f32 %v11494_v42, %v15306_v32  ;;  %v4634_v17 = vadd.f32 %v4602_v26, %v4438_v61  ;;  %v3822_v0 = vmul.f32 %v11465_v29, %v15307_v20  ;;  %v4437_v36 = vadd.f32 %v4405_v37, %v4241_v19  ;;  %v15309_v61 = vld [vmem:[#allocation8_spill] sm:$0xff]  ;;  %v15310_v20 = vld [vmem:[#allocation101_spill] sm:$0xff]  ;;  %v15311_v19 = vld [vmem:[#allocation42_spill] sm:$0xff] }
 0x614   : > { %3623 = vperm.xlu1 %8195, %v11469_v52   ;;  %v11688_v18 = vpop.permute.xlu0 %3974  ;;  %v11750_v50 = vpop.eup %8563  ;;  %v3851_v51 = vadd.f32 %v3819_v12, %v3655_v5  ;;  %v3658_v60 = vmul.f32 %v11476_v24, %v15308_v31  ;;  %v4244_v32 = vadd.f32 %v4212_v21, %v4048_v23  ;;  %v3811_v26 = vmul.f32 %v11465_v29, %v15309_v61  ;;  %v15312_v23 = vld [vmem:[#allocation118_spill] sm:$0xff]  ;;  %v15313_v31 = vld [vmem:[#allocation16_spill] sm:$0xff] }
 0x615   : > { %8218 = vset.pattern.permute.xlu0 %v14975_v8  ;;  %v4601_v33 = vmul.f32 %v11546_v56, %v15310_v20  ;;  %8569 = vtanh.f32 %v4670_v22  ;;  %v4408_v37 = vmul.f32 %v11533_v57, %v15311_v19  ;;  %v4673_v5 = vadd.f32 %v11583_v54, %v4634_v17  ;;  %v15316_v17 = vld [vmem:[#allocation135_spill] sm:$0xff]  ;;  %v15317_v19 = vld [vmem:[#allocation22_spill] sm:$0xff] }
 0x616   : > { %5123 = vperm.xlu0 %8218, %v11673_v41   ;;  %v3854_v12 = vadd.f32 %v3822_v0, %v3658_v60  ;;  %v3647_v21 = vmul.f32 %v11476_v24, %v15312_v23  ;;  %v4211_v61 = vmul.f32 %v11503_v6, %v15313_v31  ;;  %v4018_v0 = vmul.f32 %v11494_v42, %v15316_v17 }
 0x617   : > { %v11696_v28 = vpop.permute.xlu1 %3583  ;;  %v4440_v60 = vadd.f32 %v4408_v37, %v4244_v32  ;;  %v4604_v23 = vmul.f32 %v11546_v56, %v15317_v19  ;;  %8571 = vtanh.f32 %v4673_v5  ;;  %v15321_v37 = vld [vmem:[#allocation151_spill] sm:$0xff] }
 0x618   : > { %8197 = vset.pattern.permute.xlu1 %v14975_v8  ;;  %v3843_v31 = vadd.f32 %v3811_v26, %v3647_v21  ;;  %v4050_v32 = vadd.f32 %v4018_v0, %v3854_v12  ;;  %v4214_v17 = vmul.f32 %v11503_v6, %v15321_v37  ;;  %v15322_v26 = vld [vmem:[#allocation137_spill] sm:$0xff]  ;;  %v15326_v0 = vld [vmem:[#allocation12_spill] sm:$0xff] }
 0x619   : > { %3986 = vperm.xlu1 %8197, %v11469_v52   ;;  %v11708_v7 = vpop.permute.xlu0 %4366  ;;  %v4399_v37 = vmul.f32 %v11533_v57, %v15326_v0 }
 0x61a   : > { %15285 = vst [vmem:[#allocation23_spill] sm:$0xff] %v11708_v7  ;;  %8219 = vset.pattern.permute.xlu0 %v14974_v62 }
 0x61b   : > { %4747 = vperm.xlu0 %8219, %v11710_v9   ;;  %v11793_v2 = vpop.eup %8565 }
 0x61c   : > { %v11718_v35 = vpop.permute.xlu1 %3954 }
 0x61d   : > { %8199 = vset.pattern.permute.xlu1 %v15042_v45 }
 0x61e   : > { %4378 = vperm.xlu1 %8199, %v11469_v52   ;;  %v11725_v63 = vpop.permute.xlu0 %3774  ;;  %v4047_v52 = vadd.f32 %v4015_v34, %v3851_v51  ;;  %v11816_v34 = vpop.eup %8567  ;;  %v15315_v51 = vld [vmem:[#allocation119_spill] sm:$0xff] }
 0x61f   : > { %8220 = vset.pattern.permute.xlu0 %v14975_v8  ;;  %v4007_v20 = vmul.f32 %v11494_v42, %v15315_v51  ;;  %v15320_v51 = vld [vmem:[#allocation120_spill] sm:$0xff] }
 0x620   : > { %5135 = vperm.xlu0 %8220, %v11710_v9  }
 0x621   : > { %v11737_v14 = vpop.permute.xlu1 %4346 }
 0x622   : > { %8202 = vset.pattern.permute.xlu1 %v14971_v13 }
 0x623   : > { %3802 = vperm.xlu1 %8202, %v11540_v49   ;;  %v11748_v38 = vpop.permute.xlu0 %4166 }
 0x624   : > { %15294 = vst [vmem:[#allocation98_spill] sm:$0xff] %v11748_v38  ;;  %8224 = vset.pattern.permute.xlu0 %v14974_v62  ;;  %v4636_v38 = vadd.f32 %v4604_v23, %v4440_v60  ;;  %v15328_v60 = vld [vmem:[#allocation122_spill] sm:$0xff] }
 0x625   : > { %4757 = vperm.xlu0 %8224, %v11750_v50   ;;  %v4595_v23 = vmul.f32 %v11546_v56, %v15328_v60 }
 0x626   : > { %v11758_v39 = vpop.permute.xlu1 %3770 }
 0x627   : > { %8204 = vset.pattern.permute.xlu1 %v14972_v1  ;;  %v15319_v1 = vld [vmem:[#allocation154_spill] sm:$0xff] }
 0x628   : > { %4194 = vperm.xlu1 %8204, %v11540_v49   ;;  %v11766_v11 = vpop.permute.xlu0 %4558 }
 0x629   : > { %15299 = vst [vmem:[#allocation89_spill] sm:$0xff] %v11766_v11  ;;  %8226 = vset.pattern.permute.xlu0 %v14975_v8  ;;  %v3657_v11 = vmul.f32 %v11476_v24, %v15319_v1 }
 0x62a   : > { %5143 = vperm.xlu0 %8226, %v11750_v50  }
 0x62b   : > { %v11780_v25 = vpop.permute.xlu1 %4162 }
 0x62c   : > { %8206 = vset.pattern.permute.xlu1 %v15040_v44 }
 0x62d   : > { %4586 = vperm.xlu1 %8206, %v11540_v49   ;;  %v11791_v4 = vpop.permute.xlu0 %3618  ;;  %v4633_v49 = vadd.f32 %v4601_v33, %v4437_v36  ;;  %v4243_v33 = vadd.f32 %v4211_v61, %v4047_v52  ;;  %v15318_v36 = vld [vmem:[#allocation21_spill] sm:$0xff]  ;;  %v3821_v52 = vmul.f32 %v11465_v29, %v15322_v26  ;;  %v15323_v61 = vld [vmem:[#allocation156_spill] sm:$0xff] }
 0x62e   : > { %8228 = vset.pattern.permute.xlu0 %v14971_v13  ;;  %v4407_v44 = vmul.f32 %v11533_v57, %v15318_v36  ;;  %v4017_v1 = vmul.f32 %v11494_v42, %v15323_v61  ;;  %v4039_v36 = vadd.f32 %v4007_v20, %v3843_v31  ;;  %v15327_v61 = vld [vmem:[#allocation142_spill] sm:$0xff]  ;;  %v4246_v20 = vadd.f32 %v4214_v17, %v4050_v32  ;;  %v15329_v31 = vld [vmem:[#allocation43_spill] sm:$0xff] }
 0x62f   : > { %4943 = vperm.xlu0 %8228, %v11793_v2   ;;  %v4672_v21 = vadd.f32 %v11583_v54, %v4633_v49  ;;  %v3853_v7 = vadd.f32 %v3821_v52, %v3657_v11  ;;  %v3660_v46 = vmul.f32 %v11476_v24, %v15327_v61  ;;  %v15331_v17 = vld [vmem:[#allocation138_spill] sm:$0xff] }
 0x630   : > { %v11803_v27 = vpop.permute.xlu1 %4554  ;;  %v4439_v26 = vadd.f32 %v4407_v44, %v4243_v33  ;;  %v15330_v44 = vld [vmem:[#allocation104_spill] sm:$0xff]  ;;  %v4213_v52 = vmul.f32 %v11503_v6, %v15331_v17  ;;  %v15336_v17 = vld [vmem:[#allocation158_spill] sm:$0xff] }
 0x631   : > { %8207 = vset.pattern.permute.xlu1 %v14974_v62  ;;  %8573 = vtanh.f32 %v4672_v21  ;;  %v4410_v11 = vmul.f32 %v11533_v57, %v15330_v44  ;;  %v15332_v21 = vld [vmem:[#allocation143_spill] sm:$0xff] }
 0x632   : > { %3633 = vperm.xlu1 %8207, %v11606_v47   ;;  %v11814_v22 = vpop.permute.xlu0 %3982 }
 0x633   : > { %15314 = vst [vmem:[#allocation9_spill] sm:$0xff] %v11814_v22  ;;  %8230 = vset.pattern.permute.xlu0 %v14974_v62  ;;  %v4203_v22 = vmul.f32 %v11503_v6, %v15320_v51  ;;  %v15324_v51 = vld [vmem:[#allocation2_spill] sm:$0xff]  ;;  %v4442_v60 = vadd.f32 %v4410_v11, %v4246_v20  ;;  %v4216_v20 = vmul.f32 %v11503_v6, %v15336_v17 }
 0x634   : > { %4767 = vperm.xlu0 %8230, %v11816_v34   ;;  %v3824_v5 = vmul.f32 %v11465_v29, %v15324_v51  ;;  %v4603_v51 = vmul.f32 %v11546_v56, %v15329_v31  ;;  %v15333_v31 = vld [vmem:[#allocation25_spill] sm:$0xff] }
 0x635   : > { %v11834_v19 = vpop.permute.xlu1 %3593  ;;  %v4235_v49 = vadd.f32 %v4203_v22, %v4039_v36  ;;  %v4675_v22 = vadd.f32 %v11583_v54, %v4636_v38 }
 0x636   : > { %8209 = vset.pattern.permute.xlu1 %v14975_v8  ;;  %v3856_v33 = vadd.f32 %v3824_v5, %v3660_v46  ;;  %v4635_v36 = vadd.f32 %v4603_v51, %v4439_v26  ;;  %v4606_v46 = vmul.f32 %v11546_v56, %v15333_v31 }
 0x637   : > { %3994 = vperm.xlu1 %8209, %v11606_v47   ;;  %v11845_v12 = vpop.permute.xlu0 %4374  ;;  %v4431_v32 = vadd.f32 %v4399_v37, %v4235_v49  ;;  %v15334_v37 = vld [vmem:[#allocation24_spill] sm:$0xff]  ;;  %v15335_v49 = vld [vmem:[#allocation83_spill] sm:$0xff]  ;;  %8575 = vtanh.f32 %v4675_v22 }
 0x638   : > { %15325 = vst [vmem:[#allocation6_spill] sm:$0xff] %v11845_v12  ;;  %8232 = vset.pattern.permute.xlu0 %v14975_v8  ;;  %v4049_v12 = vadd.f32 %v4017_v1, %v3853_v7  ;;  %v11868_v7 = vpop.eup %8569  ;;  %v4020_v1 = vmul.f32 %v11494_v42, %v15332_v21  ;;  %v4409_v26 = vmul.f32 %v11533_v57, %v15334_v37  ;;  %v15337_v21 = vld [vmem:[#allocation147_spill] sm:$0xff]  ;;  %v15339_v37 = vld [vmem:[#allocation10_spill] sm:$0xff] }
 0x639   : > { %5151 = vperm.xlu0 %8232, %v11816_v34   ;;  %v4627_v38 = vadd.f32 %v4595_v23, %v4431_v32  ;;  %v3659_v51 = vmul.f32 %v11476_v24, %v15335_v49  ;;  %v3823_v31 = vmul.f32 %v11465_v29, %v15337_v21  ;;  %v15338_v23 = vld [vmem:[#allocation160_spill] sm:$0xff]  ;;  %v3826_v22 = vmul.f32 %v11465_v29, %v15339_v37 }
 0x63a   : > { %v11857_v0 = vpop.permute.xlu1 %3962  ;;  %v4245_v5 = vadd.f32 %v4213_v52, %v4049_v12  ;;  %v4052_v44 = vadd.f32 %v4020_v1, %v3856_v33  ;;  %v4674_v12 = vadd.f32 %v11583_v54, %v4635_v36  ;;  %v4019_v32 = vmul.f32 %v11494_v42, %v15338_v23  ;;  %v11895_v1 = vpop.eup %8571  ;;  %v15341_v36 = vld [vmem:[#allocation152_spill] sm:$0xff] }
 0x63b   : > { %8211 = vset.pattern.permute.xlu1 %v15042_v45  ;;  %v4638_v52 = vadd.f32 %v4606_v46, %v4442_v60  ;;  %v4666_v49 = vadd.f32 %v11583_v54, %v4627_v38  ;;  %v3855_v21 = vadd.f32 %v3823_v31, %v3659_v51  ;;  %v3662_v23 = vmul.f32 %v11476_v24, %v15341_v36  ;;  %v15342_v60 = vld [vmem:[#allocation45_spill] sm:$0xff]  ;;  %v15344_v51 = vld [vmem:[#allocation148_spill] sm:$0xff] }
 0x63c   : > { %4386 = vperm.xlu1 %8211, %v11606_v47   ;;  %v11866_v61 = vpop.permute.xlu0 %3782  ;;  %v4441_v17 = vadd.f32 %v4409_v26, %v4245_v5  ;;  %v4248_v47 = vadd.f32 %v4216_v20, %v4052_v44  ;;  %v4605_v46 = vmul.f32 %v11546_v56, %v15342_v60  ;;  %8577 = vtanh.f32 %v4674_v12  ;;  %v15348_v36 = vld [vmem:[#allocation28_spill] sm:$0xff] }
 0x63d   : > { %8234 = vset.pattern.permute.xlu0 %v14971_v13  ;;  %v4051_v37 = vadd.f32 %v4019_v32, %v3855_v21  ;;  %v4677_v5 = vadd.f32 %v11583_v54, %v4638_v52  ;;  %v3858_v26 = vadd.f32 %v3826_v22, %v3662_v23  ;;  %8579 = vtanh.f32 %v4666_v49  ;;  %v15347_v32 = vld [vmem:[#allocation153_spill] sm:$0xff]  ;;  %v15349_v49 = vld [vmem:[#allocation27_spill] sm:$0xff] }
 0x63e   : > { %4951 = vperm.xlu0 %8234, %v11868_v7   ;;  %v4215_v44 = vmul.f32 %v11503_v6, %v15344_v51  ;;  %v4637_v20 = vadd.f32 %v4605_v46, %v4441_v17  ;;  %v11915_v12 = vpop.eup %8573  ;;  %v4022_v21 = vmul.f32 %v11494_v42, %v15347_v32  ;;  %v4608_v52 = vmul.f32 %v11546_v56, %v15348_v36  ;;  %v15350_v17 = vld [vmem:[#allocation87_spill] sm:$0xff] }
 0x63f   : > { %v11882_v11 = vpop.permute.xlu1 %4354  ;;  %15346 = vst [vmem:[#allocation128_spill] sm:$0xff] %v11915_v12  ;;  %v4411_v23 = vmul.f32 %v11533_v57, %v15349_v49  ;;  %v3661_v60 = vmul.f32 %v11476_v24, %v15350_v17  ;;  %8581 = vtanh.f32 %v4677_v5  ;;  %v15351_v51 = vld [vmem:[#allocation51_spill] sm:$0xff]  ;;  %v3828_v5 = vmul.f32 %v11465_v29, %v11520_v10 }
 0x640   : > { %8213 = vset.pattern.permute.xlu1 %v14974_v62  ;;  %v4247_v22 = vadd.f32 %v4215_v44, %v4051_v37  ;;  %v4054_v46 = vadd.f32 %v4022_v21, %v3858_v26  ;;  %v4218_v32 = vmul.f32 %v11503_v6, %v15351_v51  ;;  %v4676_v37 = vadd.f32 %v11583_v54, %v4637_v20  ;;  %v15353_v44 = vld [vmem:[#allocation162_spill] sm:$0xff]  ;;  %v15354_v20 = vld [vmem:[#allocation159_spill] sm:$0xff] }
 0x641   : > { %4737 = vperm.xlu1 %8213, %v11657_v43   ;;  %v11893_v33 = vpop.permute.xlu0 %4174  ;;  %v4021_v49 = vmul.f32 %v11494_v42, %v15353_v44 }
 0x642   : > { %15340 = vst [vmem:[#allocation54_spill] sm:$0xff] %v11893_v33  ;;  %8236 = vset.pattern.permute.xlu0 %v14974_v62  ;;  %v15343_v33 = vld [vmem:[#allocation46_spill] sm:$0xff]  ;;  %v4443_v51 = vadd.f32 %v4411_v23, %v4247_v22  ;;  %v4250_v44 = vadd.f32 %v4218_v32, %v4054_v46  ;;  %8583 = vtanh.f32 %v4676_v37  ;;  %v15358_v37 = vld [vmem:[#allocation84_spill] sm:$0xff] }
 0x643   : > { %4777 = vperm.xlu0 %8236, %v11895_v1   ;;  %v4412_v38 = vmul.f32 %v11533_v57, %v15343_v33 }
 0x644   : > { %v11904_v45 = vpop.permute.xlu1 %3778  ;;  %v11942_v21 = vpop.eup %8575 }
 0x645   : > { %8215 = vset.pattern.permute.xlu1 %v14975_v8  ;;  %v4444_v33 = vadd.f32 %v4412_v38, %v4248_v47  ;;  %v15352_v38 = vld [vmem:[#allocation157_spill] sm:$0xff] }
 0x646   : > { %5127 = vperm.xlu1 %8215, %v11657_v43   ;;  %v11913_v31 = vpop.permute.xlu0 %4566  ;;  %v3825_v36 = vmul.f32 %v11465_v29, %v15352_v38  ;;  %v3664_v38 = vmul.f32 %v11476_v24, %v15354_v20 }
 0x647   : > { %15345 = vst [vmem:[#allocation32_spill] sm:$0xff] %v11913_v31  ;;  %8239 = vset.pattern.permute.xlu0 %v14971_v13  ;;  %v4640_v17 = vadd.f32 %v4608_v52, %v4444_v33  ;;  %v15355_v33 = vld [vmem:[#allocation47_spill] sm:$0xff]  ;;  %v15356_v31 = vld [vmem:[#allocation48_spill] sm:$0xff] }
 0x648   : > { %4959 = vperm.xlu0 %8239, %v11915_v12   ;;  %v3857_v43 = vadd.f32 %v3825_v36, %v3661_v60  ;;  %v4607_v52 = vmul.f32 %v11546_v56, %v15355_v33  ;;  %v4414_v12 = vmul.f32 %v11533_v57, %v15356_v31  ;;  %v3860_v23 = vadd.f32 %v3828_v5, %v3664_v38  ;;  %v15357_v60 = vld [vmem:[#allocation109_spill] sm:$0xff]  ;;  %v15359_v33 = vld [vmem:[#allocation30_spill] sm:$0xff] }
 0x649   : > { %v11929_v47 = vpop.permute.xlu1 %4170  ;;  %v4679_v22 = vadd.f32 %v11583_v54, %v4640_v17  ;;  %v4217_v46 = vmul.f32 %v11503_v6, %v15357_v60  ;;  %v11960_v20 = vpop.eup %8577  ;;  %v4610_v31 = vmul.f32 %v11546_v56, %v15359_v33  ;;  %v15360_v5 = vld [vmem:[#allocation29_spill] sm:$0xff]  ;;  %v4220_v60 = vmul.f32 %v11503_v6, %v11550_v55 }
 0x64a   : > { %8217 = vset.pattern.permute.xlu1 %v14971_v13  ;;  %v4053_v10 = vadd.f32 %v4021_v49, %v3857_v43  ;;  %v4639_v32 = vadd.f32 %v4607_v52, %v4443_v51  ;;  %v4024_v43 = vmul.f32 %v11494_v42, %v15358_v37  ;;  %v4446_v49 = vadd.f32 %v4414_v12, %v4250_v44  ;;  %v11970_v51 = vpop.eup %8579  ;;  %v15363_v55 = vld [vmem:[#allocation161_spill] sm:$0xff] }
 0x64b   : > { %4927 = vperm.xlu1 %8217, %v11673_v41   ;;  %v11940_v26 = vpop.permute.xlu0 %3628  ;;  %v4413_v38 = vmul.f32 %v11533_v57, %v15360_v5  ;;  %15361 = vst [vmem:[#allocation121_spill] sm:$0xff] %v11970_v51  ;;  %8585 = vtanh.f32 %v4679_v22 }
 0x64c   : > { %8241 = vset.pattern.permute.xlu0 %v14974_v62  ;;  %v4249_v17 = vadd.f32 %v4217_v46, %v4053_v10  ;;  %v4056_v52 = vadd.f32 %v4024_v43, %v3860_v23  ;;  %v4678_v12 = vadd.f32 %v11583_v54, %v4639_v32  ;;  %v4642_v44 = vadd.f32 %v4610_v31, %v4446_v49  ;;  %v11983_v33 = vpop.eup %8581  ;;  %v15364_v32 = vld [vmem:[#allocation85_spill] sm:$0xff] }
 0x64d   : > { %4787 = vperm.xlu0 %8241, %v11942_v21   ;;  %v3830_v10 = vmul.f32 %v11465_v29, %v11642_v59  ;;  %15362 = vst [vmem:[#allocation38_spill] sm:$0xff] %v11983_v33  ;;  %v3666_v23 = vmul.f32 %v11476_v24, %v15363_v55  ;;  %v4609_v5 = vmul.f32 %v11546_v56, %v15364_v32  ;;  %v15365_v59 = vld [vmem:[#allocation93_spill] sm:$0xff] }
 0x64e   : > { %v11950_v41 = vpop.permute.xlu1 %4562  ;;  %v4445_v22 = vadd.f32 %v4413_v38, %v4249_v17  ;;  %v4252_v43 = vadd.f32 %v4220_v60, %v4056_v52  ;;  %8587 = vtanh.f32 %v4678_v12  ;;  %v4416_v31 = vmul.f32 %v11533_v57, %v15365_v59 }
 0x64f   : > { %4939 = vperm.xlu1 %8217, %v11710_v9   ;;  %v4681_v17 = vadd.f32 %v11583_v54, %v4642_v44  ;;  %v3862_v38 = vadd.f32 %v3830_v10, %v3666_v23  ;;  %v12000_v60 = vpop.eup %8583  ;;  %v15366_v9 = vld [vmem:[#allocation110_spill] sm:$0xff]  ;;  %v3665_v44 = vmul.f32 %v11476_v24, %v11696_v28  ;;  %v3832_v59 = vmul.f32 %v11465_v29, %v11758_v39 }
 0x650   : > { %v11958_v36 = vpop.permute.xlu0 %3990  ;;  %v4641_v55 = vadd.f32 %v4609_v5, %v4445_v22  ;;  %v4026_v12 = vmul.f32 %v11494_v42, %v15366_v9  ;;  %v4448_v32 = vadd.f32 %v4416_v31, %v4252_v43  ;;  %v4222_v22 = vmul.f32 %v11503_v6, %v11665_v48  ;;  %v15367_v9 = vld [vmem:[#allocation114_spill] sm:$0xff] }
 0x651   : > { %8244 = vset.pattern.permute.xlu0 %v14971_v13  ;;  %8589 = vtanh.f32 %v4681_v17  ;;  %v3829_v43 = vmul.f32 %v11465_v29, %v15367_v9  ;;  %v4025_v5 = vmul.f32 %v11494_v42, %v11718_v35  ;;  %v15369_v39 = vld [vmem:[#allocation18_spill] sm:$0xff] }
 0x652   : > { %4967 = vperm.xlu0 %8244, %v11960_v20   ;;  %v4058_v10 = vadd.f32 %v4026_v12, %v3862_v38  ;;  %v15368_v38 = vld [vmem:[#allocation3_spill] sm:$0xff] }
 0x653   : > { %v11974_v37 = vpop.permute.xlu1 %3603  ;;  %8221 = vset.pattern.permute.xlu1 %v14974_v62  ;;  %v3861_v17 = vadd.f32 %v3829_v43, %v3665_v44  ;;  %v3668_v12 = vmul.f32 %v11476_v24, %v15368_v38  ;;  %v15370_v43 = vld [vmem:[#allocation90_spill] sm:$0xff] }
 0x654   : > { %4742 = vperm.xlu1 %8221, %v11970_v51   ;;  %v4221_v38 = vmul.f32 %v11503_v6, %v15370_v43  ;;  %v4224_v43 = vmul.f32 %v11503_v6, %v11780_v25 }
 0x655   : > { %v11981_v46 = vpop.permute.xlu0 %4382  ;;  %v4057_v35 = vadd.f32 %v4025_v5, %v3861_v17  ;;  %v3864_v44 = vadd.f32 %v3832_v59, %v3668_v12  ;;  %v4417_v59 = vmul.f32 %v11533_v57, %v11737_v14  ;;  %v3667_v12 = vmul.f32 %v11476_v24, %v11834_v19 }
 0x656   : > { %8245 = vset.pattern.permute.xlu0 %v14974_v62  ;;  %v4682_v14 = vadd.f32 %v11583_v54, %v11640_v30  ;;  %v4027_v19 = vmul.f32 %v11494_v42, %v11857_v0  ;;  %v15372_v0 = vld [vmem:[#allocation111_spill] sm:$0xff] }
 0x657   : > { %4797 = vperm.xlu0 %8245, %v11983_v33   ;;  %v4612_v33 = vmul.f32 %v11546_v56, %v11574_v58  ;;  %v4680_v58 = vadd.f32 %v11583_v54, %v4641_v55  ;;  %v4254_v55 = vadd.f32 %v4222_v22, %v4058_v10 }
 0x658   : > { %v11991_v49 = vpop.permute.xlu1 %3970  ;;  %8222 = vset.pattern.permute.xlu1 %v14971_v13  ;;  %v12025_v48 = vpop.eup %8585 }
 0x659   : > { %4935 = vperm.xlu1 %8222, %v11970_v51   ;;  %v4644_v28 = vadd.f32 %v4612_v33, %v4448_v32  ;;  %8591 = vtanh.f32 %v4680_v58  ;;  %v4418_v33 = vmul.f32 %v11533_v57, %v15369_v39  ;;  %v15371_v58 = vld [vmem:[#allocation94_spill] sm:$0xff] }
 0x65a   : > { %v11998_v52 = vpop.permute.xlu0 %3790  ;;  %v4028_v5 = vmul.f32 %v11494_v42, %v15371_v58 }
 0x65b   : > { %8248 = vset.pattern.permute.xlu0 %v14971_v13  ;;  %v4683_v32 = vadd.f32 %v11583_v54, %v4644_v28  ;;  %v12042_v22 = vpop.eup %8587  ;;  %v4450_v17 = vadd.f32 %v4418_v33, %v4254_v55  ;;  %v4253_v28 = vadd.f32 %v4221_v38, %v4057_v35  ;;  %v3834_v33 = vmul.f32 %v11465_v29, %v11904_v45 }
 0x65c   : > { %4975 = vperm.xlu0 %8248, %v12000_v60   ;;  %v4060_v39 = vadd.f32 %v4028_v5, %v3864_v44  ;;  %v4420_v5 = vmul.f32 %v11533_v57, %v11600_v16  ;;  %v4616_v16 = vmul.f32 %v11546_v56, %v11803_v27  ;;  %v3833_v27 = vmul.f32 %v11465_v29, %v11725_v63 }
 0x65d   : > { %v12012_v23 = vpop.permute.xlu1 %4362  ;;  %8223 = vset.pattern.permute.xlu1 %v14975_v8  ;;  %8593 = vtanh.f32 %v4683_v32  ;;  %v4449_v44 = vadd.f32 %v4417_v59, %v4253_v28  ;;  %v3672_v63 = vmul.f32 %v11476_v24, %v11791_v4  ;;  %v15375_v4 = vld [vmem:[#allocation98_spill] sm:$0xff] }
 0x65e   : > { %5131 = vperm.xlu1 %8223, %v11970_v51   ;;  %v4614_v51 = vmul.f32 %v11546_v56, %v11683_v3  ;;  %v3831_v3 = vmul.f32 %v11465_v29, %v11617_v15  ;;  %v12070_v32 = vpop.eup %8589  ;;  %v3670_v15 = vmul.f32 %v11476_v24, %v11671_v40  ;;  %v4256_v30 = vadd.f32 %v4224_v43, %v4060_v39 }
 0x65f   : > { %v12023_v31 = vpop.permute.xlu0 %4182  ;;  %8595 = vtanh.f32 %v4682_v14  ;;  %v4223_v40 = vmul.f32 %v11503_v6, %v11632_v53  ;;  %v4030_v43 = vmul.f32 %v11494_v42, %v11688_v18  ;;  %v3669_v53 = vmul.f32 %v11476_v24, %v11974_v37 }
 0x660   : > { %8249 = vset.pattern.permute.xlu0 %v14974_v62  ;;  %v4646_v35 = vadd.f32 %v4614_v51, %v4450_v17  ;;  %v3863_v38 = vadd.f32 %v3831_v3, %v3667_v12  ;;  %v4613_v51 = vmul.f32 %v11546_v56, %v15372_v0  ;;  %v3866_v28 = vadd.f32 %v3834_v33, %v3670_v15 }
 0x661   : > { %4807 = vperm.xlu0 %8249, %v12025_v48   ;;  %v4452_v3 = vadd.f32 %v4420_v5, %v4256_v30  ;;  %v4226_v18 = vmul.f32 %v11503_v6, %v11929_v47  ;;  %v3865_v0 = vadd.f32 %v3833_v27, %v3669_v53 }
 0x662   : > { %v12031_v9 = vpop.permute.xlu1 %3786  ;;  %8225 = vset.pattern.permute.xlu1 %v14971_v13  ;;  %v4059_v58 = vadd.f32 %v4027_v19, %v3863_v38  ;;  %v4685_v17 = vadd.f32 %v11583_v54, %v4646_v35  ;;  %v4645_v59 = vadd.f32 %v4613_v51, %v4449_v44  ;;  %v4419_v19 = vmul.f32 %v11533_v57, %v11882_v11 }
 0x663   : > { %4947 = vperm.xlu1 %8225, %v11750_v50   ;;  %v4062_v35 = vadd.f32 %v4030_v43, %v3866_v28  ;;  %v4029_v11 = vmul.f32 %v11494_v42, %v11991_v49  ;;  %v4648_v37 = vadd.f32 %v4616_v16, %v4452_v3  ;;  %v3836_v38 = vmul.f32 %v11465_v29, %v12031_v9  ;;  %v15373_v49 = vld [vmem:[#allocation91_spill] sm:$0xff] }
 0x664   : > { %v12040_v10 = vpop.permute.xlu0 %4574  ;;  %v4255_v14 = vadd.f32 %v4223_v40, %v4059_v58  ;;  %8597 = vtanh.f32 %v4685_v17  ;;  %v4684_v44 = vadd.f32 %v11583_v54, %v4645_v59  ;;  %v4615_v58 = vmul.f32 %v11546_v56, %v15373_v49  ;;  %v15374_v17 = vld [vmem:[#allocation23_spill] sm:$0xff] }
 0x665   : > { %8252 = vset.pattern.permute.xlu0 %v14971_v13  ;;  %v4258_v51 = vadd.f32 %v4226_v18, %v4062_v35  ;;  %v4061_v5 = vadd.f32 %v4029_v11, %v3865_v0  ;;  %v4422_v28 = vmul.f32 %v11533_v57, %v15374_v17  ;;  %v4687_v40 = vadd.f32 %v11583_v54, %v4648_v37  ;;  %v15378_v17 = vld [vmem:[#allocation6_spill] sm:$0xff] }
 0x666   : > { %4983 = vperm.xlu0 %8252, %v12042_v22   ;;  %v12089_v39 = vpop.eup %8591  ;;  %v4451_v30 = vadd.f32 %v4419_v19, %v4255_v14  ;;  %8599 = vtanh.f32 %v4684_v44  ;;  %v3868_v59 = vadd.f32 %v3836_v38, %v3672_v63  ;;  %v4225_v43 = vmul.f32 %v11503_v6, %v15375_v4  ;;  %v15376_v19 = vld [vmem:[#allocation9_spill] sm:$0xff] }
 0x667   : > { %v12056_v55 = vpop.permute.xlu1 %4178  ;;  %8227 = vset.pattern.permute.xlu1 %v14974_v62  ;;  %v4032_v53 = vmul.f32 %v11494_v42, %v15376_v19  ;;  %v4454_v35 = vadd.f32 %v4422_v28, %v4258_v51  ;;  %v4618_v18 = vmul.f32 %v11546_v56, %v11950_v41  ;;  %v4421_v44 = vmul.f32 %v11533_v57, %v12012_v23 }
 0x668   : > { %4752 = vperm.xlu1 %8227, %v11793_v2   ;;  %v4647_v3 = vadd.f32 %v4615_v58, %v4451_v30  ;;  %v4257_v27 = vadd.f32 %v4225_v43, %v4061_v5  ;;  %8601 = vtanh.f32 %v4687_v40  ;;  %v4228_v38 = vmul.f32 %v11503_v6, %v12056_v55  ;;  %v15377_v5 = vld [vmem:[#allocation89_spill] sm:$0xff] }
 0x669   : > { %v12068_v25 = vpop.permute.xlu0 %3638  ;;  %v4064_v37 = vadd.f32 %v4032_v53, %v3868_v59  ;;  %v3835_v41 = vmul.f32 %v11465_v29, %v11866_v61  ;;  %v4650_v23 = vadd.f32 %v4618_v18, %v4454_v35  ;;  %v4617_v61 = vmul.f32 %v11546_v56, %v15377_v5  ;;  %v12166_v59 = vld [vmem:[%s14774_s10] ss:$0 sm:$0xff]  ;;  %v15381_v5 = vld [vmem:[#allocation32_spill] sm:$0xff] }
 0x66a   : > { %8253 = vset.pattern.permute.xlu0 %v14974_v62  ;;  %v12114_v47 = vpop.eup %8593  ;;  %v4686_v0 = vadd.f32 %v11583_v54, %v4647_v3  ;;  %v4453_v49 = vadd.f32 %v4421_v44, %v4257_v27  ;;  %v4424_v28 = vmul.f32 %v11533_v57, %v15378_v17  ;;  %v3674_v40 = vmul.f32 %v11476_v24, %v11940_v26  ;;  %v15379_v3 = vld [vmem:[#allocation54_spill] sm:$0xff] }
 0x66b   : > { %4817 = vperm.xlu0 %8253, %v12070_v32   ;;  %v4260_v55 = vadd.f32 %v4228_v38, %v4064_v37  ;;  %v4689_v4 = vadd.f32 %v12166_v59, %v4650_v23  ;;  %v4227_v19 = vmul.f32 %v11503_v6, %v15379_v3  ;;  %v4034_v26 = vmul.f32 %v11494_v42, %v11958_v36  ;;  %v15380_v23 = vld [vmem:[#allocation128_spill] sm:$0xff] }
 0x66c   : > { %v12078_v45 = vpop.permute.xlu1 %4570  ;;  %8229 = vset.pattern.permute.xlu1 %v14975_v8  ;;  %v12131_v14 = vpop.eup %8595  ;;  %8603 = vtanh.f32 %v4686_v0  ;;  %v4649_v53 = vadd.f32 %v4617_v61, %v4453_v49  ;;  %v4619_v61 = vmul.f32 %v11546_v56, %v15381_v5 }
 0x66d   : > { %5139 = vperm.xlu1 %8229, %v11793_v2   ;;  %v4456_v27 = vadd.f32 %v4424_v28, %v4260_v55  ;;  %v4620_v44 = vmul.f32 %v11546_v56, %v12078_v45  ;;  %8605 = vtanh.f32 %v4689_v4 }
 0x66e   : > { %v12087_v12 = vpop.permute.xlu0 %3998 }
 0x66f   : > { %8256 = vset.pattern.permute.xlu0 %v14971_v13  ;;  %v4652_v45 = vadd.f32 %v4620_v44, %v4456_v27 }
 0x670   : > { %4991 = vperm.xlu0 %8256, %v12089_v39  }
 0x671   : > { %v3614_v33 = vpop.permute.xlu1 %3613  ;;  %8231 = vset.pattern.permute.xlu1 %v14971_v13  ;;  %v12152_v51 = vpop.eup %8597  ;;  %v4691_v17 = vadd.f32 %v12166_v59, %v4652_v45 }
 0x672   : > { %4955 = vperm.xlu1 %8231, %v11816_v34   ;;  %v3671_v11 = vmul.f32 %v11476_v24, %v3614_v33 }
 0x673   : > { %v12112_v15 = vpop.permute.xlu0 %4390  ;;  %v12175_v18 = vpop.eup %8599 }
 0x674   : > { %8257 = vset.pattern.permute.xlu0 %v14974_v62  ;;  %v3867_v58 = vadd.f32 %v3835_v41, %v3671_v11 }
 0x675   : > { %4827 = vperm.xlu0 %8257, %v12114_v47  }
 0x676   : > { %v3979_v9 = vpop.permute.xlu1 %3978  ;;  %8233 = vset.pattern.permute.xlu1 %v14974_v62 }
 0x677   : > { %4762 = vperm.xlu1 %8233, %v11868_v7   ;;  %v4031_v63 = vmul.f32 %v11494_v42, %v3979_v9 }
 0x678   : > { %v12129_v16 = vpop.permute.xlu0 %3798 }
 0x679   : > { %8260 = vset.pattern.permute.xlu0 %v14971_v13  ;;  %v4063_v54 = vadd.f32 %v4031_v63, %v3867_v58  ;;  %v4688_v63 = vadd.f32 %v12166_v59, %v4649_v53  ;;  %v12190_v58 = vpop.eup %8601 }
 0x67a   : > { %4999 = vperm.xlu0 %8260, %v12131_v14   ;;  %v12203_v4 = vpop.eup %8603 }
 0x67b   : > { %v4371_v30 = vpop.permute.xlu1 %4370  ;;  %8235 = vset.pattern.permute.xlu1 %v14975_v8  ;;  %v4259_v37 = vadd.f32 %v4227_v19, %v4063_v54  ;;  %8607 = vtanh.f32 %v4688_v63  ;;  %v12214_v44 = vpop.eup %8605 }
 0x67c   : > { %5147 = vperm.xlu1 %8235, %v11868_v7   ;;  %v4423_v38 = vmul.f32 %v11533_v57, %v4371_v30  ;;  %8609 = vtanh.f32 %v4691_v17 }
 0x67d   : > { %v12150_v33 = vpop.permute.xlu0 %4190 }
 0x67e   : > { %8261 = vset.pattern.permute.xlu0 %v14974_v62  ;;  %v4455_v55 = vadd.f32 %v4423_v38, %v4259_v37 }
 0x67f   : > { %4837 = vperm.xlu0 %8261, %v12152_v51  }
 0x680   : > { %v3795_v9 = vpop.permute.xlu1 %3794  ;;  %8237 = vset.pattern.permute.xlu1 %v14971_v13  ;;  %v4651_v28 = vadd.f32 %v4619_v61, %v4455_v55  ;;  %v15382_v61 = vld [vmem:[#allocation38_spill] sm:$0xff] }
 0x681   : > { %v3838_v43 = vmul.f32 %v11465_v29, %v3795_v9  ;;  %4963 = vperm.xlu1 %8237, %v11895_v1   ;;  %v4426_v9 = vmul.f32 %v11533_v57, %v11981_v46 }
 0x682   : > { %v12173_v35 = vpop.permute.xlu0 %4582  ;;  %v4690_v46 = vadd.f32 %v12166_v59, %v4651_v28 }
 0x683   : > { %v3870_v11 = vadd.f32 %v3838_v43, %v3674_v40  ;;  %8264 = vset.pattern.permute.xlu0 %v14971_v13 }
 0x684   : > { %5007 = vperm.xlu0 %8264, %v12175_v18   ;;  %8611 = vtanh.f32 %v4690_v46 }
 0x685   : > { %v4187_v41 = vpop.permute.xlu1 %4186  ;;  %v4066_v0 = vadd.f32 %v4034_v26, %v3870_v11  ;;  %8238 = vset.pattern.permute.xlu1 %v14974_v62  ;;  %v3837_v11 = vmul.f32 %v11465_v29, %v11998_v52  ;;  %v4229_v52 = vmul.f32 %v11503_v6, %v12023_v31  ;;  %v4621_v31 = vmul.f32 %v11546_v56, %v12040_v10 }
 0x686   : > { %v4230_v36 = vmul.f32 %v11503_v6, %v4187_v41  ;;  %4772 = vperm.xlu1 %8238, %v15380_v23   ;;  %v4036_v10 = vmul.f32 %v11494_v42, %v12087_v12  ;;  %v4428_v12 = vmul.f32 %v11533_v57, %v12112_v15 }
 0x687   : > { %v12188_v49 = vpop.permute.xlu0 %4931 }
 0x688   : > { %8265 = vset.pattern.permute.xlu0 %v14974_v62  ;;  %v4262_v30 = vadd.f32 %v4230_v36, %v4066_v0  ;;  %v12226_v36 = vpop.eup %8607 }
 0x689   : > { %4847 = vperm.xlu0 %8265, %v12190_v58  }
 0x68a   : > { %v4579_v54 = vpop.permute.xlu1 %4578  ;;  %8240 = vset.pattern.permute.xlu1 %v14975_v8  ;;  %v4458_v43 = vadd.f32 %v4426_v9, %v4262_v30  ;;  %v12237_v9 = vpop.eup %8609 }
 0x68b   : > { %5155 = vperm.xlu1 %8240, %v15380_v23   ;;  %v4622_v3 = vmul.f32 %v11546_v56, %v4579_v54 }
 0x68c   : > { %v12201_v40 = vpop.permute.xlu0 %4732 }
 0x68d   : > { %8268 = vset.pattern.permute.xlu0 %v14971_v13  ;;  %v4654_v53 = vadd.f32 %v4622_v3, %v4458_v43  ;;  %v3676_v3 = vmul.f32 %v11476_v24, %v12068_v25 }
 0x68e   : > { %5015 = vperm.xlu0 %8268, %v12203_v4  }
 0x68f   : > { %v3624_v19 = vpop.permute.xlu1 %3623  ;;  %8242 = vset.pattern.permute.xlu1 %v14971_v13  ;;  %v4693_v38 = vadd.f32 %v12166_v59, %v4654_v53 }
 0x690   : > { %4971 = vperm.xlu1 %8242, %v11942_v21   ;;  %v3673_v26 = vmul.f32 %v11476_v24, %v3624_v19 }
 0x691   : > { %v12212_v27 = vpop.permute.xlu0 %5123  ;;  %8613 = vtanh.f32 %v4693_v38  ;;  %v12249_v53 = vpop.eup %8611 }
 0x692   : > { %8269 = vset.pattern.permute.xlu0 %v14974_v62  ;;  %v3869_v41 = vadd.f32 %v3837_v11, %v3673_v26 }
 0x693   : > { %4857 = vperm.xlu0 %8269, %v12214_v44  }
 0x694   : > { %v3987_v37 = vpop.permute.xlu1 %3986  ;;  %8243 = vset.pattern.permute.xlu1 %v14974_v62 }
 0x695   : > { %v4033_v0 = vmul.f32 %v11494_v42, %v3987_v37  ;;  %4782 = vperm.xlu1 %8243, %v11960_v20  }
 0x696   : > { %v12224_v63 = vpop.permute.xlu0 %4747 }
 0x697   : > { %v4065_v45 = vadd.f32 %v4033_v0, %v3869_v41  ;;  %8272 = vset.pattern.permute.xlu0 %v14971_v13 }
 0x698   : > { %5023 = vperm.xlu0 %8272, %v12226_v36  }
 0x699   : > { %v4379_v55 = vpop.permute.xlu1 %4378  ;;  %v4261_v30 = vadd.f32 %v4229_v52, %v4065_v45  ;;  %8246 = vset.pattern.permute.xlu1 %v14971_v13 }
 0x69a   : > { %v4425_v5 = vmul.f32 %v11533_v57, %v4379_v55  ;;  %4979 = vperm.xlu1 %8246, %v15382_v61  }
 0x69b   : > { %v12235_v54 = vpop.permute.xlu0 %5135 }
 0x69c   : > { %v4457_v17 = vadd.f32 %v4425_v5, %v4261_v30  ;;  %8273 = vset.pattern.permute.xlu0 %v14974_v62 }
 0x69d   : > { %4867 = vperm.xlu0 %8273, %v12237_v9  }
 0x69e   : > { %v4653_v28 = vadd.f32 %v4621_v31, %v4457_v17  ;;  %v3803_v43 = vpop.permute.xlu1 %3802  ;;  %8247 = vset.pattern.permute.xlu1 %v14974_v62  ;;  %v12260_v41 = vpop.eup %8613 }
 0x69f   : > { %v3840_v19 = vmul.f32 %v11465_v29, %v3803_v43  ;;  %4792 = vperm.xlu1 %8247, %v12000_v60  }
 0x6a0   : > { %v4692_v46 = vadd.f32 %v12166_v59, %v4653_v28  ;;  %v12253_v11 = vpop.permute.xlu0 %4757 }
 0x6a1   : > { %v3872_v26 = vadd.f32 %v3840_v19, %v3676_v3  ;;  %8276 = vset.pattern.permute.xlu0 %v14971_v13  ;;  %v3839_v3 = vmul.f32 %v11465_v29, %v12129_v16 }
 0x6a2   : > { %8615 = vtanh.f32 %v4692_v46  ;;  %5031 = vperm.xlu0 %8276, %v12249_v53  }
 0x6a3   : > { %v4195_v25 = vpop.permute.xlu1 %4194  ;;  %v4068_v37 = vadd.f32 %v4036_v10, %v3872_v26  ;;  %8250 = vset.pattern.permute.xlu1 %v14971_v13 }
 0x6a4   : > { %v4232_v38 = vmul.f32 %v11503_v6, %v4195_v25  ;;  %4987 = vperm.xlu1 %8250, %v12025_v48  }
 0x6a5   : > { %v12265_v52 = vpop.permute.xlu0 %5143 }
 0x6a6   : > { %v4264_v0 = vadd.f32 %v4232_v38, %v4068_v37  ;;  %8277 = vset.pattern.permute.xlu0 %v14974_v62 }
 0x6a7   : > { %4877 = vperm.xlu0 %8277, %v12260_v41  }
 0x6a8   : > { %v4587_v45 = vpop.permute.xlu1 %4586  ;;  %v4460_v55 = vadd.f32 %v4428_v12, %v4264_v0  ;;  %8251 = vset.pattern.permute.xlu1 %v14974_v62 }
 0x6a9   : > { %v4624_v30 = vmul.f32 %v11546_v56, %v4587_v45  ;;  %4802 = vperm.xlu1 %8251, %v12042_v22  }
 0x6aa   : > { %v12273_v31 = vpop.permute.xlu0 %4943 }
 0x6ab   : > { %v4656_v5 = vadd.f32 %v4624_v30, %v4460_v55  ;;  %8280 = vset.pattern.permute.xlu0 %v14971_v13 }
 0x6ad   : > { %v4695_v15 = vadd.f32 %v12166_v59, %v4656_v5  ;;  %v3634_v17 = vpop.permute.xlu1 %3633  ;;  %8254 = vset.pattern.permute.xlu1 %v14971_v13 }
 0x6ae   : > { %4995 = vperm.xlu1 %8254, %v12070_v32   ;;  %v3675_v43 = vmul.f32 %v11476_v24, %v3634_v17  ;;  %v4231_v24 = vmul.f32 %v11503_v6, %v12150_v33 }
 0x6af   : > { %v12277_v28 = vpop.eup %8615  ;;  %8617 = vtanh.f32 %v4695_v15  ;;  %v12284_v10 = vpop.permute.xlu0 %4767 }
 0x6b0   : > { %5039 = vperm.xlu0 %8280, %v12277_v28   ;;  %v3871_v46 = vadd.f32 %v3839_v3, %v3675_v43 }
 0x6b2   : > { %v3995_v19 = vpop.permute.xlu1 %3994  ;;  %8255 = vset.pattern.permute.xlu1 %v14974_v62 }
 0x6b3   : > { %v4035_v26 = vmul.f32 %v11494_v42, %v3995_v19  ;;  %4812 = vperm.xlu1 %8255, %v12089_v39   ;;  %v4623_v42 = vmul.f32 %v11546_v56, %v12173_v35 }
 0x6b4   : > { %8281 = vset.pattern.permute.xlu0 %v14974_v62  ;;  %v12294_v16 = vpop.permute.xlu0 %5151 }
 0x6b5   : > { %v4067_v25 = vadd.f32 %v4035_v26, %v3871_v46 }
 0x6b7   : > { %v4387_v37 = vpop.permute.xlu1 %4386  ;;  %v4263_v38 = vadd.f32 %v4231_v24, %v4067_v25  ;;  %8258 = vset.pattern.permute.xlu1 %v14971_v13 }
 0x6b8   : > { %v4427_v29 = vmul.f32 %v11533_v57, %v4387_v37  ;;  %5003 = vperm.xlu1 %8258, %v12114_v47  }
 0x6b9   : > { %v12306_v57 = vpop.permute.xlu0 %4951 }
 0x6ba   : > { %v4459_v12 = vadd.f32 %v4427_v29, %v4263_v38 }
 0x6bc   : > { %v12298_v0 = vpop.eup %8617  ;;  %v4655_v45 = vadd.f32 %v4623_v42, %v4459_v12  ;;  %v12300_v55 = vpop.permute.xlu1 %4737  ;;  %8259 = vset.pattern.permute.xlu1 %v14974_v62 }
 0x6bd   : > { %4822 = vperm.xlu1 %8259, %v12131_v14   ;;  %4887 = vperm.xlu0 %8281, %v12298_v0  }
 0x6be   : > { %v4694_v6 = vadd.f32 %v12166_v59, %v4655_v45  ;;  %v12313_v56 = vpop.permute.xlu0 %4777 }
 0x6c0   : > { %8619 = vtanh.f32 %v4694_v6 }
 0x6c1   : > { %v12308_v33 = vpop.permute.xlu1 %5127  ;;  %8262 = vset.pattern.permute.xlu1 %v14971_v13  ;;  %8284 = vset.pattern.permute.xlu0 %v14971_v13 }
 0x6c2   : > { %5011 = vperm.xlu1 %8262, %v12152_v51  }
 0x6c3   : > { %v12321_v30 = vpop.permute.xlu0 %4959 }
 0x6c6   : > { %v12315_v35 = vpop.permute.xlu1 %4927  ;;  %8263 = vset.pattern.permute.xlu1 %v14974_v62 }
 0x6c7   : > { %4832 = vperm.xlu1 %8263, %v12175_v18  }
 0x6c8   : > { %v12331_v17 = vpop.permute.xlu0 %4787 }
 0x6ca   : > { %v12319_v59 = vpop.permute.xlu1 %4939 }
 0x6cb   : > { %8266 = vset.pattern.permute.xlu1 %v14971_v13 }
 0x6cc   : > { %5019 = vperm.xlu1 %8266, %v12190_v58  }
 0x6cd   : > { %v12325_v5 = vpop.eup %8619  ;;  %v12340_v3 = vpop.permute.xlu0 %4967 }
 0x6ce   : > { %5047 = vperm.xlu0 %8284, %v12325_v5   ;;  %15383 = vst [vmem:[#allocation124_spill] sm:$0xff] %v12340_v3  ;;  %v15417_v3 = vld [vmem:[#allocation95_spill] sm:$0xff] }
 0x6cf   : > { %v12328_v15 = vpop.permute.xlu1 %4742 }
 0x6d0   : > { %8267 = vset.pattern.permute.xlu1 %v14974_v62 }
 0x6d1   : > { %4842 = vperm.xlu1 %8267, %v12203_v4  }
 0x6d2   : > { %8285 = vset.pattern.permute.xlu0 %v14975_v8  ;;  %v12348_v46 = vpop.permute.xlu0 %4797 }
 0x6d3   : > { %5159 = vperm.xlu0 %8285, %v11895_v1   ;;  %15384 = vst [vmem:[#allocation126_spill] sm:$0xff] %v12348_v46 }
 0x6d4   : > { %v12336_v43 = vpop.permute.xlu1 %4935 }
 0x6d5   : > { %8270 = vset.pattern.permute.xlu1 %v14971_v13 }
 0x6d6   : > { %5027 = vperm.xlu1 %8270, %v12214_v44  }
 0x6d7   : > { %5167 = vperm.xlu0 %8285, %v11942_v21   ;;  %v12355_v24 = vpop.permute.xlu0 %4975 }
 0x6d8   : > { %15385 = vst [vmem:[#allocation11_spill] sm:$0xff] %v12355_v24 }
 0x6d9   : > { %v12343_v19 = vpop.permute.xlu1 %5131 }
 0x6da   : > { %8271 = vset.pattern.permute.xlu1 %v14974_v62 }
 0x6db   : > { %4852 = vperm.xlu1 %8271, %v12226_v36   ;;  %5175 = vperm.xlu0 %8285, %v15382_v61  }
 0x6dc   : > { %v12365_v38 = vpop.permute.xlu0 %4807 }
 0x6dd   : > { %15386 = vst [vmem:[#allocation14_spill] sm:$0xff] %v12365_v38 }
 0x6de   : > { %v12350_v26 = vpop.permute.xlu1 %4947 }
 0x6df   : > { %8274 = vset.pattern.permute.xlu1 %v14971_v13  ;;  %5183 = vperm.xlu0 %8285, %v12025_v48  }
 0x6e0   : > { %5035 = vperm.xlu1 %8274, %v12237_v9  }
 0x6e1   : > { %v12373_v42 = vpop.permute.xlu0 %4983 }
 0x6e2   : > { %15387 = vst [vmem:[#allocation133_spill] sm:$0xff] %v12373_v42 }
 0x6e3   : > { %v12357_v25 = vpop.permute.xlu1 %4752  ;;  %5191 = vperm.xlu0 %8285, %v12070_v32  }
 0x6e4   : > { %8275 = vset.pattern.permute.xlu1 %v14974_v62 }
 0x6e5   : > { %4862 = vperm.xlu1 %8275, %v12249_v53  }
 0x6e6   : > { %v12382_v45 = vpop.permute.xlu0 %4817 }
 0x6e7   : > { %5199 = vperm.xlu0 %8285, %v12114_v47   ;;  %15389 = vst [vmem:[#allocation136_spill] sm:$0xff] %v12382_v45 }
 0x6e8   : > { %v12363_v37 = vpop.permute.xlu1 %5139 }
 0x6e9   : > { %8278 = vset.pattern.permute.xlu1 %v14971_v13 }
 0x6ea   : > { %5043 = vperm.xlu1 %8278, %v12260_v41  }
 0x6eb   : > { %5207 = vperm.xlu0 %8285, %v12152_v51   ;;  %v12389_v42 = vpop.permute.xlu0 %4991 }
 0x6ec   : > { %15391 = vst [vmem:[#allocation41_spill] sm:$0xff] %v12389_v42 }
 0x6ed   : > { %v12370_v29 = vpop.permute.xlu1 %4955 }
 0x6ee   : > { %8279 = vset.pattern.permute.xlu1 %v14974_v62 }
 0x6ef   : > { %4872 = vperm.xlu1 %8279, %v12277_v28   ;;  %5215 = vperm.xlu0 %8285, %v12190_v58  }
 0x6f2   : > { %v12377_v12 = vpop.permute.xlu1 %4762 }
 0x6f3   : > { %15388 = vst [vmem:[#allocation129_spill] sm:$0xff] %v12377_v12  ;;  %8282 = vset.pattern.permute.xlu1 %v14971_v13  ;;  %5223 = vperm.xlu0 %8285, %v12214_v44   ;;  %v12397_v13 = vpop.permute.xlu0 %4827 }
 0x6f4   : > { %5051 = vperm.xlu1 %8282, %v12298_v0   ;;  %15393 = vst [vmem:[#allocation40_spill] sm:$0xff] %v12397_v13 }
 0x6f7   : > { %v12384_v6 = vpop.permute.xlu1 %5147  ;;  %5231 = vperm.xlu0 %8285, %v12237_v9  }
 0x6f8   : > { %15390 = vst [vmem:[#allocation139_spill] sm:$0xff] %v12384_v6  ;;  %8283 = vset.pattern.permute.xlu1 %v14974_v62  ;;  %v15395_v62 = vmov 3   ;;  %v15396_v6 = vld [vmem:[#allocation7_spill] sm:$0xff] }
 0x6f9   : > { %4882 = vperm.xlu1 %8283, %v12325_v5  }
 0x6fb   : > { %5239 = vperm.xlu0 %8285, %v12260_v41  }
 0x6fc   : > { %v12392_v38 = vpop.permute.xlu1 %4963 }
 0x6fd   : > { %15392 = vst [vmem:[#allocation39_spill] sm:$0xff] %v12392_v38  ;;  %8286 = vset.pattern.permute.xlu1 %v14975_v8  ;;  %v12407_v38 = vpop.permute.xlu0 %4999 }
 0x6fe   : > { %5163 = vperm.xlu1 %8286, %v11960_v20   ;;  %15398 = vst [vmem:[#allocation20_spill] sm:$0xff] %v12407_v38 }
 0x6ff   : > { %5247 = vperm.xlu0 %8285, %v12298_v0  }
 0x701   : > { %v12399_v45 = vpop.permute.xlu1 %4772  ;;  %v12414_v13 = vpop.permute.xlu0 %4837 }
 0x702   : > { %15394 = vst [vmem:[#allocation13_spill] sm:$0xff] %v12399_v45  ;;  %5171 = vperm.xlu1 %8286, %v12000_v60   ;;  %15400 = vst [vmem:[#allocation144_spill] sm:$0xff] %v12414_v13 }
 0x703   : > { %8288 = vset.pattern.permute.xlu0 %v15395_v62 }
 0x704   : > { %5323 = vperm.xlu0 %8288, %v15396_v6  }
 0x706   : > { %v12404_v42 = vpop.permute.xlu1 %5155  ;;  %5179 = vperm.xlu1 %8286, %v12042_v22  }
 0x707   : > { %15397 = vst [vmem:[#allocation17_spill] sm:$0xff] %v12404_v42  ;;  %v12421_v42 = vpop.permute.xlu0 %5007 }
 0x708   : > { %5335 = vperm.xlu0 %8288, %v11793_v2   ;;  %15402 = vst [vmem:[#allocation131_spill] sm:$0xff] %v12421_v42 }
 0x70a   : > { %5187 = vperm.xlu1 %8286, %v12089_v39  }
 0x70b   : > { %v12411_v8 = vpop.permute.xlu1 %4971 }
 0x70c   : > { %15399 = vst [vmem:[#allocation19_spill] sm:$0xff] %v12411_v8  ;;  %5343 = vperm.xlu0 %8288, %v11868_v7   ;;  %v12428_v8 = vpop.permute.xlu0 %4847 }
 0x70d   : > { %15404 = vst [vmem:[#allocation149_spill] sm:$0xff] %v12428_v8 }
 0x70e   : > { %5195 = vperm.xlu1 %8286, %v12131_v14  }
 0x710   : > { %v12417_v45 = vpop.permute.xlu1 %4782  ;;  %5351 = vperm.xlu0 %8288, %v15380_v23  }
 0x711   : > { %15401 = vst [vmem:[#allocation141_spill] sm:$0xff] %v12417_v45  ;;  %v12435_v45 = vpop.permute.xlu0 %5015 }
 0x712   : > { %5203 = vperm.xlu1 %8286, %v12175_v18   ;;  %15406 = vst [vmem:[#allocation8_spill] sm:$0xff] %v12435_v45 }
 0x714   : > { %5359 = vperm.xlu0 %8288, %v11960_v20  }
 0x715   : > { %v12424_v38 = vpop.permute.xlu1 %4979  ;;  %v12444_v8 = vpop.permute.xlu0 %4857 }
 0x716   : > { %15403 = vst [vmem:[#allocation146_spill] sm:$0xff] %v12424_v38  ;;  %5211 = vperm.xlu1 %8286, %v12203_v4   ;;  %15409 = vst [vmem:[#allocation118_spill] sm:$0xff] %v12444_v8 }
 0x718   : > { %5367 = vperm.xlu0 %8288, %v12000_v60  }
 0x719   : > { %v12451_v45 = vpop.permute.xlu0 %5023 }
 0x71a   : > { %v12430_v13 = vpop.permute.xlu1 %4792  ;;  %5219 = vperm.xlu1 %8286, %v12226_v36   ;;  %15411 = vst [vmem:[#allocation119_spill] sm:$0xff] %v12451_v45 }
 0x71b   : > { %15405 = vst [vmem:[#allocation134_spill] sm:$0xff] %v12430_v13 }
 0x71c   : > { %5375 = vperm.xlu0 %8288, %v12042_v22  }
 0x71d   : > { %v12459_v8 = vpop.permute.xlu0 %4867 }
 0x71e   : > { %5227 = vperm.xlu1 %8286, %v12249_v53   ;;  %15415 = vst [vmem:[#allocation22_spill] sm:$0xff] %v12459_v8 }
 0x71f   : > { %v12437_v42 = vpop.permute.xlu1 %4987 }
 0x720   : > { %15407 = vst [vmem:[#allocation101_spill] sm:$0xff] %v12437_v42  ;;  %5383 = vperm.xlu0 %8288, %v12089_v39   ;;  %v15412_v42 = vld [vmem:[#allocation116_spill] sm:$0xff] }
 0x722   : > { %5235 = vperm.xlu1 %8286, %v12277_v28  }
 0x724   : > { %v12441_v38 = vpop.permute.xlu1 %4802  ;;  %5391 = vperm.xlu0 %8288, %v12131_v14  }
 0x725   : > { %15408 = vst [vmem:[#allocation42_spill] sm:$0xff] %v12441_v38  ;;  %v15414_v38 = vld [vmem:[#allocation121_spill] sm:$0xff] }
 0x726   : > { %5243 = vperm.xlu1 %8286, %v12325_v5  }
 0x728   : > { %5399 = vperm.xlu0 %8288, %v12175_v18  }
 0x729   : > { %v12448_v13 = vpop.permute.xlu1 %4995 }
 0x72a   : > { %15410 = vst [vmem:[#allocation16_spill] sm:$0xff] %v12448_v13  ;;  %8287 = vset.pattern.permute.xlu1 %v15395_v62  ;;  %v12465_v62 = vpop.permute.xlu0 %5031 }
 0x72b   : > { %5319 = vperm.xlu1 %8287, %v15412_v42   ;;  %15418 = vst [vmem:[#allocation154_spill] sm:$0xff] %v12465_v62 }
 0x72c   : > { %5407 = vperm.xlu0 %8288, %v12203_v4  }
 0x72e   : > { %v12455_v24 = vpop.permute.xlu1 %4812 }
 0x72f   : > { %15413 = vst [vmem:[#allocation135_spill] sm:$0xff] %v12455_v24  ;;  %5327 = vperm.xlu1 %8287, %v15414_v38   ;;  %v12473_v24 = vpop.permute.xlu0 %4877 }
 0x730   : > { %5415 = vperm.xlu0 %8288, %v12226_v36   ;;  %15420 = vst [vmem:[#allocation151_spill] sm:$0xff] %v12473_v24 }
 0x733   : > { %v12461_v46 = vpop.permute.xlu1 %5003  ;;  %5331 = vperm.xlu1 %8287, %v15417_v3   ;;  %v12479_v13 = vpop.permute.xlu0 %5039 }
 0x734   : > { %15416 = vst [vmem:[#allocation21_spill] sm:$0xff] %v12461_v46  ;;  %5423 = vperm.xlu0 %8288, %v12249_v53   ;;  %v15422_v46 = vmov 4   ;;  %15423 = vst [vmem:[#allocation156_spill] sm:$0xff] %v12479_v13 }
 0x737   : > { %5339 = vperm.xlu1 %8287, %v11750_v50  }
 0x738   : > { %v12468_v45 = vpop.permute.xlu1 %4822  ;;  %5431 = vperm.xlu0 %8288, %v12277_v28  }
 0x739   : > { %15419 = vst [vmem:[#allocation120_spill] sm:$0xff] %v12468_v45  ;;  %v12485_v45 = vpop.permute.xlu0 %4887 }
 0x73a   : > { %15425 = vst [vmem:[#allocation12_spill] sm:$0xff] %v12485_v45 }
 0x73b   : > { %5347 = vperm.xlu1 %8287, %v11816_v34  }
 0x73c   : > { %5439 = vperm.xlu0 %8288, %v12325_v5  }
 0x73d   : > { %v12475_v8 = vpop.permute.xlu1 %5011 }
 0x73e   : > { %15421 = vst [vmem:[#allocation137_spill] sm:$0xff] %v12475_v8 }
 0x73f   : > { %5355 = vperm.xlu1 %8287, %v11895_v1  }
 0x740   : > { %8289 = vset.pattern.permute.xlu0 %v15422_v46 }
 0x741   : > { %5515 = vperm.xlu0 %8289, %v15412_v42  }
 0x742   : > { %v12482_v62 = vpop.permute.xlu1 %4832 }
 0x743   : > { %15424 = vst [vmem:[#allocation2_spill] sm:$0xff] %v12482_v62  ;;  %5363 = vperm.xlu1 %8287, %v11942_v21  }
 0x745   : > { %5527 = vperm.xlu0 %8289, %v15417_v3  }
 0x747   : > { %v12488_v12 = vpop.permute.xlu1 %5019  ;;  %5371 = vperm.xlu1 %8287, %v15382_v61  }
 0x748   : > { %15426 = vst [vmem:[#allocation142_spill] sm:$0xff] %v12488_v12 }
 0x749   : > { %5535 = vperm.xlu0 %8289, %v11750_v50   ;;  %v12492_v8 = vpop.permute.xlu0 %5047 }
 0x74a   : > { %15427 = vst [vmem:[#allocation122_spill] sm:$0xff] %v12492_v8 }
 0x74b   : > { %5379 = vperm.xlu1 %8287, %v12025_v48  }
 0x74c   : > { %v12495_v13 = vpop.permute.xlu1 %4842 }
 0x74d   : > { %15428 = vst [vmem:[#allocation43_spill] sm:$0xff] %v12495_v13  ;;  %5543 = vperm.xlu0 %8289, %v11816_v34  }
 0x74e   : > { %v12498_v62 = vpop.permute.xlu0 %5159 }
 0x74f   : > { %15429 = vst [vmem:[#allocation104_spill] sm:$0xff] %v12498_v62  ;;  %5387 = vperm.xlu1 %8287, %v12070_v32  }
 0x751   : > { %v12501_v45 = vpop.permute.xlu1 %5027  ;;  %5551 = vperm.xlu0 %8289, %v11895_v1  }
 0x752   : > { %15430 = vst [vmem:[#allocation138_spill] sm:$0xff] %v12501_v45  ;;  %v12504_v12 = vpop.permute.xlu0 %5167 }
 0x753   : > { %15431 = vst [vmem:[#allocation143_spill] sm:$0xff] %v12504_v12  ;;  %5395 = vperm.xlu1 %8287, %v12114_v47  }
 0x755   : > { %5559 = vperm.xlu0 %8289, %v11942_v21  }
 0x756   : > { %v12508_v8 = vpop.permute.xlu1 %4852  ;;  %v12510_v24 = vpop.permute.xlu0 %5175 }
 0x757   : > { %15432 = vst [vmem:[#allocation25_spill] sm:$0xff] %v12508_v8  ;;  %15433 = vst [vmem:[#allocation24_spill] sm:$0xff] %v12510_v24  ;;  %5403 = vperm.xlu1 %8287, %v12152_v51  }
 0x759   : > { %5567 = vperm.xlu0 %8289, %v15382_v61  }
 0x75a   : > { %v12514_v62 = vpop.permute.xlu0 %5183 }
 0x75b   : > { %15434 = vst [vmem:[#allocation83_spill] sm:$0xff] %v12514_v62  ;;  %v12516_v13 = vpop.permute.xlu1 %5035  ;;  %5411 = vperm.xlu1 %8287, %v12190_v58  }
 0x75c   : > { %15435 = vst [vmem:[#allocation158_spill] sm:$0xff] %v12516_v13 }
 0x75d   : > { %5575 = vperm.xlu0 %8289, %v12025_v48  }
 0x75e   : > { %v12520_v12 = vpop.permute.xlu0 %5191 }
 0x75f   : > { %15436 = vst [vmem:[#allocation147_spill] sm:$0xff] %v12520_v12  ;;  %5419 = vperm.xlu1 %8287, %v12214_v44  }
 0x760   : > { %v12523_v45 = vpop.permute.xlu1 %4862 }
 0x761   : > { %15437 = vst [vmem:[#allocation160_spill] sm:$0xff] %v12523_v45  ;;  %5583 = vperm.xlu0 %8289, %v12070_v32  }
 0x762   : > { %v12526_v24 = vpop.permute.xlu0 %5199 }
 0x763   : > { %15438 = vst [vmem:[#allocation10_spill] sm:$0xff] %v12526_v24  ;;  %5427 = vperm.xlu1 %8287, %v12237_v9  }
 0x765   : > { %v12529_v8 = vpop.permute.xlu1 %5043  ;;  %5591 = vperm.xlu0 %8289, %v12114_v47  }
 0x766   : > { %15439 = vst [vmem:[#allocation152_spill] sm:$0xff] %v12529_v8  ;;  %v12532_v13 = vpop.permute.xlu0 %5207 }
 0x767   : > { %15440 = vst [vmem:[#allocation45_spill] sm:$0xff] %v12532_v13  ;;  %5435 = vperm.xlu1 %8287, %v12260_v41  }
 0x769   : > { %5599 = vperm.xlu0 %8289, %v12152_v51  }
 0x76a   : > { %v12536_v12 = vpop.permute.xlu1 %4872  ;;  %v12538_v62 = vpop.permute.xlu0 %5215 }
 0x76b   : > { %15441 = vst [vmem:[#allocation46_spill] sm:$0xff] %v12536_v12  ;;  %15442 = vst [vmem:[#allocation148_spill] sm:$0xff] %v12538_v62  ;;  %5443 = vperm.xlu1 %8287, %v12298_v0  }
 0x76d   : > { %5607 = vperm.xlu0 %8289, %v12190_v58  }
 0x76e   : > { %v12542_v24 = vpop.permute.xlu0 %5223 }
 0x76f   : > { %15443 = vst [vmem:[#allocation153_spill] sm:$0xff] %v12542_v24  ;;  %v12544_v45 = vpop.permute.xlu1 %5051  ;;  %8290 = vset.pattern.permute.xlu1 %v15422_v46 }
 0x770   : > { %15444 = vst [vmem:[#allocation28_spill] sm:$0xff] %v12544_v45  ;;  %5519 = vperm.xlu1 %8290, %v15396_v6  }
 0x771   : > { %5615 = vperm.xlu0 %8289, %v12214_v44  }
 0x772   : > { %v12549_v13 = vpop.permute.xlu0 %5231 }
 0x773   : > { %15445 = vst [vmem:[#allocation27_spill] sm:$0xff] %v12549_v13 }
 0x774   : > { %5523 = vperm.xlu1 %8290, %v15414_v38   ;;  %v12552_v12 = vpop.permute.xlu1 %4882 }
 0x775   : > { %15446 = vst [vmem:[#allocation87_spill] sm:$0xff] %v12552_v12  ;;  %5623 = vperm.xlu0 %8289, %v12237_v9  }
 0x776   : > { %v12555_v62 = vpop.permute.xlu0 %5239 }
 0x777   : > { %15447 = vst [vmem:[#allocation51_spill] sm:$0xff] %v12555_v62  ;;  %v15453_v62 = vmov 5  }
 0x778   : > { %5531 = vperm.xlu1 %8290, %v11793_v2  }
 0x779   : > { %v12558_v24 = vpop.permute.xlu1 %5163  ;;  %5631 = vperm.xlu0 %8289, %v12260_v41  }
 0x77a   : > { %15448 = vst [vmem:[#allocation157_spill] sm:$0xff] %v12558_v24  ;;  %v12561_v46 = vpop.permute.xlu0 %5247 }
 0x77b   : > { %15449 = vst [vmem:[#allocation162_spill] sm:$0xff] %v12561_v46 }
 0x77c   : > { %5539 = vperm.xlu1 %8290, %v11868_v7  }
 0x77d   : > { %v12564_v45 = vpop.permute.xlu1 %5171  ;;  %5639 = vperm.xlu0 %8289, %v12298_v0  }
 0x77e   : > { %15450 = vst [vmem:[#allocation159_spill] sm:$0xff] %v12564_v45 }
 0x77f   : > { %v12567_v13 = vpop.permute.xlu0 %5323 }
 0x780   : > { %15451 = vst [vmem:[#allocation47_spill] sm:$0xff] %v12567_v13  ;;  %5547 = vperm.xlu1 %8290, %v15380_v23  }
 0x781   : > { %v12570_v12 = vpop.permute.xlu1 %5179  ;;  %8292 = vset.pattern.permute.xlu0 %v15453_v62 }
 0x782   : > { %15452 = vst [vmem:[#allocation48_spill] sm:$0xff] %v12570_v12  ;;  %5715 = vperm.xlu0 %8292, %v15396_v6  }
 0x783   : > { %v12574_v24 = vpop.permute.xlu0 %5335 }
 0x784   : > { %15454 = vst [vmem:[#allocation109_spill] sm:$0xff] %v12574_v24  ;;  %5555 = vperm.xlu1 %8290, %v11960_v20  }
 0x785   : > { %v12577_v46 = vpop.permute.xlu1 %5187 }
 0x786   : > { %15455 = vst [vmem:[#allocation84_spill] sm:$0xff] %v12577_v46  ;;  %5727 = vperm.xlu0 %8292, %v11793_v2  }
 0x787   : > { %v12580_v45 = vpop.permute.xlu0 %5343 }
 0x788   : > { %15456 = vst [vmem:[#allocation30_spill] sm:$0xff] %v12580_v45  ;;  %5563 = vperm.xlu1 %8290, %v12000_v60  }
 0x789   : > { %v12583_v13 = vpop.permute.xlu1 %5195 }
 0x78a   : > { %15457 = vst [vmem:[#allocation29_spill] sm:$0xff] %v12583_v13  ;;  %5735 = vperm.xlu0 %8292, %v11868_v7  }
 0x78b   : > { %v12586_v12 = vpop.permute.xlu0 %5351 }
 0x78c   : > { %15458 = vst [vmem:[#allocation161_spill] sm:$0xff] %v12586_v12  ;;  %5571 = vperm.xlu1 %8290, %v12042_v22  }
 0x78d   : > { %v12589_v8 = vpop.permute.xlu1 %5203 }
 0x78e   : > { %15459 = vst [vmem:[#allocation85_spill] sm:$0xff] %v12589_v8  ;;  %5743 = vperm.xlu0 %8292, %v15380_v23  }
 0x78f   : > { %v12592_v24 = vpop.permute.xlu0 %5359 }
 0x790   : > { %15460 = vst [vmem:[#allocation93_spill] sm:$0xff] %v12592_v24  ;;  %5579 = vperm.xlu1 %8290, %v12089_v39  }
 0x791   : > { %v12595_v46 = vpop.permute.xlu1 %5211 }
 0x792   : > { %15461 = vst [vmem:[#allocation110_spill] sm:$0xff] %v12595_v46  ;;  %5751 = vperm.xlu0 %8292, %v11960_v20  }
 0x793   : > { %v12598_v45 = vpop.permute.xlu0 %5367 }
 0x794   : > { %15462 = vst [vmem:[#allocation114_spill] sm:$0xff] %v12598_v45  ;;  %5587 = vperm.xlu1 %8290, %v12131_v14  }
 0x795   : > { %v12601_v13 = vpop.permute.xlu1 %5219 }
 0x796   : > { %15463 = vst [vmem:[#allocation3_spill] sm:$0xff] %v12601_v13  ;;  %5759 = vperm.xlu0 %8292, %v12000_v60  }
 0x797   : > { %v12604_v12 = vpop.permute.xlu0 %5375 }
 0x798   : > { %15464 = vst [vmem:[#allocation18_spill] sm:$0xff] %v12604_v12  ;;  %5595 = vperm.xlu1 %8290, %v12175_v18  }
 0x799   : > { %v12607_v8 = vpop.permute.xlu1 %5227 }
 0x79a   : > { %15465 = vst [vmem:[#allocation90_spill] sm:$0xff] %v12607_v8  ;;  %5767 = vperm.xlu0 %8292, %v12042_v22  }
 0x79b   : > { %v12610_v24 = vpop.permute.xlu0 %5383 }
 0x79c   : > { %15466 = vst [vmem:[#allocation94_spill] sm:$0xff] %v12610_v24  ;;  %5603 = vperm.xlu1 %8290, %v12203_v4  }
 0x79d   : > { %v12613_v46 = vpop.permute.xlu1 %5235 }
 0x79e   : > { %15467 = vst [vmem:[#allocation111_spill] sm:$0xff] %v12613_v46  ;;  %5775 = vperm.xlu0 %8292, %v12089_v39  }
 0x79f   : > { %v12616_v45 = vpop.permute.xlu0 %5391 }
 0x7a0   : > { %15468 = vst [vmem:[#allocation91_spill] sm:$0xff] %v12616_v45  ;;  %5611 = vperm.xlu1 %8290, %v12226_v36  }
 0x7a1   : > { %v12619_v13 = vpop.permute.xlu1 %5243 }
 0x7a2   : > { %15469 = vst [vmem:[#allocation23_spill] sm:$0xff] %v12619_v13  ;;  %5783 = vperm.xlu0 %8292, %v12131_v14  }
 0x7a3   : > { %v12622_v12 = vpop.permute.xlu0 %5399 }
 0x7a4   : > { %15470 = vst [vmem:[#allocation98_spill] sm:$0xff] %v12622_v12  ;;  %5619 = vperm.xlu1 %8290, %v12249_v53  }
 0x7a6   : > { %v12625_v8 = vpop.permute.xlu1 %5319  ;;  %5791 = vperm.xlu0 %8292, %v12175_v18  }
 0x7a7   : > { %15471 = vst [vmem:[#allocation9_spill] sm:$0xff] %v12625_v8  ;;  %v12628_v24 = vpop.permute.xlu0 %5407 }
 0x7a8   : > { %15472 = vst [vmem:[#allocation89_spill] sm:$0xff] %v12628_v24  ;;  %5627 = vperm.xlu1 %8290, %v12277_v28  }
 0x7aa   : > { %v12631_v46 = vpop.permute.xlu1 %5327  ;;  %5799 = vperm.xlu0 %8292, %v12203_v4  }
 0x7ab   : > { %15473 = vst [vmem:[#allocation6_spill] sm:$0xff] %v12631_v46  ;;  %v12634_v45 = vpop.permute.xlu0 %5415 }
 0x7ac   : > { %15474 = vst [vmem:[#allocation54_spill] sm:$0xff] %v12634_v45  ;;  %5635 = vperm.xlu1 %8290, %v12325_v5  }
 0x7ae   : > { %v12637_v13 = vpop.permute.xlu1 %5331  ;;  %5807 = vperm.xlu0 %8292, %v12226_v36  }
 0x7af   : > { %15475 = vst [vmem:[#allocation128_spill] sm:$0xff] %v12637_v13  ;;  %v12640_v12 = vpop.permute.xlu0 %5423 }
 0x7b0   : > { %15476 = vst [vmem:[#allocation32_spill] sm:$0xff] %v12640_v12  ;;  %8291 = vset.pattern.permute.xlu1 %v15453_v62 }
 0x7b1   : > { %5711 = vperm.xlu1 %8291, %v15412_v42  }
 0x7b2   : > { %v12644_v24 = vpop.permute.xlu1 %5339  ;;  %5815 = vperm.xlu0 %8292, %v12249_v53  }
 0x7b3   : > { %15477 = vst [vmem:[#allocation38_spill] sm:$0xff] %v12644_v24  ;;  %v12647_v46 = vpop.permute.xlu0 %5431 }
 0x7b4   : > { %15478 = vst [vmem:[#allocation7_spill] sm:$0xff] %v12647_v46  ;;  %v8799_v46 = vmov 6  }
 0x7b5   : > { %5719 = vperm.xlu1 %8291, %v15414_v38  }
 0x7b6   : > { %v12650_v45 = vpop.permute.xlu1 %5347  ;;  %5823 = vperm.xlu0 %8292, %v12277_v28  }
 0x7b7   : > { %15479 = vst [vmem:[#allocation116_spill] sm:$0xff] %v12650_v45  ;;  %v12653_v13 = vpop.permute.xlu0 %5439 }
 0x7b8   : > { %15480 = vst [vmem:[#allocation121_spill] sm:$0xff] %v12653_v13 }
 0x7b9   : > { %5723 = vperm.xlu1 %8291, %v15417_v3  }
 0x7ba   : > { %v12656_v12 = vpop.permute.xlu1 %5355  ;;  %5831 = vperm.xlu0 %8292, %v12325_v5  }
 0x7bb   : > { %15481 = vst [vmem:[#allocation95_spill] sm:$0xff] %v12656_v12 }
 0x7bc   : > { %v12659_v62 = vpop.permute.xlu0 %5515 }
 0x7bd   : > { %15482 = vst [vmem:[#allocation163_spill] sm:$0xff] %v12659_v62  ;;  %5731 = vperm.xlu1 %8291, %v11750_v50  }
 0x7be   : > { %v12662_v24 = vpop.permute.xlu1 %5363  ;;  %8293 = vset.pattern.permute.xlu0 %v8799_v46 }
 0x7bf   : > { %15483 = vst [vmem:[#allocation164_spill] sm:$0xff] %v12662_v24  ;;  %5907 = vperm.xlu0 %8293, %v15412_v42  }
 0x7c0   : > { %v12665_v45 = vpop.permute.xlu0 %5527 }
 0x7c1   : > { %15484 = vst [vmem:[#allocation165_spill] sm:$0xff] %v12665_v45  ;;  %5739 = vperm.xlu1 %8291, %v11816_v34  }
 0x7c2   : > { %v12668_v13 = vpop.permute.xlu1 %5371 }
 0x7c3   : > { %15485 = vst [vmem:[#allocation166_spill] sm:$0xff] %v12668_v13  ;;  %5919 = vperm.xlu0 %8293, %v15417_v3  }
 0x7c4   : > { %v12671_v12 = vpop.permute.xlu0 %5535 }
 0x7c5   : > { %15486 = vst [vmem:[#allocation167_spill] sm:$0xff] %v12671_v12  ;;  %5747 = vperm.xlu1 %8291, %v11895_v1  }
 0x7c6   : > { %v12674_v62 = vpop.permute.xlu1 %5379 }
 0x7c7   : > { %15487 = vst [vmem:[#allocation168_spill] sm:$0xff] %v12674_v62  ;;  %5927 = vperm.xlu0 %8293, %v11750_v50  }
 0x7c8   : > { %v12677_v24 = vpop.permute.xlu0 %5543 }
 0x7c9   : > { %15488 = vst [vmem:[#allocation169_spill] sm:$0xff] %v12677_v24  ;;  %5755 = vperm.xlu1 %8291, %v11942_v21  }
 0x7ca   : > { %v12680_v8 = vpop.permute.xlu1 %5387 }
 0x7cb   : > { %15489 = vst [vmem:[#allocation170_spill] sm:$0xff] %v12680_v8  ;;  %5935 = vperm.xlu0 %8293, %v11816_v34  }
 0x7cc   : > { %v12683_v45 = vpop.permute.xlu0 %5551 }
 0x7cd   : > { %15490 = vst [vmem:[#allocation171_spill] sm:$0xff] %v12683_v45  ;;  %5763 = vperm.xlu1 %8291, %v15382_v61  }
 0x7ce   : > { %v12686_v13 = vpop.permute.xlu1 %5395 }
 0x7cf   : > { %15491 = vst [vmem:[#allocation172_spill] sm:$0xff] %v12686_v13  ;;  %5943 = vperm.xlu0 %8293, %v11895_v1  }
 0x7d0   : > { %v12689_v12 = vpop.permute.xlu0 %5559 }
 0x7d1   : > { %15492 = vst [vmem:[#allocation173_spill] sm:$0xff] %v12689_v12  ;;  %5771 = vperm.xlu1 %8291, %v12025_v48  }
 0x7d2   : > { %v12692_v62 = vpop.permute.xlu1 %5403 }
 0x7d3   : > { %15493 = vst [vmem:[#allocation174_spill] sm:$0xff] %v12692_v62  ;;  %5951 = vperm.xlu0 %8293, %v11942_v21  }
 0x7d4   : > { %v12695_v24 = vpop.permute.xlu0 %5567 }
 0x7d5   : > { %15494 = vst [vmem:[#allocation175_spill] sm:$0xff] %v12695_v24  ;;  %5779 = vperm.xlu1 %8291, %v12070_v32  }
 0x7d6   : > { %v12698_v8 = vpop.permute.xlu1 %5411 }
 0x7d7   : > { %15495 = vst [vmem:[#allocation176_spill] sm:$0xff] %v12698_v8  ;;  %5959 = vperm.xlu0 %8293, %v15382_v61  }
 0x7d8   : > { %v12701_v45 = vpop.permute.xlu0 %5575 }
 0x7d9   : > { %15496 = vst [vmem:[#allocation177_spill] sm:$0xff] %v12701_v45  ;;  %5787 = vperm.xlu1 %8291, %v12114_v47  }
 0x7da   : > { %v12704_v13 = vpop.permute.xlu1 %5419 }
 0x7db   : > { %15497 = vst [vmem:[#allocation178_spill] sm:$0xff] %v12704_v13  ;;  %5967 = vperm.xlu0 %8293, %v12025_v48  }
 0x7dc   : > { %v12707_v12 = vpop.permute.xlu0 %5583 }
 0x7dd   : > { %15498 = vst [vmem:[#allocation179_spill] sm:$0xff] %v12707_v12  ;;  %5795 = vperm.xlu1 %8291, %v12152_v51  }
 0x7de   : > { %v12710_v62 = vpop.permute.xlu1 %5427 }
 0x7df   : > { %15499 = vst [vmem:[#allocation180_spill] sm:$0xff] %v12710_v62  ;;  %5975 = vperm.xlu0 %8293, %v12070_v32  }
 0x7e0   : > { %v12713_v24 = vpop.permute.xlu0 %5591 }
 0x7e1   : > { %15500 = vst [vmem:[#allocation181_spill] sm:$0xff] %v12713_v24  ;;  %5803 = vperm.xlu1 %8291, %v12190_v58  }
 0x7e2   : > { %v12716_v8 = vpop.permute.xlu1 %5435 }
 0x7e3   : > { %15501 = vst [vmem:[#allocation182_spill] sm:$0xff] %v12716_v8  ;;  %5983 = vperm.xlu0 %8293, %v12114_v47  }
 0x7e4   : > { %v12719_v45 = vpop.permute.xlu0 %5599 }
 0x7e5   : > { %15502 = vst [vmem:[#allocation183_spill] sm:$0xff] %v12719_v45  ;;  %5811 = vperm.xlu1 %8291, %v12214_v44  }
 0x7e6   : > { %v12722_v13 = vpop.permute.xlu1 %5443 }
 0x7e7   : > { %15503 = vst [vmem:[#allocation184_spill] sm:$0xff] %v12722_v13  ;;  %5991 = vperm.xlu0 %8293, %v12152_v51  }
 0x7e8   : > { %v12725_v12 = vpop.permute.xlu0 %5607 }
 0x7e9   : > { %15504 = vst [vmem:[#allocation185_spill] sm:$0xff] %v12725_v12  ;;  %5819 = vperm.xlu1 %8291, %v12237_v9  }
 0x7eb   : > { %v12728_v62 = vpop.permute.xlu1 %5519  ;;  %5999 = vperm.xlu0 %8293, %v12190_v58  }
 0x7ec   : > { %15505 = vst [vmem:[#allocation186_spill] sm:$0xff] %v12728_v62  ;;  %v12731_v24 = vpop.permute.xlu0 %5615 }
 0x7ed   : > { %15506 = vst [vmem:[#allocation187_spill] sm:$0xff] %v12731_v24  ;;  %5827 = vperm.xlu1 %8291, %v12260_v41  }
 0x7ef   : > { %v12734_v8 = vpop.permute.xlu1 %5523  ;;  %6007 = vperm.xlu0 %8293, %v12214_v44  }
 0x7f0   : > { %15507 = vst [vmem:[#allocation188_spill] sm:$0xff] %v12734_v8  ;;  %v12737_v45 = vpop.permute.xlu0 %5623 }
 0x7f1   : > { %15508 = vst [vmem:[#allocation189_spill] sm:$0xff] %v12737_v45  ;;  %5835 = vperm.xlu1 %8291, %v12298_v0  }
 0x7f3   : > { %v12740_v13 = vpop.permute.xlu1 %5531  ;;  %6015 = vperm.xlu0 %8293, %v12237_v9  }
 0x7f4   : > { %15509 = vst [vmem:[#allocation190_spill] sm:$0xff] %v12740_v13  ;;  %v12743_v12 = vpop.permute.xlu0 %5631 }
 0x7f5   : > { %15510 = vst [vmem:[#allocation191_spill] sm:$0xff] %v12743_v12  ;;  %8294 = vset.pattern.permute.xlu1 %v8799_v46  ;;  %v8800_v46 = vmov 7  }
 0x7f6   : > { %5911 = vperm.xlu1 %8294, %v15396_v6  }
 0x7f7   : > { %v12746_v24 = vpop.permute.xlu1 %5539  ;;  %6023 = vperm.xlu0 %8293, %v12260_v41  }
 0x7f8   : > { %15511 = vst [vmem:[#allocation192_spill] sm:$0xff] %v12746_v24  ;;  %v12749_v8 = vpop.permute.xlu0 %5639 }
 0x7f9   : > { %15512 = vst [vmem:[#allocation193_spill] sm:$0xff] %v12749_v8 }
 0x7fa   : > { %5915 = vperm.xlu1 %8294, %v15414_v38  }
 0x7fb   : > { %v12752_v45 = vpop.permute.xlu1 %5547  ;;  %6031 = vperm.xlu0 %8293, %v12298_v0  }
 0x7fc   : > { %15513 = vst [vmem:[#allocation194_spill] sm:$0xff] %v12752_v45 }
 0x7fd   : > { %v12755_v13 = vpop.permute.xlu0 %5715 }
 0x7fe   : > { %15514 = vst [vmem:[#allocation195_spill] sm:$0xff] %v12755_v13  ;;  %5923 = vperm.xlu1 %8294, %v11793_v2  }
 0x7ff   : > { %v12758_v12 = vpop.permute.xlu1 %5555  ;;  %8296 = vset.pattern.permute.xlu0 %v8800_v46 }
 0x800   : > { %15515 = vst [vmem:[#allocation196_spill] sm:$0xff] %v12758_v12  ;;  %6107 = vperm.xlu0 %8296, %v15396_v6  }
 0x801   : > { %v12761_v24 = vpop.permute.xlu0 %5727 }
 0x802   : > { %15516 = vst [vmem:[#allocation197_spill] sm:$0xff] %v12761_v24  ;;  %5931 = vperm.xlu1 %8294, %v11868_v7  }
 0x803   : > { %v12764_v8 = vpop.permute.xlu1 %5563 }
 0x804   : > { %15517 = vst [vmem:[#allocation198_spill] sm:$0xff] %v12764_v8  ;;  %6119 = vperm.xlu0 %8296, %v11793_v2  }
 0x805   : > { %v12767_v45 = vpop.permute.xlu0 %5735 }
 0x806   : > { %15518 = vst [vmem:[#allocation199_spill] sm:$0xff] %v12767_v45  ;;  %5939 = vperm.xlu1 %8294, %v15380_v23  }
 0x807   : > { %v12770_v13 = vpop.permute.xlu1 %5571 }
 0x808   : > { %15519 = vst [vmem:[#allocation200_spill] sm:$0xff] %v12770_v13  ;;  %6127 = vperm.xlu0 %8296, %v11868_v7  }
 0x809   : > { %v12773_v12 = vpop.permute.xlu0 %5743 }
 0x80a   : > { %15520 = vst [vmem:[#allocation201_spill] sm:$0xff] %v12773_v12  ;;  %5947 = vperm.xlu1 %8294, %v11960_v20  }
 0x80b   : > { %v12776_v62 = vpop.permute.xlu1 %5579 }
 0x80c   : > { %15521 = vst [vmem:[#allocation202_spill] sm:$0xff] %v12776_v62  ;;  %6135 = vperm.xlu0 %8296, %v15380_v23  }
 0x80d   : > { %v12779_v24 = vpop.permute.xlu0 %5751 }
 0x80e   : > { %15522 = vst [vmem:[#allocation203_spill] sm:$0xff] %v12779_v24  ;;  %5955 = vperm.xlu1 %8294, %v12000_v60  }
 0x80f   : > { %v12782_v8 = vpop.permute.xlu1 %5587 }
 0x810   : > { %15523 = vst [vmem:[#allocation204_spill] sm:$0xff] %v12782_v8  ;;  %6143 = vperm.xlu0 %8296, %v11960_v20  }
 0x811   : > { %v12785_v45 = vpop.permute.xlu0 %5759 }
 0x812   : > { %15524 = vst [vmem:[#allocation205_spill] sm:$0xff] %v12785_v45  ;;  %5963 = vperm.xlu1 %8294, %v12042_v22  }
 0x813   : > { %v12788_v13 = vpop.permute.xlu1 %5595 }
 0x814   : > { %15525 = vst [vmem:[#allocation206_spill] sm:$0xff] %v12788_v13  ;;  %6151 = vperm.xlu0 %8296, %v12000_v60  }
 0x815   : > { %v12791_v12 = vpop.permute.xlu0 %5767 }
 0x816   : > { %15526 = vst [vmem:[#allocation207_spill] sm:$0xff] %v12791_v12  ;;  %5971 = vperm.xlu1 %8294, %v12089_v39  }
 0x817   : > { %v12794_v62 = vpop.permute.xlu1 %5603 }
 0x818   : > { %15527 = vst [vmem:[#allocation208_spill] sm:$0xff] %v12794_v62  ;;  %6159 = vperm.xlu0 %8296, %v12042_v22  }
 0x819   : > { %v12797_v24 = vpop.permute.xlu0 %5775 }
 0x81a   : > { %15528 = vst [vmem:[#allocation209_spill] sm:$0xff] %v12797_v24  ;;  %5979 = vperm.xlu1 %8294, %v12131_v14  }
 0x81b   : > { %v12800_v8 = vpop.permute.xlu1 %5611 }
 0x81c   : > { %15529 = vst [vmem:[#allocation210_spill] sm:$0xff] %v12800_v8  ;;  %6167 = vperm.xlu0 %8296, %v12089_v39  }
 0x81d   : > { %v12803_v45 = vpop.permute.xlu0 %5783 }
 0x81e   : > { %15530 = vst [vmem:[#allocation211_spill] sm:$0xff] %v12803_v45  ;;  %5987 = vperm.xlu1 %8294, %v12175_v18  }
 0x81f   : > { %v12806_v13 = vpop.permute.xlu1 %5619 }
 0x820   : > { %15531 = vst [vmem:[#allocation212_spill] sm:$0xff] %v12806_v13  ;;  %6175 = vperm.xlu0 %8296, %v12131_v14  }
 0x821   : > { %v12809_v12 = vpop.permute.xlu0 %5791 }
 0x822   : > { %15532 = vst [vmem:[#allocation213_spill] sm:$0xff] %v12809_v12  ;;  %5995 = vperm.xlu1 %8294, %v12203_v4  }
 0x823   : > { %v12812_v62 = vpop.permute.xlu1 %5627 }
 0x824   : > { %15533 = vst [vmem:[#allocation214_spill] sm:$0xff] %v12812_v62  ;;  %6183 = vperm.xlu0 %8296, %v12175_v18  }
 0x825   : > { %v12815_v24 = vpop.permute.xlu0 %5799 }
 0x826   : > { %15534 = vst [vmem:[#allocation215_spill] sm:$0xff] %v12815_v24  ;;  %6003 = vperm.xlu1 %8294, %v12226_v36  }
 0x827   : > { %v12818_v8 = vpop.permute.xlu1 %5635 }
 0x828   : > { %15535 = vst [vmem:[#allocation216_spill] sm:$0xff] %v12818_v8  ;;  %6191 = vperm.xlu0 %8296, %v12203_v4  }
 0x829   : > { %v12821_v45 = vpop.permute.xlu0 %5807 }
 0x82a   : > { %15536 = vst [vmem:[#allocation217_spill] sm:$0xff] %v12821_v45  ;;  %6011 = vperm.xlu1 %8294, %v12249_v53  }
 0x82c   : > { %v12824_v13 = vpop.permute.xlu1 %5711  ;;  %6199 = vperm.xlu0 %8296, %v12226_v36  }
 0x82d   : > { %15537 = vst [vmem:[#allocation218_spill] sm:$0xff] %v12824_v13  ;;  %v12827_v12 = vpop.permute.xlu0 %5815  ;;  %v8801_v13 = vmov 8  }
 0x82e   : > { %15538 = vst [vmem:[#allocation219_spill] sm:$0xff] %v12827_v12  ;;  %6019 = vperm.xlu1 %8294, %v12277_v28  }
 0x830   : > { %v12830_v62 = vpop.permute.xlu1 %5719  ;;  %6207 = vperm.xlu0 %8296, %v12249_v53  }
 0x831   : > { %15539 = vst [vmem:[#allocation220_spill] sm:$0xff] %v12830_v62  ;;  %v12833_v24 = vpop.permute.xlu0 %5823 }
 0x832   : > { %15540 = vst [vmem:[#allocation221_spill] sm:$0xff] %v12833_v24  ;;  %6027 = vperm.xlu1 %8294, %v12325_v5  }
 0x834   : > { %v12836_v8 = vpop.permute.xlu1 %5723  ;;  %6215 = vperm.xlu0 %8296, %v12277_v28  }
 0x835   : > { %15541 = vst [vmem:[#allocation222_spill] sm:$0xff] %v12836_v8  ;;  %v12839_v45 = vpop.permute.xlu0 %5831 }
 0x836   : > { %15542 = vst [vmem:[#allocation223_spill] sm:$0xff] %v12839_v45  ;;  %8295 = vset.pattern.permute.xlu1 %v8800_v46 }
 0x837   : > { %6103 = vperm.xlu1 %8295, %v15412_v42  }
 0x838   : > { %v12842_v12 = vpop.permute.xlu1 %5731  ;;  %6223 = vperm.xlu0 %8296, %v12325_v5  }
 0x839   : > { %15543 = vst [vmem:[#allocation224_spill] sm:$0xff] %v12842_v12 }
 0x83a   : > { %v12845_v62 = vpop.permute.xlu0 %5907 }
 0x83b   : > { %15544 = vst [vmem:[#allocation225_spill] sm:$0xff] %v12845_v62  ;;  %6111 = vperm.xlu1 %8295, %v15414_v38  }
 0x83c   : > { %v12848_v24 = vpop.permute.xlu1 %5739  ;;  %8297 = vset.pattern.permute.xlu0 %v8801_v13 }
 0x83d   : > { %15545 = vst [vmem:[#allocation226_spill] sm:$0xff] %v12848_v24  ;;  %6299 = vperm.xlu0 %8297, %v15412_v42  }
 0x83e   : > { %v12851_v8 = vpop.permute.xlu0 %5919 }
 0x83f   : > { %15546 = vst [vmem:[#allocation227_spill] sm:$0xff] %v12851_v8  ;;  %6115 = vperm.xlu1 %8295, %v15417_v3  }
 0x840   : > { %v12854_v46 = vpop.permute.xlu1 %5747 }
 0x841   : > { %15547 = vst [vmem:[#allocation228_spill] sm:$0xff] %v12854_v46  ;;  %6311 = vperm.xlu0 %8297, %v15417_v3  }
 0x842   : > { %v12857_v12 = vpop.permute.xlu0 %5927 }
 0x843   : > { %15548 = vst [vmem:[#allocation229_spill] sm:$0xff] %v12857_v12  ;;  %6123 = vperm.xlu1 %8295, %v11750_v50  }
 0x844   : > { %v12860_v62 = vpop.permute.xlu1 %5755 }
 0x845   : > { %15549 = vst [vmem:[#allocation230_spill] sm:$0xff] %v12860_v62  ;;  %6319 = vperm.xlu0 %8297, %v11750_v50  }
 0x846   : > { %v12863_v24 = vpop.permute.xlu0 %5935 }
 0x847   : > { %15550 = vst [vmem:[#allocation231_spill] sm:$0xff] %v12863_v24  ;;  %6131 = vperm.xlu1 %8295, %v11816_v34  }
 0x848   : > { %v12866_v45 = vpop.permute.xlu1 %5763 }
 0x849   : > { %15551 = vst [vmem:[#allocation232_spill] sm:$0xff] %v12866_v45  ;;  %6327 = vperm.xlu0 %8297, %v11816_v34  }
 0x84a   : > { %v12869_v8 = vpop.permute.xlu0 %5943 }
 0x84b   : > { %15552 = vst [vmem:[#allocation233_spill] sm:$0xff] %v12869_v8  ;;  %6139 = vperm.xlu1 %8295, %v11895_v1  }
 0x84c   : > { %v12872_v46 = vpop.permute.xlu1 %5771 }
 0x84d   : > { %15553 = vst [vmem:[#allocation234_spill] sm:$0xff] %v12872_v46  ;;  %6335 = vperm.xlu0 %8297, %v11895_v1  }
 0x84e   : > { %v12875_v12 = vpop.permute.xlu0 %5951 }
 0x84f   : > { %15554 = vst [vmem:[#allocation235_spill] sm:$0xff] %v12875_v12  ;;  %6147 = vperm.xlu1 %8295, %v11942_v21  }
 0x850   : > { %v12878_v62 = vpop.permute.xlu1 %5779 }
 0x851   : > { %15555 = vst [vmem:[#allocation236_spill] sm:$0xff] %v12878_v62  ;;  %6343 = vperm.xlu0 %8297, %v11942_v21  }
 0x852   : > { %v12881_v24 = vpop.permute.xlu0 %5959 }
 0x853   : > { %15556 = vst [vmem:[#allocation237_spill] sm:$0xff] %v12881_v24  ;;  %6155 = vperm.xlu1 %8295, %v15382_v61  }
 0x854   : > { %v12884_v45 = vpop.permute.xlu1 %5787 }
 0x855   : > { %15557 = vst [vmem:[#allocation238_spill] sm:$0xff] %v12884_v45  ;;  %6351 = vperm.xlu0 %8297, %v15382_v61  }
 0x856   : > { %v12887_v8 = vpop.permute.xlu0 %5967 }
 0x857   : > { %15558 = vst [vmem:[#allocation239_spill] sm:$0xff] %v12887_v8  ;;  %6163 = vperm.xlu1 %8295, %v12025_v48  }
 0x858   : > { %v12890_v46 = vpop.permute.xlu1 %5795 }
 0x859   : > { %15559 = vst [vmem:[#allocation240_spill] sm:$0xff] %v12890_v46  ;;  %6359 = vperm.xlu0 %8297, %v12025_v48  }
 0x85a   : > { %v12893_v12 = vpop.permute.xlu0 %5975 }
 0x85b   : > { %15560 = vst [vmem:[#allocation241_spill] sm:$0xff] %v12893_v12  ;;  %6171 = vperm.xlu1 %8295, %v12070_v32  }
 0x85c   : > { %v12896_v62 = vpop.permute.xlu1 %5803 }
 0x85d   : > { %15561 = vst [vmem:[#allocation242_spill] sm:$0xff] %v12896_v62  ;;  %6367 = vperm.xlu0 %8297, %v12070_v32  }
 0x85e   : > { %v12899_v24 = vpop.permute.xlu0 %5983 }
 0x85f   : > { %15562 = vst [vmem:[#allocation243_spill] sm:$0xff] %v12899_v24  ;;  %6179 = vperm.xlu1 %8295, %v12114_v47  }
 0x860   : > { %v12902_v45 = vpop.permute.xlu1 %5811 }
 0x861   : > { %15563 = vst [vmem:[#allocation244_spill] sm:$0xff] %v12902_v45  ;;  %6375 = vperm.xlu0 %8297, %v12114_v47  }
 0x862   : > { %v12905_v8 = vpop.permute.xlu0 %5991 }
 0x863   : > { %15564 = vst [vmem:[#allocation245_spill] sm:$0xff] %v12905_v8  ;;  %6187 = vperm.xlu1 %8295, %v12152_v51  }
 0x864   : > { %v12908_v46 = vpop.permute.xlu1 %5819 }
 0x865   : > { %15565 = vst [vmem:[#allocation246_spill] sm:$0xff] %v12908_v46  ;;  %6383 = vperm.xlu0 %8297, %v12152_v51  }
 0x866   : > { %v12911_v12 = vpop.permute.xlu0 %5999 }
 0x867   : > { %15566 = vst [vmem:[#allocation247_spill] sm:$0xff] %v12911_v12  ;;  %6195 = vperm.xlu1 %8295, %v12190_v58  }
 0x868   : > { %v12914_v62 = vpop.permute.xlu1 %5827 }
 0x869   : > { %15567 = vst [vmem:[#allocation248_spill] sm:$0xff] %v12914_v62  ;;  %6391 = vperm.xlu0 %8297, %v12190_v58  }
 0x86a   : > { %v12917_v24 = vpop.permute.xlu0 %6007 }
 0x86b   : > { %15568 = vst [vmem:[#allocation249_spill] sm:$0xff] %v12917_v24  ;;  %6203 = vperm.xlu1 %8295, %v12214_v44  }
 0x86c   : > { %v12920_v45 = vpop.permute.xlu1 %5835 }
 0x86d   : > { %15569 = vst [vmem:[#allocation250_spill] sm:$0xff] %v12920_v45  ;;  %6399 = vperm.xlu0 %8297, %v12214_v44  }
 0x86e   : > { %v12923_v8 = vpop.permute.xlu0 %6015 }
 0x86f   : > { %15570 = vst [vmem:[#allocation251_spill] sm:$0xff] %v12923_v8  ;;  %6211 = vperm.xlu1 %8295, %v12237_v9  }
 0x871   : > { %v12926_v46 = vpop.permute.xlu1 %5911  ;;  %6407 = vperm.xlu0 %8297, %v12237_v9  }
 0x872   : > { %15571 = vst [vmem:[#allocation252_spill] sm:$0xff] %v12926_v46  ;;  %v12929_v12 = vpop.permute.xlu0 %6023  ;;  %v8802_v46 = vmov 9  }
 0x873   : > { %15572 = vst [vmem:[#allocation253_spill] sm:$0xff] %v12929_v12  ;;  %6219 = vperm.xlu1 %8295, %v12260_v41  }
 0x875   : > { %v12932_v62 = vpop.permute.xlu1 %5915  ;;  %6415 = vperm.xlu0 %8297, %v12260_v41  }
 0x876   : > { %15573 = vst [vmem:[#allocation254_spill] sm:$0xff] %v12932_v62  ;;  %v12935_v24 = vpop.permute.xlu0 %6031 }
 0x877   : > { %15574 = vst [vmem:[#allocation255_spill] sm:$0xff] %v12935_v24  ;;  %6227 = vperm.xlu1 %8295, %v12298_v0  }
 0x879   : > { %v12938_v45 = vpop.permute.xlu1 %5923  ;;  %6423 = vperm.xlu0 %8297, %v12298_v0  }
 0x87a   : > { %15575 = vst [vmem:[#allocation256_spill] sm:$0xff] %v12938_v45 }
 0x87b   : > { %8298 = vset.pattern.permute.xlu1 %v8801_v13  ;;  %v12941_v8 = vpop.permute.xlu0 %6107 }
 0x87c   : > { %15576 = vst [vmem:[#allocation257_spill] sm:$0xff] %v12941_v8  ;;  %6303 = vperm.xlu1 %8298, %v15396_v6   ;;  %v15684_v8 = vld [vmem:[#allocation147_spill] sm:$0xff] }
 0x87d   : > { %v12944_v12 = vpop.permute.xlu1 %5931  ;;  %8300 = vset.pattern.permute.xlu0 %v8802_v46 }
 0x87e   : > { %15577 = vst [vmem:[#allocation258_spill] sm:$0xff] %v12944_v12  ;;  %6499 = vperm.xlu0 %8300, %v15396_v6  }
 0x87f   : > { %v12947_v62 = vpop.permute.xlu0 %6119 }
 0x880   : > { %15578 = vst [vmem:[#allocation259_spill] sm:$0xff] %v12947_v62  ;;  %6307 = vperm.xlu1 %8298, %v15414_v38  }
 0x881   : > { %v12950_v24 = vpop.permute.xlu1 %5939 }
 0x882   : > { %15579 = vst [vmem:[#allocation260_spill] sm:$0xff] %v12950_v24  ;;  %6511 = vperm.xlu0 %8300, %v11793_v2  }
 0x883   : > { %v12953_v45 = vpop.permute.xlu0 %6127 }
 0x884   : > { %15580 = vst [vmem:[#allocation261_spill] sm:$0xff] %v12953_v45  ;;  %6315 = vperm.xlu1 %8298, %v11793_v2   ;;  %v15667_v45 = vld [vmem:[#allocation43_spill] sm:$0xff] }
 0x885   : > { %v12956_v13 = vpop.permute.xlu1 %5947 }
 0x886   : > { %15581 = vst [vmem:[#allocation262_spill] sm:$0xff] %v12956_v13  ;;  %6519 = vperm.xlu0 %8300, %v11868_v7  }
 0x887   : > { %v12959_v12 = vpop.permute.xlu0 %6135 }
 0x888   : > { %15582 = vst [vmem:[#allocation263_spill] sm:$0xff] %v12959_v12  ;;  %6323 = vperm.xlu1 %8298, %v11868_v7   ;;  %v15666_v12 = vld [vmem:[#allocation142_spill] sm:$0xff] }
 0x889   : > { %v12962_v6 = vpop.permute.xlu1 %5955 }
 0x88a   : > { %15583 = vst [vmem:[#allocation264_spill] sm:$0xff] %v12962_v6  ;;  %6527 = vperm.xlu0 %8300, %v15380_v23  }
 0x88b   : > { %v12965_v62 = vpop.permute.xlu0 %6143 }
 0x88c   : > { %15584 = vst [vmem:[#allocation265_spill] sm:$0xff] %v12965_v62  ;;  %6331 = vperm.xlu1 %8298, %v15380_v23   ;;  %v15665_v62 = vld [vmem:[#allocation2_spill] sm:$0xff] }
 0x88d   : > { %v12968_v24 = vpop.permute.xlu1 %5963 }
 0x88e   : > { %15585 = vst [vmem:[#allocation266_spill] sm:$0xff] %v12968_v24  ;;  %6535 = vperm.xlu0 %8300, %v11960_v20  }
 0x88f   : > { %v12971_v2 = vpop.permute.xlu0 %6151 }
 0x890   : > { %15586 = vst [vmem:[#allocation267_spill] sm:$0xff] %v12971_v2  ;;  %6339 = vperm.xlu1 %8298, %v11960_v20  }
 0x891   : > { %v12974_v13 = vpop.permute.xlu1 %5971 }
 0x892   : > { %15587 = vst [vmem:[#allocation268_spill] sm:$0xff] %v12974_v13  ;;  %6543 = vperm.xlu0 %8300, %v12000_v60  }
 0x893   : > { %v12977_v7 = vpop.permute.xlu0 %6159 }
 0x894   : > { %15588 = vst [vmem:[#allocation269_spill] sm:$0xff] %v12977_v7  ;;  %6347 = vperm.xlu1 %8298, %v12000_v60   ;;  %v15661_v7 = vld [vmem:[#allocation120_spill] sm:$0xff] }
 0x895   : > { %v12980_v6 = vpop.permute.xlu1 %5979 }
 0x896   : > { %15589 = vst [vmem:[#allocation270_spill] sm:$0xff] %v12980_v6  ;;  %6551 = vperm.xlu0 %8300, %v12042_v22  }
 0x897   : > { %v12983_v23 = vpop.permute.xlu0 %6167 }
 0x898   : > { %15590 = vst [vmem:[#allocation271_spill] sm:$0xff] %v12983_v23  ;;  %6355 = vperm.xlu1 %8298, %v12042_v22   ;;  %v15658_v23 = vld [vmem:[#allocation21_spill] sm:$0xff] }
 0x899   : > { %v12986_v24 = vpop.permute.xlu1 %5987 }
 0x89a   : > { %15591 = vst [vmem:[#allocation272_spill] sm:$0xff] %v12986_v24  ;;  %6559 = vperm.xlu0 %8300, %v12089_v39  }
 0x89b   : > { %v12989_v20 = vpop.permute.xlu0 %6175 }
 0x89c   : > { %15592 = vst [vmem:[#allocation273_spill] sm:$0xff] %v12989_v20  ;;  %6363 = vperm.xlu1 %8298, %v12089_v39   ;;  %v15654_v20 = vld [vmem:[#allocation16_spill] sm:$0xff] }
 0x89d   : > { %v12992_v13 = vpop.permute.xlu1 %5995 }
 0x89e   : > { %15593 = vst [vmem:[#allocation274_spill] sm:$0xff] %v12992_v13  ;;  %6567 = vperm.xlu0 %8300, %v12131_v14  }
 0x89f   : > { %v12995_v60 = vpop.permute.xlu0 %6183 }
 0x8a0   : > { %15594 = vst [vmem:[#allocation275_spill] sm:$0xff] %v12995_v60  ;;  %6371 = vperm.xlu1 %8298, %v12131_v14  }
 0x8a1   : > { %v12998_v6 = vpop.permute.xlu1 %6003 }
 0x8a2   : > { %15595 = vst [vmem:[#allocation276_spill] sm:$0xff] %v12998_v6  ;;  %6575 = vperm.xlu0 %8300, %v12175_v18  }
 0x8a3   : > { %v13001_v22 = vpop.permute.xlu0 %6191 }
 0x8a4   : > { %15596 = vst [vmem:[#allocation277_spill] sm:$0xff] %v13001_v22  ;;  %6379 = vperm.xlu1 %8298, %v12175_v18  }
 0x8a5   : > { %v13004_v24 = vpop.permute.xlu1 %6011 }
 0x8a6   : > { %15597 = vst [vmem:[#allocation278_spill] sm:$0xff] %v13004_v24  ;;  %6583 = vperm.xlu0 %8300, %v12203_v4  }
 0x8a7   : > { %v13007_v39 = vpop.permute.xlu0 %6199 }
 0x8a8   : > { %15598 = vst [vmem:[#allocation279_spill] sm:$0xff] %v13007_v39  ;;  %6387 = vperm.xlu1 %8298, %v12203_v4   ;;  %v15644_v39 = vld [vmem:[#allocation146_spill] sm:$0xff] }
 0x8a9   : > { %v13010_v13 = vpop.permute.xlu1 %6019 }
 0x8aa   : > { %15599 = vst [vmem:[#allocation280_spill] sm:$0xff] %v13010_v13  ;;  %6591 = vperm.xlu0 %8300, %v12226_v36  }
 0x8ab   : > { %v13013_v14 = vpop.permute.xlu0 %6207 }
 0x8ac   : > { %15600 = vst [vmem:[#allocation281_spill] sm:$0xff] %v13013_v14  ;;  %6395 = vperm.xlu1 %8298, %v12226_v36  }
 0x8ad   : > { %v13016_v6 = vpop.permute.xlu1 %6027 }
 0x8ae   : > { %15601 = vst [vmem:[#allocation282_spill] sm:$0xff] %v13016_v6  ;;  %6599 = vperm.xlu0 %8300, %v12249_v53  }
 0x8af   : > { %v13019_v18 = vpop.permute.xlu0 %6215 }
 0x8b0   : > { %15602 = vst [vmem:[#allocation283_spill] sm:$0xff] %v13019_v18  ;;  %6403 = vperm.xlu1 %8298, %v12249_v53  }
 0x8b2   : > { %v13022_v24 = vpop.permute.xlu1 %6103  ;;  %6607 = vperm.xlu0 %8300, %v12277_v28  }
 0x8b3   : > { %15603 = vst [vmem:[#allocation284_spill] sm:$0xff] %v13022_v24  ;;  %v13025_v4 = vpop.permute.xlu0 %6223 }
 0x8b4   : > { %15604 = vst [vmem:[#allocation285_spill] sm:$0xff] %v13025_v4  ;;  %6411 = vperm.xlu1 %8298, %v12277_v28  }
 0x8b6   : > { %v13028_v13 = vpop.permute.xlu1 %6111  ;;  %6615 = vperm.xlu0 %8300, %v12325_v5  }
 0x8b7   : > { %15605 = vst [vmem:[#allocation286_spill] sm:$0xff] %v13028_v13 }
 0x8b8   : > { %6419 = vperm.xlu1 %8298, %v12325_v5   ;;  %v13032_v36 = vpop.permute.xlu0 %6299  ;;  %v13049_v5 = vld [vmem:[%s14775_s11] sm:$0xff] }
 0x8b9   : > { %15606 = vst [vmem:[#allocation287_spill] sm:$0xff] %v13032_v36 }
 0x8ba   : > { %v13034_v6 = vpop.permute.xlu1 %6115 }
 0x8bb   : > { %15607 = vst [vmem:[#allocation288_spill] sm:$0xff] %v13034_v6 }
 0x8bc   : > { %8299 = vset.pattern.permute.xlu1 %v8802_v46  ;;  %v13036_v53 = vpop.permute.xlu0 %6311 }
 0x8bd   : > { %15608 = vst [vmem:[#allocation289_spill] sm:$0xff] %v13036_v53  ;;  %6495 = vperm.xlu1 %8299, %v15412_v42   ;;  %v15614_v42 = vld [vmem:[#allocation33_spill] sm:$0xff] }
 0x8be   : > { %v13039_v18 = vpop.permute.xlu1 %6123  ;;  %v13058_v53 = vrot.slane %v13049_v5, %v15614_v42  ;;  %v15670_v42 = vld [vmem:[#allocation104_spill] sm:$0xff] }
 0x8bf   : > { %15609 = vst [vmem:[#allocation290_spill] sm:$0xff] %v13039_v18 }
 0x8c0   : > { %v13041_v4 = vpop.permute.xlu0 %6319 }
 0x8c1   : > { %15610 = vst [vmem:[#allocation291_spill] sm:$0xff] %v13041_v4  ;;  %6503 = vperm.xlu1 %8299, %v15414_v38   ;;  %v15615_v4 = vld [vmem:[#allocation34_spill] sm:$0xff] }
 0x8c2   : > { %v13044_v28 = vpop.permute.xlu1 %6131  ;;  %v13062_v38 = vrot.slane %v13049_v5, %v15615_v4 }
 0x8c3   : > { %15611 = vst [vmem:[#allocation292_spill] sm:$0xff] %v13044_v28  ;;  %v15616_v28 = vld [vmem:[#allocation35_spill] sm:$0xff] }
 0x8c4   : > { %v13051_v14 = vpop.permute.xlu0 %6327  ;;  %v13066_v18 = vrot.slane %v13049_v5, %v15616_v28  ;;  %v4894_v13 = vmul.f32 %v13062_v38, %v12201_v40  ;;  %v4895_v36 = vmul.f32 %v13062_v38, %v12300_v55  ;;  %v5061_v28 = vmul.f32 %v13058_v53, %v12319_v59 }
 0x8c5   : > { %15612 = vst [vmem:[#allocation293_spill] sm:$0xff] %v13051_v14  ;;  %6507 = vperm.xlu1 %8299, %v15417_v3   ;;  %v5058_v14 = vmul.f32 %v13058_v53, %v12315_v35  ;;  %v5062_v55 = vmul.f32 %v13058_v53, %v12273_v31  ;;  %v5064_v31 = vmul.f32 %v13058_v53, %v12306_v57 }
 0x8c6   : > { %v13054_v46 = vpop.permute.xlu1 %6139  ;;  %v5257_v35 = vmul.f32 %v13066_v18, %v12235_v54  ;;  %v5259_v40 = vmul.f32 %v13066_v18, %v12265_v52  ;;  %v5261_v54 = vmul.f32 %v13066_v18, %v12294_v16  ;;  %v5063_v52 = vmul.f32 %v13058_v53, %v12350_v26 }
 0x8c7   : > { %15613 = vst [vmem:[#allocation294_spill] sm:$0xff] %v13054_v46  ;;  %v5059_v46 = vmul.f32 %v13058_v53, %v12188_v49  ;;  %v4899_v49 = vmul.f32 %v13062_v38, %v12253_v11  ;;  %v5090_v59 = vadd.f32 %v5058_v14, %v4894_v13  ;;  %v5060_v11 = vmul.f32 %v13058_v53, %v12336_v43 }
 0x8c8   : > { %v13068_v6 = vpop.permute.xlu0 %6335  ;;  %v5256_v16 = vmul.f32 %v13066_v18, %v12343_v19  ;;  %v4898_v43 = vmul.f32 %v13062_v38, %v12357_v25  ;;  %v5065_v26 = vmul.f32 %v13058_v53, %v12370_v29  ;;  %v5258_v25 = vmul.f32 %v13066_v18, %v12363_v37  ;;  %v15622_v29 = vld [vmem:[#allocation129_spill] sm:$0xff] }
 0x8c9   : > { %15617 = vst [vmem:[#allocation35_spill] sm:$0xff] %v13068_v6  ;;  %6515 = vperm.xlu1 %8299, %v11750_v50   ;;  %v5254_v6 = vmul.f32 %v13066_v18, %v12212_v27  ;;  %v4897_v50 = vmul.f32 %v13062_v38, %v12224_v63  ;;  %v5255_v27 = vmul.f32 %v13066_v18, %v12308_v33 }
 0x8ca   : > { %v13073_v3 = vpop.permute.xlu1 %6147  ;;  %v4901_v63 = vmul.f32 %v13062_v38, %v12284_v10  ;;  %v5091_v33 = vadd.f32 %v5059_v46, %v4895_v36  ;;  %v4896_v10 = vmul.f32 %v13062_v38, %v12328_v15  ;;  %v4905_v36 = vmul.f32 %v13062_v38, %v12331_v17 }
 0x8cb   : > { %15618 = vst [vmem:[#allocation295_spill] sm:$0xff] %v13073_v3  ;;  %v5093_v13 = vadd.f32 %v5061_v28, %v4897_v50  ;;  %v13130_v15 = vadd.f32 %v5254_v6, %v5090_v59  ;;  %v5095_v46 = vadd.f32 %v5063_v52, %v4899_v49  ;;  %v4900_v28 = vmul.f32 %v13062_v38, %v15622_v29  ;;  %v15626_v6 = vld [vmem:[#allocation11_spill] sm:$0xff] }
 0x8cc   : > { %v13091_v3 = vpop.permute.xlu0 %6343  ;;  %v13124_v57 = vadd.f32 %v5255_v27, %v5091_v33  ;;  %v5092_v19 = vadd.f32 %v5060_v11, %v4896_v10  ;;  %v15624_v27 = vld [vmem:[#allocation124_spill] sm:$0xff]  ;;  %v15625_v33 = vld [vmem:[#allocation126_spill] sm:$0xff]  ;;  %v5070_v59 = vmul.f32 %v13058_v53, %v15626_v6  ;;  %v5094_v11 = vadd.f32 %v5062_v55, %v4898_v43  ;;  %v15627_v52 = vld [vmem:[#allocation139_spill] sm:$0xff] }
 0x8cd   : > { %15619 = vst [vmem:[#allocation296_spill] sm:$0xff] %v13091_v3  ;;  %6523 = vperm.xlu1 %8299, %v11816_v34   ;;  %v4903_v34 = vmul.f32 %v13062_v38, %v12313_v56  ;;  %v5066_v56 = vmul.f32 %v13058_v53, %v12321_v30  ;;  %v5068_v30 = vmul.f32 %v13058_v53, %v15624_v27  ;;  %v15633_v55 = vld [vmem:[#allocation136_spill] sm:$0xff] }
 0x8ce   : > { %v13108_v3 = vpop.permute.xlu1 %6155  ;;  %v4907_v17 = vmul.f32 %v13062_v38, %v15625_v33  ;;  %v13147_v49 = vadd.f32 %v5256_v16, %v5092_v19  ;;  %v5097_v37 = vadd.f32 %v5065_v26, %v4901_v63  ;;  %v5260_v10 = vmul.f32 %v13066_v18, %v15627_v52  ;;  %v15636_v52 = vld [vmem:[#allocation40_spill] sm:$0xff] }
 0x8cf   : > { %15620 = vst [vmem:[#allocation297_spill] sm:$0xff] %v13108_v3  ;;  %v15631_v3 = vld [vmem:[#allocation39_spill] sm:$0xff]  ;;  %v4911_v63 = vmul.f32 %v13062_v38, %v15633_v55  ;;  %v13164_v16 = vadd.f32 %v5258_v25, %v5094_v11  ;;  %v5096_v43 = vadd.f32 %v5064_v31, %v4900_v28  ;;  %v13166_v26 = vadd.f32 %v5259_v40, %v5095_v46  ;;  %v15639_v55 = vld [vmem:[#allocation20_spill] sm:$0xff]  ;;  %v15640_v40 = vld [vmem:[#allocation141_spill] sm:$0xff] }
 0x8d0   : > { %v13122_v14 = vpop.permute.xlu0 %6351  ;;  %v5067_v6 = vmul.f32 %v13058_v53, %v15631_v3  ;;  %v4913_v3 = vmul.f32 %v13062_v38, %v15636_v52  ;;  %v5076_v25 = vmul.f32 %v13058_v53, %v15639_v55  ;;  %v4904_v46 = vmul.f32 %v13062_v38, %v15640_v40  ;;  %v15645_v55 = vld [vmem:[#allocation131_spill] sm:$0xff] }
 0x8d1   : > { %15621 = vst [vmem:[#allocation298_spill] sm:$0xff] %v13122_v14  ;;  %6531 = vperm.xlu1 %8299, %v11895_v1   ;;  %v13145_v1 = vadd.f32 %v5257_v35, %v5093_v13  ;;  %v15630_v14 = vld [vmem:[#allocation133_spill] sm:$0xff]  ;;  %v13180_v31 = vadd.f32 %v5260_v10, %v5096_v43  ;;  %v13184_v28 = vadd.f32 %v5261_v54, %v5097_v37  ;;  %v15647_v54 = vld [vmem:[#allocation134_spill] sm:$0xff] }
 0x8d2   : > { %v13137_v50 = vpop.permute.xlu1 %6163  ;;  %v5072_v33 = vmul.f32 %v13058_v53, %v15630_v14  ;;  %v15632_v35 = vld [vmem:[#allocation13_spill] sm:$0xff]  ;;  %v5078_v10 = vmul.f32 %v13058_v53, %v15645_v55  ;;  %v4906_v37 = vmul.f32 %v13062_v38, %v15647_v54  ;;  %v15652_v55 = vld [vmem:[#allocation118_spill] sm:$0xff]  ;;  %v13213_v60 = vadd.f32 %v5068_v30, %v4904_v46 }
 0x8d3   : > { %15623 = vst [vmem:[#allocation129_spill] sm:$0xff] %v13137_v50  ;;  %v15629_v50 = vld [vmem:[#allocation14_spill] sm:$0xff]  ;;  %v4902_v13 = vmul.f32 %v13062_v38, %v15632_v35  ;;  %15641 = vst [vmem:[#allocation11_spill] sm:$0xff] %v13184_v28  ;;  %v15646_v43 = vld [vmem:[#allocation149_spill] sm:$0xff] }
 0x8d4   : > { %v13151_v29 = vpop.permute.xlu0 %6359  ;;  %v4909_v27 = vmul.f32 %v13062_v38, %v15629_v50  ;;  %v15635_v50 = vld [vmem:[#allocation41_spill] sm:$0xff]  ;;  %v4917_v40 = vmul.f32 %v13062_v38, %v15646_v43  ;;  %v4919_v43 = vmul.f32 %v13062_v38, %v15652_v55  ;;  %v15653_v54 = vld [vmem:[#allocation42_spill] sm:$0xff]  ;;  %v5077_v55 = vmul.f32 %v13058_v53, %v15658_v23  ;;  %v15696_v28 = vld [vmem:[#allocation27_spill] sm:$0xff] }
 0x8d5   : > { %15628 = vst [vmem:[#allocation124_spill] sm:$0xff] %v13151_v29  ;;  %6539 = vperm.xlu1 %8299, %v11942_v21   ;;  %v5074_v14 = vmul.f32 %v13058_v53, %v15635_v50  ;;  %v15637_v29 = vld [vmem:[#allocation17_spill] sm:$0xff]  ;;  %v15638_v21 = vld [vmem:[#allocation19_spill] sm:$0xff]  ;;  %v15643_v50 = vld [vmem:[#allocation144_spill] sm:$0xff] }
 0x8d6   : > { %v13168_v19 = vpop.permute.xlu1 %6171  ;;  %v5262_v35 = vmul.f32 %v13066_v18, %v15637_v29  ;;  %v5069_v24 = vmul.f32 %v13058_v53, %v15638_v21  ;;  %v4915_v52 = vmul.f32 %v13062_v38, %v15643_v50  ;;  %v5098_v29 = vadd.f32 %v5066_v56, %v4902_v13  ;;  %v15651_v13 = vld [vmem:[#allocation101_spill] sm:$0xff]  ;;  %v15659_v30 = vld [vmem:[#allocation22_spill] sm:$0xff] }
 0x8d7   : > { %15634 = vst [vmem:[#allocation126_spill] sm:$0xff] %v13168_v19  ;;  %v5099_v19 = vadd.f32 %v5067_v6, %v4903_v34  ;;  %v5071_v21 = vmul.f32 %v13058_v53, %v15644_v39  ;;  %v15650_v39 = vld [vmem:[#allocation8_spill] sm:$0xff]  ;;  %v5073_v50 = vmul.f32 %v13058_v53, %v15651_v13  ;;  %v4921_v46 = vmul.f32 %v13062_v38, %v15659_v30  ;;  %v15664_v23 = vld [vmem:[#allocation137_spill] sm:$0xff] }
 0x8d8   : > { %v13186_v11 = vpop.permute.xlu0 %6367  ;;  %v13205_v56 = vadd.f32 %v5262_v35, %v5098_v29  ;;  %v5101_v6 = vadd.f32 %v5069_v24, %v4905_v36  ;;  %v15656_v29 = vld [vmem:[#allocation119_spill] sm:$0xff]  ;;  %v4914_v30 = vmul.f32 %v13062_v38, %v15665_v62  ;;  %v5263_v62 = vmul.f32 %v13066_v18, %v15670_v42 }
 0x8d9   : > { %15642 = vst [vmem:[#allocation139_spill] sm:$0xff] %v13186_v11  ;;  %6547 = vperm.xlu1 %8299, %v15382_v61   ;;  %v15648_v11 = vld [vmem:[#allocation37_spill] sm:$0xff]  ;;  %v5080_v61 = vmul.f32 %v13058_v53, %v15650_v39  ;;  %v5082_v39 = vmul.f32 %v13058_v53, %v15656_v29  ;;  %v5103_v24 = vadd.f32 %v5071_v21, %v4907_v17  ;;  %v15657_v36 = vld [vmem:[#allocation135_spill] sm:$0xff] }
 0x8da   : > { %v13201_v22 = vrot.slane %v13049_v5, %v15648_v11  ;;  %v13203_v34 = vpop.permute.xlu1 %6179  ;;  %v4908_v11 = vmul.f32 %v13062_v38, %v15653_v54  ;;  %v4910_v13 = vmul.f32 %v13062_v38, %v15657_v36  ;;  %v13230_v54 = vadd.f32 %v5070_v59, %v4906_v37  ;;  %v15663_v36 = vld [vmem:[#allocation151_spill] sm:$0xff] }
 0x8db   : > { %15649 = vst [vmem:[#allocation14_spill] sm:$0xff] %v13203_v34  ;;  %v5075_v34 = vmul.f32 %v13058_v53, %v15654_v20  ;;  %v15660_v20 = vld [vmem:[#allocation154_spill] sm:$0xff]  ;;  %v4912_v29 = vmul.f32 %v13062_v38, %v15661_v7  ;;  %v5105_v21 = vadd.f32 %v5073_v50, %v4909_v27  ;;  %v4923_v2 = vmul.f32 %v13062_v38, %v15663_v36  ;;  %v15669_v27 = vld [vmem:[#allocation156_spill] sm:$0xff] }
 0x8dc   : > { %v13219_v35 = vpop.permute.xlu0 %6375  ;;  %v13244_v59 = vadd.f32 %v5072_v33, %v4908_v11  ;;  %v4916_v7 = vmul.f32 %v13062_v38, %v15667_v45  ;;  %v5086_v50 = vmul.f32 %v13058_v53, %v15669_v27  ;;  %v13254_v36 = vadd.f32 %v5074_v14, %v4910_v13  ;;  %v15673_v11 = vld [vmem:[#allocation143_spill] sm:$0xff]  ;;  %v15675_v13 = vld [vmem:[#allocation25_spill] sm:$0xff] }
 0x8dd   : > { %15655 = vst [vmem:[#allocation133_spill] sm:$0xff] %v13219_v35  ;;  %6555 = vperm.xlu1 %8299, %v12025_v48   ;;  %v5084_v35 = vmul.f32 %v13058_v53, %v15660_v20  ;;  %v5079_v48 = vmul.f32 %v13058_v53, %v15664_v23  ;;  %v5107_v37 = vadd.f32 %v5075_v34, %v4911_v63  ;;  %v15671_v63 = vld [vmem:[#allocation12_spill] sm:$0xff]  ;;  %v15672_v34 = vld [vmem:[#allocation138_spill] sm:$0xff] }
 0x8de   : > { %v13236_v17 = vpop.permute.xlu1 %6187  ;;  %v5081_v20 = vmul.f32 %v13058_v53, %v15666_v12  ;;  %v5109_v23 = vadd.f32 %v5077_v55, %v4913_v3  ;;  %v13259_v33 = vadd.f32 %v5076_v25, %v4912_v29  ;;  %v4925_v12 = vmul.f32 %v13062_v38, %v15671_v63  ;;  %v15678_v63 = vld [vmem:[#allocation122_spill] sm:$0xff] }
 0x8df   : > { %15662 = vst [vmem:[#allocation39_spill] sm:$0xff] %v13236_v17  ;;  %v5083_v45 = vmul.f32 %v13058_v53, %v15672_v34  ;;  %v5111_v14 = vadd.f32 %v5079_v48, %v4915_v52  ;;  %v13269_v3 = vadd.f32 %v5078_v10, %v4914_v30  ;;  %v4918_v42 = vmul.f32 %v13062_v38, %v15675_v13  ;;  %v15682_v48 = vld [vmem:[#allocation83_spill] sm:$0xff]  ;;  %v15683_v13 = vld [vmem:[#allocation158_spill] sm:$0xff] }
 0x8e0   : > { %v13250_v17 = vpop.permute.xlu0 %6383  ;;  %v5113_v29 = vadd.f32 %v5081_v20, %v4917_v40  ;;  %v5088_v34 = vmul.f32 %v13058_v53, %v15678_v63  ;;  %v13280_v4 = vadd.f32 %v5080_v61, %v4916_v7  ;;  %v13286_v10 = vadd.f32 %v5263_v62, %v5099_v19  ;;  %v15686_v7 = vld [vmem:[#allocation160_spill] sm:$0xff] }
 0x8e1   : > { %15668 = vst [vmem:[#allocation13_spill] sm:$0xff] %v13250_v17  ;;  %6563 = vperm.xlu1 %8299, %v12070_v32   ;;  %v5265_v17 = vmul.f32 %v13066_v18, %v15673_v11  ;;  %v15676_v32 = vld [vmem:[#allocation31_spill] sm:$0xff]  ;;  %v15679_v11 = vld [vmem:[#allocation24_spill] sm:$0xff]  ;;  %v5269_v30 = vmul.f32 %v13066_v18, %v15682_v48  ;;  %v5271_v40 = vmul.f32 %v13066_v18, %v15684_v8 }
 0x8e2   : > { %v13267_v27 = vpop.permute.xlu1 %6195  ;;  %v15677_v25 = vsub.s32 4, %v15676_v32  ;;  %15681 = vst [vmem:[#allocation40_spill] sm:$0xff] %v13286_v10  ;;  %v5115_v61 = vadd.f32 %v5083_v45, %v4919_v43  ;;  %v4920_v63 = vmul.f32 %v13062_v38, %v15686_v7  ;;  %v13303_v48 = vadd.f32 %v5082_v39, %v4918_v42  ;;  %v15690_v10 = vld [vmem:[#allocation45_spill] sm:$0xff] }
 0x8e3   : > { %15674 = vst [vmem:[#allocation136_spill] sm:$0xff] %v13267_v27  ;;  %v5267_v27 = vmul.f32 %v13066_v18, %v15679_v11  ;;  %v13295_v20 = vadd.f32 %v5265_v17, %v5101_v6  ;;  %v15687_v11 = vld [vmem:[#allocation10_spill] sm:$0xff]  ;;  %v5275_v8 = vmul.f32 %v13066_v18, %v15690_v10  ;;  %v15692_v17 = vld [vmem:[#allocation148_spill] sm:$0xff]  ;;  %v15693_v7 = vld [vmem:[#allocation153_spill] sm:$0xff]  ;;  %v13323_v10 = vadd.f32 %v5271_v40, %v5107_v37 }
 0x8e4   : > { %v13276_v55 = vrot.slane %v13049_v5, %v15677_v25  ;;  %v13284_v52 = vpop.permute.xlu0 %6391  ;;  %v5085_v25 = vmul.f32 %v13058_v53, %v15683_v13  ;;  %v5273_v19 = vmul.f32 %v13066_v18, %v15687_v11  ;;  %v5277_v45 = vmul.f32 %v13066_v18, %v15692_v17  ;;  %v15697_v17 = vld [vmem:[#allocation87_spill] sm:$0xff]  ;;  %v15704_v40 = vld [vmem:[#allocation162_spill] sm:$0xff] }
 0x8e5   : > { %15680 = vst [vmem:[#allocation41_spill] sm:$0xff] %v13284_v52  ;;  %6571 = vperm.xlu1 %8299, %v12114_v47   ;;  %15685 = vst [vmem:[#allocation17_spill] sm:$0xff] %v13295_v20  ;;  %v15689_v52 = vld [vmem:[#allocation152_spill] sm:$0xff]  ;;  %v15691_v47 = vld [vmem:[#allocation46_spill] sm:$0xff]  ;;  %v13311_v43 = vadd.f32 %v5267_v27, %v5103_v24  ;;  %v5279_v11 = vmul.f32 %v13066_v18, %v15693_v7  ;;  %v5281_v24 = vmul.f32 %v13066_v18, %v15696_v28 }
 0x8e6   : > { %v13301_v62 = vpop.permute.xlu1 %6203  ;;  %v5087_v13 = vmul.f32 %v13058_v53, %v15689_v52  ;;  %v4922_v6 = vmul.f32 %v13062_v38, %v15691_v47  ;;  %v13321_v52 = vadd.f32 %v5269_v30, %v5105_v21  ;;  %v5117_v20 = vadd.f32 %v5085_v25, %v4921_v46  ;;  %v15701_v28 = vld [vmem:[#allocation157_spill] sm:$0xff] }
 0x8e7   : > { %15688 = vst [vmem:[#allocation19_spill] sm:$0xff] %v13301_v62  ;;  %v15694_v62 = vld [vmem:[#allocation28_spill] sm:$0xff]  ;;  %v13328_v27 = vadd.f32 %v5084_v35, %v4920_v63  ;;  %v13330_v47 = vadd.f32 %v5273_v19, %v5109_v23  ;;  %v4924_v7 = vmul.f32 %v13062_v38, %v15697_v17  ;;  %v13338_v37 = vadd.f32 %v5275_v8, %v5111_v14  ;;  %v15714_v17 = vld [vmem:[#allocation30_spill] sm:$0xff] }
 0x8e8   : > { %v5089_v39 = vmul.f32 %v13058_v53, %v15694_v62  ;;  %v13319_v42 = vpop.permute.xlu0 %6399  ;;  %v15698_v53 = vld [vmem:[#allocation51_spill] sm:$0xff]  ;;  %v5119_v46 = vadd.f32 %v5087_v13, %v4923_v2  ;;  %v13340_v30 = vadd.f32 %v5086_v50, %v4922_v6  ;;  %v13344_v35 = vadd.f32 %v5277_v45, %v5113_v29  ;;  %v15709_v8 = vld [vmem:[#allocation48_spill] sm:$0xff]  ;;  %v15711_v6 = vld [vmem:[#allocation109_spill] sm:$0xff] }
 0x8e9   : > { %15695 = vst [vmem:[#allocation20_spill] sm:$0xff] %v13319_v42  ;;  %6579 = vperm.xlu1 %8299, %v12152_v51   ;;  %v5283_v62 = vmul.f32 %v13066_v18, %v15698_v53  ;;  %15700 = vst [vmem:[#allocation144_spill] sm:$0xff] %v13338_v37  ;;  %v5264_v51 = vmul.f32 %v13066_v18, %v15701_v28  ;;  %v13346_v23 = vadd.f32 %v5279_v11, %v5115_v61  ;;  %v15707_v2 = vld [vmem:[#allocation159_spill] sm:$0xff]  ;;  %v15712_v11 = vld [vmem:[#allocation84_spill] sm:$0xff] }
 0x8ea   : > { %v13336_v21 = vpop.permute.xlu1 %6211  ;;  %15702 = vst [vmem:[#allocation146_spill] sm:$0xff] %v13344_v35  ;;  %v5121_v25 = vadd.f32 %v5089_v39, %v4925_v12  ;;  %v5285_v38 = vmul.f32 %v13066_v18, %v15704_v40  ;;  %v13352_v19 = vadd.f32 %v5281_v24, %v5117_v20  ;;  %v5266_v14 = vmul.f32 %v13066_v18, %v15707_v2  ;;  %v15708_v50 = vld [vmem:[#allocation47_spill] sm:$0xff]  ;;  %v15715_v28 = vld [vmem:[#allocation29_spill] sm:$0xff]  ;;  %v15772_v42 = vld [vmem:[#allocation198_spill] sm:$0xff] }
 0x8eb   : > { %15699 = vst [vmem:[#allocation141_spill] sm:$0xff] %v13336_v21  ;;  %15703 = vst [vmem:[#allocation131_spill] sm:$0xff] %v13346_v23  ;;  %v5451_v13 = vmul.f32 %v13201_v22, %v15708_v50  ;;  %v5268_v29 = vmul.f32 %v13066_v18, %v15709_v8  ;;  %v5120_v61 = vadd.f32 %v5088_v34, %v4924_v7  ;;  %v15719_v2 = vld [vmem:[#allocation93_spill] sm:$0xff]  ;;  %v15720_v8 = vsub.s32 5, %v15676_v32 }
 0x8ec   : > { %v13350_v63 = vpop.permute.xlu0 %6407  ;;  %15706 = vst [vmem:[#allocation134_spill] sm:$0xff] %v13352_v19  ;;  %v13361_v12 = vadd.f32 %v5283_v62, %v5119_v46  ;;  %v5454_v45 = vmul.f32 %v13201_v22, %v15711_v6  ;;  %v5270_v20 = vmul.f32 %v13066_v18, %v15712_v11  ;;  %v5296_v24 = vadd.f32 %v5264_v51, %v13213_v60  ;;  %v15718_v62 = vld [vmem:[#allocation85_spill] sm:$0xff] }
 0x8ed   : > { %15705 = vst [vmem:[#allocation149_spill] sm:$0xff] %v13350_v63  ;;  %6587 = vperm.xlu1 %8299, %v12190_v58   ;;  %v5456_v53 = vmul.f32 %v13201_v22, %v15714_v17  ;;  %v5272_v40 = vmul.f32 %v13066_v18, %v15715_v28  ;;  %v15716_v58 = vld [vmem:[#allocation161_spill] sm:$0xff]  ;;  %v13376_v7 = vadd.f32 %v5285_v38, %v5121_v25  ;;  %v15722_v38 = vld [vmem:[#allocation110_spill] sm:$0xff]  ;;  %v15756_v63 = vld [vmem:[#allocation172_spill] sm:$0xff] }
 0x8ee   : > { %15710 = vst [vmem:[#allocation37_spill] sm:$0xff] %v13361_v12  ;;  %v13367_v39 = vpop.permute.xlu1 %6219  ;;  %v5458_v34 = vmul.f32 %v13201_v22, %v15716_v58  ;;  %v5274_v46 = vmul.f32 %v13066_v18, %v15718_v62  ;;  %v5460_v50 = vmul.f32 %v13201_v22, %v15719_v2  ;;  %v13385_v60 = vrot.slane %v13049_v5, %v15720_v8  ;;  %v15723_v62 = vld [vmem:[#allocation114_spill] sm:$0xff]  ;;  %v15724_v8 = vld [vmem:[#allocation3_spill] sm:$0xff] }
 0x8ef   : > { %15713 = vst [vmem:[#allocation8_spill] sm:$0xff] %v13367_v39  ;;  %15717 = vst [vmem:[#allocation101_spill] sm:$0xff] %v13376_v7  ;;  %v5298_v6 = vadd.f32 %v5266_v14, %v13230_v54  ;;  %v13391_v11 = vadd.f32 %v5451_v13, %v13124_v57  ;;  %v5300_v25 = vadd.f32 %v5268_v29, %v13244_v59 }
 0x8f0   : > { %v13387_v51 = vpop.permute.xlu0 %6415  ;;  %v5276_v17 = vmul.f32 %v13066_v18, %v15722_v38  ;;  %v13398_v28 = vadd.f32 %v5454_v45, %v13164_v16  ;;  %v5302_v58 = vadd.f32 %v5270_v20, %v13254_v36  ;;  %v5462_v2 = vmul.f32 %v13201_v22, %v15723_v62  ;;  %v15726_v16 = vld [vmem:[#allocation18_spill] sm:$0xff] }
 0x8f1   : > { %15721 = vst [vmem:[#allocation118_spill] sm:$0xff] %v13387_v51  ;;  %6595 = vperm.xlu1 %8299, %v12214_v44   ;;  %v5278_v54 = vmul.f32 %v13066_v18, %v15724_v8  ;;  %v13408_v59 = vadd.f32 %v5456_v53, %v13180_v31  ;;  %v5304_v14 = vadd.f32 %v5272_v40, %v13259_v33  ;;  %v15727_v45 = vld [vmem:[#allocation90_spill] sm:$0xff]  ;;  %v15730_v53 = vld [vmem:[#allocation111_spill] sm:$0xff] }
 0x8f2   : > { %v13405_v57 = vpop.permute.xlu1 %6227  ;;  %v13412_v44 = vadd.f32 %v5458_v34, %v13205_v56  ;;  %v5464_v13 = vmul.f32 %v13201_v22, %v15726_v16  ;;  %v5306_v36 = vadd.f32 %v5274_v46, %v13269_v3  ;;  %v13417_v29 = vadd.f32 %v5460_v50, %v5296_v24  ;;  %v15728_v38 = vld [vmem:[#allocation94_spill] sm:$0xff]  ;;  %v15731_v40 = vld [vmem:[#allocation91_spill] sm:$0xff] }
 0x8f3   : > { %15725 = vst [vmem:[#allocation42_spill] sm:$0xff] %v13405_v57  ;;  %v5280_v20 = vmul.f32 %v13066_v18, %v15727_v45  ;;  %v5466_v62 = vmul.f32 %v13201_v22, %v15728_v38  ;;  %v5308_v33 = vadd.f32 %v5276_v17, %v13280_v4  ;;  %v5282_v56 = vmul.f32 %v13066_v18, %v15730_v53  ;;  %v15732_v8 = vld [vmem:[#allocation23_spill] sm:$0xff]  ;;  %v15733_v50 = vld [vmem:[#allocation98_spill] sm:$0xff]  ;;  %v15734_v45 = vld [vmem:[#allocation9_spill] sm:$0xff] }
 0x8f4   : > { %v13423_v31 = vpop.permute.xlu0 %6423  ;;  %v5468_v34 = vmul.f32 %v13201_v22, %v15731_v40  ;;  %v5284_v3 = vmul.f32 %v13066_v18, %v15732_v8  ;;  %v13433_v24 = vadd.f32 %v5462_v2, %v5298_v6  ;;  %v5310_v46 = vadd.f32 %v5278_v54, %v13303_v48  ;;  %v15735_v38 = vld [vmem:[#allocation89_spill] sm:$0xff]  ;;  %v15736_v40 = vld [vmem:[#allocation6_spill] sm:$0xff]  ;;  %v15738_v54 = vld [vmem:[#allocation128_spill] sm:$0xff] }
 0x8f5   : > { %15729 = vst [vmem:[#allocation16_spill] sm:$0xff] %v13423_v31  ;;  %6603 = vperm.xlu1 %8299, %v12237_v9   ;;  %v5470_v16 = vmul.f32 %v13201_v22, %v15733_v50  ;;  %v5450_v4 = vmul.f32 %v13201_v22, %v15734_v45  ;;  %v13440_v17 = vadd.f32 %v5464_v13, %v5300_v25  ;;  %v15737_v8 = vld [vmem:[#allocation54_spill] sm:$0xff]  ;;  %v15739_v25 = vld [vmem:[#allocation32_spill] sm:$0xff]  ;;  %v15755_v51 = vld [vmem:[#allocation171_spill] sm:$0xff] }
 0x8f6   : > { %v5472_v53 = vmul.f32 %v13201_v22, %v15735_v38  ;;  %v5452_v18 = vmul.f32 %v13201_v22, %v15736_v40  ;;  %v5474_v9 = vmul.f32 %v13201_v22, %v15737_v8  ;;  %v5312_v48 = vadd.f32 %v5280_v20, %v13328_v27  ;;  %v15740_v31 = vld [vmem:[#allocation38_spill] sm:$0xff]  ;;  %v15741_v20 = vld [vmem:[#allocation7_spill] sm:$0xff] }
 0x8f7   : > { %v13448_v6 = vpop.permute.xlu1 %6303  ;;  %v13451_v2 = vadd.f32 %v5466_v62, %v5302_v58  ;;  %v5453_v50 = vmul.f32 %v13201_v22, %v15738_v54  ;;  %v5476_v13 = vmul.f32 %v13201_v22, %v15739_v25  ;;  %v5314_v45 = vadd.f32 %v5282_v56, %v13340_v30  ;;  %v15742_v54 = vld [vmem:[#allocation116_spill] sm:$0xff] }
 0x8f8   : > { %v13458_v38 = vadd.f32 %v5468_v34, %v5304_v14  ;;  %v5316_v40 = vadd.f32 %v5284_v3, %v5120_v61  ;;  %v5455_v8 = vmul.f32 %v13201_v22, %v15740_v31  ;;  %v13465_v27 = vadd.f32 %v5470_v16, %v5306_v36  ;;  %v15743_v31 = vld [vmem:[#allocation121_spill] sm:$0xff]  ;;  %v15744_v3 = vld [vmem:[#allocation95_spill] sm:$0xff] }
 0x8f9   : > { %6611 = vperm.xlu1 %8299, %v12260_v41   ;;  %v13463_v57 = vpop.permute.xlu0 %6499  ;;  %v5482_v58 = vadd.f32 %v5450_v4, %v13130_v15  ;;  %v5478_v62 = vmul.f32 %v13201_v22, %v15741_v20  ;;  %v5457_v30 = vmul.f32 %v13201_v22, %v15742_v54  ;;  %v13472_v14 = vadd.f32 %v5472_v53, %v5308_v33  ;;  %v15745_v53 = vld [vmem:[#allocation163_spill] sm:$0xff]  ;;  %v15749_v20 = vld [vmem:[#allocation166_spill] sm:$0xff] }
 0x8fa   : > { %v5484_v61 = vadd.f32 %v5452_v18, %v13147_v49  ;;  %v13475_v56 = vadd.f32 %v5474_v9, %v5310_v46  ;;  %v5480_v41 = vmul.f32 %v13201_v22, %v15743_v31  ;;  %v5485_v36 = vadd.f32 %v5453_v50, %v13145_v1  ;;  %v15746_v46 = vld [vmem:[#allocation164_spill] sm:$0xff]  ;;  %v15747_v9 = vld [vmem:[#allocation165_spill] sm:$0xff]  ;;  %v15748_v50 = vld [vmem:[#allocation11_spill] sm:$0xff] }
 0x8fb   : > { %v13479_v34 = vpop.permute.xlu1 %6307  ;;  %v13482_v15 = vadd.f32 %v5476_v13, %v5312_v48  ;;  %v5459_v16 = vmul.f32 %v13201_v22, %v15744_v3  ;;  %v6036_v4 = vsub.s32 6, %v15676_v32  ;;  %v5487_v33 = vadd.f32 %v5455_v8, %v13166_v26  ;;  %v15750_v8 = vld [vmem:[#allocation167_spill] sm:$0xff]  ;;  %v15751_v3 = vld [vmem:[#allocation168_spill] sm:$0xff] }
 0x8fc   : > { %v5646_v49 = vmul.f32 %v13276_v55, %v15745_v53  ;;  %v5461_v18 = vmul.f32 %v13201_v22, %v15746_v46  ;;  %v5649_v25 = vmul.f32 %v13276_v55, %v15747_v9  ;;  %v13497_v48 = vadd.f32 %v5478_v62, %v5314_v45  ;;  %v15752_v46 = vld [vmem:[#allocation169_spill] sm:$0xff]  ;;  %v15753_v9 = vld [vmem:[#allocation170_spill] sm:$0xff] }
 0x8fd   : > { %6619 = vperm.xlu1 %8299, %v12298_v0   ;;  %v13495_v1 = vpop.permute.xlu0 %6511  ;;  %v5489_v13 = vadd.f32 %v5457_v30, %v15748_v50  ;;  %v5463_v26 = vmul.f32 %v13201_v22, %v15749_v20  ;;  %v5651_v54 = vmul.f32 %v13276_v55, %v15750_v8  ;;  %v13504_v31 = vadd.f32 %v5480_v41, %v5316_v40  ;;  %v15754_v30 = vld [vmem:[#allocation40_spill] sm:$0xff] }
 0x8fe   : > { %v5465_v53 = vmul.f32 %v13201_v22, %v15751_v3  ;;  %v5653_v0 = vmul.f32 %v13276_v55, %v15752_v46  ;;  %v5467_v45 = vmul.f32 %v13201_v22, %v15753_v9  ;;  %v5491_v50 = vadd.f32 %v5459_v16, %v15754_v30  ;;  %v15757_v3 = vld [vmem:[#allocation17_spill] sm:$0xff] }
 0x8ff   : > { %v13512_v62 = vpop.permute.xlu1 %6315  ;;  %v5655_v20 = vmul.f32 %v13276_v55, %v15755_v51  ;;  %v5469_v40 = vmul.f32 %v13201_v22, %v15756_v63  ;;  %v13520_v41 = vrot.slane %v13049_v5, %v6036_v4  ;;  %v13522_v8 = vadd.f32 %v5646_v49, %v5482_v58  ;;  %v15758_v9 = vld [vmem:[#allocation173_spill] sm:$0xff]  ;;  %v15759_v51 = vld [vmem:[#allocation175_spill] sm:$0xff] }
 0x900   : > { %v5493_v46 = vadd.f32 %v5461_v18, %v15757_v3  ;;  %v13525_v39 = vadd.f32 %v5649_v25, %v5485_v36  ;;  %v5657_v7 = vmul.f32 %v13276_v55, %v15758_v9  ;;  %v5495_v16 = vadd.f32 %v5463_v26, %v13311_v43  ;;  %v15760_v63 = vld [vmem:[#allocation177_spill] sm:$0xff]  ;;  %v15761_v18 = vld [vmem:[#allocation179_spill] sm:$0xff] }
 0x901   : > { %v13530_v30 = vadd.f32 %v5651_v54, %v5487_v33  ;;  %v5659_v21 = vmul.f32 %v13276_v55, %v15759_v51  ;;  %v5661_v4 = vmul.f32 %v13276_v55, %v15760_v63  ;;  %v5497_v58 = vadd.f32 %v5465_v53, %v13321_v52  ;;  %v13542_v3 = vpop.permute.xlu0 %6519  ;;  %v15763_v54 = vld [vmem:[#allocation186_spill] sm:$0xff]  ;;  %v15764_v52 = vld [vmem:[#allocation188_spill] sm:$0xff] }
 0x902   : > { %v13537_v49 = vadd.f32 %v5653_v0, %v5489_v13  ;;  %v5499_v36 = vadd.f32 %v5467_v45, %v13323_v10  ;;  %v5663_v25 = vmul.f32 %v13276_v55, %v15761_v18  ;;  %v13546_v33 = vadd.f32 %v5655_v20, %v5491_v50  ;;  %v15765_v10 = vld [vmem:[#allocation190_spill] sm:$0xff]  ;;  %v15766_v45 = vld [vmem:[#allocation192_spill] sm:$0xff]  ;;  %v15768_v18 = vld [vmem:[#allocation195_spill] sm:$0xff] }
 0x903   : > { %v13544_v43 = vpop.permute.xlu1 %6323  ;;  %v13549_v26 = vadd.f32 %v5469_v40, %v13330_v47  ;;  %v5647_v9 = vmul.f32 %v13276_v55, %v15763_v54  ;;  %v5648_v13 = vmul.f32 %v13276_v55, %v15764_v52  ;;  %v13555_v53 = vadd.f32 %v5657_v7, %v5493_v46  ;;  %v15767_v40 = vld [vmem:[#allocation194_spill] sm:$0xff]  ;;  %v15770_v46 = vld [vmem:[#allocation196_spill] sm:$0xff] }
 0x904   : > { %v5650_v0 = vmul.f32 %v13276_v55, %v15765_v10  ;;  %v5652_v51 = vmul.f32 %v13276_v55, %v15766_v45  ;;  %v6232_v50 = vsub.s32 7, %v15676_v32  ;;  %v13562_v20 = vadd.f32 %v5659_v21, %v5495_v16  ;;  %v15771_v10 = vld [vmem:[#allocation197_spill] sm:$0xff] }
 0x905   : > { %15762 = vst [vmem:[#allocation119_spill] sm:$0xff] %v13549_v26  ;;  %v13564_v47 = vadd.f32 %v5661_v4, %v5497_v58  ;;  %v5654_v63 = vmul.f32 %v13276_v55, %v15767_v40  ;;  %v5843_v54 = vmul.f32 %v13385_v60, %v15768_v18  ;;  %v13570_v7 = vadd.f32 %v5663_v25, %v5499_v36  ;;  %v15773_v58 = vld [vmem:[#allocation199_spill] sm:$0xff]  ;;  %v15774_v36 = vld [vmem:[#allocation200_spill] sm:$0xff]  ;;  %v13594_v19 = vpop.permute.xlu0 %6527 }
 0x906   : > { %v5656_v52 = vmul.f32 %v13276_v55, %v15770_v46  ;;  %v5846_v45 = vmul.f32 %v13385_v60, %v15771_v10  ;;  %v5658_v32 = vmul.f32 %v13276_v55, %v15772_v42  ;;  %v5679_v16 = vadd.f32 %v5647_v9, %v13391_v11  ;;  %v15775_v10 = vld [vmem:[#allocation201_spill] sm:$0xff]  ;;  %v15776_v9 = vld [vmem:[#allocation202_spill] sm:$0xff] }
 0x907   : > { %15769 = vst [vmem:[#allocation135_spill] sm:$0xff] %v13570_v7  ;;  %v13578_v21 = vpop.permute.xlu1 %6331  ;;  %v13581_v4 = vadd.f32 %v5648_v13, %v5484_v61  ;;  %v5848_v40 = vmul.f32 %v13385_v60, %v15773_v58  ;;  %v5660_v25 = vmul.f32 %v13276_v55, %v15774_v36  ;;  %v5682_v18 = vadd.f32 %v5650_v0, %v13398_v28  ;;  %v15777_v58 = vld [vmem:[#allocation203_spill] sm:$0xff] }
 0x908   : > { %v5684_v46 = vadd.f32 %v5652_v51, %v13408_v59  ;;  %v5850_v12 = vmul.f32 %v13385_v60, %v15775_v10  ;;  %v13592_v42 = vrot.slane %v13049_v5, %v6232_v50  ;;  %v5686_v11 = vadd.f32 %v5654_v63, %v13412_v44  ;;  %v4729_v28 = vld [vmem:[%s14775_s11 + $0x8] sm:$0x3]  ;;  %v15778_v51 = vld [vmem:[#allocation252_spill] sm:$0xff] }
 0x909   : > { %v5875_v61 = vadd.f32 %v5843_v54, %v5679_v16  ;;  %v5662_v13 = vmul.f32 %v13276_v55, %v15776_v9  ;;  %v5852_v36 = vmul.f32 %v13385_v60, %v15777_v58  ;;  %v5688_v59 = vadd.f32 %v5656_v52, %v13417_v29  ;;  %v15779_v16 = vld [vmem:[#allocation204_spill] sm:$0xff]  ;;  %v15780_v9 = vld [vmem:[#allocation205_spill] sm:$0xff]  ;;  %v15781_v29 = vld [vmem:[#allocation206_spill] sm:$0xff]  ;;  %v13638_v35 = vpop.permute.xlu0 %6535 }
 0x90a   : > { %v5878_v0 = vadd.f32 %v5846_v45, %v5682_v18  ;;  %v5690_v5 = vadd.f32 %v5658_v32, %v13433_v24  ;;  %v6039_v50 = vmul.f32 %v13520_v41, %v15778_v51  ;;  %v5880_v63 = vadd.f32 %v5848_v40, %v5684_v46  ;;  %v15782_v24 = vld [vmem:[#allocation257_spill] sm:$0xff]  ;;  %v15783_v32 = vld [vmem:[#allocation34_spill] sm:$0xff]  ;;  %v15785_v51 = vld [vmem:[#allocation208_spill] sm:$0xff] }
 0x90b   : > { %v13608_v44 = vpop.permute.xlu1 %6339  ;;  %v5692_v54 = vadd.f32 %v5660_v25, %v13440_v17  ;;  %v5664_v10 = vmul.f32 %v13276_v55, %v15779_v16  ;;  %v5854_v58 = vmul.f32 %v13385_v60, %v15780_v9  ;;  %v13615_v23 = vadd.f32 %v5850_v12, %v5686_v11  ;;  %v15784_v25 = vld [vmem:[#allocation207_spill] sm:$0xff]  ;;  %v15786_v11 = vld [vmem:[#allocation209_spill] sm:$0xff] }
 0x90c   : > { %v5666_v52 = vmul.f32 %v13276_v55, %v15781_v29  ;;  %v6235_v45 = vmul.f32 %v13592_v42, %v15782_v24  ;;  %v13622_v18 = vrot.slane %v4729_v28, %v15783_v32  ;;  %v5694_v40 = vadd.f32 %v5662_v13, %v13451_v2  ;;  %v15787_v24 = vld [vmem:[#allocation33_spill] sm:$0xff] }
 0x90d   : > { %v13625_v17 = vadd.f32 %v5852_v36, %v5688_v59  ;;  %v5856_v46 = vmul.f32 %v13385_v60, %v15784_v25  ;;  %v5668_v12 = vmul.f32 %v13276_v55, %v15785_v51  ;;  %v5858_v16 = vmul.f32 %v13385_v60, %v15786_v11  ;;  %v15788_v59 = vld [vmem:[#allocation210_spill] sm:$0xff]  ;;  %v15789_v51 = vld [vmem:[#allocation256_spill] sm:$0xff] }
 0x90e   : > { %v6071_v9 = vadd.f32 %v6039_v50, %v5875_v61  ;;  %v6431_v29 = vmul.f32 %v13622_v18, %v13448_v6  ;;  %v13636_v32 = vrot.slane %v4729_v28, %v15787_v24  ;;  %v5696_v13 = vadd.f32 %v5664_v10, %v13458_v38  ;;  %v15790_v6 = vld [vmem:[#allocation211_spill] sm:$0xff]  ;;  %v15791_v11 = vld [vmem:[#allocation212_spill] sm:$0xff] }
 0x90f   : > { %v13640_v2 = vpop.permute.xlu1 %6347  ;;  %v13643_v36 = vadd.f32 %v5854_v58, %v5690_v5  ;;  %v5670_v25 = vmul.f32 %v13276_v55, %v15788_v59  ;;  %v6042_v61 = vmul.f32 %v13520_v41, %v15789_v51  ;;  %v5698_v50 = vadd.f32 %v5666_v52, %v13465_v27  ;;  %v15792_v5 = vld [vmem:[#allocation213_spill] sm:$0xff]  ;;  %v15793_v58 = vld [vmem:[#allocation259_spill] sm:$0xff]  ;;  %v15794_v27 = vld [vmem:[#allocation214_spill] sm:$0xff] }
 0x910   : > { %v5860_v28 = vmul.f32 %v13385_v60, %v15790_v6  ;;  %v5672_v24 = vmul.f32 %v13276_v55, %v15791_v11  ;;  %v6267_v37 = vadd.f32 %v6235_v45, %v6071_v9  ;;  %v13654_v7 = vadd.f32 %v5856_v46, %v5692_v54  ;;  %v15795_v46 = vld [vmem:[#allocation258_spill] sm:$0xff] }
 0x911   : > { %v5700_v38 = vadd.f32 %v5668_v12, %v13472_v14  ;;  %v5862_v10 = vmul.f32 %v13385_v60, %v15792_v5  ;;  %v6238_v59 = vmul.f32 %v13592_v42, %v15793_v58  ;;  %v13661_v51 = vadd.f32 %v5858_v16, %v5694_v40  ;;  %v15796_v5 = vld [vmem:[#allocation215_spill] sm:$0xff]  ;;  %v13681_v58 = vpop.permute.xlu0 %6543 }
 0x912   : > { %v5674_v52 = vmul.f32 %v13276_v55, %v15794_v27  ;;  %v6463_v6 = vadd.f32 %v6431_v29, %v6267_v37  ;;  %v6627_v11 = vmul.f32 %v13636_v32, %v13463_v57  ;;  %v5702_v54 = vadd.f32 %v5670_v25, %v13475_v56  ;;  %v15797_v29 = vld [vmem:[#allocation216_spill] sm:$0xff]  ;;  %v15799_v27 = vld [vmem:[#allocation261_spill] sm:$0xff] }
 0x913   : > { %v13667_v45 = vpop.permute.xlu1 %6355  ;;  %v6074_v14 = vadd.f32 %v6042_v61, %v5878_v0  ;;  %v6044_v12 = vmul.f32 %v13520_v41, %v15795_v46  ;;  %v6434_v9 = vmul.f32 %v13622_v18, %v13512_v62  ;;  %v13674_v40 = vadd.f32 %v5860_v28, %v5696_v13  ;;  %v15798_v0 = vld [vmem:[#allocation217_spill] sm:$0xff] }
 0x914   : > { %v5704_v16 = vadd.f32 %v5672_v24, %v13482_v15  ;;  %v5864_v37 = vmul.f32 %v13385_v60, %v15796_v5  ;;  %v5676_v57 = vmul.f32 %v13276_v55, %v15797_v29  ;;  %v13683_v56 = vadd.f32 %v5862_v10, %v5698_v50  ;;  %v15800_v15 = vld [vmem:[#allocation218_spill] sm:$0xff]  ;;  %v15801_v24 = vld [vmem:[#allocation219_spill] sm:$0xff]  ;;  %v15802_v10 = vld [vmem:[#allocation260_spill] sm:$0xff] }
 0x915   : > { %v5866_v25 = vmul.f32 %v13385_v60, %v15798_v0  ;;  %v6270_v61 = vadd.f32 %v6238_v59, %v6074_v14  ;;  %v6240_v62 = vmul.f32 %v13592_v42, %v15799_v27  ;;  %v5706_v13 = vadd.f32 %v5674_v52, %v13497_v48  ;;  %v13703_v48 = vld [vmem:[%s14776_s12] ss:$0 sm:$0xff] }
 0x916   : > { %v5842_v28 = vmul.f32 %v13385_v60, %v15800_v15  ;;  %v5868_v46 = vmul.f32 %v13385_v60, %v15801_v24  ;;  %v6659_v5 = vadd.f32 %v6627_v11, %v6463_v6  ;;  %v6076_v50 = vadd.f32 %v6044_v12, %v5880_v63  ;;  %v15803_v6 = vld [vmem:[#allocation220_spill] sm:$0xff]  ;;  %v15804_v63 = vld [vmem:[#allocation221_spill] sm:$0xff]  ;;  %v13723_v24 = vpop.permute.xlu0 %6551 }
 0x917   : > { %v13694_v29 = vpop.permute.xlu1 %6363  ;;  %v6046_v26 = vmul.f32 %v13520_v41, %v15802_v10  ;;  %v6466_v0 = vadd.f32 %v6434_v9, %v6270_v61  ;;  %v6436_v59 = vmul.f32 %v13622_v18, %v13544_v43  ;;  %v13705_v52 = vadd.f32 %v5864_v37, %v5700_v38  ;;  %v15805_v61 = vld [vmem:[#allocation263_spill] sm:$0xff] }
 0x918   : > { %v5708_v14 = vadd.f32 %v5676_v57, %v13504_v31  ;;  %v5844_v11 = vmul.f32 %v13385_v60, %v15803_v6  ;;  %v5870_v12 = vmul.f32 %v13385_v60, %v15804_v63  ;;  %v13712_v27 = vadd.f32 %v5866_v25, %v5702_v54  ;;  %v15806_v31 = vld [vmem:[#allocation262_spill] sm:$0xff]  ;;  %v15808_v6 = vld [vmem:[#allocation223_spill] sm:$0xff] }
 0x919   : > { %v6272_v9 = vadd.f32 %v6240_v62, %v6076_v50  ;;  %v6242_v43 = vmul.f32 %v13592_v42, %v15805_v61  ;;  %v6630_v15 = vmul.f32 %v13636_v32, %v13495_v1  ;;  %v5874_v38 = vadd.f32 %v5842_v28, %v13522_v8  ;;  %v15807_v28 = vld [vmem:[#allocation222_spill] sm:$0xff] }
 0x91a   : > { %v13719_v37 = vadd.f32 %v5868_v46, %v5704_v16  ;;  %v6048_v57 = vmul.f32 %v13520_v41, %v15806_v31  ;;  %v13728_v54 = vadd.f32 %v13703_v48, %v6659_v5  ;;  %v6078_v25 = vadd.f32 %v6046_v26, %v13615_v23  ;;  %v15809_v5 = vld [vmem:[#allocation224_spill] sm:$0xff]  ;;  %v15810_v26 = vld [vmem:[#allocation265_spill] sm:$0xff] }
 0x91b   : > { %v13725_v10 = vpop.permute.xlu1 %6371  ;;  %v6468_v62 = vadd.f32 %v6436_v59, %v6272_v9  ;;  %v6438_v1 = vmul.f32 %v13622_v18, %v13578_v21  ;;  %v6662_v50 = vadd.f32 %v6630_v15, %v6466_v0  ;;  %v13734_v8 = vadd.f32 %v5844_v11, %v13581_v4  ;;  %v15811_v4 = vld [vmem:[#allocation225_spill] sm:$0xff]  ;;  %v15812_v11 = vld [vmem:[#allocation264_spill] sm:$0xff] }
 0x91c   : > { %v13736_v16 = vadd.f32 %v5870_v12, %v5706_v13  ;;  %v5845_v46 = vmul.f32 %v13385_v60, %v15807_v28  ;;  %v5872_v63 = vmul.f32 %v13385_v60, %v15808_v6  ;;  %v5847_v61 = vmul.f32 %v13385_v60, %v15809_v5  ;;  %v15813_v6 = vld [vmem:[#allocation226_spill] sm:$0xff] }
 0x91d   : > { %v6274_v23 = vadd.f32 %v6242_v43, %v6078_v25  ;;  %v6244_v59 = vmul.f32 %v13592_v42, %v15810_v26  ;;  %v6632_v21 = vmul.f32 %v13636_v32, %v13542_v3  ;;  %v6038_v13 = vmul.f32 %v13520_v41, %v15811_v4  ;;  %v15815_v26 = vld [vmem:[#allocation267_spill] sm:$0xff] }
 0x91e   : > { %v6080_v0 = vadd.f32 %v6048_v57, %v13625_v17  ;;  %v6050_v12 = vmul.f32 %v13520_v41, %v15812_v11  ;;  %v6732_v15 = vsel %vm3414_vm4, %v13728_v54, -inf  ;;  %v6440_v31 = vmul.f32 %v13622_v18, %v13608_v44  ;;  %v15814_v57 = vld [vmem:[#allocation227_spill] sm:$0xff]  ;;  %v13769_v11 = vpop.permute.xlu0 %6559 }
 0x91f   : > { %v13753_v9 = vpop.permute.xlu1 %6379  ;;  %v6470_v43 = vadd.f32 %v6438_v1, %v6274_v23  ;;  %v13760_v25 = vadd.f32 %v13703_v48, %v6662_v50  ;;  %v6664_v3 = vadd.f32 %v6632_v21, %v6468_v62  ;;  %v5877_v28 = vadd.f32 %v5845_v46, %v13525_v39  ;;  %v15816_v23 = vld [vmem:[#allocation266_spill] sm:$0xff] }
 0x920   : > { %v5849_v17 = vmul.f32 %v13385_v60, %v15813_v6  ;;  %v6041_v5 = vmul.f32 %v13520_v41, %v15814_v57  ;;  %v6246_v4 = vmul.f32 %v13592_v42, %v15815_v26  ;;  %v13771_v1 = vadd.f32 %v5872_v63, %v5708_v14 }
 0x921   : > { %6733 = vmax.xlane.f32.xlu1 %v6732_v15  ;;  %v5879_v44 = vadd.f32 %v5847_v61, %v13530_v30  ;;  %v6276_v50 = vadd.f32 %v6244_v59, %v6080_v0  ;;  %v6634_v39 = vmul.f32 %v13636_v32, %v13594_v19  ;;  %v13776_v62 = vadd.f32 %v6038_v13, %v5874_v38 }
 0x922   : > { %v6082_v46 = vadd.f32 %v6050_v12, %v13643_v36  ;;  %v6052_v21 = vmul.f32 %v13520_v41, %v15816_v23  ;;  %v6442_v6 = vmul.f32 %v13622_v18, %v13640_v2  ;;  %v6741_v30 = vsel %vm3414_vm4, %v13760_v25, -inf  ;;  %v15817_v36 = vld [vmem:[#allocation228_spill] sm:$0xff]  ;;  %v15818_v2 = vld [vmem:[#allocation229_spill] sm:$0xff]  ;;  %v15819_v12 = vld [vmem:[#allocation230_spill] sm:$0xff] }
 0x923   : > { %v13783_v57 = vpop.permute.xlu1 %6387  ;;  %v6472_v14 = vadd.f32 %v6440_v31, %v6276_v50  ;;  %v13788_v63 = vadd.f32 %v13703_v48, %v6664_v3  ;;  %v6666_v19 = vadd.f32 %v6634_v39, %v6470_v43  ;;  %v5881_v38 = vadd.f32 %v5849_v17, %v13537_v49  ;;  %v15820_v31 = vld [vmem:[#allocation269_spill] sm:$0xff]  ;;  %v15821_v49 = vld [vmem:[#allocation231_spill] sm:$0xff]  ;;  %v13808_v50 = vpop.permute.xlu0 %6567 }
 0x924   : > { %v13791_v61 = vadd.f32 %v6041_v5, %v5877_v28  ;;  %v5851_v59 = vmul.f32 %v13385_v60, %v15817_v36  ;;  %v6278_v13 = vadd.f32 %v6246_v4, %v6082_v46  ;;  %v6043_v0 = vmul.f32 %v13520_v41, %v15818_v2  ;;  %v15822_v5 = vld [vmem:[#allocation268_spill] sm:$0xff] }
 0x925   : > { %6742 = vmax.xlane.f32.xlu1 %v6741_v30  ;;  %v5853_v15 = vmul.f32 %v13385_v60, %v15819_v12  ;;  %v6248_v3 = vmul.f32 %v13592_v42, %v15820_v31  ;;  %v6636_v43 = vmul.f32 %v13636_v32, %v13638_v35  ;;  %v6045_v28 = vmul.f32 %v13520_v41, %v15821_v49  ;;  %v15825_v31 = vld [vmem:[#allocation271_spill] sm:$0xff] }
 0x926   : > { %v6084_v17 = vadd.f32 %v6052_v21, %v13654_v7  ;;  %v6054_v26 = vmul.f32 %v13520_v41, %v15822_v5  ;;  %v6474_v4 = vadd.f32 %v6442_v6, %v6278_v13  ;;  %v6444_v46 = vmul.f32 %v13622_v18, %v13667_v45  ;;  %v15823_v21 = vld [vmem:[#allocation232_spill] sm:$0xff]  ;;  %v15824_v6 = vld [vmem:[#allocation233_spill] sm:$0xff] }
 0x927   : > { %v13810_v39 = vpop.permute.xlu1 %6395  ;;  %v6747_v23 = vsel %vm3414_vm4, %v13788_v63, -inf  ;;  %v13817_v35 = vadd.f32 %v13703_v48, %v6666_v19  ;;  %v6668_v30 = vadd.f32 %v6636_v43, %v6472_v14  ;;  %v5883_v7 = vadd.f32 %v5851_v59, %v13546_v33  ;;  %v15826_v43 = vld [vmem:[#allocation270_spill] sm:$0xff] }
 0x928   : > { %v5855_v36 = vmul.f32 %v13385_v60, %v15823_v21  ;;  %v6047_v13 = vmul.f32 %v13520_v41, %v15824_v6  ;;  %v6638_v2 = vmul.f32 %v13636_v32, %v13681_v58  ;;  %v13826_v45 = vadd.f32 %v6043_v0, %v5879_v44  ;;  %v15832_v21 = vld [vmem:[#allocation237_spill] sm:$0xff] }
 0x929   : > { %6748 = vmax.xlane.f32.xlu1 %v6747_v23  ;;  %v13829_v12 = vadd.f32 %v5853_v15, %v13555_v53  ;;  %v6280_v19 = vadd.f32 %v6248_v3, %v6084_v17  ;;  %v6250_v14 = vmul.f32 %v13592_v42, %v15825_v31  ;;  %v13833_v33 = vadd.f32 %v6045_v28, %v5881_v38  ;;  %v15828_v15 = vld [vmem:[#allocation234_spill] sm:$0xff]  ;;  %v15829_v28 = vld [vmem:[#allocation272_spill] sm:$0xff] }
 0x92a   : > { %v6086_v59 = vadd.f32 %v6054_v26, %v13661_v51  ;;  %v6056_v49 = vmul.f32 %v13520_v41, %v15826_v43  ;;  %v6670_v58 = vadd.f32 %v6638_v2, %v6474_v4  ;;  %v6446_v44 = vmul.f32 %v13622_v18, %v13694_v29  ;;  %v6576_v26 = vpop.permute.xlu0 %6575  ;;  %v15830_v29 = vld [vmem:[#allocation235_spill] sm:$0xff] }
 0x92b   : > { %v13838_v5 = vpop.permute.xlu1 %6403  ;;  %v6476_v23 = vadd.f32 %v6444_v46, %v6280_v19  ;;  %v6753_v53 = vsel %vm3414_vm4, %v13817_v35, -inf  ;;  %v13845_v0 = vadd.f32 %v13703_v48, %v6668_v30  ;;  %v13848_v38 = vadd.f32 %v5855_v36, %v13562_v20  ;;  %v15831_v30 = vld [vmem:[#allocation273_spill] sm:$0xff] }
 0x92c   : > { %v13850_v51 = vadd.f32 %v6047_v13, %v5883_v7  ;;  %v13854_v3 = vmul.f32 %v13385_v60, %v15828_v15  ;;  %v6058_v17 = vmul.f32 %v13520_v41, %v15829_v28  ;;  %v13860_v4 = vmul.f32 %v13520_v41, %v15830_v29  ;;  %v15833_v13 = vld [vmem:[#allocation274_spill] sm:$0xff]  ;;  %v15837_v29 = vld [vmem:[#allocation276_spill] sm:$0xff] }
 0x92d   : > { %15827 = vst [vmem:[#allocation21_spill] sm:$0xff] %v13845_v0  ;;  %6754 = vmax.xlane.f32.xlu1 %v6753_v53  ;;  %v6282_v46 = vadd.f32 %v6250_v14, %v6086_v59  ;;  %v6252_v20 = vmul.f32 %v13592_v42, %v15831_v30  ;;  %v6640_v7 = vmul.f32 %v13636_v32, %v13723_v24  ;;  %v6759_v24 = vsel %vm3414_vm4, %v13845_v0, -inf  ;;  %v15835_v53 = vld [vmem:[#allocation254_spill] sm:$0xff] }
 0x92e   : > { %v13868_v36 = vmul.f32 %v13520_v41, %v15832_v21  ;;  %v6088_v6 = vadd.f32 %v6056_v49, %v13674_v40  ;;  %v6060_v2 = vmul.f32 %v13520_v41, %v15833_v13  ;;  %v13876_v31 = vadd.f32 %v13703_v48, %v6670_v58  ;;  %v15836_v49 = vld [vmem:[#allocation275_spill] sm:$0xff]  ;;  %v15839_v30 = vld [vmem:[#allocation278_spill] sm:$0xff]  ;;  %v15841_v13 = vld [vmem:[#allocation284_spill] sm:$0xff] }
 0x92f   : > { %v13873_v19 = vpop.permute.xlu1 %6411  ;;  %v6478_v14 = vadd.f32 %v6446_v44, %v6282_v46  ;;  %v6448_v59 = vmul.f32 %v13622_v18, %v13725_v10  ;;  %v6672_v43 = vadd.f32 %v6640_v7, %v6476_v23  ;;  %v6040_v15 = vmul.f32 %v13520_v41, %v15835_v53  ;;  %v15838_v46 = vld [vmem:[#allocation277_spill] sm:$0xff] }
 0x930   : > { %15834 = vst [vmem:[#allocation22_spill] sm:$0xff] %v13876_v31  ;;  %v6090_v40 = vadd.f32 %v6058_v17, %v13683_v56  ;;  %v6254_v28 = vmul.f32 %v13592_v42, %v15836_v49  ;;  %v6062_v58 = vmul.f32 %v13520_v41, %v15837_v29  ;;  %v6284_v44 = vadd.f32 %v6252_v20, %v6088_v6  ;;  %v15840_v56 = vld [vmem:[#allocation279_spill] sm:$0xff]  ;;  %v6584_v49 = vpop.permute.xlu0 %6583 }
 0x931   : > { %6760 = vmax.xlane.f32.xlu1 %v6759_v24  ;;  %v6256_v10 = vmul.f32 %v13592_v42, %v15838_v46  ;;  %v6064_v21 = vmul.f32 %v13520_v41, %v15839_v30  ;;  %v6642_v23 = vmul.f32 %v13636_v32, %v13769_v11  ;;  %v6092_v7 = vadd.f32 %v6060_v2, %v13705_v52 }
 0x932   : > { %v6258_v17 = vmul.f32 %v13592_v42, %v15840_v56  ;;  %v6234_v53 = vmul.f32 %v13592_v42, %v15841_v13  ;;  %v6765_v20 = vsel %vm3414_vm4, %v13876_v31, -inf  ;;  %v6480_v6 = vadd.f32 %v6448_v59, %v6284_v44  ;;  %v15842_v56 = vld [vmem:[#allocation287_spill] sm:$0xff]  ;;  %v15843_v59 = vld [vmem:[#allocation286_spill] sm:$0xff] }
 0x933   : > { %v13900_v24 = vpop.permute.xlu1 %6419  ;;  %v6450_v29 = vmul.f32 %v13622_v18, %v13753_v9  ;;  %v13907_v11 = vadd.f32 %v13703_v48, %v6672_v43  ;;  %v6674_v52 = vadd.f32 %v6642_v23, %v6478_v14  ;;  %v6072_v2 = vadd.f32 %v6040_v15, %v13734_v8  ;;  %v15844_v8 = vld [vmem:[#allocation288_spill] sm:$0xff] }
 0x934   : > { %v6286_v46 = vadd.f32 %v6254_v28, %v6090_v40  ;;  %v6094_v30 = vadd.f32 %v6062_v58, %v13712_v27  ;;  %v6430_v13 = vmul.f32 %v13622_v18, %v15842_v56  ;;  %v6288_v0 = vadd.f32 %v6256_v10, %v6092_v7  ;;  %v6592_v7 = vpop.permute.xlu0 %6591 }
 0x935   : > { %6766 = vmax.xlane.f32.xlu1 %v6765_v20  ;;  %v6096_v31 = vadd.f32 %v6064_v21, %v13719_v37  ;;  %v6236_v44 = vmul.f32 %v13592_v42, %v15843_v59  ;;  %v6644_v9 = vmul.f32 %v13636_v32, %v13808_v50  ;;  %v6266_v14 = vadd.f32 %v6234_v53, %v13776_v62  ;;  %v15845_v21 = vld [vmem:[#allocation280_spill] sm:$0xff] }
 0x936   : > { %v6290_v43 = vadd.f32 %v6258_v17, %v6094_v30  ;;  %v6237_v15 = vmul.f32 %v13592_v42, %v15844_v8  ;;  %v6452_v27 = vmul.f32 %v13622_v18, %v13783_v57  ;;  %v6482_v40 = vadd.f32 %v6450_v29, %v6286_v46  ;;  %v15846_v57 = vld [vmem:[#allocation281_spill] sm:$0xff]  ;;  %v15847_v29 = vld [vmem:[#allocation290_spill] sm:$0xff] }
 0x937   : > { %v6771_v37 = vsel %vm3414_vm4, %v13907_v11, -inf  ;;  %v13926_v58 = vadd.f32 %v13703_v48, %v6674_v52  ;;  %v6676_v10 = vadd.f32 %v6644_v9, %v6480_v6  ;;  %v6066_v50 = vmul.f32 %v13520_v41, %v15845_v21  ;;  %v15848_v30 = vld [vmem:[#allocation289_spill] sm:$0xff] }
 0x938   : > { %v6496_v28 = vpop.permute.xlu1 %6495  ;;  %v6462_v23 = vadd.f32 %v6430_v13, %v6266_v14  ;;  %v6432_v62 = vmul.f32 %v13622_v18, %v13479_v34  ;;  %v6260_v53 = vmul.f32 %v13592_v42, %v15846_v57  ;;  %v6268_v20 = vadd.f32 %v6236_v44, %v6072_v2  ;;  %v6600_v21 = vpop.permute.xlu0 %6599 }
 0x939   : > { %v6626_v17 = vmul.f32 %v13636_v32, %v6496_v28  ;;  %6772 = vmax.xlane.f32.xlu1 %v6771_v37  ;;  %v6239_v52 = vmul.f32 %v13592_v42, %v15847_v29  ;;  %v6646_v6 = vmul.f32 %v13636_v32, %v6576_v26  ;;  %v6269_v46 = vadd.f32 %v6237_v15, %v13791_v61 }
 0x93a   : > { %v6433_v56 = vmul.f32 %v13622_v18, %v15848_v30  ;;  %v6484_v13 = vadd.f32 %v6452_v27, %v6288_v0  ;;  %v6454_v59 = vmul.f32 %v13622_v18, %v13810_v39  ;;  %v6777_v14 = vsel %vm3414_vm4, %v13926_v58, -inf  ;;  %v15849_v27 = vld [vmem:[#allocation282_spill] sm:$0xff] }
 0x93b   : > { %v6658_v34 = vadd.f32 %v6626_v17, %v6462_v23  ;;  %v13946_v2 = vadd.f32 %v13703_v48, %v6676_v10  ;;  %v6678_v44 = vadd.f32 %v6646_v6, %v6482_v40  ;;  %v6464_v8 = vadd.f32 %v6432_v62, %v6268_v20  ;;  %v15850_v10 = vld [vmem:[#allocation291_spill] sm:$0xff]  ;;  %v15853_v30 = vld [vmem:[#allocation294_spill] sm:$0xff] }
 0x93c   : > { %v6504_v9 = vpop.permute.xlu1 %6503  ;;  %v6648_v26 = vmul.f32 %v13636_v32, %v6584_v49  ;;  %v6098_v15 = vadd.f32 %v6066_v50, %v13736_v16  ;;  %v6292_v39 = vadd.f32 %v6260_v53, %v6096_v31  ;;  %v6068_v28 = vmul.f32 %v13520_v41, %v15849_v27  ;;  %v15851_v53 = vld [vmem:[#allocation292_spill] sm:$0xff] }
 0x93d   : > { %v6628_v61 = vmul.f32 %v13636_v32, %v6504_v9  ;;  %6778 = vmax.xlane.f32.xlu1 %v6777_v14  ;;  %v13951_v0 = vadd.f32 %v13703_v48, %v6658_v34  ;;  %v6271_v37 = vadd.f32 %v6239_v52, %v13826_v45  ;;  %v6435_v40 = vmul.f32 %v13622_v18, %v15850_v10  ;;  %v15852_v52 = vld [vmem:[#allocation283_spill] sm:$0xff] }
 0x93e   : > { %v6680_v62 = vadd.f32 %v6648_v26, %v6484_v13  ;;  %v6486_v17 = vadd.f32 %v6454_v59, %v6290_v43  ;;  %v6456_v57 = vmul.f32 %v13622_v18, %v13838_v5  ;;  %v6783_v31 = vsel %vm3414_vm4, %v13946_v2, -inf }
 0x93f   : > { %v6660_v23 = vadd.f32 %v6628_v61, %v6464_v8  ;;  %v6729_v49 = vsel %vm3414_vm4, %v13951_v0, -inf  ;;  %v13966_v45 = vadd.f32 %v13703_v48, %v6678_v44  ;;  %v6465_v50 = vadd.f32 %v6433_v56, %v6269_v46  ;;  %v15854_v61 = vld [vmem:[#allocation293_spill] sm:$0xff] }
 0x940   : > { %v6508_v16 = vpop.permute.xlu1 %6507  ;;  %6730 = vmax.xlane.f32.xlu0 %v6729_v49  ;;  %v6241_v20 = vmul.f32 %v13592_v42, %v15851_v53  ;;  %v6100_v5 = vadd.f32 %v6068_v28, %v13771_v1  ;;  %v6262_v6 = vmul.f32 %v13592_v42, %v15852_v52  ;;  %v6243_v13 = vmul.f32 %v13592_v42, %v15853_v30  ;;  %v6608_v28 = vpop.permute.xlu0 %6607 }
 0x941   : > { %v6629_v29 = vmul.f32 %v13636_v32, %v6508_v16  ;;  %6784 = vmax.xlane.f32.xlu1 %v6783_v31  ;;  %v13972_v43 = vadd.f32 %v13703_v48, %v6660_v23  ;;  %v6650_v34 = vmul.f32 %v13636_v32, %v6592_v7  ;;  %v6467_v46 = vadd.f32 %v6435_v40, %v6271_v37 }
 0x942   : > { %v13983_v9 = vadd.f32 %v13703_v48, %v6680_v62  ;;  %v6488_v14 = vadd.f32 %v6456_v57, %v6292_v39  ;;  %v6458_v1 = vmul.f32 %v13622_v18, %v13873_v19  ;;  %v6789_v8 = vsel %vm3414_vm4, %v13966_v45, -inf  ;;  %v15855_v19 = vld [vmem:[#allocation285_spill] sm:$0xff]  ;;  %v15856_v62 = vld [vmem:[#allocation35_spill] sm:$0xff] }
 0x943   : > { %v6661_v56 = vadd.f32 %v6629_v29, %v6465_v50  ;;  %v6735_v59 = vsel %vm3414_vm4, %v13972_v43, -inf  ;;  %v6682_v26 = vadd.f32 %v6650_v34, %v6486_v17  ;;  %v6273_v7 = vadd.f32 %v6241_v20, %v13833_v33  ;;  %v15857_v20 = vld [vmem:[#allocation295_spill] sm:$0xff] }
 0x944   : > { %v6516_v44 = vpop.permute.xlu1 %6515  ;;  %6736 = vmax.xlane.f32.xlu0 %v6735_v59  ;;  %v6437_v27 = vmul.f32 %v13622_v18, %v15854_v61  ;;  %v6294_v10 = vadd.f32 %v6262_v6, %v6098_v15  ;;  %v6264_v40 = vmul.f32 %v13592_v42, %v15855_v19  ;;  %v6275_v23 = vadd.f32 %v6243_v13, %v13850_v51  ;;  %v15861_v19 = vld [vmem:[#allocation236_spill] sm:$0xff] }
 0x945   : > { %v6631_v37 = vmul.f32 %v13636_v32, %v6516_v44  ;;  %6790 = vmax.xlane.f32.xlu1 %v6789_v8  ;;  %v13994_v39 = vadd.f32 %v13703_v48, %v6661_v56  ;;  %v6652_v49 = vmul.f32 %v13636_v32, %v6600_v21  ;;  %v6439_v33 = vmul.f32 %v13622_v18, %v15856_v62  ;;  %v15858_v56 = vld [vmem:[#allocation297_spill] sm:$0xff] }
 0x946   : > { %v6795_v16 = vsel %vm3414_vm4, %v13983_v9, -inf  ;;  %v6490_v31 = vadd.f32 %v6458_v1, %v6294_v10  ;;  %v6460_v15 = vmul.f32 %v13622_v18, %v13900_v24  ;;  %v14009_v51 = vadd.f32 %v13703_v48, %v6682_v26 }
 0x947   : > { %v6663_v17 = vadd.f32 %v6631_v37, %v6467_v46  ;;  %v6738_v57 = vsel %vm3414_vm4, %v13994_v39, -inf  ;;  %v6684_v21 = vadd.f32 %v6652_v49, %v6488_v14  ;;  %v6469_v53 = vadd.f32 %v6437_v27, %v6273_v7  ;;  %v6616_v14 = vpop.permute.xlu0 %6615  ;;  %v15862_v49 = vld [vmem:[#allocation239_spill] sm:$0xff] }
 0x948   : > { %v6524_v50 = vpop.permute.xlu1 %6523  ;;  %6739 = vmax.xlane.f32.xlu0 %v6738_v57  ;;  %v6245_v29 = vmul.f32 %v13592_v42, %v15857_v20  ;;  %v6081_v30 = vadd.f32 %v13860_v4, %v13829_v12  ;;  %v6083_v24 = vadd.f32 %v13868_v36, %v13848_v38  ;;  %v6296_v13 = vadd.f32 %v6264_v40, %v6100_v5  ;;  %v15859_v5 = vld [vmem:[#allocation296_spill] sm:$0xff] }
 0x949   : > { %v6633_v52 = vmul.f32 %v13636_v32, %v6524_v50  ;;  %6796 = vmax.xlane.f32.xlu1 %v6795_v16  ;;  %v14015_v6 = vadd.f32 %v13703_v48, %v6663_v17  ;;  %v6654_v34 = vmul.f32 %v13636_v32, %v6608_v28  ;;  %v6471_v46 = vadd.f32 %v6439_v33, %v6275_v23  ;;  %v15860_v28 = vld [vmem:[#allocation181_spill] sm:$0xff]  ;;  %v15863_v16 = vld [vmem:[#allocation298_spill] sm:$0xff] }
 0x94a   : > { %v6247_v59 = vmul.f32 %v13592_v42, %v15858_v56  ;;  %v6492_v8 = vadd.f32 %v6460_v15, %v6296_v13  ;;  %v6801_v12 = vsel %vm3414_vm4, %v14009_v51, -inf  ;;  %v14029_v38 = vadd.f32 %v13703_v48, %v6684_v21  ;;  %v15866_v13 = vld [vmem:[#allocation119_spill] sm:$0xff] }
 0x94b   : > { %v6665_v1 = vadd.f32 %v6633_v52, %v6469_v53  ;;  %v6744_v44 = vsel %vm3414_vm4, %v14015_v6, -inf  ;;  %v6686_v4 = vadd.f32 %v6654_v34, %v6490_v31  ;;  %v6277_v36 = vadd.f32 %v6245_v29, %v6081_v30  ;;  %v15864_v53 = vld [vmem:[#allocation129_spill] sm:$0xff]  ;;  %v15865_v30 = vld [vmem:[#allocation174_spill] sm:$0xff] }
 0x94c   : > { %v6532_v26 = vpop.permute.xlu1 %6531  ;;  %6745 = vmax.xlane.f32.xlu0 %v6744_v44  ;;  %v6441_v7 = vmul.f32 %v13622_v18, %v15859_v5  ;;  %v5665_v37 = vmul.f32 %v13276_v55, %v15860_v28  ;;  %v5889_v10 = vadd.f32 %v13854_v3, %v13564_v47  ;;  %v5859_v40 = vmul.f32 %v13385_v60, %v15861_v19  ;;  %v15871_v19 = vld [vmem:[#allocation124_spill] sm:$0xff] }
 0x94d   : > { %v6635_v61 = vmul.f32 %v13636_v32, %v6532_v26  ;;  %6802 = vmax.xlane.f32.xlu1 %v6801_v12  ;;  %v14035_v27 = vadd.f32 %v13703_v48, %v6665_v1  ;;  %v6656_v23 = vmul.f32 %v13636_v32, %v6616_v14  ;;  %v6053_v62 = vmul.f32 %v13520_v41, %v15862_v49  ;;  %v15869_v1 = vld [vmem:[#allocation238_spill] sm:$0xff]  ;;  %v15872_v49 = vld [vmem:[#allocation144_spill] sm:$0xff] }
 0x94e   : > { %v6279_v33 = vadd.f32 %v6247_v59, %v6083_v24  ;;  %v6443_v31 = vmul.f32 %v13622_v18, %v15863_v16  ;;  %v6807_v47 = vsel %vm3414_vm4, %v14029_v38, -inf  ;;  %v14053_v3 = vadd.f32 %v13703_v48, %v6686_v4  ;;  %v15868_v59 = vld [vmem:[#allocation241_spill] sm:$0xff] }
 0x94f   : > { %v6667_v17 = vadd.f32 %v6635_v61, %v6471_v46  ;;  %v6750_v57 = vsel %vm3414_vm4, %v14035_v27, -inf  ;;  %v6688_v50 = vadd.f32 %v6656_v23, %v6492_v8  ;;  %v6473_v21 = vadd.f32 %v6441_v7, %v6277_v36  ;;  %v15867_v46 = vld [vmem:[#allocation135_spill] sm:$0xff]  ;;  %v15870_v36 = vld [vmem:[#allocation126_spill] sm:$0xff] }
 0x950   : > { %v6540_v15 = vpop.permute.xlu1 %6539  ;;  %6751 = vmax.xlane.f32.xlu0 %v6750_v57  ;;  %v6249_v20 = vmul.f32 %v13592_v42, %v15864_v53  ;;  %v5471_v24 = vmul.f32 %v13201_v22, %v15865_v30  ;;  %v5697_v34 = vadd.f32 %v5665_v37, %v15866_v13  ;;  %v5891_v56 = vadd.f32 %v5859_v40, %v15867_v46  ;;  %v15874_v57 = vld [vmem:[#allocation183_spill] sm:$0xff] }
 0x951   : > { %v6637_v29 = vmul.f32 %v13636_v32, %v6540_v15  ;;  %6808 = vmax.xlane.f32.xlu1 %v6807_v47  ;;  %v14059_v52 = vadd.f32 %v13703_v48, %v6667_v17  ;;  %v6055_v14 = vmul.f32 %v13520_v41, %v15868_v59  ;;  %v5861_v44 = vmul.f32 %v13385_v60, %v15869_v1  ;;  %v15875_v47 = vld [vmem:[#allocation243_spill] sm:$0xff]  ;;  %v15878_v59 = vld [vmem:[#allocation14_spill] sm:$0xff] }
 0x952   : > { %v6085_v8 = vadd.f32 %v6053_v62, %v5889_v10  ;;  %v6475_v4 = vadd.f32 %v6443_v31, %v6279_v33  ;;  %v6251_v5 = vmul.f32 %v13592_v42, %v15870_v36  ;;  %v6813_v61 = vsel %vm3414_vm4, %v14053_v3, -inf  ;;  %v15873_v33 = vld [vmem:[#allocation176_spill] sm:$0xff] }
 0x953   : > { %v6669_v26 = vadd.f32 %v6637_v29, %v6473_v21  ;;  %v6756_v12 = vsel %vm3414_vm4, %v14059_v52, -inf  ;;  %v14076_v28 = vadd.f32 %v13703_v48, %v6688_v50  ;;  %v6445_v10 = vmul.f32 %v13622_v18, %v15871_v19 }
 0x954   : > { %v6548_v7 = vpop.permute.xlu1 %6547  ;;  %6757 = vmax.xlane.f32.xlu0 %v6756_v12  ;;  %v6281_v37 = vadd.f32 %v6249_v20, %v6085_v8  ;;  %v5503_v62 = vadd.f32 %v5471_v24, %v15872_v49  ;;  %v5473_v17 = vmul.f32 %v13201_v22, %v15873_v33  ;;  %v5667_v16 = vmul.f32 %v13276_v55, %v15874_v57  ;;  %v15876_v20 = vld [vmem:[#allocation240_spill] sm:$0xff]  ;;  %v15877_v24 = vld [vmem:[#allocation139_spill] sm:$0xff]  ;;  %v15879_v8 = vld [vmem:[#allocation178_spill] sm:$0xff] }
 0x955   : > { %v6639_v40 = vmul.f32 %v13636_v32, %v6548_v7  ;;  %6814 = vmax.xlane.f32.xlu1 %v6813_v61  ;;  %v14082_v23 = vadd.f32 %v13703_v48, %v6669_v26  ;;  %v6087_v31 = vadd.f32 %v6055_v14, %v5891_v56  ;;  %v5893_v15 = vadd.f32 %v5861_v44, %v5697_v34  ;;  %v15882_v61 = vld [vmem:[#allocation146_spill] sm:$0xff] }
 0x956   : > { %v6057_v50 = vmul.f32 %v13520_v41, %v15875_v47  ;;  %v5863_v29 = vmul.f32 %v13385_v60, %v15876_v20  ;;  %v6447_v13 = vmul.f32 %v13622_v18, %v15877_v24  ;;  %v6819_v56 = vsel %vm3414_vm4, %v14076_v28, -inf  ;;  %v15883_v33 = vld [vmem:[#allocation242_spill] sm:$0xff]  ;;  %v15884_v47 = vld [vmem:[#allocation39_spill] sm:$0xff] }
 0x957   : > { %v6671_v21 = vadd.f32 %v6639_v40, %v6475_v4  ;;  %v6762_v53 = vsel %vm3414_vm4, %v14082_v23, -inf  ;;  %v6283_v30 = vadd.f32 %v6251_v5, %v6087_v31  ;;  %v6477_v34 = vadd.f32 %v6445_v10, %v6281_v37  ;;  %v15880_v4 = vld [vmem:[#allocation185_spill] sm:$0xff] }
 0x958   : > { %v6556_v46 = vpop.permute.xlu1 %6555  ;;  %6763 = vmax.xlane.f32.xlu0 %v6762_v53  ;;  %v6253_v14 = vmul.f32 %v13592_v42, %v15878_v59  ;;  %v5475_v26 = vmul.f32 %v13201_v22, %v15879_v8  ;;  %v5699_v12 = vadd.f32 %v5667_v16, %v5503_v62  ;;  %v5669_v36 = vmul.f32 %v13276_v55, %v15880_v4  ;;  %v15881_v5 = vld [vmem:[#allocation245_spill] sm:$0xff]  ;;  %v15889_v59 = vld [vmem:[#allocation247_spill] sm:$0xff]  ;;  %v15890_v4 = vld [vmem:[#allocation244_spill] sm:$0xff] }
 0x959   : > { %v6641_v1 = vmul.f32 %v13636_v32, %v6556_v46  ;;  %6820 = vmax.xlane.f32.xlu1 %v6819_v56  ;;  %v14103_v44 = vadd.f32 %v13703_v48, %v6671_v21  ;;  %v6059_v7 = vmul.f32 %v13520_v41, %v15881_v5  ;;  %v5505_v37 = vadd.f32 %v5473_v17, %v15882_v61  ;;  %v15885_v53 = vld [vmem:[#allocation133_spill] sm:$0xff]  ;;  %v15887_v46 = vld [vmem:[#allocation187_spill] sm:$0xff]  ;;  %v15888_v56 = vld [vmem:[#allocation180_spill] sm:$0xff] }
 0x95a   : > { %v6089_v19 = vadd.f32 %v6057_v50, %v5893_v15  ;;  %v5895_v49 = vadd.f32 %v5863_v29, %v5699_v12  ;;  %v5865_v57 = vmul.f32 %v13385_v60, %v15883_v33  ;;  %v6479_v31 = vadd.f32 %v6447_v13, %v6283_v30  ;;  %v15886_v50 = vld [vmem:[#allocation131_spill] sm:$0xff]  ;;  %v15893_v33 = vld [vmem:[#allocation182_spill] sm:$0xff] }
 0x95b   : > { %v6673_v10 = vadd.f32 %v6641_v1, %v6477_v34  ;;  %v6768_v40 = vsel %vm3414_vm4, %v14103_v44, -inf  ;;  %v6255_v62 = vmul.f32 %v13592_v42, %v15884_v47  ;;  %v6449_v20 = vmul.f32 %v13622_v18, %v15885_v53  ;;  %v15894_v47 = vld [vmem:[#allocation189_spill] sm:$0xff] }
 0x95c   : > { %v6564_v16 = vpop.permute.xlu1 %6563  ;;  %6769 = vmax.xlane.f32.xlu0 %v6768_v40  ;;  %v6285_v21 = vadd.f32 %v6253_v14, %v6089_v19  ;;  %v5507_v29 = vadd.f32 %v5475_v26, %v15886_v50  ;;  %v5701_v24 = vadd.f32 %v5669_v36, %v5505_v37  ;;  %v5671_v30 = vmul.f32 %v13276_v55, %v15887_v46  ;;  %v15891_v36 = vld [vmem:[#allocation13_spill] sm:$0xff]  ;;  %v15892_v19 = vld [vmem:[#allocation136_spill] sm:$0xff] }
 0x95d   : > { %v6643_v17 = vmul.f32 %v13636_v32, %v6564_v16  ;;  %v14122_v15 = vadd.f32 %v13703_v48, %v6673_v10  ;;  %v6091_v13 = vadd.f32 %v6059_v7, %v5895_v49  ;;  %v5477_v34 = vmul.f32 %v13201_v22, %v15888_v56  ;;  %v15895_v16 = vld [vmem:[#allocation249_spill] sm:$0xff] }
 0x95e   : > { %v6061_v14 = vmul.f32 %v13520_v41, %v15889_v59  ;;  %v5897_v12 = vadd.f32 %v5865_v57, %v5701_v24  ;;  %v5867_v5 = vmul.f32 %v13385_v60, %v15890_v4  ;;  %v6451_v61 = vmul.f32 %v13622_v18, %v15891_v36  ;;  %v15899_v4 = vld [vmem:[#allocation41_spill] sm:$0xff] }
 0x95f   : > { %v6675_v1 = vadd.f32 %v6643_v17, %v6479_v31  ;;  %v6774_v8 = vsel %vm3414_vm4, %v14122_v15, -inf  ;;  %v6287_v26 = vadd.f32 %v6255_v62, %v6091_v13  ;;  %v6481_v7 = vadd.f32 %v6449_v20, %v6285_v21  ;;  %v15896_v17 = vld [vmem:[#allocation134_spill] sm:$0xff] }
 0x960   : > { %v6572_v37 = vpop.permute.xlu1 %6571  ;;  %6775 = vmax.xlane.f32.xlu0 %v6774_v8  ;;  %v6257_v10 = vmul.f32 %v13592_v42, %v15892_v19  ;;  %v5479_v57 = vmul.f32 %v13201_v22, %v15893_v33  ;;  %v5703_v31 = vadd.f32 %v5671_v30, %v5507_v29  ;;  %v5673_v62 = vmul.f32 %v13276_v55, %v15894_v47  ;;  %v15897_v13 = vld [vmem:[#allocation246_spill] sm:$0xff]  ;;  %v15902_v19 = vld [vmem:[#allocation184_spill] sm:$0xff]  ;;  %v15903_v33 = vld [vmem:[#allocation251_spill] sm:$0xff] }
 0x961   : > { %v6645_v40 = vmul.f32 %v13636_v32, %v6572_v37  ;;  %v14141_v49 = vadd.f32 %v13703_v48, %v6675_v1  ;;  %v6063_v53 = vmul.f32 %v13520_v41, %v15895_v16  ;;  %v5509_v21 = vadd.f32 %v5477_v34, %v15896_v17  ;;  %v15898_v1 = vld [vmem:[#allocation19_spill] sm:$0xff]  ;;  %v15904_v17 = vld [vmem:[#allocation248_spill] sm:$0xff] }
 0x962   : > { %v6093_v20 = vadd.f32 %v6061_v14, %v5897_v12  ;;  %v5899_v46 = vadd.f32 %v5867_v5, %v5703_v31  ;;  %v5869_v56 = vmul.f32 %v13385_v60, %v15897_v13  ;;  %v6483_v59 = vadd.f32 %v6451_v61, %v6287_v26  ;;  %v15900_v12 = vld [vmem:[#allocation37_spill] sm:$0xff] }
 0x963   : > { %v6677_v50 = vadd.f32 %v6645_v40, %v6481_v7  ;;  %v6780_v24 = vsel %vm3414_vm4, %v14141_v49, -inf  ;;  %v6259_v29 = vmul.f32 %v13592_v42, %v15898_v1  ;;  %v6453_v36 = vmul.f32 %v13622_v18, %v15899_v4  ;;  %v15901_v7 = vld [vmem:[#allocation191_spill] sm:$0xff]  ;;  %v15909_v4 = vld [vmem:[#allocation101_spill] sm:$0xff] }
 0x964   : > { %v6580_v30 = vpop.permute.xlu1 %6579  ;;  %6781 = vmax.xlane.f32.xlu0 %v6780_v24  ;;  %v6289_v8 = vadd.f32 %v6257_v10, %v6093_v20  ;;  %v5511_v5 = vadd.f32 %v5479_v57, %v15900_v12  ;;  %v5705_v37 = vadd.f32 %v5673_v62, %v5509_v21  ;;  %v5675_v26 = vmul.f32 %v13276_v55, %v15901_v7  ;;  %v15905_v62 = vld [vmem:[#allocation20_spill] sm:$0xff]  ;;  %v15906_v24 = vld [vmem:[#allocation141_spill] sm:$0xff]  ;;  %v15910_v7 = vld [vmem:[#allocation250_spill] sm:$0xff] }
 0x965   : > { %v6647_v34 = vmul.f32 %v13636_v32, %v6580_v30  ;;  %v14160_v14 = vadd.f32 %v13703_v48, %v6677_v50  ;;  %v6095_v61 = vadd.f32 %v6063_v53, %v5899_v46  ;;  %v5481_v40 = vmul.f32 %v13201_v22, %v15902_v19  ;;  %v15908_v30 = vld [vmem:[#allocation253_spill] sm:$0xff] }
 0x966   : > { %v6065_v10 = vmul.f32 %v13520_v41, %v15903_v33  ;;  %v5901_v16 = vadd.f32 %v5869_v56, %v5705_v37  ;;  %v5871_v20 = vmul.f32 %v13385_v60, %v15904_v17  ;;  %v6455_v21 = vmul.f32 %v13622_v18, %v15905_v62  ;;  %v15907_v56 = vld [vmem:[#allocation193_spill] sm:$0xff]  ;;  %v15911_v33 = vld [vmem:[#allocation8_spill] sm:$0xff] }
 0x967   : > { %v6679_v31 = vadd.f32 %v6647_v34, %v6483_v59  ;;  %v6786_v47 = vsel %vm3414_vm4, %v14160_v14, -inf  ;;  %v6291_v57 = vadd.f32 %v6259_v29, %v6095_v61  ;;  %v6485_v53 = vadd.f32 %v6453_v36, %v6289_v8 }
 0x968   : > { %v6588_v50 = vpop.permute.xlu1 %6587  ;;  %6787 = vmax.xlane.f32.xlu0 %v6786_v47  ;;  %v6261_v22 = vmul.f32 %v13592_v42, %v15906_v24  ;;  %v5707_v59 = vadd.f32 %v5675_v26, %v5511_v5  ;;  %v5677_v1 = vmul.f32 %v13276_v55, %v15907_v56  ;;  %v6067_v29 = vmul.f32 %v13520_v41, %v15908_v30 }
 0x969   : > { %v6649_v46 = vmul.f32 %v13636_v32, %v6588_v50  ;;  %v14179_v13 = vadd.f32 %v13703_v48, %v6679_v31  ;;  %v5513_v34 = vadd.f32 %v5481_v40, %v15909_v4  ;;  %v6097_v12 = vadd.f32 %v6065_v10, %v5901_v16  ;;  %v15912_v31 = vld [vmem:[#allocation149_spill] sm:$0xff] }
 0x96a   : > { %v5903_v36 = vadd.f32 %v5871_v20, %v5707_v59  ;;  %v5873_v61 = vmul.f32 %v13385_v60, %v15910_v7  ;;  %v6487_v19 = vadd.f32 %v6455_v21, %v6291_v57  ;;  %v6263_v5 = vmul.f32 %v13592_v42, %v15911_v33  ;;  %v15913_v20 = vld [vmem:[#allocation255_spill] sm:$0xff]  ;;  %v15915_v59 = vld [vmem:[#allocation42_spill] sm:$0xff] }
 0x96b   : > { %v6681_v37 = vadd.f32 %v6649_v46, %v6485_v53  ;;  %v6792_v8 = vsel %vm3414_vm4, %v14179_v13, -inf  ;;  %v6293_v55 = vadd.f32 %v6261_v22, %v6097_v12  ;;  %v6457_v47 = vmul.f32 %v13622_v18, %v15912_v31  ;;  %v15914_v53 = vld [vmem:[#allocation118_spill] sm:$0xff] }
 0x96c   : > { %v6596_v26 = vpop.permute.xlu1 %6595  ;;  %6793 = vmax.xlane.f32.xlu0 %v6792_v8  ;;  %v5709_v16 = vadd.f32 %v5677_v1, %v5513_v34  ;;  %v6099_v17 = vadd.f32 %v6067_v29, %v5903_v36  ;;  %v6069_v60 = vmul.f32 %v13520_v41, %v15913_v20  ;;  %v6459_v24 = vmul.f32 %v13622_v18, %v15914_v53  ;;  %v15916_v8 = vld [vmem:[#allocation16_spill] sm:$0xff] }
 0x96d   : > { %v6651_v40 = vmul.f32 %v13636_v32, %v6596_v26  ;;  %v14196_v10 = vadd.f32 %v13703_v48, %v6681_v37  ;;  %v6489_v46 = vadd.f32 %v6457_v47, %v6293_v55  ;;  %v6265_v56 = vmul.f32 %v13592_v42, %v15915_v59 }
 0x96e   : > { %v5905_v21 = vadd.f32 %v5873_v61, %v5709_v16  ;;  %v6295_v50 = vadd.f32 %v6263_v5, %v6099_v17  ;;  %v6461_v36 = vmul.f32 %v13622_v18, %v15916_v8 }
 0x96f   : > { %v6683_v57 = vadd.f32 %v6651_v40, %v6487_v19  ;;  %v6798_v62 = vsel %vm3414_vm4, %v14196_v10, -inf }
 0x970   : > { %v6604_v22 = vpop.permute.xlu1 %6603  ;;  %6799 = vmax.xlane.f32.xlu0 %v6798_v62  ;;  %v6101_v41 = vadd.f32 %v6069_v60, %v5905_v21  ;;  %v6491_v34 = vadd.f32 %v6459_v24, %v6295_v50 }
 0x971   : > { %v6653_v1 = vmul.f32 %v13636_v32, %v6604_v22  ;;  %v14208_v30 = vadd.f32 %v13703_v48, %v6683_v57 }
 0x972   : > { %v6297_v37 = vadd.f32 %v6265_v56, %v6101_v41 }
 0x973   : > { %v6685_v29 = vadd.f32 %v6653_v1, %v6489_v46  ;;  %v6804_v4 = vsel %vm3414_vm4, %v14208_v30, -inf }
 0x974   : > { %v6612_v12 = vpop.permute.xlu1 %6611  ;;  %6805 = vmax.xlane.f32.xlu0 %v6804_v4  ;;  %v6493_v5 = vadd.f32 %v6461_v36, %v6297_v37 }
 0x975   : > { %v6655_v7 = vmul.f32 %v13636_v32, %v6612_v12  ;;  %v14216_v42 = vadd.f32 %v13703_v48, %v6685_v29 }
 0x977   : > { %v6687_v61 = vadd.f32 %v6655_v7, %v6491_v34  ;;  %v6810_v19 = vsel %vm3414_vm4, %v14216_v42, -inf  ;;  %v15917_v7 = vld [vmem:[#allocation21_spill] sm:$0xff] }
 0x978   : > { %v6620_v33 = vpop.permute.xlu1 %6619  ;;  %6811 = vmax.xlane.f32.xlu0 %v6810_v19 }
 0x979   : > { %v6657_v26 = vmul.f32 %v13636_v32, %v6620_v33  ;;  %v14222_v55 = vadd.f32 %v13703_v48, %v6687_v61 }
 0x97b   : > { %v6689_v31 = vadd.f32 %v6657_v26, %v6493_v5  ;;  %v6816_v18 = vsel %vm3414_vm4, %v14222_v55, -inf  ;;  %v15918_v26 = vld [vmem:[#allocation22_spill] sm:$0xff] }
 0x97c   : > { %6817 = vmax.xlane.f32.xlu0 %v6816_v18 }
 0x97d   : > { %v14227_v47 = vadd.f32 %v13703_v48, %v6689_v31 }
 0x97f   : > { %v6822_v40 = vsel %vm3414_vm4, %v14227_v47, -inf }
 0x980   : > { %6823 = vmax.xlane.f32.xlu0 %v6822_v40 }
 0x9aa   : > { %v6734_v16 = vpop.xlane.xlu1 %6733 }
 0x9ab   : > { %v6826_v17 = vsub.f32 %v13728_v54, %v6734_v16 }
 0x9ad   : > { %v6859_v20 = vmul.f32 1.442695, %v6826_v17 }
 0x9ae   : > { %v6743_v32 = vpop.xlane.xlu1 %6742 }
 0x9af   : > { %8621 = vpow2.f32 %v6859_v20  ;;  %v6829_v22 = vsub.f32 %v13760_v25, %v6743_v32 }
 0x9b1   : > { %v6865_v1 = vmul.f32 1.442695, %v6829_v22 }
 0x9b2   : > { %v6749_v60 = vpop.xlane.xlu1 %6748 }
 0x9b3   : > { %v6831_v41 = vsub.f32 %v13788_v63, %v6749_v60 }
 0x9b5   : > { %v6869_v37 = vmul.f32 1.442695, %v6831_v41 }
 0x9b6   : > { %v6755_v57 = vpop.xlane.xlu1 %6754 }
 0x9ba   : > { %v6761_v48 = vpop.xlane.xlu1 %6760 }
 0x9bb   : > { %v6835_v61 = vsub.f32 %v15917_v7, %v6761_v48 }
 0x9bc   : > { %v14232_v62 = vpop.eup %8621 }
 0x9bd   : > { %v6924_v21 = vsel %vm3414_vm4, %v14232_v62, 0.0 }
 0x9be   : > { %6925 = vadd.xlane.f32.xlu0 %v6924_v21  ;;  %v6767_v50 = vpop.xlane.xlu1 %6766 }
 0x9bf   : > { %v6837_v31 = vsub.f32 %v15918_v26, %v6767_v50 }
 0x9c1   : > { %v6881_v20 = vmul.f32 1.442695, %v6837_v31 }
 0x9c2   : > { %v6773_v54 = vpop.xlane.xlu1 %6772 }
 0x9c6   : > { %v6779_v12 = vpop.xlane.xlu1 %6778 }
 0x9c9   : > { %v6731_v53 = vpop.xlane.xlu0 %6730 }
 0x9ca   : > { %v6825_v24 = vsub.f32 %v13951_v0, %v6731_v53  ;;  %v6833_v0 = vsub.f32 %v13817_v35, %v6755_v57  ;;  %v6785_v19 = vpop.xlane.xlu1 %6784  ;;  %v6877_v35 = vmul.f32 1.442695, %v6835_v61 }
 0x9cb   : > { %v6843_v41 = vsub.f32 %v13946_v2, %v6785_v19 }
 0x9cc   : > { %v6857_v46 = vmul.f32 1.442695, %v6825_v24  ;;  %v6841_v24 = vsub.f32 %v13926_v58, %v6779_v12 }
 0x9cd   : > { %v6737_v59 = vpop.xlane.xlu0 %6736 }
 0x9ce   : > { %8623 = vpow2.f32 %v6857_v46  ;;  %v6827_v56 = vsub.f32 %v13972_v43, %v6737_v59  ;;  %v6873_v43 = vmul.f32 1.442695, %v6833_v0  ;;  %v6791_v32 = vpop.xlane.xlu1 %6790  ;;  %v6889_v58 = vmul.f32 1.442695, %v6841_v24 }
 0x9cf   : > { %v6845_v2 = vsub.f32 %v13966_v45, %v6791_v32 }
 0x9d0   : > { %v6861_v29 = vmul.f32 1.442695, %v6827_v56 }
 0x9d1   : > { %v6740_v4 = vpop.xlane.xlu0 %6739  ;;  %v6897_v45 = vmul.f32 1.442695, %v6845_v2 }
 0x9d2   : > { %8625 = vpow2.f32 %v6861_v29  ;;  %v6828_v34 = vsub.f32 %v13994_v39, %v6740_v4  ;;  %v6797_v59 = vpop.xlane.xlu1 %6796 }
 0x9d3   : > { %8627 = vpow2.f32 %v6865_v1 }
 0x9d4   : > { %v6863_v25 = vmul.f32 1.442695, %v6828_v34 }
 0x9d5   : > { %v6746_v8 = vpop.xlane.xlu0 %6745 }
 0x9d6   : > { %8629 = vpow2.f32 %v6863_v25  ;;  %v6830_v36 = vsub.f32 %v14015_v6, %v6746_v8  ;;  %v6893_v25 = vmul.f32 1.442695, %v6843_v41  ;;  %v6803_v8 = vpop.xlane.xlu1 %6802 }
 0x9d7   : > { %8631 = vpow2.f32 %v6869_v37 }
 0x9d8   : > { %v6867_v63 = vmul.f32 1.442695, %v6830_v36 }
 0x9d9   : > { %v6752_v33 = vpop.xlane.xlu0 %6751 }
 0x9da   : > { %8633 = vpow2.f32 %v6867_v63  ;;  %v6832_v39 = vsub.f32 %v14035_v27, %v6752_v33  ;;  %v6839_v27 = vsub.f32 %v13907_v11, %v6773_v54 }
 0x9db   : > { %v14245_v5 = vpop.eup %8623  ;;  %8635 = vpow2.f32 %v6873_v43 }
 0x9dc   : > { %v6871_v18 = vmul.f32 1.442695, %v6832_v39  ;;  %v6921_v6 = vsel %vm3414_vm4, %v14245_v5, 0.0  ;;  %v6847_v39 = vsub.f32 %v13983_v9, %v6797_v59 }
 0x9dd   : > { %6922 = vadd.xlane.f32.xlu1 %v6921_v6  ;;  %v6758_v40 = vpop.xlane.xlu0 %6757 }
 0x9de   : > { %8637 = vpow2.f32 %v6871_v18  ;;  %v6834_v16 = vsub.f32 %v14059_v52, %v6758_v40  ;;  %v6885_v52 = vmul.f32 1.442695, %v6839_v27  ;;  %v6809_v18 = vpop.xlane.xlu1 %6808  ;;  %v6849_v27 = vsub.f32 %v14009_v51, %v6803_v8 }
 0x9df   : > { %v14251_v17 = vpop.eup %8625  ;;  %8639 = vpow2.f32 %v6877_v35 }
 0x9e0   : > { %v6875_v60 = vmul.f32 1.442695, %v6834_v16  ;;  %v6927_v57 = vsel %vm3414_vm4, %v14251_v17, 0.0  ;;  %v14256_v21 = vpop.eup %8627  ;;  %v6905_v51 = vmul.f32 1.442695, %v6849_v27 }
 0x9e1   : > { %6928 = vadd.xlane.f32.xlu1 %v6927_v57  ;;  %v6764_v48 = vpop.xlane.xlu0 %6763  ;;  %v6933_v22 = vsel %vm3414_vm4, %v14256_v21, 0.0 }
 0x9e2   : > { %8641 = vpow2.f32 %v6875_v60  ;;  %v6836_v50 = vsub.f32 %v14082_v23, %v6764_v48 }
 0x9e3   : > { %v14259_v53 = vpop.eup %8629  ;;  %8643 = vpow2.f32 %v6881_v20  ;;  %v6901_v20 = vmul.f32 1.442695, %v6847_v39 }
 0x9e4   : > { %v6879_v11 = vmul.f32 1.442695, %v6836_v50  ;;  %v6930_v46 = vsel %vm3414_vm4, %v14259_v53, 0.0  ;;  %v14266_v54 = vpop.eup %8631  ;;  %v6851_v50 = vsub.f32 %v14029_v38, %v6809_v18 }
 0x9e5   : > { %6934 = vadd.xlane.f32.xlu1 %v6933_v22  ;;  %6931 = vadd.xlane.f32.xlu0 %v6930_v46  ;;  %v6770_v56 = vpop.xlane.xlu0 %6769  ;;  %v6939_v4 = vsel %vm3414_vm4, %v14266_v54, 0.0 }
 0x9e6   : > { %8645 = vpow2.f32 %v6879_v11  ;;  %v6838_v23 = vsub.f32 %v14103_v44, %v6770_v56  ;;  %v6909_v38 = vmul.f32 1.442695, %v6851_v50 }
 0x9e7   : > { %v14269_v1 = vpop.eup %8633  ;;  %8647 = vpow2.f32 %v6885_v52  ;;  %v6815_v52 = vpop.xlane.xlu1 %6814 }
 0x9e8   : > { %v6883_v29 = vmul.f32 1.442695, %v6838_v23  ;;  %v6936_v34 = vsel %vm3414_vm4, %v14269_v1, 0.0  ;;  %v14276_v12 = vpop.eup %8635  ;;  %v6853_v41 = vsub.f32 %v14053_v3, %v6815_v52 }
 0x9e9   : > { %6940 = vadd.xlane.f32.xlu1 %v6939_v4  ;;  %6937 = vadd.xlane.f32.xlu0 %v6936_v34  ;;  %v6776_v37 = vpop.xlane.xlu0 %6775  ;;  %v6945_v43 = vsel %vm3414_vm4, %v14276_v12, 0.0 }
 0x9ea   : > { %8649 = vpow2.f32 %v6883_v29  ;;  %v6840_v44 = vsub.f32 %v14122_v15, %v6776_v37  ;;  %v6913_v3 = vmul.f32 1.442695, %v6853_v41 }
 0x9eb   : > { %v14279_v0 = vpop.eup %8637  ;;  %8651 = vpow2.f32 %v6889_v58  ;;  %v6821_v34 = vpop.xlane.xlu1 %6820 }
 0x9ec   : > { %v6887_v36 = vmul.f32 1.442695, %v6840_v44  ;;  %v6942_v7 = vsel %vm3414_vm4, %v14279_v0, 0.0  ;;  %v14286_v61 = vpop.eup %8639  ;;  %v6855_v8 = vsub.f32 %v14076_v28, %v6821_v34  ;;  %v15920_v34 = vld [vmem:[#allocation58_spill] sm:$0xff] }
 0x9ed   : > { %6946 = vadd.xlane.f32.xlu1 %v6945_v43  ;;  %6943 = vadd.xlane.f32.xlu0 %v6942_v7  ;;  %v6782_v63 = vpop.xlane.xlu0 %6781  ;;  %v6951_v31 = vsel %vm3414_vm4, %v14286_v61, 0.0 }
 0x9ee   : > { %8653 = vpow2.f32 %v6887_v36  ;;  %v6842_v15 = vsub.f32 %v14141_v49, %v6782_v63 }
 0x9ef   : > { %v14289_v19 = vpop.eup %8641  ;;  %8655 = vpow2.f32 %v6893_v25 }
 0x9f0   : > { %v14291_v33 = vpop.eup %8643  ;;  %v6891_v26 = vmul.f32 1.442695, %v6842_v15  ;;  %v6948_v35 = vsel %vm3414_vm4, %v14289_v19, 0.0 }
 0x9f1   : > { %6952 = vadd.xlane.f32.xlu1 %v6951_v31  ;;  %6949 = vadd.xlane.f32.xlu0 %v6948_v35  ;;  %v6788_v6 = vpop.xlane.xlu0 %6787  ;;  %v6957_v9 = vsel %vm3414_vm4, %v14291_v33, 0.0 }
 0x9f2   : > { %8657 = vpow2.f32 %v6891_v26  ;;  %v6844_v49 = vsub.f32 %v14160_v14, %v6788_v6 }
 0x9f3   : > { %v14299_v40 = vpop.eup %8645  ;;  %8659 = vpow2.f32 %v6897_v45  ;;  %v6917_v45 = vmul.f32 1.442695, %v6855_v8  ;;  %v15925_v8 = vld [vmem:[#allocation61_spill] sm:$0xff] }
 0x9f4   : > { %v14303_v16 = vpop.eup %8647  ;;  %v6895_v32 = vmul.f32 1.442695, %v6844_v49  ;;  %v6954_v60 = vsel %vm3414_vm4, %v14299_v40, 0.0 }
 0x9f5   : > { %6958 = vadd.xlane.f32.xlu1 %v6957_v9  ;;  %6955 = vadd.xlane.f32.xlu0 %v6954_v60  ;;  %v6794_v57 = vpop.xlane.xlu0 %6793  ;;  %v6963_v24 = vsel %vm3414_vm4, %v14303_v16, 0.0 }
 0x9f6   : > { %8661 = vpow2.f32 %v6895_v32  ;;  %v6846_v14 = vsub.f32 %v14179_v13, %v6794_v57 }
 0x9f7   : > { %v14309_v48 = vpop.eup %8649  ;;  %8663 = vpow2.f32 %v6901_v20 }
 0x9f8   : > { %v14314_v11 = vpop.eup %8651  ;;  %v6899_v22 = vmul.f32 1.442695, %v6846_v14  ;;  %v6960_v46 = vsel %vm3414_vm4, %v14309_v48, 0.0 }
 0x9f9   : > { %6964 = vadd.xlane.f32.xlu1 %v6963_v24  ;;  %6961 = vadd.xlane.f32.xlu0 %v6960_v46  ;;  %v6800_v59 = vpop.xlane.xlu0 %6799  ;;  %v6969_v23 = vsel %vm3414_vm4, %v14314_v11, 0.0 }
 0x9fa   : > { %8665 = vpow2.f32 %v6899_v22  ;;  %v6848_v13 = vsub.f32 %v14196_v10, %v6800_v59 }
 0x9fb   : > { %v14319_v56 = vpop.eup %8653  ;;  %8667 = vpow2.f32 %v6905_v51 }
 0x9fc   : > { %v14323_v58 = vpop.eup %8655  ;;  %v6903_v29 = vmul.f32 1.442695, %v6848_v13  ;;  %v6966_v4 = vsel %vm3414_vm4, %v14319_v56, 0.0 }
 0x9fd   : > { %6970 = vadd.xlane.f32.xlu1 %v6969_v23  ;;  %6967 = vadd.xlane.f32.xlu0 %v6966_v4  ;;  %v6806_v37 = vpop.xlane.xlu0 %6805  ;;  %v6975_v25 = vsel %vm3414_vm4, %v14323_v58, 0.0  ;;  %v15919_v4 = vld [vmem:[#allocation56_spill] sm:$0xff] }
 0x9fe   : > { %8669 = vpow2.f32 %v6903_v29  ;;  %v6850_v10 = vsub.f32 %v14208_v30, %v6806_v37  ;;  %v15921_v37 = vld [vmem:[#allocation57_spill] sm:$0xff] }
 0x9ff   : > { %v14329_v44 = vpop.eup %8657  ;;  %8671 = vpow2.f32 %v6909_v38 }
 0xa00   : > { %v14333_v2 = vpop.eup %8659  ;;  %v6907_v36 = vmul.f32 1.442695, %v6850_v10  ;;  %v6972_v43 = vsel %vm3414_vm4, %v14329_v44, 0.0  ;;  %v15922_v10 = vld [vmem:[#allocation55_spill] sm:$0xff] }
 0xa01   : > { %6976 = vadd.xlane.f32.xlu1 %v6975_v25  ;;  %6973 = vadd.xlane.f32.xlu0 %v6972_v43  ;;  %v6812_v7 = vpop.xlane.xlu0 %6811  ;;  %v6981_v15 = vsel %vm3414_vm4, %v14333_v2, 0.0  ;;  %v15923_v25 = vld [vmem:[#allocation59_spill] sm:$0xff] }
 0xa02   : > { %8673 = vpow2.f32 %v6907_v36  ;;  %v6852_v30 = vsub.f32 %v14216_v42, %v6812_v7  ;;  %v15926_v36 = vld [vmem:[#allocation62_spill] sm:$0xff]  ;;  %v15927_v43 = vld [vmem:[#allocation63_spill] sm:$0xff]  ;;  %v15928_v7 = vld [vmem:[#allocation64_spill] sm:$0xff] }
 0xa03   : > { %v14339_v63 = vpop.eup %8661  ;;  %8675 = vpow2.f32 %v6913_v3  ;;  %v15924_v3 = vld [vmem:[#allocation60_spill] sm:$0xff] }
 0xa04   : > { %v6911_v39 = vmul.f32 1.442695, %v6852_v30  ;;  %v6978_v28 = vsel %vm3414_vm4, %v14339_v63, 0.0  ;;  %v14345_v26 = vpop.eup %8663  ;;  %v15929_v30 = vld [vmem:[#allocation65_spill] sm:$0xff] }
 0xa05   : > { %6982 = vadd.xlane.f32.xlu1 %v6981_v15  ;;  %6979 = vadd.xlane.f32.xlu0 %v6978_v28  ;;  %v6818_v31 = vpop.xlane.xlu0 %6817  ;;  %v6987_v6 = vsel %vm3414_vm4, %v14345_v26, 0.0  ;;  %v15930_v15 = vld [vmem:[#allocation66_spill] sm:$0xff]  ;;  %v15933_v28 = vld [vmem:[#allocation69_spill] sm:$0xff] }
 0xa06   : > { %8677 = vpow2.f32 %v6911_v39  ;;  %v6854_v35 = vsub.f32 %v14222_v55, %v6818_v31  ;;  %v15932_v39 = vld [vmem:[#allocation68_spill] sm:$0xff]  ;;  %v15934_v31 = vld [vmem:[#allocation70_spill] sm:$0xff] }
 0xa07   : > { %v14348_v42 = vpop.eup %8665  ;;  %8679 = vpow2.f32 %v6917_v45  ;;  %v15931_v45 = vld [vmem:[#allocation67_spill] sm:$0xff] }
 0xa08   : > { %v6915_v18 = vmul.f32 1.442695, %v6854_v35  ;;  %v6984_v49 = vsel %vm3414_vm4, %v14348_v42, 0.0  ;;  %v14354_v9 = vpop.eup %8667  ;;  %v15935_v35 = vld [vmem:[#allocation71_spill] sm:$0xff] }
 0xa09   : > { %6988 = vadd.xlane.f32.xlu1 %v6987_v6  ;;  %6985 = vadd.xlane.f32.xlu0 %v6984_v49  ;;  %v6824_v20 = vpop.xlane.xlu0 %6823  ;;  %v6993_v57 = vsel %vm3414_vm4, %v14354_v9, 0.0  ;;  %v15937_v6 = vld [vmem:[#allocation73_spill] sm:$0xff]  ;;  %v15938_v49 = vld [vmem:[#allocation74_spill] sm:$0xff] }
 0xa0a   : > { %8681 = vpow2.f32 %v6915_v18  ;;  %v6856_v27 = vsub.f32 %v14227_v47, %v6824_v20  ;;  %v15936_v18 = vld [vmem:[#allocation72_spill] sm:$0xff]  ;;  %v15939_v20 = vld [vmem:[#allocation75_spill] sm:$0xff] }
 0xa0b   : > { %v14357_v32 = vpop.eup %8669 }
 0xa0c   : > { %v14359_v55 = vpop.eup %8671  ;;  %v6919_v60 = vmul.f32 1.442695, %v6856_v27  ;;  %v6990_v14 = vsel %vm3414_vm4, %v14357_v32, 0.0  ;;  %v15940_v27 = vld [vmem:[#allocation76_spill] sm:$0xff] }
 0xa0d   : > { %6994 = vadd.xlane.f32.xlu1 %v6993_v57  ;;  %6991 = vadd.xlane.f32.xlu0 %v6990_v14  ;;  %v6999_v52 = vsel %vm3414_vm4, %v14359_v55, 0.0  ;;  %v15941_v57 = vld [vmem:[#allocation77_spill] sm:$0xff]  ;;  %v15942_v14 = vld [vmem:[#allocation78_spill] sm:$0xff] }
 0xa0e   : > { %8683 = vpow2.f32 %v6919_v60 }
 0xa0f   : > { %v14365_v50 = vpop.eup %8673 }
 0xa10   : > { %v6996_v47 = vsel %vm3414_vm4, %v14365_v50, 0.0  ;;  %v14371_v24 = vpop.eup %8675 }
 0xa11   : > { %7000 = vadd.xlane.f32.xlu1 %v6999_v52  ;;  %6997 = vadd.xlane.f32.xlu0 %v6996_v47  ;;  %v7005_v22 = vsel %vm3414_vm4, %v14371_v24, 0.0  ;;  %v15943_v52 = vld [vmem:[#allocation79_spill] sm:$0xff]  ;;  %v15944_v47 = vld [vmem:[#allocation80_spill] sm:$0xff] }
 0xa13   : > { %v14373_v51 = vpop.eup %8677 }
 0xa14   : > { %v7002_v46 = vsel %vm3414_vm4, %v14373_v51, 0.0  ;;  %v14379_v59 = vpop.eup %8679 }
 0xa15   : > { %7006 = vadd.xlane.f32.xlu1 %v7005_v22  ;;  %7003 = vadd.xlane.f32.xlu0 %v7002_v46  ;;  %v7011_v38 = vsel %vm3414_vm4, %v14379_v59, 0.0  ;;  %v15945_v22 = vld [vmem:[#allocation81_spill] sm:$0xff]  ;;  %v15946_v46 = vld [vmem:[#allocation82_spill] sm:$0xff] }
 0xa17   : > { %v14381_v13 = vpop.eup %8681 }
 0xa18   : > { %v7008_v23 = vsel %vm3414_vm4, %v14381_v13, 0.0 }
 0xa19   : > { %7012 = vadd.xlane.f32.xlu1 %v7011_v38  ;;  %7009 = vadd.xlane.f32.xlu0 %v7008_v23  ;;  %v15947_v23 = vld [vmem:[#allocation86_spill] sm:$0xff] }
 0xa1b   : > { %v14387_v41 = vpop.eup %8683 }
 0xa1c   : > { %v7014_v29 = vsel %vm3414_vm4, %v14387_v41, 0.0  ;;  %vm7337_vm4 = vcmask 48128  }
 0xa1d   : > { %7015 = vadd.xlane.f32.xlu0 %v7014_v29  ;;  %v15948_v29 = vld [vmem:[#allocation88_spill] sm:$0xff] }
 0xa2a   : > { %7113 = vrot.lane.b32.xlu1 %v15919_v4, %s8803_s17 }
 0xa2e   : > { %7117 = vrot.lane.b32.xlu1 %v15920_v34, %s8803_s17  ;;  %v15949_v34 = vld [vmem:[#allocation96_spill] sm:$0xff] }
 0xa32   : > { %7119 = vrot.lane.b32.xlu1 %v15921_v37, %s8803_s17 }
 0xa33   : > { %7115 = vrot.lane.b32.xlu0 %v15922_v10, %s8803_s17  ;;  %v15950_v10 = vld [vmem:[#allocation97_spill] sm:$0xff] }
 0xa36   : > { %7123 = vrot.lane.b32.xlu1 %v15923_v25, %s8803_s17 }
 0xa37   : > { %7121 = vrot.lane.b32.xlu0 %v15924_v3, %s8803_s17 }
 0xa3a   : > { %7127 = vrot.lane.b32.xlu1 %v15925_v8, %s8803_s17 }
 0xa3b   : > { %7125 = vrot.lane.b32.xlu0 %v15926_v36, %s8803_s17 }
 0xa3e   : > { %7131 = vrot.lane.b32.xlu1 %v15927_v43, %s8803_s17 }
 0xa3f   : > { %7129 = vrot.lane.b32.xlu0 %v15928_v7, %s8803_s17 }
 0xa42   : > { %7135 = vrot.lane.b32.xlu1 %v15929_v30, %s8803_s17 }
 0xa43   : > { %7133 = vrot.lane.b32.xlu0 %v15930_v15, %s8803_s17 }
 0xa46   : > { %7139 = vrot.lane.b32.xlu1 %v15931_v45, %s8803_s17 }
 0xa47   : > { %7137 = vrot.lane.b32.xlu0 %v15932_v39, %s8803_s17  ;;  %v6926_v60 = vpop.xlane.xlu0 %6925 }
 0xa48   : > { %8685 = vrcp.f32 %v6926_v60 }
 0xa4a   : > { %7143 = vrot.lane.b32.xlu1 %v15933_v28, %s8803_s17 }
 0xa4b   : > { %7141 = vrot.lane.b32.xlu0 %v15934_v31, %s8803_s17 }
 0xa4e   : > { %7147 = vrot.lane.b32.xlu1 %v15935_v35, %s8803_s17 }
 0xa4f   : > { %7145 = vrot.lane.b32.xlu0 %v15936_v18, %s8803_s17 }
 0xa52   : > { %7151 = vrot.lane.b32.xlu1 %v15937_v6, %s8803_s17 }
 0xa53   : > { %7149 = vrot.lane.b32.xlu0 %v15938_v49, %s8803_s17 }
 0xa55   : > { %v8686_v4 = vpop.eup %8685 }
 0xa56   : > { %7155 = vrot.lane.b32.xlu1 %v15939_v20, %s8803_s17  ;;  %v7050_v25 = vmul.f32 %v8686_v4, %v14232_v62 }
 0xa57   : > { %7153 = vrot.lane.b32.xlu0 %v15940_v27, %s8803_s17 }
 0xa5a   : > { %7159 = vrot.lane.b32.xlu1 %v15941_v57, %s8803_s17 }
 0xa5b   : > { %7157 = vrot.lane.b32.xlu0 %v15942_v14, %s8803_s17 }
 0xa5e   : > { %7163 = vrot.lane.b32.xlu1 %v15943_v52, %s8803_s17 }
 0xa5f   : > { %7161 = vrot.lane.b32.xlu0 %v15944_v47, %s8803_s17 }
 0xa62   : > { %7167 = vrot.lane.b32.xlu1 %v15945_v22, %s8803_s17 }
 0xa63   : > { %7165 = vrot.lane.b32.xlu0 %v15946_v46, %s8803_s17 }
 0xa66   : > { %v6923_v38 = vpop.xlane.xlu1 %6922  ;;  %7171 = vrot.lane.b32.xlu1 %v15947_v23, %s8803_s17 }
 0xa67   : > { %8687 = vrcp.f32 %v6923_v38  ;;  %7169 = vrot.lane.b32.xlu0 %v15948_v29, %s8803_s17 }
 0xa6a   : > { %7175 = vrot.lane.b32.xlu1 %v15949_v34, %s8803_s17  ;;  %v6929_v37 = vpop.xlane.xlu1 %6928 }
 0xa6b   : > { %8689 = vrcp.f32 %v6929_v37  ;;  %7173 = vrot.lane.b32.xlu0 %v15950_v10, %s8803_s17 }
 0xa6e   : > { %v6935_v3 = vpop.xlane.xlu1 %6934  ;;  %7243 = vrot.lane.b32.xlu1 %v7050_v25, %s8804_s18  ;;  %v6932_v8 = vpop.xlane.xlu0 %6931 }
 0xa6f   : > { %8691 = vrcp.f32 %v6935_v3 }
 0xa70   : > { %8693 = vrcp.f32 %v6932_v8 }
 0xa72   : > { %v6941_v36 = vpop.xlane.xlu1 %6940  ;;  %v6938_v43 = vpop.xlane.xlu0 %6937 }
 0xa73   : > { %8695 = vrcp.f32 %v6941_v36 }
 0xa74   : > { %v8688_v7 = vpop.eup %8687  ;;  %8697 = vrcp.f32 %v6938_v43 }
 0xa75   : > { %v7049_v30 = vmul.f32 %v8688_v7, %v14245_v5 }
 0xa76   : > { %v6947_v15 = vpop.xlane.xlu1 %6946  ;;  %v6944_v45 = vpop.xlane.xlu0 %6943 }
 0xa77   : > { %8699 = vrcp.f32 %v6947_v15  ;;  %7241 = vrot.lane.b32.xlu0 %v7049_v30, %s8804_s18 }
 0xa78   : > { %v8690_v62 = vpop.eup %8689  ;;  %8701 = vrcp.f32 %v6944_v45 }
 0xa79   : > { %v7051_v39 = vmul.f32 %v8690_v62, %v14251_v17 }
 0xa7a   : > { %v6953_v28 = vpop.xlane.xlu1 %6952  ;;  %v6950_v31 = vpop.xlane.xlu0 %6949 }
 0xa7b   : > { %8703 = vrcp.f32 %v6953_v28  ;;  %7245 = vrot.lane.b32.xlu0 %v7051_v39, %s8804_s18 }
 0xa7c   : > { %v8692_v35 = vpop.eup %8691  ;;  %8705 = vrcp.f32 %v6950_v31 }
 0xa7d   : > { %v8694_v18 = vpop.eup %8693  ;;  %v7053_v6 = vmul.f32 %v8692_v35, %v14256_v21 }
 0xa7e   : > { %v6959_v5 = vpop.xlane.xlu1 %6958  ;;  %v6956_v49 = vpop.xlane.xlu0 %6955  ;;  %v7052_v20 = vmul.f32 %v8694_v18, %v14259_v53 }
 0xa7f   : > { %8707 = vrcp.f32 %v6959_v5  ;;  %7249 = vrot.lane.b32.xlu0 %v7053_v6, %s8804_s18 }
 0xa80   : > { %v8696_v27 = vpop.eup %8695  ;;  %8709 = vrcp.f32 %v6956_v49  ;;  %7247 = vrot.lane.b32.xlu1 %v7052_v20, %s8804_s18 }
 0xa81   : > { %v8698_v17 = vpop.eup %8697  ;;  %v7055_v60 = vmul.f32 %v8696_v27, %v14266_v54 }
 0xa82   : > { %v6965_v57 = vpop.xlane.xlu1 %6964  ;;  %v6962_v14 = vpop.xlane.xlu0 %6961  ;;  %v7054_v52 = vmul.f32 %v8698_v17, %v14269_v1 }
 0xa83   : > { %8711 = vrcp.f32 %v6965_v57  ;;  %7253 = vrot.lane.b32.xlu0 %v7055_v60, %s8804_s18 }
 0xa84   : > { %v8700_v21 = vpop.eup %8699  ;;  %8713 = vrcp.f32 %v6962_v14  ;;  %7251 = vrot.lane.b32.xlu1 %v7054_v52, %s8804_s18 }
 0xa85   : > { %v8702_v53 = vpop.eup %8701  ;;  %v7057_v47 = vmul.f32 %v8700_v21, %v14276_v12 }
 0xa86   : > { %v6971_v22 = vpop.xlane.xlu1 %6970  ;;  %v6968_v46 = vpop.xlane.xlu0 %6967  ;;  %v7056_v38 = vmul.f32 %v8702_v53, %v14279_v0 }
 0xa87   : > { %8715 = vrcp.f32 %v6971_v22  ;;  %7257 = vrot.lane.b32.xlu0 %v7057_v47, %s8804_s18 }
 0xa88   : > { %v8704_v54 = vpop.eup %8703  ;;  %8717 = vrcp.f32 %v6968_v46  ;;  %7255 = vrot.lane.b32.xlu1 %v7056_v38, %s8804_s18 }
 0xa89   : > { %v8706_v1 = vpop.eup %8705  ;;  %v7059_v23 = vmul.f32 %v8704_v54, %v14286_v61 }
 0xa8a   : > { %v6977_v29 = vpop.xlane.xlu1 %6976  ;;  %v6974_v4 = vpop.xlane.xlu0 %6973  ;;  %v7058_v34 = vmul.f32 %v8706_v1, %v14289_v19 }
 0xa8b   : > { %8719 = vrcp.f32 %v6977_v29  ;;  %7261 = vrot.lane.b32.xlu0 %v7059_v23, %s8804_s18 }
 0xa8c   : > { %v8708_v12 = vpop.eup %8707  ;;  %8721 = vrcp.f32 %v6974_v4  ;;  %7259 = vrot.lane.b32.xlu1 %v7058_v34, %s8804_s18 }
 0xa8d   : > { %v8710_v0 = vpop.eup %8709  ;;  %v7061_v37 = vmul.f32 %v8708_v12, %v14291_v33 }
 0xa8e   : > { %v6983_v10 = vpop.xlane.xlu1 %6982  ;;  %v6980_v25 = vpop.xlane.xlu0 %6979  ;;  %v7060_v3 = vmul.f32 %v8710_v0, %v14299_v40 }
 0xa8f   : > { %8723 = vrcp.f32 %v6983_v10  ;;  %7265 = vrot.lane.b32.xlu0 %v7061_v37, %s8804_s18 }
 0xa90   : > { %v8712_v61 = vpop.eup %8711  ;;  %8725 = vrcp.f32 %v6980_v25  ;;  %7263 = vrot.lane.b32.xlu1 %v7060_v3, %s8804_s18 }
 0xa91   : > { %v8714_v19 = vpop.eup %8713  ;;  %v7063_v8 = vmul.f32 %v8712_v61, %v14303_v16 }
 0xa92   : > { %v6989_v36 = vpop.xlane.xlu1 %6988  ;;  %v6986_v43 = vpop.xlane.xlu0 %6985  ;;  %v7062_v7 = vmul.f32 %v8714_v19, %v14309_v48 }
 0xa93   : > { %8727 = vrcp.f32 %v6989_v36  ;;  %7269 = vrot.lane.b32.xlu0 %v7063_v8, %s8804_s18 }
 0xa94   : > { %v8716_v33 = vpop.eup %8715  ;;  %8729 = vrcp.f32 %v6986_v43  ;;  %7267 = vrot.lane.b32.xlu1 %v7062_v7, %s8804_s18 }
 0xa95   : > { %v8718_v40 = vpop.eup %8717  ;;  %v7065_v30 = vmul.f32 %v8716_v33, %v14314_v11 }
 0xa96   : > { %v6995_v15 = vpop.xlane.xlu1 %6994  ;;  %v6992_v45 = vpop.xlane.xlu0 %6991  ;;  %v7064_v62 = vmul.f32 %v8718_v40, %v14319_v56 }
 0xa97   : > { %8731 = vrcp.f32 %v6995_v15  ;;  %7273 = vrot.lane.b32.xlu0 %v7065_v30, %s8804_s18 }
 0xa98   : > { %v8720_v16 = vpop.eup %8719  ;;  %8733 = vrcp.f32 %v6992_v45  ;;  %7271 = vrot.lane.b32.xlu1 %v7064_v62, %s8804_s18 }
 0xa99   : > { %v8722_v48 = vpop.eup %8721  ;;  %v7067_v39 = vmul.f32 %v8720_v16, %v14323_v58 }
 0xa9a   : > { %v7001_v28 = vpop.xlane.xlu1 %7000  ;;  %v6998_v31 = vpop.xlane.xlu0 %6997  ;;  %v7066_v35 = vmul.f32 %v8722_v48, %v14329_v44 }
 0xa9b   : > { %8735 = vrcp.f32 %v7001_v28  ;;  %7277 = vrot.lane.b32.xlu0 %v7067_v39, %s8804_s18 }
 0xa9c   : > { %v8724_v11 = vpop.eup %8723  ;;  %8737 = vrcp.f32 %v6998_v31  ;;  %7275 = vrot.lane.b32.xlu1 %v7066_v35, %s8804_s18  ;;  %v15951_v35 = vld [vmem:[#allocation113_spill] sm:$0xff] }
 0xa9d   : > { %v8726_v56 = vpop.eup %8725  ;;  %v7069_v18 = vmul.f32 %v8724_v11, %v14333_v2 }
 0xa9e   : > { %v7007_v6 = vpop.xlane.xlu1 %7006  ;;  %v7004_v5 = vpop.xlane.xlu0 %7003  ;;  %v7068_v49 = vmul.f32 %v8726_v56, %v14339_v63  ;;  %v15952_v56 = vld [vmem:[#allocation100_spill] sm:$0xff] }
 0xa9f   : > { %8739 = vrcp.f32 %v7007_v6  ;;  %7281 = vrot.lane.b32.xlu0 %v7069_v18, %s8804_s18 }
 0xaa0   : > { %v8728_v58 = vpop.eup %8727  ;;  %8741 = vrcp.f32 %v7004_v5  ;;  %7279 = vrot.lane.b32.xlu1 %v7068_v49, %s8804_s18  ;;  %v15953_v5 = vld [vmem:[#allocation99_spill] sm:$0xff] }
 0xaa1   : > { %v8730_v44 = vpop.eup %8729  ;;  %v7071_v20 = vmul.f32 %v8728_v58, %v14345_v26 }
 0xaa2   : > { %v7013_v27 = vpop.xlane.xlu1 %7012  ;;  %v7010_v17 = vpop.xlane.xlu0 %7009  ;;  %v7070_v60 = vmul.f32 %v8730_v44, %v14348_v42 }
 0xaa3   : > { %8743 = vrcp.f32 %v7013_v27  ;;  %7285 = vrot.lane.b32.xlu0 %v7071_v20, %s8804_s18  ;;  %v15954_v27 = vld [vmem:[#allocation106_spill] sm:$0xff] }
 0xaa4   : > { %v8732_v2 = vpop.eup %8731  ;;  %8745 = vrcp.f32 %v7010_v17  ;;  %7283 = vrot.lane.b32.xlu1 %v7070_v60, %s8804_s18 }
 0xaa5   : > { %v8734_v63 = vpop.eup %8733  ;;  %v7073_v57 = vmul.f32 %v8732_v2, %v14354_v9 }
 0xaa6   : > { %v14502_v14 = vpop.permute.xlu1 %7113  ;;  %v7016_v52 = vpop.xlane.xlu0 %7015  ;;  %v7072_v21 = vmul.f32 %v8734_v63, %v14357_v32  ;;  %v15955_v63 = vld [vmem:[#allocation107_spill] sm:$0xff] }
 0xaa7   : > { %8747 = vrcp.f32 %v7016_v52  ;;  %7289 = vrot.lane.b32.xlu0 %v7073_v57, %s8804_s18  ;;  %v7338_v18 = vsel %vm7337_vm4, %v15952_v56, %v14502_v14  ;;  %v15956_v52 = vld [vmem:[#allocation103_spill] sm:$0xff] }
 0xaa8   : > { %v8736_v26 = vpop.eup %8735  ;;  %7287 = vrot.lane.b32.xlu1 %v7072_v21, %s8804_s18 }
 0xaa9   : > { %v8738_v42 = vpop.eup %8737  ;;  %v7075_v53 = vmul.f32 %v8736_v26, %v14359_v55 }
 0xaaa   : > { %v14508_v47 = vpop.permute.xlu1 %7117  ;;  %v7116_v22 = vpop.permute.xlu0 %7115  ;;  %v7074_v46 = vmul.f32 %v8738_v42, %v14365_v50 }
 0xaab   : > { %7293 = vrot.lane.b32.xlu0 %v7075_v53, %s8804_s18  ;;  %v7339_v49 = vsel %vm7337_vm4, %v15953_v5, %v7116_v22  ;;  %v7340_v17 = vsel %vm7337_vm4, %v15954_v27, %v14508_v47  ;;  %v15957_v47 = vld [vmem:[#allocation5_spill] sm:$0xff] }
 0xaac   : > { %v8740_v9 = vpop.eup %8739  ;;  %7291 = vrot.lane.b32.xlu1 %v7074_v46, %s8804_s18  ;;  %v15963_v5 = vld [vmem:[#allocation117_spill] sm:$0xff] }
 0xaad   : > { %v8742_v32 = vpop.eup %8741  ;;  %v7077_v38 = vmul.f32 %v8740_v9, %v14371_v24  ;;  %v15958_v9 = vld [vmem:[#allocation105_spill] sm:$0xff] }
 0xaae   : > { %v7120_v54 = vpop.permute.xlu1 %7119  ;;  %v7122_v1 = vpop.permute.xlu0 %7121  ;;  %v7076_v23 = vmul.f32 %v8742_v32, %v14373_v51 }
 0xaaf   : > { %7297 = vrot.lane.b32.xlu0 %v7077_v38, %s8804_s18  ;;  %v7342_v57 = vsel %vm7337_vm4, %v15955_v63, %v7122_v1  ;;  %v7341_v21 = vsel %vm7337_vm4, %v15956_v52, %v7120_v54  ;;  %v15967_v52 = vld [vmem:[#allocation127_spill] sm:$0xff] }
 0xab0   : > { %v8744_v55 = vpop.eup %8743  ;;  %7295 = vrot.lane.b32.xlu1 %v7076_v23, %s8804_s18  ;;  %v15959_v23 = vld [vmem:[#allocation15_spill] sm:$0xff] }
 0xab1   : > { %v8746_v29 = vpop.eup %8745  ;;  %v7079_v50 = vmul.f32 %v8744_v55, %v14379_v59 }
 0xab2   : > { %v7124_v4 = vpop.permute.xlu1 %7123  ;;  %v7126_v34 = vpop.permute.xlu0 %7125  ;;  %v7078_v12 = vmul.f32 %v8746_v29, %v14381_v13 }
 0xab3   : > { %7301 = vrot.lane.b32.xlu0 %v7079_v50, %s8804_s18  ;;  %v7344_v22 = vsel %vm7337_vm4, %v15957_v47, %v7126_v34  ;;  %v7343_v32 = vsel %vm7337_vm4, %v15958_v9, %v7124_v4  ;;  %v15960_v50 = vld [vmem:[#allocation108_spill] sm:$0xff]  ;;  %v15970_v9 = vld [vmem:[#allocation125_spill] sm:$0xff] }
 0xab4   : > { %v8748_v0 = vpop.eup %8747  ;;  %7299 = vrot.lane.b32.xlu1 %v7078_v12, %s8804_s18 }
 0xab5   : > { %v7080_v24 = vmul.f32 %v8748_v0, %v14387_v41 }
 0xab6   : > { %v7128_v51 = vpop.permute.xlu1 %7127  ;;  %v7130_v37 = vpop.permute.xlu0 %7129 }
 0xab7   : > { %v7346_v55 = vsel %vm7337_vm4, %v15959_v23, %v7130_v37  ;;  %v7345_v34 = vsel %vm7337_vm4, %v15960_v50, %v7128_v51 }
 0xab8   : > { %7303 = vrot.lane.b32.xlu1 %v7080_v24, %s8804_s18  ;;  %v15961_v24 = vld [vmem:[#allocation115_spill] sm:$0xff] }
 0xaba   : > { %v14523_v10 = vpop.permute.xlu1 %7131  ;;  %v14525_v25 = vpop.permute.xlu0 %7133 }
 0xabe   : > { %v14527_v59 = vpop.permute.xlu1 %7135  ;;  %v14529_v3 = vpop.permute.xlu0 %7137 }
 0xac2   : > { %v14531_v13 = vpop.permute.xlu1 %7139  ;;  %v14533_v61 = vpop.permute.xlu0 %7141 }
 0xac6   : > { %v14535_v19 = vpop.permute.xlu1 %7143  ;;  %v14537_v8 = vpop.permute.xlu0 %7145 }
 0xaca   : > { %v14539_v41 = vpop.permute.xlu1 %7147  ;;  %v14541_v36 = vpop.permute.xlu0 %7149 }
 0xace   : > { %v14543_v43 = vpop.permute.xlu1 %7151  ;;  %v14545_v7 = vpop.permute.xlu0 %7153 }
 0xad2   : > { %v14547_v33 = vpop.permute.xlu1 %7155  ;;  %v14549_v40 = vpop.permute.xlu0 %7157 }
 0xad6   : > { %v14551_v30 = vpop.permute.xlu1 %7159  ;;  %v14553_v15 = vpop.permute.xlu0 %7161 }
 0xada   : > { %v14555_v45 = vpop.permute.xlu1 %7163  ;;  %v14557_v62 = vpop.permute.xlu0 %7165 }
 0xade   : > { %v14559_v16 = vpop.permute.xlu1 %7167  ;;  %v14561_v48 = vpop.permute.xlu0 %7169 }
 0xae2   : > { %v14563_v39 = vpop.permute.xlu1 %7171  ;;  %v14565_v28 = vpop.permute.xlu0 %7173 }
 0xae6   : > { %v7176_v31 = vpop.permute.xlu1 %7175 }
 0xae7   : > { %v14569_v11 = vsel %vm7337_vm4, %v15951_v35, %v7176_v31  ;;  %v7348_v31 = vsel %vm7337_vm4, %v15961_v24, %v14525_v25  ;;  %v15962_v35 = vld [vmem:[#allocation92_spill] sm:$0xff]  ;;  %v7350_v25 = vsel %vm7337_vm4, %v15963_v5, %v14529_v3 }
 0xae8   : > { %v7347_v51 = vsel %vm7337_vm4, %v15962_v35, %v14523_v10  ;;  %v15975_v35 = vld [vmem:[#allocation155_spill] sm:$0xff] }
 0xae9   : > { %v7242_v6 = vpop.permute.xlu0 %7241 }
 0xaea   : > { %v7371_v58 = vsel %vm7370_vm5, %v7338_v18, %v7242_v6  ;;  %v7244_v44 = vpop.permute.xlu1 %7243 }
 0xaeb   : > { %7404 = vst.msk [vmem:[%s14576_s20] sm:$0xff] %vm7403_vm12, %v7371_v58  ;;  %v7372_v20 = vsel %vm7370_vm5, %v7339_v49, %v7244_v44  ;;  %v15964_v58 = vld [vmem:[#allocation112_spill] sm:$0xff] }
 0xaec   : > { %7405 = vst.msk [vmem:[%s14576_s20 + $0x8] sm:$0xff] %vm7403_vm12, %v7372_v20  ;;  %v7349_v10 = vsel %vm7337_vm4, %v15964_v58, %v14527_v59  ;;  %v15978_v58 = vld [vmem:[#allocation150_spill] sm:$0xff] }
 0xaed   : > { %v7246_v60 = vpop.permute.xlu0 %7245 }
 0xaee   : > { %v7373_v2 = vsel %vm7370_vm5, %v7340_v17, %v7246_v60  ;;  %v15965_v17 = vld [vmem:[#allocation123_spill] sm:$0xff] }
 0xaef   : > { %7406 = vst.msk [vmem:[%s14576_s20 + $0x10] sm:$0xff] %vm7403_vm12, %v7373_v2  ;;  %v7352_v3 = vsel %vm7337_vm4, %v15965_v17, %v14533_v61  ;;  %v15966_v2 = vld [vmem:[#allocation26_spill] sm:$0xff]  ;;  %v7354_v61 = vsel %vm7337_vm4, %v15967_v52, %v14537_v8 }
 0xaf0   : > { %v7351_v59 = vsel %vm7337_vm4, %v15966_v2, %v14531_v13 }
 0xaf1   : > { %v7250_v14 = vpop.permute.xlu0 %7249 }
 0xaf2   : > { %v7248_v26 = vpop.permute.xlu1 %7247  ;;  %v7375_v42 = vsel %vm7370_vm5, %v7342_v57, %v7250_v14 }
 0xaf3   : > { %v7374_v53 = vsel %vm7370_vm5, %v7341_v21, %v7248_v26  ;;  %7408 = vst.msk [vmem:[%s14576_s20 + $0x20] sm:$0xff] %vm7403_vm12, %v7375_v42  ;;  %v15968_v26 = vld [vmem:[#allocation36_spill] sm:$0xff] }
 0xaf4   : > { %7407 = vst.msk [vmem:[%s14576_s20 + $0x18] sm:$0xff] %vm7403_vm12, %v7374_v53  ;;  %v7353_v13 = vsel %vm7337_vm4, %v15968_v26, %v14535_v19  ;;  %v7355_v19 = vsel %vm7337_vm4, %v15970_v9, %v14539_v41 }
 0xaf5   : > { %v7254_v46 = vpop.permute.xlu0 %7253 }
 0xaf6   : > { %v7252_v38 = vpop.permute.xlu1 %7251  ;;  %v7377_v54 = vsel %vm7370_vm5, %v7344_v22, %v7254_v46  ;;  %v15969_v22 = vld [vmem:[#allocation130_spill] sm:$0xff] }
 0xaf7   : > { %v7376_v1 = vsel %vm7370_vm5, %v7343_v32, %v7252_v38  ;;  %7410 = vst.msk [vmem:[%s14576_s20 + $0x30] sm:$0xff] %vm7403_vm12, %v7377_v54  ;;  %v7356_v8 = vsel %vm7337_vm4, %v15969_v22, %v14541_v36 }
 0xaf8   : > { %7409 = vst.msk [vmem:[%s14576_s20 + $0x28] sm:$0xff] %vm7403_vm12, %v7376_v1  ;;  %v15971_v1 = vld [vmem:[#allocation44_spill] sm:$0xff] }
 0xaf9   : > { %v7258_v29 = vpop.permute.xlu0 %7257  ;;  %v7358_v36 = vsel %vm7337_vm4, %v15971_v1, %v14545_v7 }
 0xafa   : > { %v7256_v12 = vpop.permute.xlu1 %7255  ;;  %v7379_v4 = vsel %vm7370_vm5, %v7346_v55, %v7258_v29  ;;  %v15972_v55 = vld [vmem:[#allocation102_spill] sm:$0xff] }
 0xafb   : > { %v7378_v0 = vsel %vm7370_vm5, %v7345_v34, %v7256_v12  ;;  %7412 = vst.msk [vmem:[%s14576_s20 + $0x40] sm:$0xff] %vm7403_vm12, %v7379_v4  ;;  %v7357_v41 = vsel %vm7337_vm4, %v15972_v55, %v14543_v43  ;;  %v15973_v12 = vld [vmem:[#allocation145_spill] sm:$0xff] }
 0xafc   : > { %7411 = vst.msk [vmem:[%s14576_s20 + $0x38] sm:$0xff] %vm7403_vm12, %v7378_v0  ;;  %v7360_v7 = vsel %vm7337_vm4, %v15973_v12, %v14549_v40  ;;  %v15974_v0 = vld [vmem:[#allocation132_spill] sm:$0xff]  ;;  %v7362_v40 = vsel %vm7337_vm4, %v15975_v35, %v14553_v15 }
 0xafd   : > { %v7262_v37 = vpop.permute.xlu0 %7261  ;;  %v7359_v43 = vsel %vm7337_vm4, %v15974_v0, %v14547_v33 }
 0xafe   : > { %v7260_v56 = vpop.permute.xlu1 %7259  ;;  %v7381_v18 = vsel %vm7370_vm5, %v7348_v31, %v7262_v37 }
 0xaff   : > { %v7380_v6 = vsel %vm7370_vm5, %v7347_v51, %v7260_v56  ;;  %7414 = vst.msk [vmem:[%s14576_s20 + $0x50] sm:$0xff] %vm7403_vm12, %v7381_v18  ;;  %v15976_v56 = vld [vmem:[#allocation140_spill] sm:$0xff] }
 0xb00   : > { %7413 = vst.msk [vmem:[%s14576_s20 + $0x48] sm:$0xff] %vm7403_vm12, %v7380_v6  ;;  %v7361_v33 = vsel %vm7337_vm4, %v15976_v56, %v14551_v30  ;;  %v7363_v30 = vsel %vm7337_vm4, %v15978_v58, %v14555_v45 }
 0xb01   : > { %v7266_v49 = vpop.permute.xlu0 %7265 }
 0xb02   : > { %v7264_v44 = vpop.permute.xlu1 %7263  ;;  %v7383_v20 = vsel %vm7370_vm5, %v7350_v25, %v7266_v49  ;;  %v15977_v25 = vld [vmem:[#allocation50_spill] sm:$0xff] }
 0xb03   : > { %v7382_v27 = vsel %vm7370_vm5, %v7349_v10, %v7264_v44  ;;  %7416 = vst.msk [vmem:[%s14576_s20 + $0x60] sm:$0xff] %vm7403_vm12, %v7383_v20  ;;  %v7364_v15 = vsel %vm7337_vm4, %v15977_v25, %v14557_v62 }
 0xb04   : > { %7415 = vst.msk [vmem:[%s14576_s20 + $0x58] sm:$0xff] %vm7403_vm12, %v7382_v27  ;;  %v15979_v27 = vld [vmem:[#allocation52_spill] sm:$0xff] }
 0xb05   : > { %v7270_v60 = vpop.permute.xlu0 %7269  ;;  %v7366_v62 = vsel %vm7337_vm4, %v15979_v27, %v14561_v48 }
 0xb06   : > { %v7268_v63 = vpop.permute.xlu1 %7267  ;;  %v7385_v57 = vsel %vm7370_vm5, %v7352_v3, %v7270_v60  ;;  %v15980_v3 = vld [vmem:[#allocation49_spill] sm:$0xff] }
 0xb07   : > { %v7384_v14 = vsel %vm7370_vm5, %v7351_v59, %v7268_v63  ;;  %7418 = vst.msk [vmem:[%s14576_s20 + $0x70] sm:$0xff] %vm7403_vm12, %v7385_v57  ;;  %v7365_v45 = vsel %vm7337_vm4, %v15980_v3, %v14559_v16  ;;  %v15981_v63 = vld [vmem:[#allocation53_spill] sm:$0xff] }
 0xb08   : > { %7417 = vst.msk [vmem:[%s14576_s20 + $0x68] sm:$0xff] %vm7403_vm12, %v7384_v14  ;;  %v7368_v57 = vsel %vm7337_vm4, %v15981_v63, %v14565_v28  ;;  %v15982_v14 = vld [vmem:[#allocation4_spill] sm:$0xff] }
 0xb09   : > { %v7274_v21 = vpop.permute.xlu0 %7273  ;;  %v7367_v52 = vsel %vm7337_vm4, %v15982_v14, %v14563_v39 }
 0xb0a   : > { %v7272_v42 = vpop.permute.xlu1 %7271  ;;  %v7387_v53 = vsel %vm7370_vm5, %v7354_v61, %v7274_v21 }
 0xb0b   : > { %v7386_v47 = vsel %vm7370_vm5, %v7353_v13, %v7272_v42  ;;  %7420 = vst.msk [vmem:[%s14576_s20 + $0x80] sm:$0xff] %vm7403_vm12, %v7387_v53 }
 0xb0c   : > { %7419 = vst.msk [vmem:[%s14576_s20 + $0x78] sm:$0xff] %vm7403_vm12, %v7386_v47 }
 0xb0d   : > { %v7278_v46 = vpop.permute.xlu0 %7277 }
 0xb0e   : > { %v7276_v32 = vpop.permute.xlu1 %7275  ;;  %v7389_v38 = vsel %vm7370_vm5, %v7356_v8, %v7278_v46 }
 0xb0f   : > { %v7388_v54 = vsel %vm7370_vm5, %v7355_v19, %v7276_v32  ;;  %7422 = vst.msk [vmem:[%s14576_s20 + $0x90] sm:$0xff] %vm7403_vm12, %v7389_v38 }
 0xb10   : > { %7421 = vst.msk [vmem:[%s14576_s20 + $0x88] sm:$0xff] %vm7403_vm12, %v7388_v54 }
 0xb11   : > { %v7282_v23 = vpop.permute.xlu0 %7281 }
 0xb12   : > { %v7280_v29 = vpop.permute.xlu1 %7279  ;;  %v7391_v50 = vsel %vm7370_vm5, %v7358_v36, %v7282_v23 }
 0xb13   : > { %v7390_v34 = vsel %vm7370_vm5, %v7357_v41, %v7280_v29  ;;  %7424 = vst.msk [vmem:[%s14576_s20 + $0xa0] sm:$0xff] %vm7403_vm12, %v7391_v50 }
 0xb14   : > { %7423 = vst.msk [vmem:[%s14576_s20 + $0x98] sm:$0xff] %vm7403_vm12, %v7390_v34 }
 0xb15   : > { %v7286_v4 = vpop.permute.xlu0 %7285 }
 0xb16   : > { %v7284_v24 = vpop.permute.xlu1 %7283  ;;  %v7393_v31 = vsel %vm7370_vm5, %v7360_v7, %v7286_v4 }
 0xb17   : > { %v7392_v37 = vsel %vm7370_vm5, %v7359_v43, %v7284_v24  ;;  %7426 = vst.msk [vmem:[%s14576_s20 + $0xb0] sm:$0xff] %vm7403_vm12, %v7393_v31 }
 0xb18   : > { %7425 = vst.msk [vmem:[%s14576_s20 + $0xa8] sm:$0xff] %vm7403_vm12, %v7392_v37 }
 0xb19   : > { %v7290_v51 = vpop.permute.xlu0 %7289 }
 0xb1a   : > { %v7288_v18 = vpop.permute.xlu1 %7287  ;;  %v7395_v6 = vsel %vm7370_vm5, %v7362_v40, %v7290_v51 }
 0xb1b   : > { %v7394_v5 = vsel %vm7370_vm5, %v7361_v33, %v7288_v18  ;;  %7428 = vst.msk [vmem:[%s14576_s20 + $0xc0] sm:$0xff] %vm7403_vm12, %v7395_v6 }
 0xb1c   : > { %7427 = vst.msk [vmem:[%s14576_s20 + $0xb8] sm:$0xff] %vm7403_vm12, %v7394_v5 }
 0xb1d   : > { %v7294_v49 = vpop.permute.xlu0 %7293 }
 0xb1e   : > { %v7292_v10 = vpop.permute.xlu1 %7291  ;;  %v7397_v44 = vsel %vm7370_vm5, %v7364_v15, %v7294_v49 }
 0xb1f   : > { %v7396_v20 = vsel %vm7370_vm5, %v7363_v30, %v7292_v10  ;;  %7430 = vst.msk [vmem:[%s14576_s20 + $0xd0] sm:$0xff] %vm7403_vm12, %v7397_v44 }
 0xb20   : > { %7429 = vst.msk [vmem:[%s14576_s20 + $0xc8] sm:$0xff] %vm7403_vm12, %v7396_v20 }
 0xb21   : > { %v7298_v17 = vpop.permute.xlu0 %7297 }
 0xb22   : > { %v7296_v60 = vpop.permute.xlu1 %7295  ;;  %v7399_v2 = vsel %vm7370_vm5, %v7366_v62, %v7298_v17 }
 0xb23   : > { %v7398_v59 = vsel %vm7370_vm5, %v7365_v45, %v7296_v60  ;;  %7432 = vst.msk [vmem:[%s14576_s20 + $0xe0] sm:$0xff] %vm7403_vm12, %v7399_v2 }
 0xb24   : > { %7431 = vst.msk [vmem:[%s14576_s20 + $0xd8] sm:$0xff] %vm7403_vm12, %v7398_v59 }
 0xb25   : > { %v7302_v48 = vpop.permute.xlu0 %7301 }
 0xb26   : > { %v7300_v16 = vpop.permute.xlu1 %7299  ;;  %v7401_v61 = vsel %vm7370_vm5, %v7368_v57, %v7302_v48 }
 0xb27   : > { %v7400_v21 = vsel %vm7370_vm5, %v7367_v52, %v7300_v16  ;;  %7434 = vst.msk [vmem:[%s14576_s20 + $0xf0] sm:$0xff] %vm7403_vm12, %v7401_v61 }
 0xb28   : > { %7433 = vst.msk [vmem:[%s14576_s20 + $0xe8] sm:$0xff] %vm7403_vm12, %v7400_v21 }
 0xb2a   : > { %v7304_v26 = vpop.permute.xlu1 %7303 }
 0xb2b   : > { %v7402_v13 = vsel %vm7370_vm5, %v14569_v11, %v7304_v26 }
 0xb2c   : > { %7435 = vst.msk [vmem:[%s14576_s20 + $0xf8] sm:$0xff] %vm7403_vm12, %v7402_v13 }
 0xb2d PF: > { %s23_s25 = sadd.s32 1, %s8791_s25  }
 0xb2e   : > { %p20_p4 = scmp.ge.s32.totalorder %s23_s25, 4  }
 0xb30   :  { %22 = sbr.rel (!%p20_p4) target bundleno = 1 (0x1), region = 102 }

</bundles_post_ra>
